<compile_context>
chip_gen: v7x
topology: tpu7x:2x2x1
jax: 0.10.0
libtpu: 0.0.40
codegen_flags: <defaults>
</compile_context>

<pallas_src>
import functools

import jax
import jax.numpy as jnp
from jax import lax
from jax.experimental import pallas as pl
from jax.experimental.pallas import tpu as pltpu

NEG_SLOPE = 0.01      # nn.LeakyReLU default negative_slope
BN_EPS = 1e-5         # nn.BatchNorm2d default eps


# ---------------------------------------------------------------------------
# Pallas kernels
# ---------------------------------------------------------------------------
def stage_kernel(x_ref, w1_ref, w2_ref, ss_ref, mask_ref, c_ref, y1p_ref, *,
                 H, W, neg_slope):
    """Fused [conv3x3 -> affine(BN) -> (leaky)ReLU] x 2 for one image.

    The zero-padded image is stored flat over (H+3, W+2) rows, so each of the
    nine 3x3 taps is a *contiguous* row-slice of the flat buffer -> nine MXU
    GEMMs with no im2col.  Each conv produces W+2 columns per output row; the
    two right-most columns are garbage (row wrap) and are masked before the
    in-VMEM re-pad (conv1) or discarded by the wrapper (conv2).

    x_ref:    ((H+3)*(W+2), Cin)  f32   zero-padded input, rows flattened
    w1_ref:   (9, Cin, C)         bf16  conv1 weights, tap-major (dy*3+dx)
    w2_ref:   (9, C, C)           bf16  conv2 weights
    ss_ref:   (4, C)              f32   [scale1, shift1, scale2, shift2]
    mask_ref: (H*(W+2), 1)        f32   1.0 on valid columns, 0.0 on garbage
    c_ref:    (H*(W+2), C)        f32   stage output (flat, incl. garbage cols)
    y1p_ref:  ((H+3)*(W+2), C)    f32   VMEM scratch: re-padded conv1 output
    """
    W2 = W + 2
    M = H * W2

    def conv3x3(src_ref, w_ref):
        # Nine shifted contiguous views -> nine bf16 MXU dots, f32 accumulation.
        tap0 = src_ref[0:M, :].astype(jnp.bfloat16)
        acc = jnp.dot(tap0, w_ref[0], preferred_element_type=jnp.float32)
        for t in range(1, 9):
            off = (t // 3) * W2 + (t % 3)
            tap = src_ref[off:off + M, :].astype(jnp.bfloat16)
            acc = acc + jnp.dot(tap, w_ref[t],
                                preferred_element_type=jnp.float32)
        return acc

    def affine_act(acc, scale, shift):
        y = acc * scale + shift                      # folded bias / BatchNorm
        return jnp.where(y >= 0.0, y, neg_slope * y)  # LeakyReLU / ReLU

    # conv1 + folded BatchNorm + LeakyReLU
    y1 = affine_act(conv3x3(x_ref, w1_ref), ss_ref[0, :], ss_ref[1, :])

    # Re-pad conv1 output inside VMEM (zero halo) so conv2 taps read it
    # directly; garbage columns are zeroed so they land on the halo correctly.
    y1p_ref[...] = jnp.zeros(y1p_ref.shape, y1p_ref.dtype)
    y1p_ref[W2 + 1:W2 + 1 + M, :] = y1 * mask_ref[...]

    # conv2 + folded BatchNorm + LeakyReLU
    y2 = affine_act(conv3x3(y1p_ref, w2_ref), ss_ref[2, :], ss_ref[3, :])
    c_ref[...] = y2.astype(c_ref.dtype)


def maxpool_kernel(x_ref, o_ref, *, Wh):
    """2x2 / stride-2 max pool over one image of the flat stage output.

    x_ref: (Hh, 2, Wh+1, 2, C) f32  (reshaped flat output; last column garbage)
    o_ref: (Hh, Wh, C)         f32
    """
    x = x_ref[...]
    m = jnp.maximum(x[:, 0], x[:, 1])   # pairwise max over the row pair
    p = jnp.max(m, axis=2)              # max over the adjacent column pair
    o_ref[...] = p[:, :Wh, :].astype(o_ref.dtype)   # drop garbage column


# ---------------------------------------------------------------------------
# Wrappers
# ---------------------------------------------------------------------------
def pad_to_flat(x_nhwc):
    """Zero-pad (1 top / 2 bottom rows, 1 left/right col) and flatten rows."""
    N, H, W, C = x_nhwc.shape
    xp = jnp.pad(x_nhwc, ((0, 0), (1, 2), (1, 1), (0, 0)))
    return xp.reshape(N, (H + 3) * (W + 2), C)


def flat_to_nchw(c_flat, H, W):
    """Drop the 2 garbage columns per row and convert NHWC -> NCHW."""
    N, M, C = c_flat.shape
    c = c_flat.reshape(N, H, W + 2, C)[:, :, :W, :]
    return jnp.transpose(c, (0, 3, 1, 2))


def run_stage(xf, p1, p2, slope, H, W):
    """xf: (N, (H+3)*(W+2), Cin) f32 -> flat stage output (N, H*(W+2), C) f32."""
    N, Rp, Cin = xf.shape
    C = p1["w"].shape[2]
    W2 = W + 2
    M = H * W2
    assert Rp == (H + 3) * W2

    w1 = p1["w"].astype(jnp.bfloat16)
    w2 = p2["w"].astype(jnp.bfloat16)
    ss = jnp.concatenate(
        [p1["scale"], p1["shift"], p2["scale"], p2["shift"]], axis=0)  # (4, C)
    mask = (jnp.arange(M, dtype=jnp.int32) % W2 < W)
    mask = mask.astype(jnp.float32).reshape(M, 1)

    kern = functools.partial(stage_kernel, H=H, W=W, neg_slope=slope)
    # TODO(synk): for production resolutions add a row-tiled grid axis with
    # halo re-fetch (and generation-aware VMEM budgeting, esp. v7x 64 MiB).
    return pl.pallas_call(
        kern,
        out_shape=jax.ShapeDtypeStruct((N, M, C), jnp.float32),
        grid=(N,),
        in_specs=[
            pl.BlockSpec((None, Rp, Cin), lambda n: (n, 0, 0)),
            pl.BlockSpec((9, Cin, C), lambda n: (0, 0, 0)),
            pl.BlockSpec((9, C, C), lambda n: (0, 0, 0)),
            pl.BlockSpec((4, C), lambda n: (0, 0)),
            pl.BlockSpec((M, 1), lambda n: (0, 0)),
        ],
        out_specs=pl.BlockSpec((None, M, C), lambda n: (n, 0, 0)),
        scratch_shapes=[pltpu.VMEM((Rp, C), jnp.float32)],
        compiler_params=pltpu.CompilerParams(
            dimension_semantics=("parallel",)),
    )(xf, w1, w2, ss, mask)


def run_maxpool(c_flat, H, W):
    """c_flat: (N, H*(W+2), C) f32 -> pooled (N, H//2, W//2, C) f32."""
    N, M, C = c_flat.shape
    Hh, Wh = H // 2, W // 2
    x = c_flat.reshape(N * Hh, 2, Wh + 1, 2, C)   # pure (free) reshape
    kern = functools.partial(maxpool_kernel, Wh=Wh)
    out = pl.pallas_call(
        kern,
        out_shape=jax.ShapeDtypeStruct((N * Hh, Wh, C), jnp.float32),
        grid=(N,),
        in_specs=[pl.BlockSpec((Hh, 2, Wh + 1, 2, C),
                               lambda n: (n, 0, 0, 0, 0))],
        out_specs=pl.BlockSpec((Hh, Wh, C), lambda n: (n, 0, 0)),
        compiler_params=pltpu.CompilerParams(
            dimension_semantics=("parallel",)),
    )(x)
    return out.reshape(N, Hh, Wh, C)


# ---------------------------------------------------------------------------
# Parameter initialization (deterministic, synthetic)
# ---------------------------------------------------------------------------
def make_conv_params(key, cin, cout, with_bn):
    ks = jax.random.split(key, 6)
    w = jax.random.normal(ks[0], (3, 3, cin, cout), jnp.float32) / jnp.sqrt(9.0 * cin)
    b = 0.1 * jax.random.normal(ks[1], (cout,), jnp.float32)
    if with_bn:
        gamma = 1.0 + 0.1 * jax.random.normal(ks[2], (cout,), jnp.float32)
        beta = 0.1 * jax.random.normal(ks[3], (cout,), jnp.float32)
        r_mean = 0.1 * jax.random.normal(ks[4], (cout,), jnp.float32)
        r_var = 1.0 + 0.1 * jnp.abs(jax.random.normal(ks[5], (cout,), jnp.float32))
        s = gamma / jnp.sqrt(r_var + BN_EPS)
        shift = beta + (b - r_mean) * s
    else:
        s = jnp.ones((cout,), jnp.float32)
        shift = b
    return dict(w=w.reshape(9, cin, cout),        # tap-major (dy*3+dx)
                scale=s.reshape(1, cout),
                shift=shift.reshape(1, cout))


def init_encoder_params(key, in_channels, nf):
    specs = [
        ("contr_1_1", in_channels, nf, True),
        ("contr_1_2", nf, nf, True),
        ("contr_2_1", nf, nf * 2, True),
        ("contr_2_2", nf * 2, nf * 2, True),
        ("contr_3_1", nf * 2, nf * 4, True),
        ("contr_3_2", nf * 4, nf * 4, True),
        ("contr_4_1", nf * 4, nf * 8, True),
        ("contr_4_2", nf * 8, nf * 8, True),
        ("center_1", nf * 8, nf * 16, False),
        ("center_2", nf * 16, nf * 16, False),
    ]
    keys = jax.random.split(key, len(specs))
    return {name: make_conv_params(k, ci, co, bn)
            for k, (name, ci, co, bn) in zip(keys, specs)}


# ---------------------------------------------------------------------------
# Encoder forward (Pallas)
# ---------------------------------------------------------------------------
def encoder_forward(x_nchw, params):
    # TODO(synk): Dropout2d / BatchNorm train-mode batch statistics not modeled
    # (eval-mode semantics: dropout = identity, BN folded into scale/shift).
    N, Cin, H, W = x_nchw.shape
    x = jnp.transpose(x_nchw, (0, 2, 3, 1))   # NCHW -> NHWC, f32

    def stage(xin_flat, n1, n2, slope, h, w):
        return run_stage(xin_flat, params[n1], params[n2], slope, h, w)

    c1f = stage(pad_to_flat(x), "contr_1_1", "contr_1_2", NEG_SLOPE, H, W)
    p1 = run_maxpool(c1f, H, W)

    c2f = stage(pad_to_flat(p1), "contr_2_1", "contr_2_2", NEG_SLOPE, H // 2, W // 2)
    p2 = run_maxpool(c2f, H // 2, W // 2)

    c3f = stage(pad_to_flat(p2), "contr_3_1", "contr_3_2", NEG_SLOPE, H // 4, W // 4)
    p3 = run_maxpool(c3f, H // 4, W // 4)

    c4f = stage(pad_to_flat(p3), "contr_4_1", "contr_4_2", NEG_SLOPE, H // 8, W // 8)
    p4 = run_maxpool(c4f, H // 8, W // 8)

    outf = stage(pad_to_flat(p4), "center_1", "center_2", 0.0, H // 16, W // 16)

    out = flat_to_nchw(outf, H // 16, W // 16)
    c4 = flat_to_nchw(c4f, H // 8, W // 8)
    c3 = flat_to_nchw(c3f, H // 4, W // 4)
    c2 = flat_to_nchw(c2f, H // 2, W // 2)
    c1 = flat_to_nchw(c1f, H, W)
    return (out, c4, c3, c2, c1)


# ---------------------------------------------------------------------------
# Pure-JAX reference (mirrors the bf16 matmul-input / f32-accumulate scheme)
# ---------------------------------------------------------------------------
def ref_conv(x_bf16, p, slope):
    cin, cout = p["w"].shape[1], p["w"].shape[2]
    w = p["w"].reshape(3, 3, cin, cout).astype(jnp.bfloat16)
    y = lax.conv_general_dilated(
        x_bf16, w, (1, 1), "SAME",
        dimension_numbers=("NHWC", "HWIO", "NHWC"),
        preferred_element_type=jnp.float32)
    y = y * p["scale"].reshape(1, 1, 1, cout) + p["shift"].reshape(1, 1, 1, cout)
    return jnp.where(y >= 0.0, y, slope * y)


def ref_stage(x_bf16, p1, p2, slope):
    y = ref_conv(x_bf16, p1, slope)
    return ref_conv(y.astype(jnp.bfloat16), p2, slope)   # (N, H, W, C) f32


def ref_pool(y_f32):
    N, H, W, C = y_f32.shape
    p = y_f32.reshape(N, H // 2, 2, W // 2, 2, C).max(axis=(2, 4))
    return p.astype(jnp.bfloat16)


def encoder_forward_ref(x_nchw, params):
    x = jnp.transpose(x_nchw, (0, 2, 3, 1)).astype(jnp.bfloat16)
    c1 = ref_stage(x, params["contr_1_1"], params["contr_1_2"], NEG_SLOPE)
    p1 = ref_pool(c1)
    c2 = ref_stage(p1, params["contr_2_1"], params["contr_2_2"], NEG_SLOPE)
    p2 = ref_pool(c2)
    c3 = ref_stage(p2, params["contr_3_1"], params["contr_3_2"], NEG_SLOPE)
    p3 = ref_pool(c3)
    c4 = ref_stage(p3, params["contr_4_1"], params["contr_4_2"], NEG_SLOPE)
    p4 = ref_pool(c4)
    out = ref_stage(p4, params["center_1"], params["center_2"], 0.0)
    to_nchw = lambda t: jnp.transpose(t, (0, 3, 1, 2))
    return tuple(to_nchw(t) for t in (out, c4, c3, c2, c1))


# ---------------------------------------------------------------------------
if __name__ == "__main__":
    key = jax.random.PRNGKey(0)
    kx, kp = jax.random.split(key)

    in_channels, initial_filter_size = 4, 8
    x = jax.random.normal(kx, (2, in_channels, 16, 16), jnp.float32)  # NCHW
    params = init_encoder_params(kp, in_channels, initial_filter_size)

    fwd = jax.jit(encoder_forward)
    outs = jax.block_until_ready(fwd(x, params))
    refs = jax.block_until_ready(encoder_forward_ref(x, params))

    expected_shapes = [(2, 128, 1, 1), (2, 64, 2, 2), (2, 32, 4, 4),
                       (2, 16, 8, 8), (2, 8, 16, 16)]
    for o, r, s in zip(outs, refs, expected_shapes):
        assert o.shape == s, (o.shape, s)
        err = float(jnp.max(jnp.abs(o - r)))
        assert jnp.allclose(o, r, rtol=1e-2, atol=1e-2), err

    print("KERNEL_OK")
</pallas_src>

<mosaic_0001>
module attributes {stable_mosaic.version = 11 : i64} {
  func.func @stage_kernel(%arg0: i32, %arg1: memref<1x342x4xf32, #tpu.memory_space<vmem>>, %arg2: memref<9x4x8xbf16, #tpu.memory_space<vmem>>, %arg3: memref<9x8x8xbf16, #tpu.memory_space<vmem>>, %arg4: memref<4x8xf32, #tpu.memory_space<vmem>>, %arg5: memref<288x1xf32, #tpu.memory_space<vmem>>, %arg6: memref<1x288x8xf32, #tpu.memory_space<vmem>>, %arg7: memref<342x8xf32, #tpu.memory_space<vmem>>) attributes {dimension_semantics = [#tpu.dimension_semantics<parallel>], iteration_bounds = array<i64: 2>, scalar_prefetch = 0 : i64, scratch_operands = 1 : i64, tpu.core_type = #tpu.core_type<tc>, window_params = [{transform_indices = @transform_0, window_bounds = array<i64: 1, 342, 4>}, {pipeline_mode = #tpu.pipeline_mode<synchronous>, transform_indices = @transform_1, window_bounds = array<i64: 9, 4, 8>}, {pipeline_mode = #tpu.pipeline_mode<synchronous>, transform_indices = @transform_2, window_bounds = array<i64: 9, 8, 8>}, {pipeline_mode = #tpu.pipeline_mode<synchronous>, transform_indices = @transform_3, window_bounds = array<i64: 4, 8>}, {pipeline_mode = #tpu.pipeline_mode<synchronous>, transform_indices = @transform_4, window_bounds = array<i64: 288, 1>}, {transform_indices = @transform_5, window_bounds = array<i64: 1, 288, 8>}]} {
    %c0 = arith.constant 0 : index
    %c0_0 = arith.constant 0 : index
    %c0_1 = arith.constant 0 : index
    %0 = vector.load %arg1[%c0, %c0_0, %c0_1] : memref<1x342x4xf32, #tpu.memory_space<vmem>>, vector<1x288x4xf32>
    %1 = vector.shape_cast %0 : vector<1x288x4xf32> to vector<288x4xf32>
    %2 = arith.truncf %1 : vector<288x4xf32> to vector<288x4xbf16>
    %c0_2 = arith.constant 0 : index
    %c0_3 = arith.constant 0 : index
    %c0_4 = arith.constant 0 : index
    %3 = vector.load %arg2[%c0_2, %c0_3, %c0_4] : memref<9x4x8xbf16, #tpu.memory_space<vmem>>, vector<1x4x8xbf16>
    %4 = vector.shape_cast %3 : vector<1x4x8xbf16> to vector<4x8xbf16>
    %cst = arith.constant dense<0.000000e+00> : vector<288x8xf32>
    %5 = tpu.matmul %2, %4, %cst {dimension_numbers = #tpu.dot_dimension_numbers<[1], [0], [0], [1], [0, 0, 1, 1], [], []>} : vector<288x4xbf16>, vector<4x8xbf16>, vector<288x8xf32> -> vector<288x8xf32>
    %c0_5 = arith.constant 0 : index
    %c1 = arith.constant 1 : index
    %c0_6 = arith.constant 0 : index
    %6 = vector.load %arg1[%c0_5, %c1, %c0_6] : memref<1x342x4xf32, #tpu.memory_space<vmem>>, vector<1x288x4xf32>
    %7 = vector.shape_cast %6 : vector<1x288x4xf32> to vector<288x4xf32>
    %8 = arith.truncf %7 : vector<288x4xf32> to vector<288x4xbf16>
    %c1_7 = arith.constant 1 : index
    %c0_8 = arith.constant 0 : index
    %c0_9 = arith.constant 0 : index
    %9 = vector.load %arg2[%c1_7, %c0_8, %c0_9] : memref<9x4x8xbf16, #tpu.memory_space<vmem>>, vector<1x4x8xbf16>
    %10 = vector.shape_cast %9 : vector<1x4x8xbf16> to vector<4x8xbf16>
    %cst_10 = arith.constant dense<0.000000e+00> : vector<288x8xf32>
    %11 = tpu.matmul %8, %10, %cst_10 {dimension_numbers = #tpu.dot_dimension_numbers<[1], [0], [0], [1], [0, 0, 1, 1], [], []>} : vector<288x4xbf16>, vector<4x8xbf16>, vector<288x8xf32> -> vector<288x8xf32>
    %12 = arith.addf %5, %11 : vector<288x8xf32>
    %c0_11 = arith.constant 0 : index
    %c2 = arith.constant 2 : index
    %c0_12 = arith.constant 0 : index
    %13 = vector.load %arg1[%c0_11, %c2, %c0_12] : memref<1x342x4xf32, #tpu.memory_space<vmem>>, vector<1x288x4xf32>
    %14 = vector.shape_cast %13 : vector<1x288x4xf32> to vector<288x4xf32>
    %15 = arith.truncf %14 : vector<288x4xf32> to vector<288x4xbf16>
    %c2_13 = arith.constant 2 : index
    %c0_14 = arith.constant 0 : index
    %c0_15 = arith.constant 0 : index
    %16 = vector.load %arg2[%c2_13, %c0_14, %c0_15] : memref<9x4x8xbf16, #tpu.memory_space<vmem>>, vector<1x4x8xbf16>
    %17 = vector.shape_cast %16 : vector<1x4x8xbf16> to vector<4x8xbf16>
    %cst_16 = arith.constant dense<0.000000e+00> : vector<288x8xf32>
    %18 = tpu.matmul %15, %17, %cst_16 {dimension_numbers = #tpu.dot_dimension_numbers<[1], [0], [0], [1], [0, 0, 1, 1], [], []>} : vector<288x4xbf16>, vector<4x8xbf16>, vector<288x8xf32> -> vector<288x8xf32>
    %19 = arith.addf %12, %18 : vector<288x8xf32>
    %c0_17 = arith.constant 0 : index
    %c18 = arith.constant 18 : index
    %c0_18 = arith.constant 0 : index
    %20 = vector.load %arg1[%c0_17, %c18, %c0_18] : memref<1x342x4xf32, #tpu.memory_space<vmem>>, vector<1x288x4xf32>
    %21 = vector.shape_cast %20 : vector<1x288x4xf32> to vector<288x4xf32>
    %22 = arith.truncf %21 : vector<288x4xf32> to vector<288x4xbf16>
    %c3 = arith.constant 3 : index
    %c0_19 = arith.constant 0 : index
    %c0_20 = arith.constant 0 : index
    %23 = vector.load %arg2[%c3, %c0_19, %c0_20] : memref<9x4x8xbf16, #tpu.memory_space<vmem>>, vector<1x4x8xbf16>
    %24 = vector.shape_cast %23 : vector<1x4x8xbf16> to vector<4x8xbf16>
    %cst_21 = arith.constant dense<0.000000e+00> : vector<288x8xf32>
    %25 = tpu.matmul %22, %24, %cst_21 {dimension_numbers = #tpu.dot_dimension_numbers<[1], [0], [0], [1], [0, 0, 1, 1], [], []>} : vector<288x4xbf16>, vector<4x8xbf16>, vector<288x8xf32> -> vector<288x8xf32>
    %26 = arith.addf %19, %25 : vector<288x8xf32>
    %c0_22 = arith.constant 0 : index
    %c19 = arith.constant 19 : index
    %c0_23 = arith.constant 0 : index
    %27 = vector.load %arg1[%c0_22, %c19, %c0_23] : memref<1x342x4xf32, #tpu.memory_space<vmem>>, vector<1x288x4xf32>
    %28 = vector.shape_cast %27 : vector<1x288x4xf32> to vector<288x4xf32>
    %29 = arith.truncf %28 : vector<288x4xf32> to vector<288x4xbf16>
    %c4 = arith.constant 4 : index
    %c0_24 = arith.constant 0 : index
    %c0_25 = arith.constant 0 : index
    %30 = vector.load %arg2[%c4, %c0_24, %c0_25] : memref<9x4x8xbf16, #tpu.memory_space<vmem>>, vector<1x4x8xbf16>
    %31 = vector.shape_cast %30 : vector<1x4x8xbf16> to vector<4x8xbf16>
    %cst_26 = arith.constant dense<0.000000e+00> : vector<288x8xf32>
    %32 = tpu.matmul %29, %31, %cst_26 {dimension_numbers = #tpu.dot_dimension_numbers<[1], [0], [0], [1], [0, 0, 1, 1], [], []>} : vector<288x4xbf16>, vector<4x8xbf16>, vector<288x8xf32> -> vector<288x8xf32>
    %33 = arith.addf %26, %32 : vector<288x8xf32>
    %c0_27 = arith.constant 0 : index
    %c20 = arith.constant 20 : index
    %c0_28 = arith.constant 0 : index
    %34 = vector.load %arg1[%c0_27, %c20, %c0_28] : memref<1x342x4xf32, #tpu.memory_space<vmem>>, vector<1x288x4xf32>
    %35 = vector.shape_cast %34 : vector<1x288x4xf32> to vector<288x4xf32>
    %36 = arith.truncf %35 : vector<288x4xf32> to vector<288x4xbf16>
    %c5 = arith.constant 5 : index
    %c0_29 = arith.constant 0 : index
    %c0_30 = arith.constant 0 : index
    %37 = vector.load %arg2[%c5, %c0_29, %c0_30] : memref<9x4x8xbf16, #tpu.memory_space<vmem>>, vector<1x4x8xbf16>
    %38 = vector.shape_cast %37 : vector<1x4x8xbf16> to vector<4x8xbf16>
    %cst_31 = arith.constant dense<0.000000e+00> : vector<288x8xf32>
    %39 = tpu.matmul %36, %38, %cst_31 {dimension_numbers = #tpu.dot_dimension_numbers<[1], [0], [0], [1], [0, 0, 1, 1], [], []>} : vector<288x4xbf16>, vector<4x8xbf16>, vector<288x8xf32> -> vector<288x8xf32>
    %40 = arith.addf %33, %39 : vector<288x8xf32>
    %c0_32 = arith.constant 0 : index
    %c36 = arith.constant 36 : index
    %c0_33 = arith.constant 0 : index
    %41 = vector.load %arg1[%c0_32, %c36, %c0_33] : memref<1x342x4xf32, #tpu.memory_space<vmem>>, vector<1x288x4xf32>
    %42 = vector.shape_cast %41 : vector<1x288x4xf32> to vector<288x4xf32>
    %43 = arith.truncf %42 : vector<288x4xf32> to vector<288x4xbf16>
    %c6 = arith.constant 6 : index
    %c0_34 = arith.constant 0 : index
    %c0_35 = arith.constant 0 : index
    %44 = vector.load %arg2[%c6, %c0_34, %c0_35] : memref<9x4x8xbf16, #tpu.memory_space<vmem>>, vector<1x4x8xbf16>
    %45 = vector.shape_cast %44 : vector<1x4x8xbf16> to vector<4x8xbf16>
    %cst_36 = arith.constant dense<0.000000e+00> : vector<288x8xf32>
    %46 = tpu.matmul %43, %45, %cst_36 {dimension_numbers = #tpu.dot_dimension_numbers<[1], [0], [0], [1], [0, 0, 1, 1], [], []>} : vector<288x4xbf16>, vector<4x8xbf16>, vector<288x8xf32> -> vector<288x8xf32>
    %47 = arith.addf %40, %46 : vector<288x8xf32>
    %c0_37 = arith.constant 0 : index
    %c37 = arith.constant 37 : index
    %c0_38 = arith.constant 0 : index
    %48 = vector.load %arg1[%c0_37, %c37, %c0_38] : memref<1x342x4xf32, #tpu.memory_space<vmem>>, vector<1x288x4xf32>
    %49 = vector.shape_cast %48 : vector<1x288x4xf32> to vector<288x4xf32>
    %50 = arith.truncf %49 : vector<288x4xf32> to vector<288x4xbf16>
    %c7 = arith.constant 7 : index
    %c0_39 = arith.constant 0 : index
    %c0_40 = arith.constant 0 : index
    %51 = vector.load %arg2[%c7, %c0_39, %c0_40] : memref<9x4x8xbf16, #tpu.memory_space<vmem>>, vector<1x4x8xbf16>
    %52 = vector.shape_cast %51 : vector<1x4x8xbf16> to vector<4x8xbf16>
    %cst_41 = arith.constant dense<0.000000e+00> : vector<288x8xf32>
    %53 = tpu.matmul %50, %52, %cst_41 {dimension_numbers = #tpu.dot_dimension_numbers<[1], [0], [0], [1], [0, 0, 1, 1], [], []>} : vector<288x4xbf16>, vector<4x8xbf16>, vector<288x8xf32> -> vector<288x8xf32>
    %54 = arith.addf %47, %53 : vector<288x8xf32>
    %c0_42 = arith.constant 0 : index
    %c38 = arith.constant 38 : index
    %c0_43 = arith.constant 0 : index
    %55 = vector.load %arg1[%c0_42, %c38, %c0_43] : memref<1x342x4xf32, #tpu.memory_space<vmem>>, vector<1x288x4xf32>
    %56 = vector.shape_cast %55 : vector<1x288x4xf32> to vector<288x4xf32>
    %57 = arith.truncf %56 : vector<288x4xf32> to vector<288x4xbf16>
    %c8 = arith.constant 8 : index
    %c0_44 = arith.constant 0 : index
    %c0_45 = arith.constant 0 : index
    %58 = vector.load %arg2[%c8, %c0_44, %c0_45] : memref<9x4x8xbf16, #tpu.memory_space<vmem>>, vector<1x4x8xbf16>
    %59 = vector.shape_cast %58 : vector<1x4x8xbf16> to vector<4x8xbf16>
    %cst_46 = arith.constant dense<0.000000e+00> : vector<288x8xf32>
    %60 = tpu.matmul %57, %59, %cst_46 {dimension_numbers = #tpu.dot_dimension_numbers<[1], [0], [0], [1], [0, 0, 1, 1], [], []>} : vector<288x4xbf16>, vector<4x8xbf16>, vector<288x8xf32> -> vector<288x8xf32>
    %61 = arith.addf %54, %60 : vector<288x8xf32>
    %c0_47 = arith.constant 0 : index
    %c0_48 = arith.constant 0 : index
    %62 = vector.load %arg4[%c0_47, %c0_48] : memref<4x8xf32, #tpu.memory_space<vmem>>, vector<1x8xf32>
    %63 = vector.shape_cast %62 : vector<1x8xf32> to vector<8xf32>
    %c1_49 = arith.constant 1 : index
    %c0_50 = arith.constant 0 : index
    %64 = vector.load %arg4[%c1_49, %c0_50] : memref<4x8xf32, #tpu.memory_space<vmem>>, vector<1x8xf32>
    %65 = vector.shape_cast %64 : vector<1x8xf32> to vector<8xf32>
    %66 = vector.shape_cast %63 : vector<8xf32> to vector<1x8xf32>
    %67 = vector.broadcast %66 : vector<1x8xf32> to vector<288x8xf32>
    %68 = arith.mulf %61, %67 : vector<288x8xf32>
    %69 = vector.shape_cast %65 : vector<8xf32> to vector<1x8xf32>
    %70 = vector.broadcast %69 : vector<1x8xf32> to vector<288x8xf32>
    %71 = arith.addf %68, %70 : vector<288x8xf32>
    %cst_51 = arith.constant 0.000000e+00 : f32
    %72 = vector.broadcast %cst_51 : f32 to vector<288x8xf32>
    %73 = arith.cmpf oge, %71, %72 : vector<288x8xf32>
    %cst_52 = arith.constant 0.00999999977 : f32
    %74 = vector.broadcast %cst_52 : f32 to vector<288x8xf32>
    %75 = arith.mulf %74, %71 : vector<288x8xf32>
    %76 = arith.select %73, %71, %75 : vector<288x8xi1>, vector<288x8xf32>
    %cst_53 = arith.constant 0.000000e+00 : f32
    %77 = vector.broadcast %cst_53 : f32 to vector<342x8xf32>
    %c0_54 = arith.constant 0 : index
    %c0_55 = arith.constant 0 : index
    %78 = vector.load %arg7[%c0_54, %c0_55] : memref<342x8xf32, #tpu.memory_space<vmem>>, vector<342x8xf32>
    tpu.vector_store %arg7[%c0_54, %c0_55], %77 {strides = array<i32>} : memref<342x8xf32, #tpu.memory_space<vmem>>, vector<342x8xf32>,
    %c0_56 = arith.constant 0 : index
    %c0_57 = arith.constant 0 : index
    %79 = vector.load %arg5[%c0_56, %c0_57] : memref<288x1xf32, #tpu.memory_space<vmem>>, vector<288x1xf32>
    %80 = vector.broadcast %79 : vector<288x1xf32> to vector<288x8xf32>
    %81 = arith.mulf %76, %80 : vector<288x8xf32>
    %c19_58 = arith.constant 19 : index
    %c0_59 = arith.constant 0 : index
    %82 = vector.load %arg7[%c19_58, %c0_59] : memref<342x8xf32, #tpu.memory_space<vmem>>, vector<288x8xf32>
    tpu.vector_store %arg7[%c19_58, %c0_59], %81 {strides = array<i32>} : memref<342x8xf32, #tpu.memory_space<vmem>>, vector<288x8xf32>,
    %c0_60 = arith.constant 0 : index
    %c0_61 = arith.constant 0 : index
    %83 = vector.load %arg7[%c0_60, %c0_61] : memref<342x8xf32, #tpu.memory_space<vmem>>, vector<288x8xf32>
    %84 = arith.truncf %83 : vector<288x8xf32> to vector<288x8xbf16>
    %c0_62 = arith.constant 0 : index
    %c0_63 = arith.constant 0 : index
    %c0_64 = arith.constant 0 : index
    %85 = vector.load %arg3[%c0_62, %c0_63, %c0_64] : memref<9x8x8xbf16, #tpu.memory_space<vmem>>, vector<1x8x8xbf16>
    %86 = vector.shape_cast %85 : vector<1x8x8xbf16> to vector<8x8xbf16>
    %cst_65 = arith.constant dense<0.000000e+00> : vector<288x8xf32>
    %87 = tpu.matmul %84, %86, %cst_65 {dimension_numbers = #tpu.dot_dimension_numbers<[1], [0], [0], [1], [0, 0, 1, 1], [], []>} : vector<288x8xbf16>, vector<8x8xbf16>, vector<288x8xf32> -> vector<288x8xf32>
    %c1_66 = arith.constant 1 : index
    %c0_67 = arith.constant 0 : index
    %88 = vector.load %arg7[%c1_66, %c0_67] : memref<342x8xf32, #tpu.memory_space<vmem>>, vector<288x8xf32>
    %89 = arith.truncf %88 : vector<288x8xf32> to vector<288x8xbf16>
    %c1_68 = arith.constant 1 : index
    %c0_69 = arith.constant 0 : index
    %c0_70 = arith.constant 0 : index
    %90 = vector.load %arg3[%c1_68, %c0_69, %c0_70] : memref<9x8x8xbf16, #tpu.memory_space<vmem>>, vector<1x8x8xbf16>
    %91 = vector.shape_cast %90 : vector<1x8x8xbf16> to vector<8x8xbf16>
    %cst_71 = arith.constant dense<0.000000e+00> : vector<288x8xf32>
    %92 = tpu.matmul %89, %91, %cst_71 {dimension_numbers = #tpu.dot_dimension_numbers<[1], [0], [0], [1], [0, 0, 1, 1], [], []>} : vector<288x8xbf16>, vector<8x8xbf16>, vector<288x8xf32> -> vector<288x8xf32>
    %93 = arith.addf %87, %92 : vector<288x8xf32>
    %c2_72 = arith.constant 2 : index
    %c0_73 = arith.constant 0 : index
    %94 = vector.load %arg7[%c2_72, %c0_73] : memref<342x8xf32, #tpu.memory_space<vmem>>, vector<288x8xf32>
    %95 = arith.truncf %94 : vector<288x8xf32> to vector<288x8xbf16>
    %c2_74 = arith.constant 2 : index
    %c0_75 = arith.constant 0 : index
    %c0_76 = arith.constant 0 : index
    %96 = vector.load %arg3[%c2_74, %c0_75, %c0_76] : memref<9x8x8xbf16, #tpu.memory_space<vmem>>, vector<1x8x8xbf16>
    %97 = vector.shape_cast %96 : vector<1x8x8xbf16> to vector<8x8xbf16>
    %cst_77 = arith.constant dense<0.000000e+00> : vector<288x8xf32>
    %98 = tpu.matmul %95, %97, %cst_77 {dimension_numbers = #tpu.dot_dimension_numbers<[1], [0], [0], [1], [0, 0, 1, 1], [], []>} : vector<288x8xbf16>, vector<8x8xbf16>, vector<288x8xf32> -> vector<288x8xf32>
    %99 = arith.addf %93, %98 : vector<288x8xf32>
    %c18_78 = arith.constant 18 : index
    %c0_79 = arith.constant 0 : index
    %100 = vector.load %arg7[%c18_78, %c0_79] : memref<342x8xf32, #tpu.memory_space<vmem>>, vector<288x8xf32>
    %101 = arith.truncf %100 : vector<288x8xf32> to vector<288x8xbf16>
    %c3_80 = arith.constant 3 : index
    %c0_81 = arith.constant 0 : index
    %c0_82 = arith.constant 0 : index
    %102 = vector.load %arg3[%c3_80, %c0_81, %c0_82] : memref<9x8x8xbf16, #tpu.memory_space<vmem>>, vector<1x8x8xbf16>
    %103 = vector.shape_cast %102 : vector<1x8x8xbf16> to vector<8x8xbf16>
    %cst_83 = arith.constant dense<0.000000e+00> : vector<288x8xf32>
    %104 = tpu.matmul %101, %103, %cst_83 {dimension_numbers = #tpu.dot_dimension_numbers<[1], [0], [0], [1], [0, 0, 1, 1], [], []>} : vector<288x8xbf16>, vector<8x8xbf16>, vector<288x8xf32> -> vector<288x8xf32>
    %105 = arith.addf %99, %104 : vector<288x8xf32>
    %c19_84 = arith.constant 19 : index
    %c0_85 = arith.constant 0 : index
    %106 = vector.load %arg7[%c19_84, %c0_85] : memref<342x8xf32, #tpu.memory_space<vmem>>, vector<288x8xf32>
    %107 = arith.truncf %106 : vector<288x8xf32> to vector<288x8xbf16>
    %c4_86 = arith.constant 4 : index
    %c0_87 = arith.constant 0 : index
    %c0_88 = arith.constant 0 : index
    %108 = vector.load %arg3[%c4_86, %c0_87, %c0_88] : memref<9x8x8xbf16, #tpu.memory_space<vmem>>, vector<1x8x8xbf16>
    %109 = vector.shape_cast %108 : vector<1x8x8xbf16> to vector<8x8xbf16>
    %cst_89 = arith.constant dense<0.000000e+00> : vector<288x8xf32>
    %110 = tpu.matmul %107, %109, %cst_89 {dimension_numbers = #tpu.dot_dimension_numbers<[1], [0], [0], [1], [0, 0, 1, 1], [], []>} : vector<288x8xbf16>, vector<8x8xbf16>, vector<288x8xf32> -> vector<288x8xf32>
    %111 = arith.addf %105, %110 : vector<288x8xf32>
    %c20_90 = arith.constant 20 : index
    %c0_91 = arith.constant 0 : index
    %112 = vector.load %arg7[%c20_90, %c0_91] : memref<342x8xf32, #tpu.memory_space<vmem>>, vector<288x8xf32>
    %113 = arith.truncf %112 : vector<288x8xf32> to vector<288x8xbf16>
    %c5_92 = arith.constant 5 : index
    %c0_93 = arith.constant 0 : index
    %c0_94 = arith.constant 0 : index
    %114 = vector.load %arg3[%c5_92, %c0_93, %c0_94] : memref<9x8x8xbf16, #tpu.memory_space<vmem>>, vector<1x8x8xbf16>
    %115 = vector.shape_cast %114 : vector<1x8x8xbf16> to vector<8x8xbf16>
    %cst_95 = arith.constant dense<0.000000e+00> : vector<288x8xf32>
    %116 = tpu.matmul %113, %115, %cst_95 {dimension_numbers = #tpu.dot_dimension_numbers<[1], [0], [0], [1], [0, 0, 1, 1], [], []>} : vector<288x8xbf16>, vector<8x8xbf16>, vector<288x8xf32> -> vector<288x8xf32>
    %117 = arith.addf %111, %116 : vector<288x8xf32>
    %c36_96 = arith.constant 36 : index
    %c0_97 = arith.constant 0 : index
    %118 = vector.load %arg7[%c36_96, %c0_97] : memref<342x8xf32, #tpu.memory_space<vmem>>, vector<288x8xf32>
    %119 = arith.truncf %118 : vector<288x8xf32> to vector<288x8xbf16>
    %c6_98 = arith.constant 6 : index
    %c0_99 = arith.constant 0 : index
    %c0_100 = arith.constant 0 : index
    %120 = vector.load %arg3[%c6_98, %c0_99, %c0_100] : memref<9x8x8xbf16, #tpu.memory_space<vmem>>, vector<1x8x8xbf16>
    %121 = vector.shape_cast %120 : vector<1x8x8xbf16> to vector<8x8xbf16>
    %cst_101 = arith.constant dense<0.000000e+00> : vector<288x8xf32>
    %122 = tpu.matmul %119, %121, %cst_101 {dimension_numbers = #tpu.dot_dimension_numbers<[1], [0], [0], [1], [0, 0, 1, 1], [], []>} : vector<288x8xbf16>, vector<8x8xbf16>, vector<288x8xf32> -> vector<288x8xf32>
    %123 = arith.addf %117, %122 : vector<288x8xf32>
    %c37_102 = arith.constant 37 : index
    %c0_103 = arith.constant 0 : index
    %124 = vector.load %arg7[%c37_102, %c0_103] : memref<342x8xf32, #tpu.memory_space<vmem>>, vector<288x8xf32>
    %125 = arith.truncf %124 : vector<288x8xf32> to vector<288x8xbf16>
    %c7_104 = arith.constant 7 : index
    %c0_105 = arith.constant 0 : index
    %c0_106 = arith.constant 0 : index
    %126 = vector.load %arg3[%c7_104, %c0_105, %c0_106] : memref<9x8x8xbf16, #tpu.memory_space<vmem>>, vector<1x8x8xbf16>
    %127 = vector.shape_cast %126 : vector<1x8x8xbf16> to vector<8x8xbf16>
    %cst_107 = arith.constant dense<0.000000e+00> : vector<288x8xf32>
    %128 = tpu.matmul %125, %127, %cst_107 {dimension_numbers = #tpu.dot_dimension_numbers<[1], [0], [0], [1], [0, 0, 1, 1], [], []>} : vector<288x8xbf16>, vector<8x8xbf16>, vector<288x8xf32> -> vector<288x8xf32>
    %129 = arith.addf %123, %128 : vector<288x8xf32>
    %c38_108 = arith.constant 38 : index
    %c0_109 = arith.constant 0 : index
    %130 = vector.load %arg7[%c38_108, %c0_109] : memref<342x8xf32, #tpu.memory_space<vmem>>, vector<288x8xf32>
    %131 = arith.truncf %130 : vector<288x8xf32> to vector<288x8xbf16>
    %c8_110 = arith.constant 8 : index
    %c0_111 = arith.constant 0 : index
    %c0_112 = arith.constant 0 : index
    %132 = vector.load %arg3[%c8_110, %c0_111, %c0_112] : memref<9x8x8xbf16, #tpu.memory_space<vmem>>, vector<1x8x8xbf16>
    %133 = vector.shape_cast %132 : vector<1x8x8xbf16> to vector<8x8xbf16>
    %cst_113 = arith.constant dense<0.000000e+00> : vector<288x8xf32>
    %134 = tpu.matmul %131, %133, %cst_113 {dimension_numbers = #tpu.dot_dimension_numbers<[1], [0], [0], [1], [0, 0, 1, 1], [], []>} : vector<288x8xbf16>, vector<8x8xbf16>, vector<288x8xf32> -> vector<288x8xf32>
    %135 = arith.addf %129, %134 : vector<288x8xf32>
    %c2_114 = arith.constant 2 : index
    %c0_115 = arith.constant 0 : index
    %136 = vector.load %arg4[%c2_114, %c0_115] : memref<4x8xf32, #tpu.memory_space<vmem>>, vector<1x8xf32>
    %137 = vector.shape_cast %136 : vector<1x8xf32> to vector<8xf32>
    %c3_116 = arith.constant 3 : index
    %c0_117 = arith.constant 0 : index
    %138 = vector.load %arg4[%c3_116, %c0_117] : memref<4x8xf32, #tpu.memory_space<vmem>>, vector<1x8xf32>
    %139 = vector.shape_cast %138 : vector<1x8xf32> to vector<8xf32>
    %140 = vector.shape_cast %137 : vector<8xf32> to vector<1x8xf32>
    %141 = vector.broadcast %140 : vector<1x8xf32> to vector<288x8xf32>
    %142 = arith.mulf %135, %141 : vector<288x8xf32>
    %143 = vector.shape_cast %139 : vector<8xf32> to vector<1x8xf32>
    %144 = vector.broadcast %143 : vector<1x8xf32> to vector<288x8xf32>
    %145 = arith.addf %142, %144 : vector<288x8xf32>
    %cst_118 = arith.constant 0.000000e+00 : f32
    %146 = vector.broadcast %cst_118 : f32 to vector<288x8xf32>
    %147 = arith.cmpf oge, %145, %146 : vector<288x8xf32>
    %cst_119 = arith.constant 0.00999999977 : f32
    %148 = vector.broadcast %cst_119 : f32 to vector<288x8xf32>
    %149 = arith.mulf %148, %145 : vector<288x8xf32>
    %150 = arith.select %147, %145, %149 : vector<288x8xi1>, vector<288x8xf32>
    %c0_120 = arith.constant 0 : index
    %c0_121 = arith.constant 0 : index
    %c0_122 = arith.constant 0 : index
    %151 = vector.load %arg6[%c0_120, %c0_121, %c0_122] : memref<1x288x8xf32, #tpu.memory_space<vmem>>, vector<1x288x8xf32>
    %152 = vector.shape_cast %151 : vector<1x288x8xf32> to vector<288x8xf32>
    %153 = vector.shape_cast %150 : vector<288x8xf32> to vector<1x288x8xf32>
    tpu.vector_store %arg6[%c0_120, %c0_121, %c0_122], %153 {strides = array<i32>} : memref<1x288x8xf32, #tpu.memory_space<vmem>>, vector<1x288x8xf32>,
    return
  }
  func.func @transform_0(%arg0: i32) -> (i32, i32, i32) {
    %c0_i32 = arith.constant 0 : i32
    %c0_i32_0 = arith.constant 0 : i32
    %c0_i32_1 = arith.constant 0 : i32
    return %arg0, %c0_i32, %c0_i32_0 : i32, i32, i32
  }
  func.func @transform_1(%arg0: i32) -> (i32, i32, i32) {
    %c0_i32 = arith.constant 0 : i32
    %c0_i32_0 = arith.constant 0 : i32
    %c0_i32_1 = arith.constant 0 : i32
    %c0_i32_2 = arith.constant 0 : i32
    return %c0_i32, %c0_i32_0, %c0_i32_1 : i32, i32, i32
  }
  func.func @transform_2(%arg0: i32) -> (i32, i32, i32) {
    %c0_i32 = arith.constant 0 : i32
    %c0_i32_0 = arith.constant 0 : i32
    %c0_i32_1 = arith.constant 0 : i32
    %c0_i32_2 = arith.constant 0 : i32
    return %c0_i32, %c0_i32_0, %c0_i32_1 : i32, i32, i32
  }
  func.func @transform_3(%arg0: i32) -> (i32, i32) {
    %c0_i32 = arith.constant 0 : i32
    %c0_i32_0 = arith.constant 0 : i32
    %c0_i32_1 = arith.constant 0 : i32
    return %c0_i32, %c0_i32_0 : i32, i32
  }
  func.func @transform_4(%arg0: i32) -> (i32, i32) {
    %c0_i32 = arith.constant 0 : i32
    %c0_i32_0 = arith.constant 0 : i32
    %c0_i32_1 = arith.constant 0 : i32
    return %c0_i32, %c0_i32_0 : i32, i32
  }
  func.func @transform_5(%arg0: i32) -> (i32, i32, i32) {
    %c0_i32 = arith.constant 0 : i32
    %c0_i32_0 = arith.constant 0 : i32
    %c0_i32_1 = arith.constant 0 : i32
    return %arg0, %c0_i32, %c0_i32_0 : i32, i32, i32
  }
}

module attributes {stable_mosaic.version = 11 : i64} {
  func.func @maxpool_kernel(%arg0: i32, %arg1: memref<8x2x9x2x8xf32, #tpu.memory_space<vmem>>, %arg2: memref<8x8x8xf32, #tpu.memory_space<vmem>>) attributes {dimension_semantics = [#tpu.dimension_semantics<parallel>], iteration_bounds = array<i64: 2>, scalar_prefetch = 0 : i64, scratch_operands = 0 : i64, tpu.core_type = #tpu.core_type<tc>, window_params = [{transform_indices = @transform_0, window_bounds = array<i64: 8, 2, 9, 2, 8>}, {transform_indices = @transform_1, window_bounds = array<i64: 8, 8, 8>}]} {
    %c0 = arith.constant 0 : index
    %c0_0 = arith.constant 0 : index
    %c0_1 = arith.constant 0 : index
    %c0_2 = arith.constant 0 : index
    %c0_3 = arith.constant 0 : index
    %0 = vector.load %arg1[%c0, %c0_0, %c0_1, %c0_2, %c0_3] : memref<8x2x9x2x8xf32, #tpu.memory_space<vmem>>, vector<8x2x9x2x8xf32>
    %1 = vector.extract_strided_slice %0 {offsets = [0, 0, 0, 0, 0], sizes = [8, 1, 9, 2, 8], strides = [1, 1, 1, 1, 1]} : vector<8x2x9x2x8xf32> to vector<8x1x9x2x8xf32>
    %2 = vector.shape_cast %1 : vector<8x1x9x2x8xf32> to vector<8x9x2x8xf32>
    %3 = vector.extract_strided_slice %0 {offsets = [0, 1, 0, 0, 0], sizes = [8, 1, 9, 2, 8], strides = [1, 1, 1, 1, 1]} : vector<8x2x9x2x8xf32> to vector<8x1x9x2x8xf32>
    %4 = vector.shape_cast %3 : vector<8x1x9x2x8xf32> to vector<8x9x2x8xf32>
    %5 = arith.maximumf %2, %4 : vector<8x9x2x8xf32>
    %cst = arith.constant dense<0xFF800000> : vector<8x9x8xf32>
    %6 = vector.multi_reduction <maximumf>, %5, %cst [2] : vector<8x9x2x8xf32> to vector<8x9x8xf32>
    %7 = vector.extract_strided_slice %6 {offsets = [0, 0, 0], sizes = [8, 8, 8], strides = [1, 1, 1]} : vector<8x9x8xf32> to vector<8x8x8xf32>
    %c0_4 = arith.constant 0 : index
    %c0_5 = arith.constant 0 : index
    %c0_6 = arith.constant 0 : index
    %8 = vector.load %arg2[%c0_4, %c0_5, %c0_6] : memref<8x8x8xf32, #tpu.memory_space<vmem>>, vector<8x8x8xf32>
    tpu.vector_store %arg2[%c0_4, %c0_5, %c0_6], %7 {strides = array<i32>} : memref<8x8x8xf32, #tpu.memory_space<vmem>>, vector<8x8x8xf32>,
    return
  }
  func.func @transform_0(%arg0: i32) -> (i32, i32, i32, i32, i32) {
    %c0_i32 = arith.constant 0 : i32
    %c0_i32_0 = arith.constant 0 : i32
    %c0_i32_1 = arith.constant 0 : i32
    %c0_i32_2 = arith.constant 0 : i32
    %c0_i32_3 = arith.constant 0 : i32
    return %arg0, %c0_i32, %c0_i32_0, %c0_i32_1, %c0_i32_2 : i32, i32, i32, i32, i32
  }
  func.func @transform_1(%arg0: i32) -> (i32, i32, i32) {
    %c0_i32 = arith.constant 0 : i32
    %c0_i32_0 = arith.constant 0 : i32
    %c0_i32_1 = arith.constant 0 : i32
    return %arg0, %c0_i32, %c0_i32_0 : i32, i32, i32
  }
}

module attributes {stable_mosaic.version = 11 : i64} {
  func.func @maxpool_kernel(%arg0: i32, %arg1: memref<4x2x5x2x16xf32, #tpu.memory_space<vmem>>, %arg2: memref<4x4x16xf32, #tpu.memory_space<vmem>>) attributes {dimension_semantics = [#tpu.dimension_semantics<parallel>], iteration_bounds = array<i64: 2>, scalar_prefetch = 0 : i64, scratch_operands = 0 : i64, tpu.core_type = #tpu.core_type<tc>, window_params = [{transform_indices = @transform_0, window_bounds = array<i64: 4, 2, 5, 2, 16>}, {transform_indices = @transform_1, window_bounds = array<i64: 4, 4, 16>}]} {
    %c0 = arith.constant 0 : index
    %c0_0 = arith.constant 0 : index
    %c0_1 = arith.constant 0 : index
    %c0_2 = arith.constant 0 : index
    %c0_3 = arith.constant 0 : index
    %0 = vector.load %arg1[%c0, %c0_0, %c0_1, %c0_2, %c0_3] : memref<4x2x5x2x16xf32, #tpu.memory_space<vmem>>, vector<4x2x5x2x16xf32>
    %1 = vector.extract_strided_slice %0 {offsets = [0, 0, 0, 0, 0], sizes = [4, 1, 5, 2, 16], strides = [1, 1, 1, 1, 1]} : vector<4x2x5x2x16xf32> to vector<4x1x5x2x16xf32>
    %2 = vector.shape_cast %1 : vector<4x1x5x2x16xf32> to vector<4x5x2x16xf32>
    %3 = vector.extract_strided_slice %0 {offsets = [0, 1, 0, 0, 0], sizes = [4, 1, 5, 2, 16], strides = [1, 1, 1, 1, 1]} : vector<4x2x5x2x16xf32> to vector<4x1x5x2x16xf32>
    %4 = vector.shape_cast %3 : vector<4x1x5x2x16xf32> to vector<4x5x2x16xf32>
    %5 = arith.maximumf %2, %4 : vector<4x5x2x16xf32>
    %cst = arith.constant dense<0xFF800000> : vector<4x5x16xf32>
    %6 = vector.multi_reduction <maximumf>, %5, %cst [2] : vector<4x5x2x16xf32> to vector<4x5x16xf32>
    %7 = vector.extract_strided_slice %6 {offsets = [0, 0, 0], sizes = [4, 4, 16], strides = [1, 1, 1]} : vector<4x5x16xf32> to vector<4x4x16xf32>
    %c0_4 = arith.constant 0 : index
    %c0_5 = arith.constant 0 : index
    %c0_6 = arith.constant 0 : index
    %8 = vector.load %arg2[%c0_4, %c0_5, %c0_6] : memref<4x4x16xf32, #tpu.memory_space<vmem>>, vector<4x4x16xf32>
    tpu.vector_store %arg2[%c0_4, %c0_5, %c0_6], %7 {strides = array<i32>} : memref<4x4x16xf32, #tpu.memory_space<vmem>>, vector<4x4x16xf32>,
    return
  }
  func.func @transform_0(%arg0: i32) -> (i32, i32, i32, i32, i32) {
    %c0_i32 = arith.constant 0 : i32
    %c0_i32_0 = arith.constant 0 : i32
    %c0_i32_1 = arith.constant 0 : i32
    %c0_i32_2 = arith.constant 0 : i32
    %c0_i32_3 = arith.constant 0 : i32
    return %arg0, %c0_i32, %c0_i32_0, %c0_i32_1, %c0_i32_2 : i32, i32, i32, i32, i32
  }
  func.func @transform_1(%arg0: i32) -> (i32, i32, i32) {
    %c0_i32 = arith.constant 0 : i32
    %c0_i32_0 = arith.constant 0 : i32
    %c0_i32_1 = arith.constant 0 : i32
    return %arg0, %c0_i32, %c0_i32_0 : i32, i32, i32
  }
}

module attributes {stable_mosaic.version = 11 : i64} {
  func.func @stage_kernel(%arg0: i32, %arg1: memref<1x110x8xf32, #tpu.memory_space<vmem>>, %arg2: memref<9x8x16xbf16, #tpu.memory_space<vmem>>, %arg3: memref<9x16x16xbf16, #tpu.memory_space<vmem>>, %arg4: memref<4x16xf32, #tpu.memory_space<vmem>>, %arg5: memref<80x1xf32, #tpu.memory_space<vmem>>, %arg6: memref<1x80x16xf32, #tpu.memory_space<vmem>>, %arg7: memref<110x16xf32, #tpu.memory_space<vmem>>) attributes {dimension_semantics = [#tpu.dimension_semantics<parallel>], iteration_bounds = array<i64: 2>, scalar_prefetch = 0 : i64, scratch_operands = 1 : i64, tpu.core_type = #tpu.core_type<tc>, window_params = [{transform_indices = @transform_0, window_bounds = array<i64: 1, 110, 8>}, {pipeline_mode = #tpu.pipeline_mode<synchronous>, transform_indices = @transform_1, window_bounds = array<i64: 9, 8, 16>}, {pipeline_mode = #tpu.pipeline_mode<synchronous>, transform_indices = @transform_2, window_bounds = array<i64: 9, 16, 16>}, {pipeline_mode = #tpu.pipeline_mode<synchronous>, transform_indices = @transform_3, window_bounds = array<i64: 4, 16>}, {pipeline_mode = #tpu.pipeline_mode<synchronous>, transform_indices = @transform_4, window_bounds = array<i64: 80, 1>}, {transform_indices = @transform_5, window_bounds = array<i64: 1, 80, 16>}]} {
    %c0 = arith.constant 0 : index
    %c0_0 = arith.constant 0 : index
    %c0_1 = arith.constant 0 : index
    %0 = vector.load %arg1[%c0, %c0_0, %c0_1] : memref<1x110x8xf32, #tpu.memory_space<vmem>>, vector<1x80x8xf32>
    %1 = vector.shape_cast %0 : vector<1x80x8xf32> to vector<80x8xf32>
    %2 = arith.truncf %1 : vector<80x8xf32> to vector<80x8xbf16>
    %c0_2 = arith.constant 0 : index
    %c0_3 = arith.constant 0 : index
    %c0_4 = arith.constant 0 : index
    %3 = vector.load %arg2[%c0_2, %c0_3, %c0_4] : memref<9x8x16xbf16, #tpu.memory_space<vmem>>, vector<1x8x16xbf16>
    %4 = vector.shape_cast %3 : vector<1x8x16xbf16> to vector<8x16xbf16>
    %cst = arith.constant dense<0.000000e+00> : vector<80x16xf32>
    %5 = tpu.matmul %2, %4, %cst {dimension_numbers = #tpu.dot_dimension_numbers<[1], [0], [0], [1], [0, 0, 1, 1], [], []>} : vector<80x8xbf16>, vector<8x16xbf16>, vector<80x16xf32> -> vector<80x16xf32>
    %c0_5 = arith.constant 0 : index
    %c1 = arith.constant 1 : index
    %c0_6 = arith.constant 0 : index
    %6 = vector.load %arg1[%c0_5, %c1, %c0_6] : memref<1x110x8xf32, #tpu.memory_space<vmem>>, vector<1x80x8xf32>
    %7 = vector.shape_cast %6 : vector<1x80x8xf32> to vector<80x8xf32>
    %8 = arith.truncf %7 : vector<80x8xf32> to vector<80x8xbf16>
    %c1_7 = arith.constant 1 : index
    %c0_8 = arith.constant 0 : index
    %c0_9 = arith.constant 0 : index
    %9 = vector.load %arg2[%c1_7, %c0_8, %c0_9] : memref<9x8x16xbf16, #tpu.memory_space<vmem>>, vector<1x8x16xbf16>
    %10 = vector.shape_cast %9 : vector<1x8x16xbf16> to vector<8x16xbf16>
    %cst_10 = arith.constant dense<0.000000e+00> : vector<80x16xf32>
    %11 = tpu.matmul %8, %10, %cst_10 {dimension_numbers = #tpu.dot_dimension_numbers<[1], [0], [0], [1], [0, 0, 1, 1], [], []>} : vector<80x8xbf16>, vector<8x16xbf16>, vector<80x16xf32> -> vector<80x16xf32>
    %12 = arith.addf %5, %11 : vector<80x16xf32>
    %c0_11 = arith.constant 0 : index
    %c2 = arith.constant 2 : index
    %c0_12 = arith.constant 0 : index
    %13 = vector.load %arg1[%c0_11, %c2, %c0_12] : memref<1x110x8xf32, #tpu.memory_space<vmem>>, vector<1x80x8xf32>
    %14 = vector.shape_cast %13 : vector<1x80x8xf32> to vector<80x8xf32>
    %15 = arith.truncf %14 : vector<80x8xf32> to vector<80x8xbf16>
    %c2_13 = arith.constant 2 : index
    %c0_14 = arith.constant 0 : index
    %c0_15 = arith.constant 0 : index
    %16 = vector.load %arg2[%c2_13, %c0_14, %c0_15] : memref<9x8x16xbf16, #tpu.memory_space<vmem>>, vector<1x8x16xbf16>
    %17 = vector.shape_cast %16 : vector<1x8x16xbf16> to vector<8x16xbf16>
    %cst_16 = arith.constant dense<0.000000e+00> : vector<80x16xf32>
    %18 = tpu.matmul %15, %17, %cst_16 {dimension_numbers = #tpu.dot_dimension_numbers<[1], [0], [0], [1], [0, 0, 1, 1], [], []>} : vector<80x8xbf16>, vector<8x16xbf16>, vector<80x16xf32> -> vector<80x16xf32>
    %19 = arith.addf %12, %18 : vector<80x16xf32>
    %c0_17 = arith.constant 0 : index
    %c10 = arith.constant 10 : index
    %c0_18 = arith.constant 0 : index
    %20 = vector.load %arg1[%c0_17, %c10, %c0_18] : memref<1x110x8xf32, #tpu.memory_space<vmem>>, vector<1x80x8xf32>
    %21 = vector.shape_cast %20 : vector<1x80x8xf32> to vector<80x8xf32>
    %22 = arith.truncf %21 : vector<80x8xf32> to vector<80x8xbf16>
    %c3 = arith.constant 3 : index
    %c0_19 = arith.constant 0 : index
    %c0_20 = arith.constant 0 : index
    %23 = vector.load %arg2[%c3, %c0_19, %c0_20] : memref<9x8x16xbf16, #tpu.memory_space<vmem>>, vector<1x8x16xbf16>
    %24 = vector.shape_cast %23 : vector<1x8x16xbf16> to vector<8x16xbf16>
    %cst_21 = arith.constant dense<0.000000e+00> : vector<80x16xf32>
    %25 = tpu.matmul %22, %24, %cst_21 {dimension_numbers = #tpu.dot_dimension_numbers<[1], [0], [0], [1], [0, 0, 1, 1], [], []>} : vector<80x8xbf16>, vector<8x16xbf16>, vector<80x16xf32> -> vector<80x16xf32>
    %26 = arith.addf %19, %25 : vector<80x16xf32>
    %c0_22 = arith.constant 0 : index
    %c11 = arith.constant 11 : index
    %c0_23 = arith.constant 0 : index
    %27 = vector.load %arg1[%c0_22, %c11, %c0_23] : memref<1x110x8xf32, #tpu.memory_space<vmem>>, vector<1x80x8xf32>
    %28 = vector.shape_cast %27 : vector<1x80x8xf32> to vector<80x8xf32>
    %29 = arith.truncf %28 : vector<80x8xf32> to vector<80x8xbf16>
    %c4 = arith.constant 4 : index
    %c0_24 = arith.constant 0 : index
    %c0_25 = arith.constant 0 : index
    %30 = vector.load %arg2[%c4, %c0_24, %c0_25] : memref<9x8x16xbf16, #tpu.memory_space<vmem>>, vector<1x8x16xbf16>
    %31 = vector.shape_cast %30 : vector<1x8x16xbf16> to vector<8x16xbf16>
    %cst_26 = arith.constant dense<0.000000e+00> : vector<80x16xf32>
    %32 = tpu.matmul %29, %31, %cst_26 {dimension_numbers = #tpu.dot_dimension_numbers<[1], [0], [0], [1], [0, 0, 1, 1], [], []>} : vector<80x8xbf16>, vector<8x16xbf16>, vector<80x16xf32> -> vector<80x16xf32>
    %33 = arith.addf %26, %32 : vector<80x16xf32>
    %c0_27 = arith.constant 0 : index
    %c12 = arith.constant 12 : index
    %c0_28 = arith.constant 0 : index
    %34 = vector.load %arg1[%c0_27, %c12, %c0_28] : memref<1x110x8xf32, #tpu.memory_space<vmem>>, vector<1x80x8xf32>
    %35 = vector.shape_cast %34 : vector<1x80x8xf32> to vector<80x8xf32>
    %36 = arith.truncf %35 : vector<80x8xf32> to vector<80x8xbf16>
    %c5 = arith.constant 5 : index
    %c0_29 = arith.constant 0 : index
    %c0_30 = arith.constant 0 : index
    %37 = vector.load %arg2[%c5, %c0_29, %c0_30] : memref<9x8x16xbf16, #tpu.memory_space<vmem>>, vector<1x8x16xbf16>
    %38 = vector.shape_cast %37 : vector<1x8x16xbf16> to vector<8x16xbf16>
    %cst_31 = arith.constant dense<0.000000e+00> : vector<80x16xf32>
    %39 = tpu.matmul %36, %38, %cst_31 {dimension_numbers = #tpu.dot_dimension_numbers<[1], [0], [0], [1], [0, 0, 1, 1], [], []>} : vector<80x8xbf16>, vector<8x16xbf16>, vector<80x16xf32> -> vector<80x16xf32>
    %40 = arith.addf %33, %39 : vector<80x16xf32>
    %c0_32 = arith.constant 0 : index
    %c20 = arith.constant 20 : index
    %c0_33 = arith.constant 0 : index
    %41 = vector.load %arg1[%c0_32, %c20, %c0_33] : memref<1x110x8xf32, #tpu.memory_space<vmem>>, vector<1x80x8xf32>
    %42 = vector.shape_cast %41 : vector<1x80x8xf32> to vector<80x8xf32>
    %43 = arith.truncf %42 : vector<80x8xf32> to vector<80x8xbf16>
    %c6 = arith.constant 6 : index
    %c0_34 = arith.constant 0 : index
    %c0_35 = arith.constant 0 : index
    %44 = vector.load %arg2[%c6, %c0_34, %c0_35] : memref<9x8x16xbf16, #tpu.memory_space<vmem>>, vector<1x8x16xbf16>
    %45 = vector.shape_cast %44 : vector<1x8x16xbf16> to vector<8x16xbf16>
    %cst_36 = arith.constant dense<0.000000e+00> : vector<80x16xf32>
    %46 = tpu.matmul %43, %45, %cst_36 {dimension_numbers = #tpu.dot_dimension_numbers<[1], [0], [0], [1], [0, 0, 1, 1], [], []>} : vector<80x8xbf16>, vector<8x16xbf16>, vector<80x16xf32> -> vector<80x16xf32>
    %47 = arith.addf %40, %46 : vector<80x16xf32>
    %c0_37 = arith.constant 0 : index
    %c21 = arith.constant 21 : index
    %c0_38 = arith.constant 0 : index
    %48 = vector.load %arg1[%c0_37, %c21, %c0_38] : memref<1x110x8xf32, #tpu.memory_space<vmem>>, vector<1x80x8xf32>
    %49 = vector.shape_cast %48 : vector<1x80x8xf32> to vector<80x8xf32>
    %50 = arith.truncf %49 : vector<80x8xf32> to vector<80x8xbf16>
    %c7 = arith.constant 7 : index
    %c0_39 = arith.constant 0 : index
    %c0_40 = arith.constant 0 : index
    %51 = vector.load %arg2[%c7, %c0_39, %c0_40] : memref<9x8x16xbf16, #tpu.memory_space<vmem>>, vector<1x8x16xbf16>
    %52 = vector.shape_cast %51 : vector<1x8x16xbf16> to vector<8x16xbf16>
    %cst_41 = arith.constant dense<0.000000e+00> : vector<80x16xf32>
    %53 = tpu.matmul %50, %52, %cst_41 {dimension_numbers = #tpu.dot_dimension_numbers<[1], [0], [0], [1], [0, 0, 1, 1], [], []>} : vector<80x8xbf16>, vector<8x16xbf16>, vector<80x16xf32> -> vector<80x16xf32>
    %54 = arith.addf %47, %53 : vector<80x16xf32>
    %c0_42 = arith.constant 0 : index
    %c22 = arith.constant 22 : index
    %c0_43 = arith.constant 0 : index
    %55 = vector.load %arg1[%c0_42, %c22, %c0_43] : memref<1x110x8xf32, #tpu.memory_space<vmem>>, vector<1x80x8xf32>
    %56 = vector.shape_cast %55 : vector<1x80x8xf32> to vector<80x8xf32>
    %57 = arith.truncf %56 : vector<80x8xf32> to vector<80x8xbf16>
    %c8 = arith.constant 8 : index
    %c0_44 = arith.constant 0 : index
    %c0_45 = arith.constant 0 : index
    %58 = vector.load %arg2[%c8, %c0_44, %c0_45] : memref<9x8x16xbf16, #tpu.memory_space<vmem>>, vector<1x8x16xbf16>
    %59 = vector.shape_cast %58 : vector<1x8x16xbf16> to vector<8x16xbf16>
    %cst_46 = arith.constant dense<0.000000e+00> : vector<80x16xf32>
    %60 = tpu.matmul %57, %59, %cst_46 {dimension_numbers = #tpu.dot_dimension_numbers<[1], [0], [0], [1], [0, 0, 1, 1], [], []>} : vector<80x8xbf16>, vector<8x16xbf16>, vector<80x16xf32> -> vector<80x16xf32>
    %61 = arith.addf %54, %60 : vector<80x16xf32>
    %c0_47 = arith.constant 0 : index
    %c0_48 = arith.constant 0 : index
    %62 = vector.load %arg4[%c0_47, %c0_48] : memref<4x16xf32, #tpu.memory_space<vmem>>, vector<1x16xf32>
    %63 = vector.shape_cast %62 : vector<1x16xf32> to vector<16xf32>
    %c1_49 = arith.constant 1 : index
    %c0_50 = arith.constant 0 : index
    %64 = vector.load %arg4[%c1_49, %c0_50] : memref<4x16xf32, #tpu.memory_space<vmem>>, vector<1x16xf32>
    %65 = vector.shape_cast %64 : vector<1x16xf32> to vector<16xf32>
    %66 = vector.shape_cast %63 : vector<16xf32> to vector<1x16xf32>
    %67 = vector.broadcast %66 : vector<1x16xf32> to vector<80x16xf32>
    %68 = arith.mulf %61, %67 : vector<80x16xf32>
    %69 = vector.shape_cast %65 : vector<16xf32> to vector<1x16xf32>
    %70 = vector.broadcast %69 : vector<1x16xf32> to vector<80x16xf32>
    %71 = arith.addf %68, %70 : vector<80x16xf32>
    %cst_51 = arith.constant 0.000000e+00 : f32
    %72 = vector.broadcast %cst_51 : f32 to vector<80x16xf32>
    %73 = arith.cmpf oge, %71, %72 : vector<80x16xf32>
    %cst_52 = arith.constant 0.00999999977 : f32
    %74 = vector.broadcast %cst_52 : f32 to vector<80x16xf32>
    %75 = arith.mulf %74, %71 : vector<80x16xf32>
    %76 = arith.select %73, %71, %75 : vector<80x16xi1>, vector<80x16xf32>
    %cst_53 = arith.constant 0.000000e+00 : f32
    %77 = vector.broadcast %cst_53 : f32 to vector<110x16xf32>
    %c0_54 = arith.constant 0 : index
    %c0_55 = arith.constant 0 : index
    %78 = vector.load %arg7[%c0_54, %c0_55] : memref<110x16xf32, #tpu.memory_space<vmem>>, vector<110x16xf32>
    tpu.vector_store %arg7[%c0_54, %c0_55], %77 {strides = array<i32>} : memref<110x16xf32, #tpu.memory_space<vmem>>, vector<110x16xf32>,
    %c0_56 = arith.constant 0 : index
    %c0_57 = arith.constant 0 : index
    %79 = vector.load %arg5[%c0_56, %c0_57] : memref<80x1xf32, #tpu.memory_space<vmem>>, vector<80x1xf32>
    %80 = vector.broadcast %79 : vector<80x1xf32> to vector<80x16xf32>
    %81 = arith.mulf %76, %80 : vector<80x16xf32>
    %c11_58 = arith.constant 11 : index
    %c0_59 = arith.constant 0 : index
    %82 = vector.load %arg7[%c11_58, %c0_59] : memref<110x16xf32, #tpu.memory_space<vmem>>, vector<80x16xf32>
    tpu.vector_store %arg7[%c11_58, %c0_59], %81 {strides = array<i32>} : memref<110x16xf32, #tpu.memory_space<vmem>>, vector<80x16xf32>,
    %c0_60 = arith.constant 0 : index
    %c0_61 = arith.constant 0 : index
    %83 = vector.load %arg7[%c0_60, %c0_61] : memref<110x16xf32, #tpu.memory_space<vmem>>, vector<80x16xf32>
    %84 = arith.truncf %83 : vector<80x16xf32> to vector<80x16xbf16>
    %c0_62 = arith.constant 0 : index
    %c0_63 = arith.constant 0 : index
    %c0_64 = arith.constant 0 : index
    %85 = vector.load %arg3[%c0_62, %c0_63, %c0_64] : memref<9x16x16xbf16, #tpu.memory_space<vmem>>, vector<1x16x16xbf16>
    %86 = vector.shape_cast %85 : vector<1x16x16xbf16> to vector<16x16xbf16>
    %cst_65 = arith.constant dense<0.000000e+00> : vector<80x16xf32>
    %87 = tpu.matmul %84, %86, %cst_65 {dimension_numbers = #tpu.dot_dimension_numbers<[1], [0], [0], [1], [0, 0, 1, 1], [], []>} : vector<80x16xbf16>, vector<16x16xbf16>, vector<80x16xf32> -> vector<80x16xf32>
    %c1_66 = arith.constant 1 : index
    %c0_67 = arith.constant 0 : index
    %88 = vector.load %arg7[%c1_66, %c0_67] : memref<110x16xf32, #tpu.memory_space<vmem>>, vector<80x16xf32>
    %89 = arith.truncf %88 : vector<80x16xf32> to vector<80x16xbf16>
    %c1_68 = arith.constant 1 : index
    %c0_69 = arith.constant 0 : index
    %c0_70 = arith.constant 0 : index
    %90 = vector.load %arg3[%c1_68, %c0_69, %c0_70] : memref<9x16x16xbf16, #tpu.memory_space<vmem>>, vector<1x16x16xbf16>
    %91 = vector.shape_cast %90 : vector<1x16x16xbf16> to vector<16x16xbf16>
    %cst_71 = arith.constant dense<0.000000e+00> : vector<80x16xf32>
    %92 = tpu.matmul %89, %91, %cst_71 {dimension_numbers = #tpu.dot_dimension_numbers<[1], [0], [0], [1], [0, 0, 1, 1], [], []>} : vector<80x16xbf16>, vector<16x16xbf16>, vector<80x16xf32> -> vector<80x16xf32>
    %93 = arith.addf %87, %92 : vector<80x16xf32>
    %c2_72 = arith.constant 2 : index
    %c0_73 = arith.constant 0 : index
    %94 = vector.load %arg7[%c2_72, %c0_73] : memref<110x16xf32, #tpu.memory_space<vmem>>, vector<80x16xf32>
    %95 = arith.truncf %94 : vector<80x16xf32> to vector<80x16xbf16>
    %c2_74 = arith.constant 2 : index
    %c0_75 = arith.constant 0 : index
    %c0_76 = arith.constant 0 : index
    %96 = vector.load %arg3[%c2_74, %c0_75, %c0_76] : memref<9x16x16xbf16, #tpu.memory_space<vmem>>, vector<1x16x16xbf16>
    %97 = vector.shape_cast %96 : vector<1x16x16xbf16> to vector<16x16xbf16>
    %cst_77 = arith.constant dense<0.000000e+00> : vector<80x16xf32>
    %98 = tpu.matmul %95, %97, %cst_77 {dimension_numbers = #tpu.dot_dimension_numbers<[1], [0], [0], [1], [0, 0, 1, 1], [], []>} : vector<80x16xbf16>, vector<16x16xbf16>, vector<80x16xf32> -> vector<80x16xf32>
    %99 = arith.addf %93, %98 : vector<80x16xf32>
    %c10_78 = arith.constant 10 : index
    %c0_79 = arith.constant 0 : index
    %100 = vector.load %arg7[%c10_78, %c0_79] : memref<110x16xf32, #tpu.memory_space<vmem>>, vector<80x16xf32>
    %101 = arith.truncf %100 : vector<80x16xf32> to vector<80x16xbf16>
    %c3_80 = arith.constant 3 : index
    %c0_81 = arith.constant 0 : index
    %c0_82 = arith.constant 0 : index
    %102 = vector.load %arg3[%c3_80, %c0_81, %c0_82] : memref<9x16x16xbf16, #tpu.memory_space<vmem>>, vector<1x16x16xbf16>
    %103 = vector.shape_cast %102 : vector<1x16x16xbf16> to vector<16x16xbf16>
    %cst_83 = arith.constant dense<0.000000e+00> : vector<80x16xf32>
    %104 = tpu.matmul %101, %103, %cst_83 {dimension_numbers = #tpu.dot_dimension_numbers<[1], [0], [0], [1], [0, 0, 1, 1], [], []>} : vector<80x16xbf16>, vector<16x16xbf16>, vector<80x16xf32> -> vector<80x16xf32>
    %105 = arith.addf %99, %104 : vector<80x16xf32>
    %c11_84 = arith.constant 11 : index
    %c0_85 = arith.constant 0 : index
    %106 = vector.load %arg7[%c11_84, %c0_85] : memref<110x16xf32, #tpu.memory_space<vmem>>, vector<80x16xf32>
    %107 = arith.truncf %106 : vector<80x16xf32> to vector<80x16xbf16>
    %c4_86 = arith.constant 4 : index
    %c0_87 = arith.constant 0 : index
    %c0_88 = arith.constant 0 : index
    %108 = vector.load %arg3[%c4_86, %c0_87, %c0_88] : memref<9x16x16xbf16, #tpu.memory_space<vmem>>, vector<1x16x16xbf16>
    %109 = vector.shape_cast %108 : vector<1x16x16xbf16> to vector<16x16xbf16>
    %cst_89 = arith.constant dense<0.000000e+00> : vector<80x16xf32>
    %110 = tpu.matmul %107, %109, %cst_89 {dimension_numbers = #tpu.dot_dimension_numbers<[1], [0], [0], [1], [0, 0, 1, 1], [], []>} : vector<80x16xbf16>, vector<16x16xbf16>, vector<80x16xf32> -> vector<80x16xf32>
    %111 = arith.addf %105, %110 : vector<80x16xf32>
    %c12_90 = arith.constant 12 : index
    %c0_91 = arith.constant 0 : index
    %112 = vector.load %arg7[%c12_90, %c0_91] : memref<110x16xf32, #tpu.memory_space<vmem>>, vector<80x16xf32>
    %113 = arith.truncf %112 : vector<80x16xf32> to vector<80x16xbf16>
    %c5_92 = arith.constant 5 : index
    %c0_93 = arith.constant 0 : index
    %c0_94 = arith.constant 0 : index
    %114 = vector.load %arg3[%c5_92, %c0_93, %c0_94] : memref<9x16x16xbf16, #tpu.memory_space<vmem>>, vector<1x16x16xbf16>
    %115 = vector.shape_cast %114 : vector<1x16x16xbf16> to vector<16x16xbf16>
    %cst_95 = arith.constant dense<0.000000e+00> : vector<80x16xf32>
    %116 = tpu.matmul %113, %115, %cst_95 {dimension_numbers = #tpu.dot_dimension_numbers<[1], [0], [0], [1], [0, 0, 1, 1], [], []>} : vector<80x16xbf16>, vector<16x16xbf16>, vector<80x16xf32> -> vector<80x16xf32>
    %117 = arith.addf %111, %116 : vector<80x16xf32>
    %c20_96 = arith.constant 20 : index
    %c0_97 = arith.constant 0 : index
    %118 = vector.load %arg7[%c20_96, %c0_97] : memref<110x16xf32, #tpu.memory_space<vmem>>, vector<80x16xf32>
    %119 = arith.truncf %118 : vector<80x16xf32> to vector<80x16xbf16>
    %c6_98 = arith.constant 6 : index
    %c0_99 = arith.constant 0 : index
    %c0_100 = arith.constant 0 : index
    %120 = vector.load %arg3[%c6_98, %c0_99, %c0_100] : memref<9x16x16xbf16, #tpu.memory_space<vmem>>, vector<1x16x16xbf16>
    %121 = vector.shape_cast %120 : vector<1x16x16xbf16> to vector<16x16xbf16>
    %cst_101 = arith.constant dense<0.000000e+00> : vector<80x16xf32>
    %122 = tpu.matmul %119, %121, %cst_101 {dimension_numbers = #tpu.dot_dimension_numbers<[1], [0], [0], [1], [0, 0, 1, 1], [], []>} : vector<80x16xbf16>, vector<16x16xbf16>, vector<80x16xf32> -> vector<80x16xf32>
    %123 = arith.addf %117, %122 : vector<80x16xf32>
    %c21_102 = arith.constant 21 : index
    %c0_103 = arith.constant 0 : index
    %124 = vector.load %arg7[%c21_102, %c0_103] : memref<110x16xf32, #tpu.memory_space<vmem>>, vector<80x16xf32>
    %125 = arith.truncf %124 : vector<80x16xf32> to vector<80x16xbf16>
    %c7_104 = arith.constant 7 : index
    %c0_105 = arith.constant 0 : index
    %c0_106 = arith.constant 0 : index
    %126 = vector.load %arg3[%c7_104, %c0_105, %c0_106] : memref<9x16x16xbf16, #tpu.memory_space<vmem>>, vector<1x16x16xbf16>
    %127 = vector.shape_cast %126 : vector<1x16x16xbf16> to vector<16x16xbf16>
    %cst_107 = arith.constant dense<0.000000e+00> : vector<80x16xf32>
    %128 = tpu.matmul %125, %127, %cst_107 {dimension_numbers = #tpu.dot_dimension_numbers<[1], [0], [0], [1], [0, 0, 1, 1], [], []>} : vector<80x16xbf16>, vector<16x16xbf16>, vector<80x16xf32> -> vector<80x16xf32>
    %129 = arith.addf %123, %128 : vector<80x16xf32>
    %c22_108 = arith.constant 22 : index
    %c0_109 = arith.constant 0 : index
    %130 = vector.load %arg7[%c22_108, %c0_109] : memref<110x16xf32, #tpu.memory_space<vmem>>, vector<80x16xf32>
    %131 = arith.truncf %130 : vector<80x16xf32> to vector<80x16xbf16>
    %c8_110 = arith.constant 8 : index
    %c0_111 = arith.constant 0 : index
    %c0_112 = arith.constant 0 : index
    %132 = vector.load %arg3[%c8_110, %c0_111, %c0_112] : memref<9x16x16xbf16, #tpu.memory_space<vmem>>, vector<1x16x16xbf16>
    %133 = vector.shape_cast %132 : vector<1x16x16xbf16> to vector<16x16xbf16>
    %cst_113 = arith.constant dense<0.000000e+00> : vector<80x16xf32>
    %134 = tpu.matmul %131, %133, %cst_113 {dimension_numbers = #tpu.dot_dimension_numbers<[1], [0], [0], [1], [0, 0, 1, 1], [], []>} : vector<80x16xbf16>, vector<16x16xbf16>, vector<80x16xf32> -> vector<80x16xf32>
    %135 = arith.addf %129, %134 : vector<80x16xf32>
    %c2_114 = arith.constant 2 : index
    %c0_115 = arith.constant 0 : index
    %136 = vector.load %arg4[%c2_114, %c0_115] : memref<4x16xf32, #tpu.memory_space<vmem>>, vector<1x16xf32>
    %137 = vector.shape_cast %136 : vector<1x16xf32> to vector<16xf32>
    %c3_116 = arith.constant 3 : index
    %c0_117 = arith.constant 0 : index
    %138 = vector.load %arg4[%c3_116, %c0_117] : memref<4x16xf32, #tpu.memory_space<vmem>>, vector<1x16xf32>
    %139 = vector.shape_cast %138 : vector<1x16xf32> to vector<16xf32>
    %140 = vector.shape_cast %137 : vector<16xf32> to vector<1x16xf32>
    %141 = vector.broadcast %140 : vector<1x16xf32> to vector<80x16xf32>
    %142 = arith.mulf %135, %141 : vector<80x16xf32>
    %143 = vector.shape_cast %139 : vector<16xf32> to vector<1x16xf32>
    %144 = vector.broadcast %143 : vector<1x16xf32> to vector<80x16xf32>
    %145 = arith.addf %142, %144 : vector<80x16xf32>
    %cst_118 = arith.constant 0.000000e+00 : f32
    %146 = vector.broadcast %cst_118 : f32 to vector<80x16xf32>
    %147 = arith.cmpf oge, %145, %146 : vector<80x16xf32>
    %cst_119 = arith.constant 0.00999999977 : f32
    %148 = vector.broadcast %cst_119 : f32 to vector<80x16xf32>
    %149 = arith.mulf %148, %145 : vector<80x16xf32>
    %150 = arith.select %147, %145, %149 : vector<80x16xi1>, vector<80x16xf32>
    %c0_120 = arith.constant 0 : index
    %c0_121 = arith.constant 0 : index
    %c0_122 = arith.constant 0 : index
    %151 = vector.load %arg6[%c0_120, %c0_121, %c0_122] : memref<1x80x16xf32, #tpu.memory_space<vmem>>, vector<1x80x16xf32>
    %152 = vector.shape_cast %151 : vector<1x80x16xf32> to vector<80x16xf32>
    %153 = vector.shape_cast %150 : vector<80x16xf32> to vector<1x80x16xf32>
    tpu.vector_store %arg6[%c0_120, %c0_121, %c0_122], %153 {strides = array<i32>} : memref<1x80x16xf32, #tpu.memory_space<vmem>>, vector<1x80x16xf32>,
    return
  }
  func.func @transform_0(%arg0: i32) -> (i32, i32, i32) {
    %c0_i32 = arith.constant 0 : i32
    %c0_i32_0 = arith.constant 0 : i32
    %c0_i32_1 = arith.constant 0 : i32
    return %arg0, %c0_i32, %c0_i32_0 : i32, i32, i32
  }
  func.func @transform_1(%arg0: i32) -> (i32, i32, i32) {
    %c0_i32 = arith.constant 0 : i32
    %c0_i32_0 = arith.constant 0 : i32
    %c0_i32_1 = arith.constant 0 : i32
    %c0_i32_2 = arith.constant 0 : i32
    return %c0_i32, %c0_i32_0, %c0_i32_1 : i32, i32, i32
  }
  func.func @transform_2(%arg0: i32) -> (i32, i32, i32) {
    %c0_i32 = arith.constant 0 : i32
    %c0_i32_0 = arith.constant 0 : i32
    %c0_i32_1 = arith.constant 0 : i32
    %c0_i32_2 = arith.constant 0 : i32
    return %c0_i32, %c0_i32_0, %c0_i32_1 : i32, i32, i32
  }
  func.func @transform_3(%arg0: i32) -> (i32, i32) {
    %c0_i32 = arith.constant 0 : i32
    %c0_i32_0 = arith.constant 0 : i32
    %c0_i32_1 = arith.constant 0 : i32
    return %c0_i32, %c0_i32_0 : i32, i32
  }
  func.func @transform_4(%arg0: i32) -> (i32, i32) {
    %c0_i32 = arith.constant 0 : i32
    %c0_i32_0 = arith.constant 0 : i32
    %c0_i32_1 = arith.constant 0 : i32
    return %c0_i32, %c0_i32_0 : i32, i32
  }
  func.func @transform_5(%arg0: i32) -> (i32, i32, i32) {
    %c0_i32 = arith.constant 0 : i32
    %c0_i32_0 = arith.constant 0 : i32
    %c0_i32_1 = arith.constant 0 : i32
    return %arg0, %c0_i32, %c0_i32_0 : i32, i32, i32
  }
}

module attributes {stable_mosaic.version = 11 : i64} {
  func.func @stage_kernel(%arg0: i32, %arg1: memref<1x42x16xf32, #tpu.memory_space<vmem>>, %arg2: memref<9x16x32xbf16, #tpu.memory_space<vmem>>, %arg3: memref<9x32x32xbf16, #tpu.memory_space<vmem>>, %arg4: memref<4x32xf32, #tpu.memory_space<vmem>>, %arg5: memref<24x1xf32, #tpu.memory_space<vmem>>, %arg6: memref<1x24x32xf32, #tpu.memory_space<vmem>>, %arg7: memref<42x32xf32, #tpu.memory_space<vmem>>) attributes {dimension_semantics = [#tpu.dimension_semantics<parallel>], iteration_bounds = array<i64: 2>, scalar_prefetch = 0 : i64, scratch_operands = 1 : i64, tpu.core_type = #tpu.core_type<tc>, window_params = [{transform_indices = @transform_0, window_bounds = array<i64: 1, 42, 16>}, {pipeline_mode = #tpu.pipeline_mode<synchronous>, transform_indices = @transform_1, window_bounds = array<i64: 9, 16, 32>}, {pipeline_mode = #tpu.pipeline_mode<synchronous>, transform_indices = @transform_2, window_bounds = array<i64: 9, 32, 32>}, {pipeline_mode = #tpu.pipeline_mode<synchronous>, transform_indices = @transform_3, window_bounds = array<i64: 4, 32>}, {pipeline_mode = #tpu.pipeline_mode<synchronous>, transform_indices = @transform_4, window_bounds = array<i64: 24, 1>}, {transform_indices = @transform_5, window_bounds = array<i64: 1, 24, 32>}]} {
    %c0 = arith.constant 0 : index
    %c0_0 = arith.constant 0 : index
    %c0_1 = arith.constant 0 : index
    %0 = vector.load %arg1[%c0, %c0_0, %c0_1] : memref<1x42x16xf32, #tpu.memory_space<vmem>>, vector<1x24x16xf32>
    %1 = vector.shape_cast %0 : vector<1x24x16xf32> to vector<24x16xf32>
    %2 = arith.truncf %1 : vector<24x16xf32> to vector<24x16xbf16>
    %c0_2 = arith.constant 0 : index
    %c0_3 = arith.constant 0 : index
    %c0_4 = arith.constant 0 : index
    %3 = vector.load %arg2[%c0_2, %c0_3, %c0_4] : memref<9x16x32xbf16, #tpu.memory_space<vmem>>, vector<1x16x32xbf16>
    %4 = vector.shape_cast %3 : vector<1x16x32xbf16> to vector<16x32xbf16>
    %cst = arith.constant dense<0.000000e+00> : vector<24x32xf32>
    %5 = tpu.matmul %2, %4, %cst {dimension_numbers = #tpu.dot_dimension_numbers<[1], [0], [0], [1], [0, 0, 1, 1], [], []>} : vector<24x16xbf16>, vector<16x32xbf16>, vector<24x32xf32> -> vector<24x32xf32>
    %c0_5 = arith.constant 0 : index
    %c1 = arith.constant 1 : index
    %c0_6 = arith.constant 0 : index
    %6 = vector.load %arg1[%c0_5, %c1, %c0_6] : memref<1x42x16xf32, #tpu.memory_space<vmem>>, vector<1x24x16xf32>
    %7 = vector.shape_cast %6 : vector<1x24x16xf32> to vector<24x16xf32>
    %8 = arith.truncf %7 : vector<24x16xf32> to vector<24x16xbf16>
    %c1_7 = arith.constant 1 : index
    %c0_8 = arith.constant 0 : index
    %c0_9 = arith.constant 0 : index
    %9 = vector.load %arg2[%c1_7, %c0_8, %c0_9] : memref<9x16x32xbf16, #tpu.memory_space<vmem>>, vector<1x16x32xbf16>
    %10 = vector.shape_cast %9 : vector<1x16x32xbf16> to vector<16x32xbf16>
    %cst_10 = arith.constant dense<0.000000e+00> : vector<24x32xf32>
    %11 = tpu.matmul %8, %10, %cst_10 {dimension_numbers = #tpu.dot_dimension_numbers<[1], [0], [0], [1], [0, 0, 1, 1], [], []>} : vector<24x16xbf16>, vector<16x32xbf16>, vector<24x32xf32> -> vector<24x32xf32>
    %12 = arith.addf %5, %11 : vector<24x32xf32>
    %c0_11 = arith.constant 0 : index
    %c2 = arith.constant 2 : index
    %c0_12 = arith.constant 0 : index
    %13 = vector.load %arg1[%c0_11, %c2, %c0_12] : memref<1x42x16xf32, #tpu.memory_space<vmem>>, vector<1x24x16xf32>
    %14 = vector.shape_cast %13 : vector<1x24x16xf32> to vector<24x16xf32>
    %15 = arith.truncf %14 : vector<24x16xf32> to vector<24x16xbf16>
    %c2_13 = arith.constant 2 : index
    %c0_14 = arith.constant 0 : index
    %c0_15 = arith.constant 0 : index
    %16 = vector.load %arg2[%c2_13, %c0_14, %c0_15] : memref<9x16x32xbf16, #tpu.memory_space<vmem>>, vector<1x16x32xbf16>
    %17 = vector.shape_cast %16 : vector<1x16x32xbf16> to vector<16x32xbf16>
    %cst_16 = arith.constant dense<0.000000e+00> : vector<24x32xf32>
    %18 = tpu.matmul %15, %17, %cst_16 {dimension_numbers = #tpu.dot_dimension_numbers<[1], [0], [0], [1], [0, 0, 1, 1], [], []>} : vector<24x16xbf16>, vector<16x32xbf16>, vector<24x32xf32> -> vector<24x32xf32>
    %19 = arith.addf %12, %18 : vector<24x32xf32>
    %c0_17 = arith.constant 0 : index
    %c6 = arith.constant 6 : index
    %c0_18 = arith.constant 0 : index
    %20 = vector.load %arg1[%c0_17, %c6, %c0_18] : memref<1x42x16xf32, #tpu.memory_space<vmem>>, vector<1x24x16xf32>
    %21 = vector.shape_cast %20 : vector<1x24x16xf32> to vector<24x16xf32>
    %22 = arith.truncf %21 : vector<24x16xf32> to vector<24x16xbf16>
    %c3 = arith.constant 3 : index
    %c0_19 = arith.constant 0 : index
    %c0_20 = arith.constant 0 : index
    %23 = vector.load %arg2[%c3, %c0_19, %c0_20] : memref<9x16x32xbf16, #tpu.memory_space<vmem>>, vector<1x16x32xbf16>
    %24 = vector.shape_cast %23 : vector<1x16x32xbf16> to vector<16x32xbf16>
    %cst_21 = arith.constant dense<0.000000e+00> : vector<24x32xf32>
    %25 = tpu.matmul %22, %24, %cst_21 {dimension_numbers = #tpu.dot_dimension_numbers<[1], [0], [0], [1], [0, 0, 1, 1], [], []>} : vector<24x16xbf16>, vector<16x32xbf16>, vector<24x32xf32> -> vector<24x32xf32>
    %26 = arith.addf %19, %25 : vector<24x32xf32>
    %c0_22 = arith.constant 0 : index
    %c7 = arith.constant 7 : index
    %c0_23 = arith.constant 0 : index
    %27 = vector.load %arg1[%c0_22, %c7, %c0_23] : memref<1x42x16xf32, #tpu.memory_space<vmem>>, vector<1x24x16xf32>
    %28 = vector.shape_cast %27 : vector<1x24x16xf32> to vector<24x16xf32>
    %29 = arith.truncf %28 : vector<24x16xf32> to vector<24x16xbf16>
    %c4 = arith.constant 4 : index
    %c0_24 = arith.constant 0 : index
    %c0_25 = arith.constant 0 : index
    %30 = vector.load %arg2[%c4, %c0_24, %c0_25] : memref<9x16x32xbf16, #tpu.memory_space<vmem>>, vector<1x16x32xbf16>
    %31 = vector.shape_cast %30 : vector<1x16x32xbf16> to vector<16x32xbf16>
    %cst_26 = arith.constant dense<0.000000e+00> : vector<24x32xf32>
    %32 = tpu.matmul %29, %31, %cst_26 {dimension_numbers = #tpu.dot_dimension_numbers<[1], [0], [0], [1], [0, 0, 1, 1], [], []>} : vector<24x16xbf16>, vector<16x32xbf16>, vector<24x32xf32> -> vector<24x32xf32>
    %33 = arith.addf %26, %32 : vector<24x32xf32>
    %c0_27 = arith.constant 0 : index
    %c8 = arith.constant 8 : index
    %c0_28 = arith.constant 0 : index
    %34 = vector.load %arg1[%c0_27, %c8, %c0_28] : memref<1x42x16xf32, #tpu.memory_space<vmem>>, vector<1x24x16xf32>
    %35 = vector.shape_cast %34 : vector<1x24x16xf32> to vector<24x16xf32>
    %36 = arith.truncf %35 : vector<24x16xf32> to vector<24x16xbf16>
    %c5 = arith.constant 5 : index
    %c0_29 = arith.constant 0 : index
    %c0_30 = arith.constant 0 : index
    %37 = vector.load %arg2[%c5, %c0_29, %c0_30] : memref<9x16x32xbf16, #tpu.memory_space<vmem>>, vector<1x16x32xbf16>
    %38 = vector.shape_cast %37 : vector<1x16x32xbf16> to vector<16x32xbf16>
    %cst_31 = arith.constant dense<0.000000e+00> : vector<24x32xf32>
    %39 = tpu.matmul %36, %38, %cst_31 {dimension_numbers = #tpu.dot_dimension_numbers<[1], [0], [0], [1], [0, 0, 1, 1], [], []>} : vector<24x16xbf16>, vector<16x32xbf16>, vector<24x32xf32> -> vector<24x32xf32>
    %40 = arith.addf %33, %39 : vector<24x32xf32>
    %c0_32 = arith.constant 0 : index
    %c12 = arith.constant 12 : index
    %c0_33 = arith.constant 0 : index
    %41 = vector.load %arg1[%c0_32, %c12, %c0_33] : memref<1x42x16xf32, #tpu.memory_space<vmem>>, vector<1x24x16xf32>
    %42 = vector.shape_cast %41 : vector<1x24x16xf32> to vector<24x16xf32>
    %43 = arith.truncf %42 : vector<24x16xf32> to vector<24x16xbf16>
    %c6_34 = arith.constant 6 : index
    %c0_35 = arith.constant 0 : index
    %c0_36 = arith.constant 0 : index
    %44 = vector.load %arg2[%c6_34, %c0_35, %c0_36] : memref<9x16x32xbf16, #tpu.memory_space<vmem>>, vector<1x16x32xbf16>
    %45 = vector.shape_cast %44 : vector<1x16x32xbf16> to vector<16x32xbf16>
    %cst_37 = arith.constant dense<0.000000e+00> : vector<24x32xf32>
    %46 = tpu.matmul %43, %45, %cst_37 {dimension_numbers = #tpu.dot_dimension_numbers<[1], [0], [0], [1], [0, 0, 1, 1], [], []>} : vector<24x16xbf16>, vector<16x32xbf16>, vector<24x32xf32> -> vector<24x32xf32>
    %47 = arith.addf %40, %46 : vector<24x32xf32>
    %c0_38 = arith.constant 0 : index
    %c13 = arith.constant 13 : index
    %c0_39 = arith.constant 0 : index
    %48 = vector.load %arg1[%c0_38, %c13, %c0_39] : memref<1x42x16xf32, #tpu.memory_space<vmem>>, vector<1x24x16xf32>
    %49 = vector.shape_cast %48 : vector<1x24x16xf32> to vector<24x16xf32>
    %50 = arith.truncf %49 : vector<24x16xf32> to vector<24x16xbf16>
    %c7_40 = arith.constant 7 : index
    %c0_41 = arith.constant 0 : index
    %c0_42 = arith.constant 0 : index
    %51 = vector.load %arg2[%c7_40, %c0_41, %c0_42] : memref<9x16x32xbf16, #tpu.memory_space<vmem>>, vector<1x16x32xbf16>
    %52 = vector.shape_cast %51 : vector<1x16x32xbf16> to vector<16x32xbf16>
    %cst_43 = arith.constant dense<0.000000e+00> : vector<24x32xf32>
    %53 = tpu.matmul %50, %52, %cst_43 {dimension_numbers = #tpu.dot_dimension_numbers<[1], [0], [0], [1], [0, 0, 1, 1], [], []>} : vector<24x16xbf16>, vector<16x32xbf16>, vector<24x32xf32> -> vector<24x32xf32>
    %54 = arith.addf %47, %53 : vector<24x32xf32>
    %c0_44 = arith.constant 0 : index
    %c14 = arith.constant 14 : index
    %c0_45 = arith.constant 0 : index
    %55 = vector.load %arg1[%c0_44, %c14, %c0_45] : memref<1x42x16xf32, #tpu.memory_space<vmem>>, vector<1x24x16xf32>
    %56 = vector.shape_cast %55 : vector<1x24x16xf32> to vector<24x16xf32>
    %57 = arith.truncf %56 : vector<24x16xf32> to vector<24x16xbf16>
    %c8_46 = arith.constant 8 : index
    %c0_47 = arith.constant 0 : index
    %c0_48 = arith.constant 0 : index
    %58 = vector.load %arg2[%c8_46, %c0_47, %c0_48] : memref<9x16x32xbf16, #tpu.memory_space<vmem>>, vector<1x16x32xbf16>
    %59 = vector.shape_cast %58 : vector<1x16x32xbf16> to vector<16x32xbf16>
    %cst_49 = arith.constant dense<0.000000e+00> : vector<24x32xf32>
    %60 = tpu.matmul %57, %59, %cst_49 {dimension_numbers = #tpu.dot_dimension_numbers<[1], [0], [0], [1], [0, 0, 1, 1], [], []>} : vector<24x16xbf16>, vector<16x32xbf16>, vector<24x32xf32> -> vector<24x32xf32>
    %61 = arith.addf %54, %60 : vector<24x32xf32>
    %c0_50 = arith.constant 0 : index
    %c0_51 = arith.constant 0 : index
    %62 = vector.load %arg4[%c0_50, %c0_51] : memref<4x32xf32, #tpu.memory_space<vmem>>, vector<1x32xf32>
    %63 = vector.shape_cast %62 : vector<1x32xf32> to vector<32xf32>
    %c1_52 = arith.constant 1 : index
    %c0_53 = arith.constant 0 : index
    %64 = vector.load %arg4[%c1_52, %c0_53] : memref<4x32xf32, #tpu.memory_space<vmem>>, vector<1x32xf32>
    %65 = vector.shape_cast %64 : vector<1x32xf32> to vector<32xf32>
    %66 = vector.shape_cast %63 : vector<32xf32> to vector<1x32xf32>
    %67 = vector.broadcast %66 : vector<1x32xf32> to vector<24x32xf32>
    %68 = arith.mulf %61, %67 : vector<24x32xf32>
    %69 = vector.shape_cast %65 : vector<32xf32> to vector<1x32xf32>
    %70 = vector.broadcast %69 : vector<1x32xf32> to vector<24x32xf32>
    %71 = arith.addf %68, %70 : vector<24x32xf32>
    %cst_54 = arith.constant 0.000000e+00 : f32
    %72 = vector.broadcast %cst_54 : f32 to vector<24x32xf32>
    %73 = arith.cmpf oge, %71, %72 : vector<24x32xf32>
    %cst_55 = arith.constant 0.00999999977 : f32
    %74 = vector.broadcast %cst_55 : f32 to vector<24x32xf32>
    %75 = arith.mulf %74, %71 : vector<24x32xf32>
    %76 = arith.select %73, %71, %75 : vector<24x32xi1>, vector<24x32xf32>
    %cst_56 = arith.constant 0.000000e+00 : f32
    %77 = vector.broadcast %cst_56 : f32 to vector<42x32xf32>
    %c0_57 = arith.constant 0 : index
    %c0_58 = arith.constant 0 : index
    %78 = vector.load %arg7[%c0_57, %c0_58] : memref<42x32xf32, #tpu.memory_space<vmem>>, vector<42x32xf32>
    tpu.vector_store %arg7[%c0_57, %c0_58], %77 {strides = array<i32>} : memref<42x32xf32, #tpu.memory_space<vmem>>, vector<42x32xf32>,
    %c0_59 = arith.constant 0 : index
    %c0_60 = arith.constant 0 : index
    %79 = vector.load %arg5[%c0_59, %c0_60] : memref<24x1xf32, #tpu.memory_space<vmem>>, vector<24x1xf32>
    %80 = vector.broadcast %79 : vector<24x1xf32> to vector<24x32xf32>
    %81 = arith.mulf %76, %80 : vector<24x32xf32>
    %c7_61 = arith.constant 7 : index
    %c0_62 = arith.constant 0 : index
    %82 = vector.load %arg7[%c7_61, %c0_62] : memref<42x32xf32, #tpu.memory_space<vmem>>, vector<24x32xf32>
    tpu.vector_store %arg7[%c7_61, %c0_62], %81 {strides = array<i32>} : memref<42x32xf32, #tpu.memory_space<vmem>>, vector<24x32xf32>,
    %c0_63 = arith.constant 0 : index
    %c0_64 = arith.constant 0 : index
    %83 = vector.load %arg7[%c0_63, %c0_64] : memref<42x32xf32, #tpu.memory_space<vmem>>, vector<24x32xf32>
    %84 = arith.truncf %83 : vector<24x32xf32> to vector<24x32xbf16>
    %c0_65 = arith.constant 0 : index
    %c0_66 = arith.constant 0 : index
    %c0_67 = arith.constant 0 : index
    %85 = vector.load %arg3[%c0_65, %c0_66, %c0_67] : memref<9x32x32xbf16, #tpu.memory_space<vmem>>, vector<1x32x32xbf16>
    %86 = vector.shape_cast %85 : vector<1x32x32xbf16> to vector<32x32xbf16>
    %cst_68 = arith.constant dense<0.000000e+00> : vector<24x32xf32>
    %87 = tpu.matmul %84, %86, %cst_68 {dimension_numbers = #tpu.dot_dimension_numbers<[1], [0], [0], [1], [0, 0, 1, 1], [], []>} : vector<24x32xbf16>, vector<32x32xbf16>, vector<24x32xf32> -> vector<24x32xf32>
    %c1_69 = arith.constant 1 : index
    %c0_70 = arith.constant 0 : index
    %88 = vector.load %arg7[%c1_69, %c0_70] : memref<42x32xf32, #tpu.memory_space<vmem>>, vector<24x32xf32>
    %89 = arith.truncf %88 : vector<24x32xf32> to vector<24x32xbf16>
    %c1_71 = arith.constant 1 : index
    %c0_72 = arith.constant 0 : index
    %c0_73 = arith.constant 0 : index
    %90 = vector.load %arg3[%c1_71, %c0_72, %c0_73] : memref<9x32x32xbf16, #tpu.memory_space<vmem>>, vector<1x32x32xbf16>
    %91 = vector.shape_cast %90 : vector<1x32x32xbf16> to vector<32x32xbf16>
    %cst_74 = arith.constant dense<0.000000e+00> : vector<24x32xf32>
    %92 = tpu.matmul %89, %91, %cst_74 {dimension_numbers = #tpu.dot_dimension_numbers<[1], [0], [0], [1], [0, 0, 1, 1], [], []>} : vector<24x32xbf16>, vector<32x32xbf16>, vector<24x32xf32> -> vector<24x32xf32>
    %93 = arith.addf %87, %92 : vector<24x32xf32>
    %c2_75 = arith.constant 2 : index
    %c0_76 = arith.constant 0 : index
    %94 = vector.load %arg7[%c2_75, %c0_76] : memref<42x32xf32, #tpu.memory_space<vmem>>, vector<24x32xf32>
    %95 = arith.truncf %94 : vector<24x32xf32> to vector<24x32xbf16>
    %c2_77 = arith.constant 2 : index
    %c0_78 = arith.constant 0 : index
    %c0_79 = arith.constant 0 : index
    %96 = vector.load %arg3[%c2_77, %c0_78, %c0_79] : memref<9x32x32xbf16, #tpu.memory_space<vmem>>, vector<1x32x32xbf16>
    %97 = vector.shape_cast %96 : vector<1x32x32xbf16> to vector<32x32xbf16>
    %cst_80 = arith.constant dense<0.000000e+00> : vector<24x32xf32>
    %98 = tpu.matmul %95, %97, %cst_80 {dimension_numbers = #tpu.dot_dimension_numbers<[1], [0], [0], [1], [0, 0, 1, 1], [], []>} : vector<24x32xbf16>, vector<32x32xbf16>, vector<24x32xf32> -> vector<24x32xf32>
    %99 = arith.addf %93, %98 : vector<24x32xf32>
    %c6_81 = arith.constant 6 : index
    %c0_82 = arith.constant 0 : index
    %100 = vector.load %arg7[%c6_81, %c0_82] : memref<42x32xf32, #tpu.memory_space<vmem>>, vector<24x32xf32>
    %101 = arith.truncf %100 : vector<24x32xf32> to vector<24x32xbf16>
    %c3_83 = arith.constant 3 : index
    %c0_84 = arith.constant 0 : index
    %c0_85 = arith.constant 0 : index
    %102 = vector.load %arg3[%c3_83, %c0_84, %c0_85] : memref<9x32x32xbf16, #tpu.memory_space<vmem>>, vector<1x32x32xbf16>
    %103 = vector.shape_cast %102 : vector<1x32x32xbf16> to vector<32x32xbf16>
    %cst_86 = arith.constant dense<0.000000e+00> : vector<24x32xf32>
    %104 = tpu.matmul %101, %103, %cst_86 {dimension_numbers = #tpu.dot_dimension_numbers<[1], [0], [0], [1], [0, 0, 1, 1], [], []>} : vector<24x32xbf16>, vector<32x32xbf16>, vector<24x32xf32> -> vector<24x32xf32>
    %105 = arith.addf %99, %104 : vector<24x32xf32>
    %c7_87 = arith.constant 7 : index
    %c0_88 = arith.constant 0 : index
    %106 = vector.load %arg7[%c7_87, %c0_88] : memref<42x32xf32, #tpu.memory_space<vmem>>, vector<24x32xf32>
    %107 = arith.truncf %106 : vector<24x32xf32> to vector<24x32xbf16>
    %c4_89 = arith.constant 4 : index
    %c0_90 = arith.constant 0 : index
    %c0_91 = arith.constant 0 : index
    %108 = vector.load %arg3[%c4_89, %c0_90, %c0_91] : memref<9x32x32xbf16, #tpu.memory_space<vmem>>, vector<1x32x32xbf16>
    %109 = vector.shape_cast %108 : vector<1x32x32xbf16> to vector<32x32xbf16>
    %cst_92 = arith.constant dense<0.000000e+00> : vector<24x32xf32>
    %110 = tpu.matmul %107, %109, %cst_92 {dimension_numbers = #tpu.dot_dimension_numbers<[1], [0], [0], [1], [0, 0, 1, 1], [], []>} : vector<24x32xbf16>, vector<32x32xbf16>, vector<24x32xf32> -> vector<24x32xf32>
    %111 = arith.addf %105, %110 : vector<24x32xf32>
    %c8_93 = arith.constant 8 : index
    %c0_94 = arith.constant 0 : index
    %112 = vector.load %arg7[%c8_93, %c0_94] : memref<42x32xf32, #tpu.memory_space<vmem>>, vector<24x32xf32>
    %113 = arith.truncf %112 : vector<24x32xf32> to vector<24x32xbf16>
    %c5_95 = arith.constant 5 : index
    %c0_96 = arith.constant 0 : index
    %c0_97 = arith.constant 0 : index
    %114 = vector.load %arg3[%c5_95, %c0_96, %c0_97] : memref<9x32x32xbf16, #tpu.memory_space<vmem>>, vector<1x32x32xbf16>
    %115 = vector.shape_cast %114 : vector<1x32x32xbf16> to vector<32x32xbf16>
    %cst_98 = arith.constant dense<0.000000e+00> : vector<24x32xf32>
    %116 = tpu.matmul %113, %115, %cst_98 {dimension_numbers = #tpu.dot_dimension_numbers<[1], [0], [0], [1], [0, 0, 1, 1], [], []>} : vector<24x32xbf16>, vector<32x32xbf16>, vector<24x32xf32> -> vector<24x32xf32>
    %117 = arith.addf %111, %116 : vector<24x32xf32>
    %c12_99 = arith.constant 12 : index
    %c0_100 = arith.constant 0 : index
    %118 = vector.load %arg7[%c12_99, %c0_100] : memref<42x32xf32, #tpu.memory_space<vmem>>, vector<24x32xf32>
    %119 = arith.truncf %118 : vector<24x32xf32> to vector<24x32xbf16>
    %c6_101 = arith.constant 6 : index
    %c0_102 = arith.constant 0 : index
    %c0_103 = arith.constant 0 : index
    %120 = vector.load %arg3[%c6_101, %c0_102, %c0_103] : memref<9x32x32xbf16, #tpu.memory_space<vmem>>, vector<1x32x32xbf16>
    %121 = vector.shape_cast %120 : vector<1x32x32xbf16> to vector<32x32xbf16>
    %cst_104 = arith.constant dense<0.000000e+00> : vector<24x32xf32>
    %122 = tpu.matmul %119, %121, %cst_104 {dimension_numbers = #tpu.dot_dimension_numbers<[1], [0], [0], [1], [0, 0, 1, 1], [], []>} : vector<24x32xbf16>, vector<32x32xbf16>, vector<24x32xf32> -> vector<24x32xf32>
    %123 = arith.addf %117, %122 : vector<24x32xf32>
    %c13_105 = arith.constant 13 : index
    %c0_106 = arith.constant 0 : index
    %124 = vector.load %arg7[%c13_105, %c0_106] : memref<42x32xf32, #tpu.memory_space<vmem>>, vector<24x32xf32>
    %125 = arith.truncf %124 : vector<24x32xf32> to vector<24x32xbf16>
    %c7_107 = arith.constant 7 : index
    %c0_108 = arith.constant 0 : index
    %c0_109 = arith.constant 0 : index
    %126 = vector.load %arg3[%c7_107, %c0_108, %c0_109] : memref<9x32x32xbf16, #tpu.memory_space<vmem>>, vector<1x32x32xbf16>
    %127 = vector.shape_cast %126 : vector<1x32x32xbf16> to vector<32x32xbf16>
    %cst_110 = arith.constant dense<0.000000e+00> : vector<24x32xf32>
    %128 = tpu.matmul %125, %127, %cst_110 {dimension_numbers = #tpu.dot_dimension_numbers<[1], [0], [0], [1], [0, 0, 1, 1], [], []>} : vector<24x32xbf16>, vector<32x32xbf16>, vector<24x32xf32> -> vector<24x32xf32>
    %129 = arith.addf %123, %128 : vector<24x32xf32>
    %c14_111 = arith.constant 14 : index
    %c0_112 = arith.constant 0 : index
    %130 = vector.load %arg7[%c14_111, %c0_112] : memref<42x32xf32, #tpu.memory_space<vmem>>, vector<24x32xf32>
    %131 = arith.truncf %130 : vector<24x32xf32> to vector<24x32xbf16>
    %c8_113 = arith.constant 8 : index
    %c0_114 = arith.constant 0 : index
    %c0_115 = arith.constant 0 : index
    %132 = vector.load %arg3[%c8_113, %c0_114, %c0_115] : memref<9x32x32xbf16, #tpu.memory_space<vmem>>, vector<1x32x32xbf16>
    %133 = vector.shape_cast %132 : vector<1x32x32xbf16> to vector<32x32xbf16>
    %cst_116 = arith.constant dense<0.000000e+00> : vector<24x32xf32>
    %134 = tpu.matmul %131, %133, %cst_116 {dimension_numbers = #tpu.dot_dimension_numbers<[1], [0], [0], [1], [0, 0, 1, 1], [], []>} : vector<24x32xbf16>, vector<32x32xbf16>, vector<24x32xf32> -> vector<24x32xf32>
    %135 = arith.addf %129, %134 : vector<24x32xf32>
    %c2_117 = arith.constant 2 : index
    %c0_118 = arith.constant 0 : index
    %136 = vector.load %arg4[%c2_117, %c0_118] : memref<4x32xf32, #tpu.memory_space<vmem>>, vector<1x32xf32>
    %137 = vector.shape_cast %136 : vector<1x32xf32> to vector<32xf32>
    %c3_119 = arith.constant 3 : index
    %c0_120 = arith.constant 0 : index
    %138 = vector.load %arg4[%c3_119, %c0_120] : memref<4x32xf32, #tpu.memory_space<vmem>>, vector<1x32xf32>
    %139 = vector.shape_cast %138 : vector<1x32xf32> to vector<32xf32>
    %140 = vector.shape_cast %137 : vector<32xf32> to vector<1x32xf32>
    %141 = vector.broadcast %140 : vector<1x32xf32> to vector<24x32xf32>
    %142 = arith.mulf %135, %141 : vector<24x32xf32>
    %143 = vector.shape_cast %139 : vector<32xf32> to vector<1x32xf32>
    %144 = vector.broadcast %143 : vector<1x32xf32> to vector<24x32xf32>
    %145 = arith.addf %142, %144 : vector<24x32xf32>
    %cst_121 = arith.constant 0.000000e+00 : f32
    %146 = vector.broadcast %cst_121 : f32 to vector<24x32xf32>
    %147 = arith.cmpf oge, %145, %146 : vector<24x32xf32>
    %cst_122 = arith.constant 0.00999999977 : f32
    %148 = vector.broadcast %cst_122 : f32 to vector<24x32xf32>
    %149 = arith.mulf %148, %145 : vector<24x32xf32>
    %150 = arith.select %147, %145, %149 : vector<24x32xi1>, vector<24x32xf32>
    %c0_123 = arith.constant 0 : index
    %c0_124 = arith.constant 0 : index
    %c0_125 = arith.constant 0 : index
    %151 = vector.load %arg6[%c0_123, %c0_124, %c0_125] : memref<1x24x32xf32, #tpu.memory_space<vmem>>, vector<1x24x32xf32>
    %152 = vector.shape_cast %151 : vector<1x24x32xf32> to vector<24x32xf32>
    %153 = vector.shape_cast %150 : vector<24x32xf32> to vector<1x24x32xf32>
    tpu.vector_store %arg6[%c0_123, %c0_124, %c0_125], %153 {strides = array<i32>} : memref<1x24x32xf32, #tpu.memory_space<vmem>>, vector<1x24x32xf32>,
    return
  }
  func.func @transform_0(%arg0: i32) -> (i32, i32, i32) {
    %c0_i32 = arith.constant 0 : i32
    %c0_i32_0 = arith.constant 0 : i32
    %c0_i32_1 = arith.constant 0 : i32
    return %arg0, %c0_i32, %c0_i32_0 : i32, i32, i32
  }
  func.func @transform_1(%arg0: i32) -> (i32, i32, i32) {
    %c0_i32 = arith.constant 0 : i32
    %c0_i32_0 = arith.constant 0 : i32
    %c0_i32_1 = arith.constant 0 : i32
    %c0_i32_2 = arith.constant 0 : i32
    return %c0_i32, %c0_i32_0, %c0_i32_1 : i32, i32, i32
  }
  func.func @transform_2(%arg0: i32) -> (i32, i32, i32) {
    %c0_i32 = arith.constant 0 : i32
    %c0_i32_0 = arith.constant 0 : i32
    %c0_i32_1 = arith.constant 0 : i32
    %c0_i32_2 = arith.constant 0 : i32
    return %c0_i32, %c0_i32_0, %c0_i32_1 : i32, i32, i32
  }
  func.func @transform_3(%arg0: i32) -> (i32, i32) {
    %c0_i32 = arith.constant 0 : i32
    %c0_i32_0 = arith.constant 0 : i32
    %c0_i32_1 = arith.constant 0 : i32
    return %c0_i32, %c0_i32_0 : i32, i32
  }
  func.func @transform_4(%arg0: i32) -> (i32, i32) {
    %c0_i32 = arith.constant 0 : i32
    %c0_i32_0 = arith.constant 0 : i32
    %c0_i32_1 = arith.constant 0 : i32
    return %c0_i32, %c0_i32_0 : i32, i32
  }
  func.func @transform_5(%arg0: i32) -> (i32, i32, i32) {
    %c0_i32 = arith.constant 0 : i32
    %c0_i32_0 = arith.constant 0 : i32
    %c0_i32_1 = arith.constant 0 : i32
    return %arg0, %c0_i32, %c0_i32_0 : i32, i32, i32
  }
}

module attributes {stable_mosaic.version = 11 : i64} {
  func.func @maxpool_kernel(%arg0: i32, %arg1: memref<2x2x3x2x32xf32, #tpu.memory_space<vmem>>, %arg2: memref<2x2x32xf32, #tpu.memory_space<vmem>>) attributes {dimension_semantics = [#tpu.dimension_semantics<parallel>], iteration_bounds = array<i64: 2>, scalar_prefetch = 0 : i64, scratch_operands = 0 : i64, tpu.core_type = #tpu.core_type<tc>, window_params = [{transform_indices = @transform_0, window_bounds = array<i64: 2, 2, 3, 2, 32>}, {transform_indices = @transform_1, window_bounds = array<i64: 2, 2, 32>}]} {
    %c0 = arith.constant 0 : index
    %c0_0 = arith.constant 0 : index
    %c0_1 = arith.constant 0 : index
    %c0_2 = arith.constant 0 : index
    %c0_3 = arith.constant 0 : index
    %0 = vector.load %arg1[%c0, %c0_0, %c0_1, %c0_2, %c0_3] : memref<2x2x3x2x32xf32, #tpu.memory_space<vmem>>, vector<2x2x3x2x32xf32>
    %1 = vector.extract_strided_slice %0 {offsets = [0, 0, 0, 0, 0], sizes = [2, 1, 3, 2, 32], strides = [1, 1, 1, 1, 1]} : vector<2x2x3x2x32xf32> to vector<2x1x3x2x32xf32>
    %2 = vector.shape_cast %1 : vector<2x1x3x2x32xf32> to vector<2x3x2x32xf32>
    %3 = vector.extract_strided_slice %0 {offsets = [0, 1, 0, 0, 0], sizes = [2, 1, 3, 2, 32], strides = [1, 1, 1, 1, 1]} : vector<2x2x3x2x32xf32> to vector<2x1x3x2x32xf32>
    %4 = vector.shape_cast %3 : vector<2x1x3x2x32xf32> to vector<2x3x2x32xf32>
    %5 = arith.maximumf %2, %4 : vector<2x3x2x32xf32>
    %cst = arith.constant dense<0xFF800000> : vector<2x3x32xf32>
    %6 = vector.multi_reduction <maximumf>, %5, %cst [2] : vector<2x3x2x32xf32> to vector<2x3x32xf32>
    %7 = vector.extract_strided_slice %6 {offsets = [0, 0, 0], sizes = [2, 2, 32], strides = [1, 1, 1]} : vector<2x3x32xf32> to vector<2x2x32xf32>
    %c0_4 = arith.constant 0 : index
    %c0_5 = arith.constant 0 : index
    %c0_6 = arith.constant 0 : index
    %8 = vector.load %arg2[%c0_4, %c0_5, %c0_6] : memref<2x2x32xf32, #tpu.memory_space<vmem>>, vector<2x2x32xf32>
    tpu.vector_store %arg2[%c0_4, %c0_5, %c0_6], %7 {strides = array<i32>} : memref<2x2x32xf32, #tpu.memory_space<vmem>>, vector<2x2x32xf32>,
    return
  }
  func.func @transform_0(%arg0: i32) -> (i32, i32, i32, i32, i32) {
    %c0_i32 = arith.constant 0 : i32
    %c0_i32_0 = arith.constant 0 : i32
    %c0_i32_1 = arith.constant 0 : i32
    %c0_i32_2 = arith.constant 0 : i32
    %c0_i32_3 = arith.constant 0 : i32
    return %arg0, %c0_i32, %c0_i32_0, %c0_i32_1, %c0_i32_2 : i32, i32, i32, i32, i32
  }
  func.func @transform_1(%arg0: i32) -> (i32, i32, i32) {
    %c0_i32 = arith.constant 0 : i32
    %c0_i32_0 = arith.constant 0 : i32
    %c0_i32_1 = arith.constant 0 : i32
    return %arg0, %c0_i32, %c0_i32_0 : i32, i32, i32
  }
}

module attributes {stable_mosaic.version = 11 : i64} {
  func.func @maxpool_kernel(%arg0: i32, %arg1: memref<1x2x2x2x64xf32, #tpu.memory_space<vmem>>, %arg2: memref<1x1x64xf32, #tpu.memory_space<vmem>>) attributes {dimension_semantics = [#tpu.dimension_semantics<parallel>], iteration_bounds = array<i64: 2>, scalar_prefetch = 0 : i64, scratch_operands = 0 : i64, tpu.core_type = #tpu.core_type<tc>, window_params = [{transform_indices = @transform_0, window_bounds = array<i64: 1, 2, 2, 2, 64>}, {transform_indices = @transform_1, window_bounds = array<i64: 1, 1, 64>}]} {
    %c0 = arith.constant 0 : index
    %c0_0 = arith.constant 0 : index
    %c0_1 = arith.constant 0 : index
    %c0_2 = arith.constant 0 : index
    %c0_3 = arith.constant 0 : index
    %0 = vector.load %arg1[%c0, %c0_0, %c0_1, %c0_2, %c0_3] : memref<1x2x2x2x64xf32, #tpu.memory_space<vmem>>, vector<1x2x2x2x64xf32>
    %1 = vector.extract_strided_slice %0 {offsets = [0, 0, 0, 0, 0], sizes = [1, 1, 2, 2, 64], strides = [1, 1, 1, 1, 1]} : vector<1x2x2x2x64xf32> to vector<1x1x2x2x64xf32>
    %2 = vector.shape_cast %1 : vector<1x1x2x2x64xf32> to vector<1x2x2x64xf32>
    %3 = vector.extract_strided_slice %0 {offsets = [0, 1, 0, 0, 0], sizes = [1, 1, 2, 2, 64], strides = [1, 1, 1, 1, 1]} : vector<1x2x2x2x64xf32> to vector<1x1x2x2x64xf32>
    %4 = vector.shape_cast %3 : vector<1x1x2x2x64xf32> to vector<1x2x2x64xf32>
    %5 = arith.maximumf %2, %4 : vector<1x2x2x64xf32>
    %cst = arith.constant dense<0xFF800000> : vector<1x2x64xf32>
    %6 = vector.multi_reduction <maximumf>, %5, %cst [2] : vector<1x2x2x64xf32> to vector<1x2x64xf32>
    %7 = vector.extract_strided_slice %6 {offsets = [0, 0, 0], sizes = [1, 1, 64], strides = [1, 1, 1]} : vector<1x2x64xf32> to vector<1x1x64xf32>
    %c0_4 = arith.constant 0 : index
    %c0_5 = arith.constant 0 : index
    %c0_6 = arith.constant 0 : index
    %8 = vector.load %arg2[%c0_4, %c0_5, %c0_6] : memref<1x1x64xf32, #tpu.memory_space<vmem>>, vector<1x1x64xf32>
    tpu.vector_store %arg2[%c0_4, %c0_5, %c0_6], %7 {strides = array<i32>} : memref<1x1x64xf32, #tpu.memory_space<vmem>>, vector<1x1x64xf32>,
    return
  }
  func.func @transform_0(%arg0: i32) -> (i32, i32, i32, i32, i32) {
    %c0_i32 = arith.constant 0 : i32
    %c0_i32_0 = arith.constant 0 : i32
    %c0_i32_1 = arith.constant 0 : i32
    %c0_i32_2 = arith.constant 0 : i32
    %c0_i32_3 = arith.constant 0 : i32
    return %arg0, %c0_i32, %c0_i32_0, %c0_i32_1, %c0_i32_2 : i32, i32, i32, i32, i32
  }
  func.func @transform_1(%arg0: i32) -> (i32, i32, i32) {
    %c0_i32 = arith.constant 0 : i32
    %c0_i32_0 = arith.constant 0 : i32
    %c0_i32_1 = arith.constant 0 : i32
    return %arg0, %c0_i32, %c0_i32_0 : i32, i32, i32
  }
}

module attributes {stable_mosaic.version = 11 : i64} {
  func.func @stage_kernel(%arg0: i32, %arg1: memref<1x20x32xf32, #tpu.memory_space<vmem>>, %arg2: memref<9x32x64xbf16, #tpu.memory_space<vmem>>, %arg3: memref<9x64x64xbf16, #tpu.memory_space<vmem>>, %arg4: memref<4x64xf32, #tpu.memory_space<vmem>>, %arg5: memref<8x1xf32, #tpu.memory_space<vmem>>, %arg6: memref<1x8x64xf32, #tpu.memory_space<vmem>>, %arg7: memref<20x64xf32, #tpu.memory_space<vmem>>) attributes {dimension_semantics = [#tpu.dimension_semantics<parallel>], iteration_bounds = array<i64: 2>, scalar_prefetch = 0 : i64, scratch_operands = 1 : i64, tpu.core_type = #tpu.core_type<tc>, window_params = [{transform_indices = @transform_0, window_bounds = array<i64: 1, 20, 32>}, {pipeline_mode = #tpu.pipeline_mode<synchronous>, transform_indices = @transform_1, window_bounds = array<i64: 9, 32, 64>}, {pipeline_mode = #tpu.pipeline_mode<synchronous>, transform_indices = @transform_2, window_bounds = array<i64: 9, 64, 64>}, {pipeline_mode = #tpu.pipeline_mode<synchronous>, transform_indices = @transform_3, window_bounds = array<i64: 4, 64>}, {pipeline_mode = #tpu.pipeline_mode<synchronous>, transform_indices = @transform_4, window_bounds = array<i64: 8, 1>}, {transform_indices = @transform_5, window_bounds = array<i64: 1, 8, 64>}]} {
    %c0 = arith.constant 0 : index
    %c0_0 = arith.constant 0 : index
    %c0_1 = arith.constant 0 : index
    %0 = vector.load %arg1[%c0, %c0_0, %c0_1] : memref<1x20x32xf32, #tpu.memory_space<vmem>>, vector<1x8x32xf32>
    %1 = vector.shape_cast %0 : vector<1x8x32xf32> to vector<8x32xf32>
    %2 = arith.truncf %1 : vector<8x32xf32> to vector<8x32xbf16>
    %c0_2 = arith.constant 0 : index
    %c0_3 = arith.constant 0 : index
    %c0_4 = arith.constant 0 : index
    %3 = vector.load %arg2[%c0_2, %c0_3, %c0_4] : memref<9x32x64xbf16, #tpu.memory_space<vmem>>, vector<1x32x64xbf16>
    %4 = vector.shape_cast %3 : vector<1x32x64xbf16> to vector<32x64xbf16>
    %cst = arith.constant dense<0.000000e+00> : vector<8x64xf32>
    %5 = tpu.matmul %2, %4, %cst {dimension_numbers = #tpu.dot_dimension_numbers<[1], [0], [0], [1], [0, 0, 1, 1], [], []>} : vector<8x32xbf16>, vector<32x64xbf16>, vector<8x64xf32> -> vector<8x64xf32>
    %c0_5 = arith.constant 0 : index
    %c1 = arith.constant 1 : index
    %c0_6 = arith.constant 0 : index
    %6 = vector.load %arg1[%c0_5, %c1, %c0_6] : memref<1x20x32xf32, #tpu.memory_space<vmem>>, vector<1x8x32xf32>
    %7 = vector.shape_cast %6 : vector<1x8x32xf32> to vector<8x32xf32>
    %8 = arith.truncf %7 : vector<8x32xf32> to vector<8x32xbf16>
    %c1_7 = arith.constant 1 : index
    %c0_8 = arith.constant 0 : index
    %c0_9 = arith.constant 0 : index
    %9 = vector.load %arg2[%c1_7, %c0_8, %c0_9] : memref<9x32x64xbf16, #tpu.memory_space<vmem>>, vector<1x32x64xbf16>
    %10 = vector.shape_cast %9 : vector<1x32x64xbf16> to vector<32x64xbf16>
    %cst_10 = arith.constant dense<0.000000e+00> : vector<8x64xf32>
    %11 = tpu.matmul %8, %10, %cst_10 {dimension_numbers = #tpu.dot_dimension_numbers<[1], [0], [0], [1], [0, 0, 1, 1], [], []>} : vector<8x32xbf16>, vector<32x64xbf16>, vector<8x64xf32> -> vector<8x64xf32>
    %12 = arith.addf %5, %11 : vector<8x64xf32>
    %c0_11 = arith.constant 0 : index
    %c2 = arith.constant 2 : index
    %c0_12 = arith.constant 0 : index
    %13 = vector.load %arg1[%c0_11, %c2, %c0_12] : memref<1x20x32xf32, #tpu.memory_space<vmem>>, vector<1x8x32xf32>
    %14 = vector.shape_cast %13 : vector<1x8x32xf32> to vector<8x32xf32>
    %15 = arith.truncf %14 : vector<8x32xf32> to vector<8x32xbf16>
    %c2_13 = arith.constant 2 : index
    %c0_14 = arith.constant 0 : index
    %c0_15 = arith.constant 0 : index
    %16 = vector.load %arg2[%c2_13, %c0_14, %c0_15] : memref<9x32x64xbf16, #tpu.memory_space<vmem>>, vector<1x32x64xbf16>
    %17 = vector.shape_cast %16 : vector<1x32x64xbf16> to vector<32x64xbf16>
    %cst_16 = arith.constant dense<0.000000e+00> : vector<8x64xf32>
    %18 = tpu.matmul %15, %17, %cst_16 {dimension_numbers = #tpu.dot_dimension_numbers<[1], [0], [0], [1], [0, 0, 1, 1], [], []>} : vector<8x32xbf16>, vector<32x64xbf16>, vector<8x64xf32> -> vector<8x64xf32>
    %19 = arith.addf %12, %18 : vector<8x64xf32>
    %c0_17 = arith.constant 0 : index
    %c4 = arith.constant 4 : index
    %c0_18 = arith.constant 0 : index
    %20 = vector.load %arg1[%c0_17, %c4, %c0_18] : memref<1x20x32xf32, #tpu.memory_space<vmem>>, vector<1x8x32xf32>
    %21 = vector.shape_cast %20 : vector<1x8x32xf32> to vector<8x32xf32>
    %22 = arith.truncf %21 : vector<8x32xf32> to vector<8x32xbf16>
    %c3 = arith.constant 3 : index
    %c0_19 = arith.constant 0 : index
    %c0_20 = arith.constant 0 : index
    %23 = vector.load %arg2[%c3, %c0_19, %c0_20] : memref<9x32x64xbf16, #tpu.memory_space<vmem>>, vector<1x32x64xbf16>
    %24 = vector.shape_cast %23 : vector<1x32x64xbf16> to vector<32x64xbf16>
    %cst_21 = arith.constant dense<0.000000e+00> : vector<8x64xf32>
    %25 = tpu.matmul %22, %24, %cst_21 {dimension_numbers = #tpu.dot_dimension_numbers<[1], [0], [0], [1], [0, 0, 1, 1], [], []>} : vector<8x32xbf16>, vector<32x64xbf16>, vector<8x64xf32> -> vector<8x64xf32>
    %26 = arith.addf %19, %25 : vector<8x64xf32>
    %c0_22 = arith.constant 0 : index
    %c5 = arith.constant 5 : index
    %c0_23 = arith.constant 0 : index
    %27 = vector.load %arg1[%c0_22, %c5, %c0_23] : memref<1x20x32xf32, #tpu.memory_space<vmem>>, vector<1x8x32xf32>
    %28 = vector.shape_cast %27 : vector<1x8x32xf32> to vector<8x32xf32>
    %29 = arith.truncf %28 : vector<8x32xf32> to vector<8x32xbf16>
    %c4_24 = arith.constant 4 : index
    %c0_25 = arith.constant 0 : index
    %c0_26 = arith.constant 0 : index
    %30 = vector.load %arg2[%c4_24, %c0_25, %c0_26] : memref<9x32x64xbf16, #tpu.memory_space<vmem>>, vector<1x32x64xbf16>
    %31 = vector.shape_cast %30 : vector<1x32x64xbf16> to vector<32x64xbf16>
    %cst_27 = arith.constant dense<0.000000e+00> : vector<8x64xf32>
    %32 = tpu.matmul %29, %31, %cst_27 {dimension_numbers = #tpu.dot_dimension_numbers<[1], [0], [0], [1], [0, 0, 1, 1], [], []>} : vector<8x32xbf16>, vector<32x64xbf16>, vector<8x64xf32> -> vector<8x64xf32>
    %33 = arith.addf %26, %32 : vector<8x64xf32>
    %c0_28 = arith.constant 0 : index
    %c6 = arith.constant 6 : index
    %c0_29 = arith.constant 0 : index
    %34 = vector.load %arg1[%c0_28, %c6, %c0_29] : memref<1x20x32xf32, #tpu.memory_space<vmem>>, vector<1x8x32xf32>
    %35 = vector.shape_cast %34 : vector<1x8x32xf32> to vector<8x32xf32>
    %36 = arith.truncf %35 : vector<8x32xf32> to vector<8x32xbf16>
    %c5_30 = arith.constant 5 : index
    %c0_31 = arith.constant 0 : index
    %c0_32 = arith.constant 0 : index
    %37 = vector.load %arg2[%c5_30, %c0_31, %c0_32] : memref<9x32x64xbf16, #tpu.memory_space<vmem>>, vector<1x32x64xbf16>
    %38 = vector.shape_cast %37 : vector<1x32x64xbf16> to vector<32x64xbf16>
    %cst_33 = arith.constant dense<0.000000e+00> : vector<8x64xf32>
    %39 = tpu.matmul %36, %38, %cst_33 {dimension_numbers = #tpu.dot_dimension_numbers<[1], [0], [0], [1], [0, 0, 1, 1], [], []>} : vector<8x32xbf16>, vector<32x64xbf16>, vector<8x64xf32> -> vector<8x64xf32>
    %40 = arith.addf %33, %39 : vector<8x64xf32>
    %c0_34 = arith.constant 0 : index
    %c8 = arith.constant 8 : index
    %c0_35 = arith.constant 0 : index
    %41 = vector.load %arg1[%c0_34, %c8, %c0_35] : memref<1x20x32xf32, #tpu.memory_space<vmem>>, vector<1x8x32xf32>
    %42 = vector.shape_cast %41 : vector<1x8x32xf32> to vector<8x32xf32>
    %43 = arith.truncf %42 : vector<8x32xf32> to vector<8x32xbf16>
    %c6_36 = arith.constant 6 : index
    %c0_37 = arith.constant 0 : index
    %c0_38 = arith.constant 0 : index
    %44 = vector.load %arg2[%c6_36, %c0_37, %c0_38] : memref<9x32x64xbf16, #tpu.memory_space<vmem>>, vector<1x32x64xbf16>
    %45 = vector.shape_cast %44 : vector<1x32x64xbf16> to vector<32x64xbf16>
    %cst_39 = arith.constant dense<0.000000e+00> : vector<8x64xf32>
    %46 = tpu.matmul %43, %45, %cst_39 {dimension_numbers = #tpu.dot_dimension_numbers<[1], [0], [0], [1], [0, 0, 1, 1], [], []>} : vector<8x32xbf16>, vector<32x64xbf16>, vector<8x64xf32> -> vector<8x64xf32>
    %47 = arith.addf %40, %46 : vector<8x64xf32>
    %c0_40 = arith.constant 0 : index
    %c9 = arith.constant 9 : index
    %c0_41 = arith.constant 0 : index
    %48 = vector.load %arg1[%c0_40, %c9, %c0_41] : memref<1x20x32xf32, #tpu.memory_space<vmem>>, vector<1x8x32xf32>
    %49 = vector.shape_cast %48 : vector<1x8x32xf32> to vector<8x32xf32>
    %50 = arith.truncf %49 : vector<8x32xf32> to vector<8x32xbf16>
    %c7 = arith.constant 7 : index
    %c0_42 = arith.constant 0 : index
    %c0_43 = arith.constant 0 : index
    %51 = vector.load %arg2[%c7, %c0_42, %c0_43] : memref<9x32x64xbf16, #tpu.memory_space<vmem>>, vector<1x32x64xbf16>
    %52 = vector.shape_cast %51 : vector<1x32x64xbf16> to vector<32x64xbf16>
    %cst_44 = arith.constant dense<0.000000e+00> : vector<8x64xf32>
    %53 = tpu.matmul %50, %52, %cst_44 {dimension_numbers = #tpu.dot_dimension_numbers<[1], [0], [0], [1], [0, 0, 1, 1], [], []>} : vector<8x32xbf16>, vector<32x64xbf16>, vector<8x64xf32> -> vector<8x64xf32>
    %54 = arith.addf %47, %53 : vector<8x64xf32>
    %c0_45 = arith.constant 0 : index
    %c10 = arith.constant 10 : index
    %c0_46 = arith.constant 0 : index
    %55 = vector.load %arg1[%c0_45, %c10, %c0_46] : memref<1x20x32xf32, #tpu.memory_space<vmem>>, vector<1x8x32xf32>
    %56 = vector.shape_cast %55 : vector<1x8x32xf32> to vector<8x32xf32>
    %57 = arith.truncf %56 : vector<8x32xf32> to vector<8x32xbf16>
    %c8_47 = arith.constant 8 : index
    %c0_48 = arith.constant 0 : index
    %c0_49 = arith.constant 0 : index
    %58 = vector.load %arg2[%c8_47, %c0_48, %c0_49] : memref<9x32x64xbf16, #tpu.memory_space<vmem>>, vector<1x32x64xbf16>
    %59 = vector.shape_cast %58 : vector<1x32x64xbf16> to vector<32x64xbf16>
    %cst_50 = arith.constant dense<0.000000e+00> : vector<8x64xf32>
    %60 = tpu.matmul %57, %59, %cst_50 {dimension_numbers = #tpu.dot_dimension_numbers<[1], [0], [0], [1], [0, 0, 1, 1], [], []>} : vector<8x32xbf16>, vector<32x64xbf16>, vector<8x64xf32> -> vector<8x64xf32>
    %61 = arith.addf %54, %60 : vector<8x64xf32>
    %c0_51 = arith.constant 0 : index
    %c0_52 = arith.constant 0 : index
    %62 = vector.load %arg4[%c0_51, %c0_52] : memref<4x64xf32, #tpu.memory_space<vmem>>, vector<1x64xf32>
    %63 = vector.shape_cast %62 : vector<1x64xf32> to vector<64xf32>
    %c1_53 = arith.constant 1 : index
    %c0_54 = arith.constant 0 : index
    %64 = vector.load %arg4[%c1_53, %c0_54] : memref<4x64xf32, #tpu.memory_space<vmem>>, vector<1x64xf32>
    %65 = vector.shape_cast %64 : vector<1x64xf32> to vector<64xf32>
    %66 = vector.shape_cast %63 : vector<64xf32> to vector<1x64xf32>
    %67 = vector.broadcast %66 : vector<1x64xf32> to vector<8x64xf32>
    %68 = arith.mulf %61, %67 : vector<8x64xf32>
    %69 = vector.shape_cast %65 : vector<64xf32> to vector<1x64xf32>
    %70 = vector.broadcast %69 : vector<1x64xf32> to vector<8x64xf32>
    %71 = arith.addf %68, %70 : vector<8x64xf32>
    %cst_55 = arith.constant 0.000000e+00 : f32
    %72 = vector.broadcast %cst_55 : f32 to vector<8x64xf32>
    %73 = arith.cmpf oge, %71, %72 : vector<8x64xf32>
    %cst_56 = arith.constant 0.00999999977 : f32
    %74 = vector.broadcast %cst_56 : f32 to vector<8x64xf32>
    %75 = arith.mulf %74, %71 : vector<8x64xf32>
    %76 = arith.select %73, %71, %75 : vector<8x64xi1>, vector<8x64xf32>
    %cst_57 = arith.constant 0.000000e+00 : f32
    %77 = vector.broadcast %cst_57 : f32 to vector<20x64xf32>
    %c0_58 = arith.constant 0 : index
    %c0_59 = arith.constant 0 : index
    %78 = vector.load %arg7[%c0_58, %c0_59] : memref<20x64xf32, #tpu.memory_space<vmem>>, vector<20x64xf32>
    tpu.vector_store %arg7[%c0_58, %c0_59], %77 {strides = array<i32>} : memref<20x64xf32, #tpu.memory_space<vmem>>, vector<20x64xf32>,
    %c0_60 = arith.constant 0 : index
    %c0_61 = arith.constant 0 : index
    %79 = vector.load %arg5[%c0_60, %c0_61] : memref<8x1xf32, #tpu.memory_space<vmem>>, vector<8x1xf32>
    %80 = vector.broadcast %79 : vector<8x1xf32> to vector<8x64xf32>
    %81 = arith.mulf %76, %80 : vector<8x64xf32>
    %c5_62 = arith.constant 5 : index
    %c0_63 = arith.constant 0 : index
    %82 = vector.load %arg7[%c5_62, %c0_63] : memref<20x64xf32, #tpu.memory_space<vmem>>, vector<8x64xf32>
    tpu.vector_store %arg7[%c5_62, %c0_63], %81 {strides = array<i32>} : memref<20x64xf32, #tpu.memory_space<vmem>>, vector<8x64xf32>,
    %c0_64 = arith.constant 0 : index
    %c0_65 = arith.constant 0 : index
    %83 = vector.load %arg7[%c0_64, %c0_65] : memref<20x64xf32, #tpu.memory_space<vmem>>, vector<8x64xf32>
    %84 = arith.truncf %83 : vector<8x64xf32> to vector<8x64xbf16>
    %c0_66 = arith.constant 0 : index
    %c0_67 = arith.constant 0 : index
    %c0_68 = arith.constant 0 : index
    %85 = vector.load %arg3[%c0_66, %c0_67, %c0_68] : memref<9x64x64xbf16, #tpu.memory_space<vmem>>, vector<1x64x64xbf16>
    %86 = vector.shape_cast %85 : vector<1x64x64xbf16> to vector<64x64xbf16>
    %cst_69 = arith.constant dense<0.000000e+00> : vector<8x64xf32>
    %87 = tpu.matmul %84, %86, %cst_69 {dimension_numbers = #tpu.dot_dimension_numbers<[1], [0], [0], [1], [0, 0, 1, 1], [], []>} : vector<8x64xbf16>, vector<64x64xbf16>, vector<8x64xf32> -> vector<8x64xf32>
    %c1_70 = arith.constant 1 : index
    %c0_71 = arith.constant 0 : index
    %88 = vector.load %arg7[%c1_70, %c0_71] : memref<20x64xf32, #tpu.memory_space<vmem>>, vector<8x64xf32>
    %89 = arith.truncf %88 : vector<8x64xf32> to vector<8x64xbf16>
    %c1_72 = arith.constant 1 : index
    %c0_73 = arith.constant 0 : index
    %c0_74 = arith.constant 0 : index
    %90 = vector.load %arg3[%c1_72, %c0_73, %c0_74] : memref<9x64x64xbf16, #tpu.memory_space<vmem>>, vector<1x64x64xbf16>
    %91 = vector.shape_cast %90 : vector<1x64x64xbf16> to vector<64x64xbf16>
    %cst_75 = arith.constant dense<0.000000e+00> : vector<8x64xf32>
    %92 = tpu.matmul %89, %91, %cst_75 {dimension_numbers = #tpu.dot_dimension_numbers<[1], [0], [0], [1], [0, 0, 1, 1], [], []>} : vector<8x64xbf16>, vector<64x64xbf16>, vector<8x64xf32> -> vector<8x64xf32>
    %93 = arith.addf %87, %92 : vector<8x64xf32>
    %c2_76 = arith.constant 2 : index
    %c0_77 = arith.constant 0 : index
    %94 = vector.load %arg7[%c2_76, %c0_77] : memref<20x64xf32, #tpu.memory_space<vmem>>, vector<8x64xf32>
    %95 = arith.truncf %94 : vector<8x64xf32> to vector<8x64xbf16>
    %c2_78 = arith.constant 2 : index
    %c0_79 = arith.constant 0 : index
    %c0_80 = arith.constant 0 : index
    %96 = vector.load %arg3[%c2_78, %c0_79, %c0_80] : memref<9x64x64xbf16, #tpu.memory_space<vmem>>, vector<1x64x64xbf16>
    %97 = vector.shape_cast %96 : vector<1x64x64xbf16> to vector<64x64xbf16>
    %cst_81 = arith.constant dense<0.000000e+00> : vector<8x64xf32>
    %98 = tpu.matmul %95, %97, %cst_81 {dimension_numbers = #tpu.dot_dimension_numbers<[1], [0], [0], [1], [0, 0, 1, 1], [], []>} : vector<8x64xbf16>, vector<64x64xbf16>, vector<8x64xf32> -> vector<8x64xf32>
    %99 = arith.addf %93, %98 : vector<8x64xf32>
    %c4_82 = arith.constant 4 : index
    %c0_83 = arith.constant 0 : index
    %100 = vector.load %arg7[%c4_82, %c0_83] : memref<20x64xf32, #tpu.memory_space<vmem>>, vector<8x64xf32>
    %101 = arith.truncf %100 : vector<8x64xf32> to vector<8x64xbf16>
    %c3_84 = arith.constant 3 : index
    %c0_85 = arith.constant 0 : index
    %c0_86 = arith.constant 0 : index
    %102 = vector.load %arg3[%c3_84, %c0_85, %c0_86] : memref<9x64x64xbf16, #tpu.memory_space<vmem>>, vector<1x64x64xbf16>
    %103 = vector.shape_cast %102 : vector<1x64x64xbf16> to vector<64x64xbf16>
    %cst_87 = arith.constant dense<0.000000e+00> : vector<8x64xf32>
    %104 = tpu.matmul %101, %103, %cst_87 {dimension_numbers = #tpu.dot_dimension_numbers<[1], [0], [0], [1], [0, 0, 1, 1], [], []>} : vector<8x64xbf16>, vector<64x64xbf16>, vector<8x64xf32> -> vector<8x64xf32>
    %105 = arith.addf %99, %104 : vector<8x64xf32>
    %c5_88 = arith.constant 5 : index
    %c0_89 = arith.constant 0 : index
    %106 = vector.load %arg7[%c5_88, %c0_89] : memref<20x64xf32, #tpu.memory_space<vmem>>, vector<8x64xf32>
    %107 = arith.truncf %106 : vector<8x64xf32> to vector<8x64xbf16>
    %c4_90 = arith.constant 4 : index
    %c0_91 = arith.constant 0 : index
    %c0_92 = arith.constant 0 : index
    %108 = vector.load %arg3[%c4_90, %c0_91, %c0_92] : memref<9x64x64xbf16, #tpu.memory_space<vmem>>, vector<1x64x64xbf16>
    %109 = vector.shape_cast %108 : vector<1x64x64xbf16> to vector<64x64xbf16>
    %cst_93 = arith.constant dense<0.000000e+00> : vector<8x64xf32>
    %110 = tpu.matmul %107, %109, %cst_93 {dimension_numbers = #tpu.dot_dimension_numbers<[1], [0], [0], [1], [0, 0, 1, 1], [], []>} : vector<8x64xbf16>, vector<64x64xbf16>, vector<8x64xf32> -> vector<8x64xf32>
    %111 = arith.addf %105, %110 : vector<8x64xf32>
    %c6_94 = arith.constant 6 : index
    %c0_95 = arith.constant 0 : index
    %112 = vector.load %arg7[%c6_94, %c0_95] : memref<20x64xf32, #tpu.memory_space<vmem>>, vector<8x64xf32>
    %113 = arith.truncf %112 : vector<8x64xf32> to vector<8x64xbf16>
    %c5_96 = arith.constant 5 : index
    %c0_97 = arith.constant 0 : index
    %c0_98 = arith.constant 0 : index
    %114 = vector.load %arg3[%c5_96, %c0_97, %c0_98] : memref<9x64x64xbf16, #tpu.memory_space<vmem>>, vector<1x64x64xbf16>
    %115 = vector.shape_cast %114 : vector<1x64x64xbf16> to vector<64x64xbf16>
    %cst_99 = arith.constant dense<0.000000e+00> : vector<8x64xf32>
    %116 = tpu.matmul %113, %115, %cst_99 {dimension_numbers = #tpu.dot_dimension_numbers<[1], [0], [0], [1], [0, 0, 1, 1], [], []>} : vector<8x64xbf16>, vector<64x64xbf16>, vector<8x64xf32> -> vector<8x64xf32>
    %117 = arith.addf %111, %116 : vector<8x64xf32>
    %c8_100 = arith.constant 8 : index
    %c0_101 = arith.constant 0 : index
    %118 = vector.load %arg7[%c8_100, %c0_101] : memref<20x64xf32, #tpu.memory_space<vmem>>, vector<8x64xf32>
    %119 = arith.truncf %118 : vector<8x64xf32> to vector<8x64xbf16>
    %c6_102 = arith.constant 6 : index
    %c0_103 = arith.constant 0 : index
    %c0_104 = arith.constant 0 : index
    %120 = vector.load %arg3[%c6_102, %c0_103, %c0_104] : memref<9x64x64xbf16, #tpu.memory_space<vmem>>, vector<1x64x64xbf16>
    %121 = vector.shape_cast %120 : vector<1x64x64xbf16> to vector<64x64xbf16>
    %cst_105 = arith.constant dense<0.000000e+00> : vector<8x64xf32>
    %122 = tpu.matmul %119, %121, %cst_105 {dimension_numbers = #tpu.dot_dimension_numbers<[1], [0], [0], [1], [0, 0, 1, 1], [], []>} : vector<8x64xbf16>, vector<64x64xbf16>, vector<8x64xf32> -> vector<8x64xf32>
    %123 = arith.addf %117, %122 : vector<8x64xf32>
    %c9_106 = arith.constant 9 : index
    %c0_107 = arith.constant 0 : index
    %124 = vector.load %arg7[%c9_106, %c0_107] : memref<20x64xf32, #tpu.memory_space<vmem>>, vector<8x64xf32>
    %125 = arith.truncf %124 : vector<8x64xf32> to vector<8x64xbf16>
    %c7_108 = arith.constant 7 : index
    %c0_109 = arith.constant 0 : index
    %c0_110 = arith.constant 0 : index
    %126 = vector.load %arg3[%c7_108, %c0_109, %c0_110] : memref<9x64x64xbf16, #tpu.memory_space<vmem>>, vector<1x64x64xbf16>
    %127 = vector.shape_cast %126 : vector<1x64x64xbf16> to vector<64x64xbf16>
    %cst_111 = arith.constant dense<0.000000e+00> : vector<8x64xf32>
    %128 = tpu.matmul %125, %127, %cst_111 {dimension_numbers = #tpu.dot_dimension_numbers<[1], [0], [0], [1], [0, 0, 1, 1], [], []>} : vector<8x64xbf16>, vector<64x64xbf16>, vector<8x64xf32> -> vector<8x64xf32>
    %129 = arith.addf %123, %128 : vector<8x64xf32>
    %c10_112 = arith.constant 10 : index
    %c0_113 = arith.constant 0 : index
    %130 = vector.load %arg7[%c10_112, %c0_113] : memref<20x64xf32, #tpu.memory_space<vmem>>, vector<8x64xf32>
    %131 = arith.truncf %130 : vector<8x64xf32> to vector<8x64xbf16>
    %c8_114 = arith.constant 8 : index
    %c0_115 = arith.constant 0 : index
    %c0_116 = arith.constant 0 : index
    %132 = vector.load %arg3[%c8_114, %c0_115, %c0_116] : memref<9x64x64xbf16, #tpu.memory_space<vmem>>, vector<1x64x64xbf16>
    %133 = vector.shape_cast %132 : vector<1x64x64xbf16> to vector<64x64xbf16>
    %cst_117 = arith.constant dense<0.000000e+00> : vector<8x64xf32>
    %134 = tpu.matmul %131, %133, %cst_117 {dimension_numbers = #tpu.dot_dimension_numbers<[1], [0], [0], [1], [0, 0, 1, 1], [], []>} : vector<8x64xbf16>, vector<64x64xbf16>, vector<8x64xf32> -> vector<8x64xf32>
    %135 = arith.addf %129, %134 : vector<8x64xf32>
    %c2_118 = arith.constant 2 : index
    %c0_119 = arith.constant 0 : index
    %136 = vector.load %arg4[%c2_118, %c0_119] : memref<4x64xf32, #tpu.memory_space<vmem>>, vector<1x64xf32>
    %137 = vector.shape_cast %136 : vector<1x64xf32> to vector<64xf32>
    %c3_120 = arith.constant 3 : index
    %c0_121 = arith.constant 0 : index
    %138 = vector.load %arg4[%c3_120, %c0_121] : memref<4x64xf32, #tpu.memory_space<vmem>>, vector<1x64xf32>
    %139 = vector.shape_cast %138 : vector<1x64xf32> to vector<64xf32>
    %140 = vector.shape_cast %137 : vector<64xf32> to vector<1x64xf32>
    %141 = vector.broadcast %140 : vector<1x64xf32> to vector<8x64xf32>
    %142 = arith.mulf %135, %141 : vector<8x64xf32>
    %143 = vector.shape_cast %139 : vector<64xf32> to vector<1x64xf32>
    %144 = vector.broadcast %143 : vector<1x64xf32> to vector<8x64xf32>
    %145 = arith.addf %142, %144 : vector<8x64xf32>
    %cst_122 = arith.constant 0.000000e+00 : f32
    %146 = vector.broadcast %cst_122 : f32 to vector<8x64xf32>
    %147 = arith.cmpf oge, %145, %146 : vector<8x64xf32>
    %cst_123 = arith.constant 0.00999999977 : f32
    %148 = vector.broadcast %cst_123 : f32 to vector<8x64xf32>
    %149 = arith.mulf %148, %145 : vector<8x64xf32>
    %150 = arith.select %147, %145, %149 : vector<8x64xi1>, vector<8x64xf32>
    %c0_124 = arith.constant 0 : index
    %c0_125 = arith.constant 0 : index
    %c0_126 = arith.constant 0 : index
    %151 = vector.load %arg6[%c0_124, %c0_125, %c0_126] : memref<1x8x64xf32, #tpu.memory_space<vmem>>, vector<1x8x64xf32>
    %152 = vector.shape_cast %151 : vector<1x8x64xf32> to vector<8x64xf32>
    %153 = vector.shape_cast %150 : vector<8x64xf32> to vector<1x8x64xf32>
    tpu.vector_store %arg6[%c0_124, %c0_125, %c0_126], %153 {strides = array<i32>} : memref<1x8x64xf32, #tpu.memory_space<vmem>>, vector<1x8x64xf32>,
    return
  }
  func.func @transform_0(%arg0: i32) -> (i32, i32, i32) {
    %c0_i32 = arith.constant 0 : i32
    %c0_i32_0 = arith.constant 0 : i32
    %c0_i32_1 = arith.constant 0 : i32
    return %arg0, %c0_i32, %c0_i32_0 : i32, i32, i32
  }
  func.func @transform_1(%arg0: i32) -> (i32, i32, i32) {
    %c0_i32 = arith.constant 0 : i32
    %c0_i32_0 = arith.constant 0 : i32
    %c0_i32_1 = arith.constant 0 : i32
    %c0_i32_2 = arith.constant 0 : i32
    return %c0_i32, %c0_i32_0, %c0_i32_1 : i32, i32, i32
  }
  func.func @transform_2(%arg0: i32) -> (i32, i32, i32) {
    %c0_i32 = arith.constant 0 : i32
    %c0_i32_0 = arith.constant 0 : i32
    %c0_i32_1 = arith.constant 0 : i32
    %c0_i32_2 = arith.constant 0 : i32
    return %c0_i32, %c0_i32_0, %c0_i32_1 : i32, i32, i32
  }
  func.func @transform_3(%arg0: i32) -> (i32, i32) {
    %c0_i32 = arith.constant 0 : i32
    %c0_i32_0 = arith.constant 0 : i32
    %c0_i32_1 = arith.constant 0 : i32
    return %c0_i32, %c0_i32_0 : i32, i32
  }
  func.func @transform_4(%arg0: i32) -> (i32, i32) {
    %c0_i32 = arith.constant 0 : i32
    %c0_i32_0 = arith.constant 0 : i32
    %c0_i32_1 = arith.constant 0 : i32
    return %c0_i32, %c0_i32_0 : i32, i32
  }
  func.func @transform_5(%arg0: i32) -> (i32, i32, i32) {
    %c0_i32 = arith.constant 0 : i32
    %c0_i32_0 = arith.constant 0 : i32
    %c0_i32_1 = arith.constant 0 : i32
    return %arg0, %c0_i32, %c0_i32_0 : i32, i32, i32
  }
}

module attributes {stable_mosaic.version = 11 : i64} {
  func.func @stage_kernel(%arg0: i32, %arg1: memref<1x12x64xf32, #tpu.memory_space<vmem>>, %arg2: memref<9x64x128xbf16, #tpu.memory_space<vmem>>, %arg3: memref<9x128x128xbf16, #tpu.memory_space<vmem>>, %arg4: memref<4x128xf32, #tpu.memory_space<vmem>>, %arg5: memref<3x1xf32, #tpu.memory_space<vmem>>, %arg6: memref<1x3x128xf32, #tpu.memory_space<vmem>>, %arg7: memref<12x128xf32, #tpu.memory_space<vmem>>) attributes {dimension_semantics = [#tpu.dimension_semantics<parallel>], iteration_bounds = array<i64: 2>, scalar_prefetch = 0 : i64, scratch_operands = 1 : i64, tpu.core_type = #tpu.core_type<tc>, window_params = [{transform_indices = @transform_0, window_bounds = array<i64: 1, 12, 64>}, {pipeline_mode = #tpu.pipeline_mode<synchronous>, transform_indices = @transform_1, window_bounds = array<i64: 9, 64, 128>}, {pipeline_mode = #tpu.pipeline_mode<synchronous>, transform_indices = @transform_2, window_bounds = array<i64: 9, 128, 128>}, {pipeline_mode = #tpu.pipeline_mode<synchronous>, transform_indices = @transform_3, window_bounds = array<i64: 4, 128>}, {pipeline_mode = #tpu.pipeline_mode<synchronous>, transform_indices = @transform_4, window_bounds = array<i64: 3, 1>}, {transform_indices = @transform_5, window_bounds = array<i64: 1, 3, 128>}]} {
    %c0 = arith.constant 0 : index
    %c0_0 = arith.constant 0 : index
    %c0_1 = arith.constant 0 : index
    %0 = vector.load %arg1[%c0, %c0_0, %c0_1] : memref<1x12x64xf32, #tpu.memory_space<vmem>>, vector<1x3x64xf32>
    %1 = vector.shape_cast %0 : vector<1x3x64xf32> to vector<3x64xf32>
    %2 = arith.truncf %1 : vector<3x64xf32> to vector<3x64xbf16>
    %c0_2 = arith.constant 0 : index
    %c0_3 = arith.constant 0 : index
    %c0_4 = arith.constant 0 : index
    %3 = vector.load %arg2[%c0_2, %c0_3, %c0_4] : memref<9x64x128xbf16, #tpu.memory_space<vmem>>, vector<1x64x128xbf16>
    %4 = vector.shape_cast %3 : vector<1x64x128xbf16> to vector<64x128xbf16>
    %cst = arith.constant dense<0.000000e+00> : vector<3x128xf32>
    %5 = tpu.matmul %2, %4, %cst {dimension_numbers = #tpu.dot_dimension_numbers<[1], [0], [0], [1], [0, 0, 1, 1], [], []>} : vector<3x64xbf16>, vector<64x128xbf16>, vector<3x128xf32> -> vector<3x128xf32>
    %c0_5 = arith.constant 0 : index
    %c1 = arith.constant 1 : index
    %c0_6 = arith.constant 0 : index
    %6 = vector.load %arg1[%c0_5, %c1, %c0_6] : memref<1x12x64xf32, #tpu.memory_space<vmem>>, vector<1x3x64xf32>
    %7 = vector.shape_cast %6 : vector<1x3x64xf32> to vector<3x64xf32>
    %8 = arith.truncf %7 : vector<3x64xf32> to vector<3x64xbf16>
    %c1_7 = arith.constant 1 : index
    %c0_8 = arith.constant 0 : index
    %c0_9 = arith.constant 0 : index
    %9 = vector.load %arg2[%c1_7, %c0_8, %c0_9] : memref<9x64x128xbf16, #tpu.memory_space<vmem>>, vector<1x64x128xbf16>
    %10 = vector.shape_cast %9 : vector<1x64x128xbf16> to vector<64x128xbf16>
    %cst_10 = arith.constant dense<0.000000e+00> : vector<3x128xf32>
    %11 = tpu.matmul %8, %10, %cst_10 {dimension_numbers = #tpu.dot_dimension_numbers<[1], [0], [0], [1], [0, 0, 1, 1], [], []>} : vector<3x64xbf16>, vector<64x128xbf16>, vector<3x128xf32> -> vector<3x128xf32>
    %12 = arith.addf %5, %11 : vector<3x128xf32>
    %c0_11 = arith.constant 0 : index
    %c2 = arith.constant 2 : index
    %c0_12 = arith.constant 0 : index
    %13 = vector.load %arg1[%c0_11, %c2, %c0_12] : memref<1x12x64xf32, #tpu.memory_space<vmem>>, vector<1x3x64xf32>
    %14 = vector.shape_cast %13 : vector<1x3x64xf32> to vector<3x64xf32>
    %15 = arith.truncf %14 : vector<3x64xf32> to vector<3x64xbf16>
    %c2_13 = arith.constant 2 : index
    %c0_14 = arith.constant 0 : index
    %c0_15 = arith.constant 0 : index
    %16 = vector.load %arg2[%c2_13, %c0_14, %c0_15] : memref<9x64x128xbf16, #tpu.memory_space<vmem>>, vector<1x64x128xbf16>
    %17 = vector.shape_cast %16 : vector<1x64x128xbf16> to vector<64x128xbf16>
    %cst_16 = arith.constant dense<0.000000e+00> : vector<3x128xf32>
    %18 = tpu.matmul %15, %17, %cst_16 {dimension_numbers = #tpu.dot_dimension_numbers<[1], [0], [0], [1], [0, 0, 1, 1], [], []>} : vector<3x64xbf16>, vector<64x128xbf16>, vector<3x128xf32> -> vector<3x128xf32>
    %19 = arith.addf %12, %18 : vector<3x128xf32>
    %c0_17 = arith.constant 0 : index
    %c3 = arith.constant 3 : index
    %c0_18 = arith.constant 0 : index
    %20 = vector.load %arg1[%c0_17, %c3, %c0_18] : memref<1x12x64xf32, #tpu.memory_space<vmem>>, vector<1x3x64xf32>
    %21 = vector.shape_cast %20 : vector<1x3x64xf32> to vector<3x64xf32>
    %22 = arith.truncf %21 : vector<3x64xf32> to vector<3x64xbf16>
    %c3_19 = arith.constant 3 : index
    %c0_20 = arith.constant 0 : index
    %c0_21 = arith.constant 0 : index
    %23 = vector.load %arg2[%c3_19, %c0_20, %c0_21] : memref<9x64x128xbf16, #tpu.memory_space<vmem>>, vector<1x64x128xbf16>
    %24 = vector.shape_cast %23 : vector<1x64x128xbf16> to vector<64x128xbf16>
    %cst_22 = arith.constant dense<0.000000e+00> : vector<3x128xf32>
    %25 = tpu.matmul %22, %24, %cst_22 {dimension_numbers = #tpu.dot_dimension_numbers<[1], [0], [0], [1], [0, 0, 1, 1], [], []>} : vector<3x64xbf16>, vector<64x128xbf16>, vector<3x128xf32> -> vector<3x128xf32>
    %26 = arith.addf %19, %25 : vector<3x128xf32>
    %c0_23 = arith.constant 0 : index
    %c4 = arith.constant 4 : index
    %c0_24 = arith.constant 0 : index
    %27 = vector.load %arg1[%c0_23, %c4, %c0_24] : memref<1x12x64xf32, #tpu.memory_space<vmem>>, vector<1x3x64xf32>
    %28 = vector.shape_cast %27 : vector<1x3x64xf32> to vector<3x64xf32>
    %29 = arith.truncf %28 : vector<3x64xf32> to vector<3x64xbf16>
    %c4_25 = arith.constant 4 : index
    %c0_26 = arith.constant 0 : index
    %c0_27 = arith.constant 0 : index
    %30 = vector.load %arg2[%c4_25, %c0_26, %c0_27] : memref<9x64x128xbf16, #tpu.memory_space<vmem>>, vector<1x64x128xbf16>
    %31 = vector.shape_cast %30 : vector<1x64x128xbf16> to vector<64x128xbf16>
    %cst_28 = arith.constant dense<0.000000e+00> : vector<3x128xf32>
    %32 = tpu.matmul %29, %31, %cst_28 {dimension_numbers = #tpu.dot_dimension_numbers<[1], [0], [0], [1], [0, 0, 1, 1], [], []>} : vector<3x64xbf16>, vector<64x128xbf16>, vector<3x128xf32> -> vector<3x128xf32>
    %33 = arith.addf %26, %32 : vector<3x128xf32>
    %c0_29 = arith.constant 0 : index
    %c5 = arith.constant 5 : index
    %c0_30 = arith.constant 0 : index
    %34 = vector.load %arg1[%c0_29, %c5, %c0_30] : memref<1x12x64xf32, #tpu.memory_space<vmem>>, vector<1x3x64xf32>
    %35 = vector.shape_cast %34 : vector<1x3x64xf32> to vector<3x64xf32>
    %36 = arith.truncf %35 : vector<3x64xf32> to vector<3x64xbf16>
    %c5_31 = arith.constant 5 : index
    %c0_32 = arith.constant 0 : index
    %c0_33 = arith.constant 0 : index
    %37 = vector.load %arg2[%c5_31, %c0_32, %c0_33] : memref<9x64x128xbf16, #tpu.memory_space<vmem>>, vector<1x64x128xbf16>
    %38 = vector.shape_cast %37 : vector<1x64x128xbf16> to vector<64x128xbf16>
    %cst_34 = arith.constant dense<0.000000e+00> : vector<3x128xf32>
    %39 = tpu.matmul %36, %38, %cst_34 {dimension_numbers = #tpu.dot_dimension_numbers<[1], [0], [0], [1], [0, 0, 1, 1], [], []>} : vector<3x64xbf16>, vector<64x128xbf16>, vector<3x128xf32> -> vector<3x128xf32>
    %40 = arith.addf %33, %39 : vector<3x128xf32>
    %c0_35 = arith.constant 0 : index
    %c6 = arith.constant 6 : index
    %c0_36 = arith.constant 0 : index
    %41 = vector.load %arg1[%c0_35, %c6, %c0_36] : memref<1x12x64xf32, #tpu.memory_space<vmem>>, vector<1x3x64xf32>
    %42 = vector.shape_cast %41 : vector<1x3x64xf32> to vector<3x64xf32>
    %43 = arith.truncf %42 : vector<3x64xf32> to vector<3x64xbf16>
    %c6_37 = arith.constant 6 : index
    %c0_38 = arith.constant 0 : index
    %c0_39 = arith.constant 0 : index
    %44 = vector.load %arg2[%c6_37, %c0_38, %c0_39] : memref<9x64x128xbf16, #tpu.memory_space<vmem>>, vector<1x64x128xbf16>
    %45 = vector.shape_cast %44 : vector<1x64x128xbf16> to vector<64x128xbf16>
    %cst_40 = arith.constant dense<0.000000e+00> : vector<3x128xf32>
    %46 = tpu.matmul %43, %45, %cst_40 {dimension_numbers = #tpu.dot_dimension_numbers<[1], [0], [0], [1], [0, 0, 1, 1], [], []>} : vector<3x64xbf16>, vector<64x128xbf16>, vector<3x128xf32> -> vector<3x128xf32>
    %47 = arith.addf %40, %46 : vector<3x128xf32>
    %c0_41 = arith.constant 0 : index
    %c7 = arith.constant 7 : index
    %c0_42 = arith.constant 0 : index
    %48 = vector.load %arg1[%c0_41, %c7, %c0_42] : memref<1x12x64xf32, #tpu.memory_space<vmem>>, vector<1x3x64xf32>
    %49 = vector.shape_cast %48 : vector<1x3x64xf32> to vector<3x64xf32>
    %50 = arith.truncf %49 : vector<3x64xf32> to vector<3x64xbf16>
    %c7_43 = arith.constant 7 : index
    %c0_44 = arith.constant 0 : index
    %c0_45 = arith.constant 0 : index
    %51 = vector.load %arg2[%c7_43, %c0_44, %c0_45] : memref<9x64x128xbf16, #tpu.memory_space<vmem>>, vector<1x64x128xbf16>
    %52 = vector.shape_cast %51 : vector<1x64x128xbf16> to vector<64x128xbf16>
    %cst_46 = arith.constant dense<0.000000e+00> : vector<3x128xf32>
    %53 = tpu.matmul %50, %52, %cst_46 {dimension_numbers = #tpu.dot_dimension_numbers<[1], [0], [0], [1], [0, 0, 1, 1], [], []>} : vector<3x64xbf16>, vector<64x128xbf16>, vector<3x128xf32> -> vector<3x128xf32>
    %54 = arith.addf %47, %53 : vector<3x128xf32>
    %c0_47 = arith.constant 0 : index
    %c8 = arith.constant 8 : index
    %c0_48 = arith.constant 0 : index
    %55 = vector.load %arg1[%c0_47, %c8, %c0_48] : memref<1x12x64xf32, #tpu.memory_space<vmem>>, vector<1x3x64xf32>
    %56 = vector.shape_cast %55 : vector<1x3x64xf32> to vector<3x64xf32>
    %57 = arith.truncf %56 : vector<3x64xf32> to vector<3x64xbf16>
    %c8_49 = arith.constant 8 : index
    %c0_50 = arith.constant 0 : index
    %c0_51 = arith.constant 0 : index
    %58 = vector.load %arg2[%c8_49, %c0_50, %c0_51] : memref<9x64x128xbf16, #tpu.memory_space<vmem>>, vector<1x64x128xbf16>
    %59 = vector.shape_cast %58 : vector<1x64x128xbf16> to vector<64x128xbf16>
    %cst_52 = arith.constant dense<0.000000e+00> : vector<3x128xf32>
    %60 = tpu.matmul %57, %59, %cst_52 {dimension_numbers = #tpu.dot_dimension_numbers<[1], [0], [0], [1], [0, 0, 1, 1], [], []>} : vector<3x64xbf16>, vector<64x128xbf16>, vector<3x128xf32> -> vector<3x128xf32>
    %61 = arith.addf %54, %60 : vector<3x128xf32>
    %c0_53 = arith.constant 0 : index
    %c0_54 = arith.constant 0 : index
    %62 = vector.load %arg4[%c0_53, %c0_54] : memref<4x128xf32, #tpu.memory_space<vmem>>, vector<1x128xf32>
    %63 = vector.shape_cast %62 : vector<1x128xf32> to vector<128xf32>
    %c1_55 = arith.constant 1 : index
    %c0_56 = arith.constant 0 : index
    %64 = vector.load %arg4[%c1_55, %c0_56] : memref<4x128xf32, #tpu.memory_space<vmem>>, vector<1x128xf32>
    %65 = vector.shape_cast %64 : vector<1x128xf32> to vector<128xf32>
    %66 = vector.shape_cast %63 : vector<128xf32> to vector<1x128xf32>
    %67 = vector.broadcast %66 : vector<1x128xf32> to vector<3x128xf32>
    %68 = arith.mulf %61, %67 : vector<3x128xf32>
    %69 = vector.shape_cast %65 : vector<128xf32> to vector<1x128xf32>
    %70 = vector.broadcast %69 : vector<1x128xf32> to vector<3x128xf32>
    %71 = arith.addf %68, %70 : vector<3x128xf32>
    %cst_57 = arith.constant 0.000000e+00 : f32
    %72 = vector.broadcast %cst_57 : f32 to vector<3x128xf32>
    %73 = arith.cmpf oge, %71, %72 : vector<3x128xf32>
    %cst_58 = arith.constant 0.000000e+00 : f32
    %74 = vector.broadcast %cst_58 : f32 to vector<3x128xf32>
    %75 = arith.mulf %74, %71 : vector<3x128xf32>
    %76 = arith.select %73, %71, %75 : vector<3x128xi1>, vector<3x128xf32>
    %cst_59 = arith.constant 0.000000e+00 : f32
    %77 = vector.broadcast %cst_59 : f32 to vector<12x128xf32>
    %c0_60 = arith.constant 0 : index
    %c0_61 = arith.constant 0 : index
    %78 = vector.load %arg7[%c0_60, %c0_61] : memref<12x128xf32, #tpu.memory_space<vmem>>, vector<12x128xf32>
    tpu.vector_store %arg7[%c0_60, %c0_61], %77 {strides = array<i32>} : memref<12x128xf32, #tpu.memory_space<vmem>>, vector<12x128xf32>,
    %c0_62 = arith.constant 0 : index
    %c0_63 = arith.constant 0 : index
    %79 = vector.load %arg5[%c0_62, %c0_63] : memref<3x1xf32, #tpu.memory_space<vmem>>, vector<3x1xf32>
    %80 = vector.broadcast %79 : vector<3x1xf32> to vector<3x128xf32>
    %81 = arith.mulf %76, %80 : vector<3x128xf32>
    %c4_64 = arith.constant 4 : index
    %c0_65 = arith.constant 0 : index
    %82 = vector.load %arg7[%c4_64, %c0_65] : memref<12x128xf32, #tpu.memory_space<vmem>>, vector<3x128xf32>
    tpu.vector_store %arg7[%c4_64, %c0_65], %81 {strides = array<i32>} : memref<12x128xf32, #tpu.memory_space<vmem>>, vector<3x128xf32>,
    %c0_66 = arith.constant 0 : index
    %c0_67 = arith.constant 0 : index
    %83 = vector.load %arg7[%c0_66, %c0_67] : memref<12x128xf32, #tpu.memory_space<vmem>>, vector<3x128xf32>
    %84 = arith.truncf %83 : vector<3x128xf32> to vector<3x128xbf16>
    %c0_68 = arith.constant 0 : index
    %c0_69 = arith.constant 0 : index
    %c0_70 = arith.constant 0 : index
    %85 = vector.load %arg3[%c0_68, %c0_69, %c0_70] : memref<9x128x128xbf16, #tpu.memory_space<vmem>>, vector<1x128x128xbf16>
    %86 = vector.shape_cast %85 : vector<1x128x128xbf16> to vector<128x128xbf16>
    %cst_71 = arith.constant dense<0.000000e+00> : vector<3x128xf32>
    %87 = tpu.matmul %84, %86, %cst_71 {dimension_numbers = #tpu.dot_dimension_numbers<[1], [0], [0], [1], [0, 0, 1, 1], [], []>} : vector<3x128xbf16>, vector<128x128xbf16>, vector<3x128xf32> -> vector<3x128xf32>
    %c1_72 = arith.constant 1 : index
    %c0_73 = arith.constant 0 : index
    %88 = vector.load %arg7[%c1_72, %c0_73] : memref<12x128xf32, #tpu.memory_space<vmem>>, vector<3x128xf32>
    %89 = arith.truncf %88 : vector<3x128xf32> to vector<3x128xbf16>
    %c1_74 = arith.constant 1 : index
    %c0_75 = arith.constant 0 : index
    %c0_76 = arith.constant 0 : index
    %90 = vector.load %arg3[%c1_74, %c0_75, %c0_76] : memref<9x128x128xbf16, #tpu.memory_space<vmem>>, vector<1x128x128xbf16>
    %91 = vector.shape_cast %90 : vector<1x128x128xbf16> to vector<128x128xbf16>
    %cst_77 = arith.constant dense<0.000000e+00> : vector<3x128xf32>
    %92 = tpu.matmul %89, %91, %cst_77 {dimension_numbers = #tpu.dot_dimension_numbers<[1], [0], [0], [1], [0, 0, 1, 1], [], []>} : vector<3x128xbf16>, vector<128x128xbf16>, vector<3x128xf32> -> vector<3x128xf32>
    %93 = arith.addf %87, %92 : vector<3x128xf32>
    %c2_78 = arith.constant 2 : index
    %c0_79 = arith.constant 0 : index
    %94 = vector.load %arg7[%c2_78, %c0_79] : memref<12x128xf32, #tpu.memory_space<vmem>>, vector<3x128xf32>
    %95 = arith.truncf %94 : vector<3x128xf32> to vector<3x128xbf16>
    %c2_80 = arith.constant 2 : index
    %c0_81 = arith.constant 0 : index
    %c0_82 = arith.constant 0 : index
    %96 = vector.load %arg3[%c2_80, %c0_81, %c0_82] : memref<9x128x128xbf16, #tpu.memory_space<vmem>>, vector<1x128x128xbf16>
    %97 = vector.shape_cast %96 : vector<1x128x128xbf16> to vector<128x128xbf16>
    %cst_83 = arith.constant dense<0.000000e+00> : vector<3x128xf32>
    %98 = tpu.matmul %95, %97, %cst_83 {dimension_numbers = #tpu.dot_dimension_numbers<[1], [0], [0], [1], [0, 0, 1, 1], [], []>} : vector<3x128xbf16>, vector<128x128xbf16>, vector<3x128xf32> -> vector<3x128xf32>
    %99 = arith.addf %93, %98 : vector<3x128xf32>
    %c3_84 = arith.constant 3 : index
    %c0_85 = arith.constant 0 : index
    %100 = vector.load %arg7[%c3_84, %c0_85] : memref<12x128xf32, #tpu.memory_space<vmem>>, vector<3x128xf32>
    %101 = arith.truncf %100 : vector<3x128xf32> to vector<3x128xbf16>
    %c3_86 = arith.constant 3 : index
    %c0_87 = arith.constant 0 : index
    %c0_88 = arith.constant 0 : index
    %102 = vector.load %arg3[%c3_86, %c0_87, %c0_88] : memref<9x128x128xbf16, #tpu.memory_space<vmem>>, vector<1x128x128xbf16>
    %103 = vector.shape_cast %102 : vector<1x128x128xbf16> to vector<128x128xbf16>
    %cst_89 = arith.constant dense<0.000000e+00> : vector<3x128xf32>
    %104 = tpu.matmul %101, %103, %cst_89 {dimension_numbers = #tpu.dot_dimension_numbers<[1], [0], [0], [1], [0, 0, 1, 1], [], []>} : vector<3x128xbf16>, vector<128x128xbf16>, vector<3x128xf32> -> vector<3x128xf32>
    %105 = arith.addf %99, %104 : vector<3x128xf32>
    %c4_90 = arith.constant 4 : index
    %c0_91 = arith.constant 0 : index
    %106 = vector.load %arg7[%c4_90, %c0_91] : memref<12x128xf32, #tpu.memory_space<vmem>>, vector<3x128xf32>
    %107 = arith.truncf %106 : vector<3x128xf32> to vector<3x128xbf16>
    %c4_92 = arith.constant 4 : index
    %c0_93 = arith.constant 0 : index
    %c0_94 = arith.constant 0 : index
    %108 = vector.load %arg3[%c4_92, %c0_93, %c0_94] : memref<9x128x128xbf16, #tpu.memory_space<vmem>>, vector<1x128x128xbf16>
    %109 = vector.shape_cast %108 : vector<1x128x128xbf16> to vector<128x128xbf16>
    %cst_95 = arith.constant dense<0.000000e+00> : vector<3x128xf32>
    %110 = tpu.matmul %107, %109, %cst_95 {dimension_numbers = #tpu.dot_dimension_numbers<[1], [0], [0], [1], [0, 0, 1, 1], [], []>} : vector<3x128xbf16>, vector<128x128xbf16>, vector<3x128xf32> -> vector<3x128xf32>
    %111 = arith.addf %105, %110 : vector<3x128xf32>
    %c5_96 = arith.constant 5 : index
    %c0_97 = arith.constant 0 : index
    %112 = vector.load %arg7[%c5_96, %c0_97] : memref<12x128xf32, #tpu.memory_space<vmem>>, vector<3x128xf32>
    %113 = arith.truncf %112 : vector<3x128xf32> to vector<3x128xbf16>
    %c5_98 = arith.constant 5 : index
    %c0_99 = arith.constant 0 : index
    %c0_100 = arith.constant 0 : index
    %114 = vector.load %arg3[%c5_98, %c0_99, %c0_100] : memref<9x128x128xbf16, #tpu.memory_space<vmem>>, vector<1x128x128xbf16>
    %115 = vector.shape_cast %114 : vector<1x128x128xbf16> to vector<128x128xbf16>
    %cst_101 = arith.constant dense<0.000000e+00> : vector<3x128xf32>
    %116 = tpu.matmul %113, %115, %cst_101 {dimension_numbers = #tpu.dot_dimension_numbers<[1], [0], [0], [1], [0, 0, 1, 1], [], []>} : vector<3x128xbf16>, vector<128x128xbf16>, vector<3x128xf32> -> vector<3x128xf32>
    %117 = arith.addf %111, %116 : vector<3x128xf32>
    %c6_102 = arith.constant 6 : index
    %c0_103 = arith.constant 0 : index
    %118 = vector.load %arg7[%c6_102, %c0_103] : memref<12x128xf32, #tpu.memory_space<vmem>>, vector<3x128xf32>
    %119 = arith.truncf %118 : vector<3x128xf32> to vector<3x128xbf16>
    %c6_104 = arith.constant 6 : index
    %c0_105 = arith.constant 0 : index
    %c0_106 = arith.constant 0 : index
    %120 = vector.load %arg3[%c6_104, %c0_105, %c0_106] : memref<9x128x128xbf16, #tpu.memory_space<vmem>>, vector<1x128x128xbf16>
    %121 = vector.shape_cast %120 : vector<1x128x128xbf16> to vector<128x128xbf16>
    %cst_107 = arith.constant dense<0.000000e+00> : vector<3x128xf32>
    %122 = tpu.matmul %119, %121, %cst_107 {dimension_numbers = #tpu.dot_dimension_numbers<[1], [0], [0], [1], [0, 0, 1, 1], [], []>} : vector<3x128xbf16>, vector<128x128xbf16>, vector<3x128xf32> -> vector<3x128xf32>
    %123 = arith.addf %117, %122 : vector<3x128xf32>
    %c7_108 = arith.constant 7 : index
    %c0_109 = arith.constant 0 : index
    %124 = vector.load %arg7[%c7_108, %c0_109] : memref<12x128xf32, #tpu.memory_space<vmem>>, vector<3x128xf32>
    %125 = arith.truncf %124 : vector<3x128xf32> to vector<3x128xbf16>
    %c7_110 = arith.constant 7 : index
    %c0_111 = arith.constant 0 : index
    %c0_112 = arith.constant 0 : index
    %126 = vector.load %arg3[%c7_110, %c0_111, %c0_112] : memref<9x128x128xbf16, #tpu.memory_space<vmem>>, vector<1x128x128xbf16>
    %127 = vector.shape_cast %126 : vector<1x128x128xbf16> to vector<128x128xbf16>
    %cst_113 = arith.constant dense<0.000000e+00> : vector<3x128xf32>
    %128 = tpu.matmul %125, %127, %cst_113 {dimension_numbers = #tpu.dot_dimension_numbers<[1], [0], [0], [1], [0, 0, 1, 1], [], []>} : vector<3x128xbf16>, vector<128x128xbf16>, vector<3x128xf32> -> vector<3x128xf32>
    %129 = arith.addf %123, %128 : vector<3x128xf32>
    %c8_114 = arith.constant 8 : index
    %c0_115 = arith.constant 0 : index
    %130 = vector.load %arg7[%c8_114, %c0_115] : memref<12x128xf32, #tpu.memory_space<vmem>>, vector<3x128xf32>
    %131 = arith.truncf %130 : vector<3x128xf32> to vector<3x128xbf16>
    %c8_116 = arith.constant 8 : index
    %c0_117 = arith.constant 0 : index
    %c0_118 = arith.constant 0 : index
    %132 = vector.load %arg3[%c8_116, %c0_117, %c0_118] : memref<9x128x128xbf16, #tpu.memory_space<vmem>>, vector<1x128x128xbf16>
    %133 = vector.shape_cast %132 : vector<1x128x128xbf16> to vector<128x128xbf16>
    %cst_119 = arith.constant dense<0.000000e+00> : vector<3x128xf32>
    %134 = tpu.matmul %131, %133, %cst_119 {dimension_numbers = #tpu.dot_dimension_numbers<[1], [0], [0], [1], [0, 0, 1, 1], [], []>} : vector<3x128xbf16>, vector<128x128xbf16>, vector<3x128xf32> -> vector<3x128xf32>
    %135 = arith.addf %129, %134 : vector<3x128xf32>
    %c2_120 = arith.constant 2 : index
    %c0_121 = arith.constant 0 : index
    %136 = vector.load %arg4[%c2_120, %c0_121] : memref<4x128xf32, #tpu.memory_space<vmem>>, vector<1x128xf32>
    %137 = vector.shape_cast %136 : vector<1x128xf32> to vector<128xf32>
    %c3_122 = arith.constant 3 : index
    %c0_123 = arith.constant 0 : index
    %138 = vector.load %arg4[%c3_122, %c0_123] : memref<4x128xf32, #tpu.memory_space<vmem>>, vector<1x128xf32>
    %139 = vector.shape_cast %138 : vector<1x128xf32> to vector<128xf32>
    %140 = vector.shape_cast %137 : vector<128xf32> to vector<1x128xf32>
    %141 = vector.broadcast %140 : vector<1x128xf32> to vector<3x128xf32>
    %142 = arith.mulf %135, %141 : vector<3x128xf32>
    %143 = vector.shape_cast %139 : vector<128xf32> to vector<1x128xf32>
    %144 = vector.broadcast %143 : vector<1x128xf32> to vector<3x128xf32>
    %145 = arith.addf %142, %144 : vector<3x128xf32>
    %cst_124 = arith.constant 0.000000e+00 : f32
    %146 = vector.broadcast %cst_124 : f32 to vector<3x128xf32>
    %147 = arith.cmpf oge, %145, %146 : vector<3x128xf32>
    %cst_125 = arith.constant 0.000000e+00 : f32
    %148 = vector.broadcast %cst_125 : f32 to vector<3x128xf32>
    %149 = arith.mulf %148, %145 : vector<3x128xf32>
    %150 = arith.select %147, %145, %149 : vector<3x128xi1>, vector<3x128xf32>
    %c0_126 = arith.constant 0 : index
    %c0_127 = arith.constant 0 : index
    %c0_128 = arith.constant 0 : index
    %151 = vector.load %arg6[%c0_126, %c0_127, %c0_128] : memref<1x3x128xf32, #tpu.memory_space<vmem>>, vector<1x3x128xf32>
    %152 = vector.shape_cast %151 : vector<1x3x128xf32> to vector<3x128xf32>
    %153 = vector.shape_cast %150 : vector<3x128xf32> to vector<1x3x128xf32>
    tpu.vector_store %arg6[%c0_126, %c0_127, %c0_128], %153 {strides = array<i32>} : memref<1x3x128xf32, #tpu.memory_space<vmem>>, vector<1x3x128xf32>,
    return
  }
  func.func @transform_0(%arg0: i32) -> (i32, i32, i32) {
    %c0_i32 = arith.constant 0 : i32
    %c0_i32_0 = arith.constant 0 : i32
    %c0_i32_1 = arith.constant 0 : i32
    return %arg0, %c0_i32, %c0_i32_0 : i32, i32, i32
  }
  func.func @transform_1(%arg0: i32) -> (i32, i32, i32) {
    %c0_i32 = arith.constant 0 : i32
    %c0_i32_0 = arith.constant 0 : i32
    %c0_i32_1 = arith.constant 0 : i32
    %c0_i32_2 = arith.constant 0 : i32
    return %c0_i32, %c0_i32_0, %c0_i32_1 : i32, i32, i32
  }
  func.func @transform_2(%arg0: i32) -> (i32, i32, i32) {
    %c0_i32 = arith.constant 0 : i32
    %c0_i32_0 = arith.constant 0 : i32
    %c0_i32_1 = arith.constant 0 : i32
    %c0_i32_2 = arith.constant 0 : i32
    return %c0_i32, %c0_i32_0, %c0_i32_1 : i32, i32, i32
  }
  func.func @transform_3(%arg0: i32) -> (i32, i32) {
    %c0_i32 = arith.constant 0 : i32
    %c0_i32_0 = arith.constant 0 : i32
    %c0_i32_1 = arith.constant 0 : i32
    return %c0_i32, %c0_i32_0 : i32, i32
  }
  func.func @transform_4(%arg0: i32) -> (i32, i32) {
    %c0_i32 = arith.constant 0 : i32
    %c0_i32_0 = arith.constant 0 : i32
    %c0_i32_1 = arith.constant 0 : i32
    return %c0_i32, %c0_i32_0 : i32, i32
  }
  func.func @transform_5(%arg0: i32) -> (i32, i32, i32) {
    %c0_i32 = arith.constant 0 : i32
    %c0_i32_0 = arith.constant 0 : i32
    %c0_i32_1 = arith.constant 0 : i32
    return %arg0, %c0_i32, %c0_i32_0 : i32, i32, i32
  }
}

</mosaic_0001>

<bundles_post_ra>
// kernel: encoder_forward.10
= control target key start
LH: loop header
LB: loop body
LE: loop exit
PB: predicated region body
PF: predicated region fallthrough
CT: control target
= control target key end

     0   :  { %s1002_s6 = smov 0   ;;  %s2026_s0 = inlined_call_operand.vmem [shape: f32[16,2,9,2,8], index: 0, kind: input, shape index: {}]   ;;  %s2027_s1 = inlined_call_operand.vmem [shape: f32[16,8,8], index: 1, kind: output, shape index: {}]  }
   0x1 LB: > { %s964_s7 = sadd.s32 4294967295, %s990_s6   ;;  %p968_p0 = scmp.ge.s32.totalorder %s990_s6, 1  ;;  %s990_s6 = sphi %s1002_s6, %s11_s6  }
   0x2   : > { %p89_p1 = scmp.lt.s32.totalorder %s990_s6, 3 }
   0x4   : > { %p90_p2 = pnand %p968_p0, %p89_p1 }
   0x6   : > { %93 = sbr.rel (%p90_p2) target bundleno = 223 (0xdf), region = 24 }
   0xd   : > { %s969_s8 = sshll.u32 %s964_s7, 3  ;;  %vm315_vm0 = vcmask 58368   ;;  %vm828_vm1 = vcmask 1041409   ;;  %vm830_vm2 = vcmask 1042434   ;;  %vm832_vm3 = vcmask 1043459  }
   0xe   : > { %p111_p3 = scmp.lt.s32.totalorder %s969_s8, 15  ;;  %vm834_vm4 = vcmask 1044484   ;;  %vm836_vm5 = vcmask 1045509   ;;  %vm838_vm6 = vcmask 1046534   ;;  %vm840_vm7 = vcmask 1047559  }
   0xf   : > { %vm899_vm8 = vcmask 64512  }
  0x10   : > { %s2415_s8 = smov (!%p111_p3, %s969_s8), 15 }
  0x11   : > { %s975_s9 = smul.u32 36, %s2415_s8  ;;  %s972_s13 = sshll.u32 %s2415_s8, 3 }
  0x12   : > { %s121_s16 = scalar_lea.vmem %s2027_s1, %s972_s13 }
  0x13   : > { %s1016_s12 = scalar_lea.vmem %s2026_s0, %s975_s9 }
  0x14   : > { %v1019_v0 = vld [vmem:[%s1016_s12] sm:$0x3]  ;;  %v1022_v1 = vld [vmem:[%s1016_s12 + $0x2] sm:$0x3]  ;;  %v1025_v2 = vld [vmem:[%s1016_s12 + $0x4] sm:$0x3] }
  0x15   : > { %v1028_v3 = vld [vmem:[%s1016_s12 + $0x12] sm:$0x3]  ;;  %v1031_v4 = vld [vmem:[%s1016_s12 + $0x14] sm:$0x3]  ;;  %v1034_v5 = vld [vmem:[%s1016_s12 + $0x16] sm:$0x3] }
  0x16   : > { %v1037_v6 = vld [vmem:[%s1016_s12 + $0x6] sm:$0x3]  ;;  %v1040_v7 = vld [vmem:[%s1016_s12 + $0x8] sm:$0x3]  ;;  %v1043_v8 = vld [vmem:[%s1016_s12 + $0xa] sm:$0x3] }
  0x17   : > { %2118 = vst [vmem:[#allocation2_spill] sm:$0xff] %v1043_v8  ;;  %v1046_v9 = vld [vmem:[%s1016_s12 + $0xc] sm:$0x3]  ;;  %v1049_v10 = vld [vmem:[%s1016_s12 + $0x18] sm:$0x3] }
  0x18   : > { %2119 = vst [vmem:[#allocation3_spill] sm:$0xff] %v1046_v9  ;;  %v1052_v11 = vld [vmem:[%s1016_s12 + $0x1a] sm:$0x3]  ;;  %v1055_v12 = vld [vmem:[%s1016_s12 + $0x1c] sm:$0x3] }
  0x19   : > { %2120 = vst [vmem:[#allocation4_spill] sm:$0xff] %v1052_v11  ;;  %2121 = vst [vmem:[#allocation5_spill] sm:$0xff] %v1055_v12  ;;  %v1058_v13 = vld [vmem:[%s1016_s12 + $0x1e] sm:$0x3]  ;;  %v1061_v14 = vld [vmem:[%s1016_s12 + $0xe] sm:$0x3] }
  0x1a   : > { %2122 = vst [vmem:[#allocation6_spill] sm:$0xff] %v1058_v13  ;;  %2123 = vst [vmem:[#allocation7_spill] sm:$0xff] %v1061_v14  ;;  %v1064_v15 = vld [vmem:[%s1016_s12 + $0x20] sm:$0x3]  ;;  %v1067_v16 = vld [vmem:[%s1016_s12 + $0x24] sm:$0x3] }
  0x1b   : > { %2124 = vst [vmem:[#allocation8_spill] sm:$0xff] %v1064_v15  ;;  %2125 = vst [vmem:[#allocation9_spill] sm:$0xff] %v1067_v16  ;;  %v1070_v17 = vld [vmem:[%s1016_s12 + $0x26] sm:$0x3]  ;;  %v1073_v18 = vld [vmem:[%s1016_s12 + $0x28] sm:$0x3] }
  0x1c   : > { %2126 = vst [vmem:[#allocation10_spill] sm:$0xff] %v1070_v17  ;;  %2127 = vst [vmem:[#allocation11_spill] sm:$0xff] %v1073_v18  ;;  %v1076_v19 = vld [vmem:[%s1016_s12 + $0x36] sm:$0x3]  ;;  %v1079_v20 = vld [vmem:[%s1016_s12 + $0x38] sm:$0x3] }
  0x1d   : > { %2128 = vst [vmem:[#allocation12_spill] sm:$0xff] %v1076_v19  ;;  %2129 = vst [vmem:[#allocation13_spill] sm:$0xff] %v1079_v20  ;;  %v1082_v21 = vld [vmem:[%s1016_s12 + $0x3a] sm:$0x3]  ;;  %v1085_v22 = vld [vmem:[%s1016_s12 + $0x2a] sm:$0x3] }
  0x1e   : > { %2130 = vst [vmem:[#allocation14_spill] sm:$0xff] %v1082_v21  ;;  %2131 = vst [vmem:[#allocation15_spill] sm:$0xff] %v1085_v22  ;;  %v1088_v23 = vld [vmem:[%s1016_s12 + $0x2c] sm:$0x3]  ;;  %v1091_v24 = vld [vmem:[%s1016_s12 + $0x2e] sm:$0x3] }
  0x1f   : > { %2132 = vst [vmem:[#allocation16_spill] sm:$0xff] %v1088_v23  ;;  %2133 = vst [vmem:[#allocation17_spill] sm:$0xff] %v1091_v24  ;;  %v1094_v25 = vld [vmem:[%s1016_s12 + $0x30] sm:$0x3]  ;;  %v1097_v26 = vld [vmem:[%s1016_s12 + $0x3c] sm:$0x3] }
  0x20   : > { %2134 = vst [vmem:[#allocation18_spill] sm:$0xff] %v1094_v25  ;;  %2135 = vst [vmem:[#allocation19_spill] sm:$0xff] %v1097_v26  ;;  %v1100_v27 = vld [vmem:[%s1016_s12 + $0x3e] sm:$0x3]  ;;  %v1103_v28 = vld [vmem:[%s1016_s12 + $0x40] sm:$0x3] }
  0x21   : > { %2136 = vst [vmem:[#allocation20_spill] sm:$0xff] %v1100_v27  ;;  %2137 = vst [vmem:[#allocation21_spill] sm:$0xff] %v1103_v28  ;;  %v1106_v29 = vld [vmem:[%s1016_s12 + $0x42] sm:$0x3]  ;;  %v1109_v30 = vld [vmem:[%s1016_s12 + $0x32] sm:$0x3] }
  0x22   : > { %2138 = vst [vmem:[#allocation22_spill] sm:$0xff] %v1106_v29  ;;  %2139 = vst [vmem:[#allocation23_spill] sm:$0xff] %v1109_v30  ;;  %v1112_v31 = vld [vmem:[%s1016_s12 + $0x44] sm:$0x3]  ;;  %v1115_v32 = vld [vmem:[%s1016_s12 + $0x48] sm:$0x3] }
  0x23   : > { %2140 = vst [vmem:[#allocation24_spill] sm:$0xff] %v1112_v31  ;;  %2141 = vst [vmem:[#allocation25_spill] sm:$0xff] %v1115_v32  ;;  %v1118_v33 = vld [vmem:[%s1016_s12 + $0x4a] sm:$0x3]  ;;  %v1121_v34 = vld [vmem:[%s1016_s12 + $0x4c] sm:$0x3] }
  0x24   : > { %2142 = vst [vmem:[#allocation26_spill] sm:$0xff] %v1118_v33  ;;  %2143 = vst [vmem:[#allocation27_spill] sm:$0xff] %v1121_v34  ;;  %v1124_v35 = vld [vmem:[%s1016_s12 + $0x5a] sm:$0x3]  ;;  %v1127_v36 = vld [vmem:[%s1016_s12 + $0x5c] sm:$0x3] }
  0x25   : > { %2144 = vst [vmem:[#allocation28_spill] sm:$0xff] %v1124_v35  ;;  %2145 = vst [vmem:[#allocation29_spill] sm:$0xff] %v1127_v36  ;;  %v1130_v37 = vld [vmem:[%s1016_s12 + $0x5e] sm:$0x3]  ;;  %v1133_v38 = vld [vmem:[%s1016_s12 + $0x4e] sm:$0x3] }
  0x26   : > { %2146 = vst [vmem:[#allocation30_spill] sm:$0xff] %v1130_v37  ;;  %2147 = vst [vmem:[#allocation31_spill] sm:$0xff] %v1133_v38  ;;  %v1136_v39 = vld [vmem:[%s1016_s12 + $0x50] sm:$0x3]  ;;  %v1139_v40 = vld [vmem:[%s1016_s12 + $0x52] sm:$0x3] }
  0x27   : > { %2148 = vst [vmem:[#allocation32_spill] sm:$0xff] %v1136_v39  ;;  %2149 = vst [vmem:[#allocation33_spill] sm:$0xff] %v1139_v40  ;;  %v1142_v41 = vld [vmem:[%s1016_s12 + $0x54] sm:$0x3]  ;;  %v1145_v42 = vld [vmem:[%s1016_s12 + $0x60] sm:$0x3] }
  0x28   : > { %2150 = vst [vmem:[#allocation34_spill] sm:$0xff] %v1142_v41  ;;  %2151 = vst [vmem:[#allocation35_spill] sm:$0xff] %v1145_v42  ;;  %v1148_v43 = vld [vmem:[%s1016_s12 + $0x62] sm:$0x3]  ;;  %v1151_v44 = vld [vmem:[%s1016_s12 + $0x64] sm:$0x3] }
  0x29   : > { %2152 = vst [vmem:[#allocation36_spill] sm:$0xff] %v1148_v43  ;;  %2153 = vst [vmem:[#allocation37_spill] sm:$0xff] %v1151_v44  ;;  %v1154_v45 = vld [vmem:[%s1016_s12 + $0x66] sm:$0x3]  ;;  %v1163_v49 = vld [vmem:[%s1016_s12 + $0x56] sm:$0x3] }
  0x2a   : > { %2154 = vst [vmem:[#allocation38_spill] sm:$0xff] %v1154_v45  ;;  %v1166_v50 = vld [vmem:[%s1016_s12 + $0x68] sm:$0x3]  ;;  %v1169_v51 = vld [vmem:[%s1016_s12 + $0x6c] sm:$0x3] }
  0x2b   : > { %2155 = vst [vmem:[#allocation39_spill] sm:$0xff] %v1166_v50  ;;  %2156 = vst [vmem:[#allocation40_spill] sm:$0xff] %v1169_v51  ;;  %v1172_v52 = vld [vmem:[%s1016_s12 + $0x6e] sm:$0x3]  ;;  %v1175_v53 = vld [vmem:[%s1016_s12 + $0x70] sm:$0x3] }
  0x2c   : > { %2157 = vst [vmem:[#allocation41_spill] sm:$0xff] %v1172_v52  ;;  %2158 = vst [vmem:[#allocation42_spill] sm:$0xff] %v1175_v53  ;;  %v1178_v54 = vld [vmem:[%s1016_s12 + $0x7e] sm:$0x3]  ;;  %v1181_v55 = vld [vmem:[%s1016_s12 + $0x80] sm:$0x3] }
  0x2d   : > { %2159 = vst [vmem:[#allocation43_spill] sm:$0xff] %v1178_v54  ;;  %2160 = vst [vmem:[#allocation44_spill] sm:$0xff] %v1181_v55  ;;  %v1184_v56 = vld [vmem:[%s1016_s12 + $0x82] sm:$0x3]  ;;  %v1195_v61 = vld [vmem:[%s1016_s12 + $0x72] sm:$0x3] }
  0x2e   : > { %2161 = vst [vmem:[#allocation45_spill] sm:$0xff] %v1184_v56  ;;  %v1198_v62 = vld [vmem:[%s1016_s12 + $0x74] sm:$0x3]  ;;  %v1201_v63 = vld [vmem:[%s1016_s12 + $0x76] sm:$0x3] }
  0x2f   : > { %2162 = vst [vmem:[#allocation46_spill] sm:$0xff] %v1198_v62  ;;  %2163 = vst [vmem:[#allocation47_spill] sm:$0xff] %v1201_v63  ;;  %v1204_v57 = vld [vmem:[%s1016_s12 + $0x78] sm:$0x3]  ;;  %v1207_v58 = vld [vmem:[%s1016_s12 + $0x84] sm:$0x3] }
  0x30   : > { %2164 = vst [vmem:[#allocation48_spill] sm:$0xff] %v1204_v57  ;;  %2165 = vst [vmem:[#allocation49_spill] sm:$0xff] %v1207_v58  ;;  %v1210_v59 = vld [vmem:[%s1016_s12 + $0x86] sm:$0x3]  ;;  %v1213_v48 = vld [vmem:[%s1016_s12 + $0x88] sm:$0x3] }
  0x31   : > { %2166 = vst [vmem:[#allocation50_spill] sm:$0xff] %v1210_v59  ;;  %2167 = vst [vmem:[#allocation51_spill] sm:$0xff] %v1213_v48  ;;  %v1216_v60 = vld [vmem:[%s1016_s12 + $0x8a] sm:$0x3]  ;;  %v1227_v12 = vld [vmem:[%s1016_s12 + $0x7a] sm:$0x3] }
  0x32   : > { %2168 = vst [vmem:[#allocation52_spill] sm:$0xff] %v1216_v60  ;;  %v1230_v8 = vld [vmem:[%s1016_s12 + $0x8c] sm:$0x3]  ;;  %v1233_v47 = vld [vmem:[%s1016_s12 + $0x90] sm:$0x3]  ;;  %v2208_v60 = vmax.f32 %v1019_v0, %v1028_v3  ;;  %v2211_v3 = vmax.f32 %v1037_v6, %v1049_v10 }
  0x33   : > { %v1236_v15 = vld [vmem:[%s1016_s12 + $0x92] sm:$0x3]  ;;  %v1239_v46 = vld [vmem:[%s1016_s12 + $0x94] sm:$0x3]  ;;  %v1242_v13 = vld [vmem:[%s1016_s12 + $0xa2] sm:$0x3] }
  0x34   : > { %2169 = vst [vmem:[#allocation53_spill] sm:$0xff] %v1239_v46  ;;  %v1245_v20 = vld [vmem:[%s1016_s12 + $0xa4] sm:$0x3]  ;;  %v1248_v9 = vld [vmem:[%s1016_s12 + $0xa6] sm:$0x3]  ;;  %v316_v57 = vsel %vm315_vm0, %v2208_v60, -inf }
  0x35   : > { %2170 = vst [vmem:[#allocation54_spill] sm:$0xff] %v1245_v20  ;;  %2171 = vst [vmem:[#allocation55_spill] sm:$0xff] %v1248_v9  ;;  %v1259_v16 = vld [vmem:[%s1016_s12 + $0x96] sm:$0x3]  ;;  %v1262_v14 = vld [vmem:[%s1016_s12 + $0x98] sm:$0x3] }
  0x36   : > { %v1265_v11 = vld [vmem:[%s1016_s12 + $0x9a] sm:$0x3]  ;;  %v1268_v21 = vld [vmem:[%s1016_s12 + $0x9c] sm:$0x3]  ;;  %v1271_v18 = vld [vmem:[%s1016_s12 + $0xa8] sm:$0x3] }
  0x37   : > { %2172 = vst [vmem:[#allocation56_spill] sm:$0xff] %v1268_v21  ;;  %v1274_v17 = vld [vmem:[%s1016_s12 + $0xaa] sm:$0x3]  ;;  %v1277_v28 = vld [vmem:[%s1016_s12 + $0xac] sm:$0x3]  ;;  %v337_v60 = vsel %vm315_vm0, %v2211_v3, -inf }
  0x38   : > { %2173 = vst [vmem:[#allocation57_spill] sm:$0xff] %v1277_v28  ;;  %v1280_v19 = vld [vmem:[%s1016_s12 + $0xae] sm:$0x3]  ;;  %v1291_v23 = vld [vmem:[%s1016_s12 + $0x9e] sm:$0x3]  ;;  %v2212_v48 = vld [vmem:[#allocation4_spill] sm:$0xff] }
  0x39   : > { %2174 = vst [vmem:[#allocation58_spill] sm:$0xff] %v1280_v19  ;;  %v1294_v26 = vld [vmem:[%s1016_s12 + $0xb0] sm:$0x3]  ;;  %v1297_v29 = vld [vmem:[%s1016_s12 + $0xb4] sm:$0x3]  ;;  %v2220_v3 = vld [vmem:[#allocation7_spill] sm:$0xff] }
  0x3a   : > { %v1300_v25 = vld [vmem:[%s1016_s12 + $0xb6] sm:$0x3]  ;;  %v1303_v24 = vld [vmem:[%s1016_s12 + $0xb8] sm:$0x3]  ;;  %v1306_v36 = vld [vmem:[%s1016_s12 + $0xc6] sm:$0x3] }
  0x3b   : > { %2175 = vst [vmem:[#allocation59_spill] sm:$0xff] %v1303_v24  ;;  %v1309_v27 = vld [vmem:[%s1016_s12 + $0xc8] sm:$0x3]  ;;  %v1312_v37 = vld [vmem:[%s1016_s12 + $0xca] sm:$0x3] }
  0x3c   : > { %2176 = vst [vmem:[#allocation60_spill] sm:$0xff] %v1309_v27  ;;  %2177 = vst [vmem:[#allocation61_spill] sm:$0xff] %v1312_v37  ;;  %v1323_v31 = vld [vmem:[%s1016_s12 + $0xba] sm:$0x3]  ;;  %v1326_v30 = vld [vmem:[%s1016_s12 + $0xbc] sm:$0x3] }
  0x3d   : > { %v1329_v34 = vld [vmem:[%s1016_s12 + $0xbe] sm:$0x3]  ;;  %v1332_v42 = vld [vmem:[%s1016_s12 + $0xc0] sm:$0x3]  ;;  %v1335_v33 = vld [vmem:[%s1016_s12 + $0xcc] sm:$0x3] }
  0x3e   : > { %2178 = vst [vmem:[#allocation62_spill] sm:$0xff] %v1332_v42  ;;  %v1338_v43 = vld [vmem:[%s1016_s12 + $0xce] sm:$0x3]  ;;  %v1341_v35 = vld [vmem:[%s1016_s12 + $0xd0] sm:$0x3] }
  0x3f   : > { %2179 = vst [vmem:[#allocation63_spill] sm:$0xff] %v1341_v35  ;;  %v1344_v44 = vld [vmem:[%s1016_s12 + $0xd2] sm:$0x3]  ;;  %v1355_v39 = vld [vmem:[%s1016_s12 + $0xc2] sm:$0x3] }
  0x40   : > { %2180 = vst [vmem:[#allocation64_spill] sm:$0xff] %v1344_v44  ;;  %v1358_v38 = vld [vmem:[%s1016_s12 + $0xd4] sm:$0x3]  ;;  %v1361_v22 = vld [vmem:[%s1016_s12 + $0xd8] sm:$0x3] }
  0x41   : > { %v1364_v32 = vld [vmem:[%s1016_s12 + $0xda] sm:$0x3]  ;;  %v1367_v50 = vld [vmem:[%s1016_s12 + $0xdc] sm:$0x3]  ;;  %v1370_v45 = vld [vmem:[%s1016_s12 + $0xea] sm:$0x3] }
  0x42   : > { %2181 = vst [vmem:[#allocation65_spill] sm:$0xff] %v1364_v32  ;;  %2182 = vst [vmem:[#allocation66_spill] sm:$0xff] %v1367_v50  ;;  %v1381_v55 = vld [vmem:[%s1016_s12 + $0xde] sm:$0x3]  ;;  %v1384_v52 = vld [vmem:[%s1016_s12 + $0xe0] sm:$0x3]  ;;  %v2210_v32 = vmax.f32 %v1025_v2, %v1034_v5 }
  0x43   : > { %v1387_v54 = vld [vmem:[%s1016_s12 + $0xe2] sm:$0x3]  ;;  %v1390_v51 = vld [vmem:[%s1016_s12 + $0xe4] sm:$0x3]  ;;  %v1393_v41 = vld [vmem:[%s1016_s12 + $0xec] sm:$0x3] }
  0x44   : > { %2183 = vst [vmem:[#allocation67_spill] sm:$0xff] %v1387_v54  ;;  %2184 = vst [vmem:[#allocation68_spill] sm:$0xff] %v1390_v51  ;;  %v1396_v40 = vld [vmem:[%s1016_s12 + $0xee] sm:$0x3]  ;;  %v1399_v56 = vld [vmem:[%s1016_s12 + $0xf0] sm:$0x3] }
  0x45   : > { %2185 = vst [vmem:[#allocation69_spill] sm:$0xff] %v1393_v41  ;;  %2186 = vst [vmem:[#allocation70_spill] sm:$0xff] %v1396_v40  ;;  %v1410_v63 = vld [vmem:[%s1016_s12 + $0xe6] sm:$0x3]  ;;  %v1413_v59 = vld [vmem:[%s1016_s12 + $0xf2] sm:$0x3] }
  0x46   : > { %2187 = vst [vmem:[#allocation71_spill] sm:$0xff] %v1410_v63  ;;  %2188 = vst [vmem:[#allocation72_spill] sm:$0xff] %v1413_v59  ;;  %v1416_v62 = vld [vmem:[%s1016_s12 + $0xf4] sm:$0x3]  ;;  %v1419_v58 = vld [vmem:[%s1016_s12 + $0xf6] sm:$0x3] }
  0x47   : > { %2189 = vst [vmem:[#allocation73_spill] sm:$0xff] %v1416_v62  ;;  %2190 = vst [vmem:[#allocation74_spill] sm:$0xff] %v1419_v58  ;;  %v1430_v9 = vld [vmem:[%s1016_s12 + $0xf8] sm:$0x3]  ;;  %v1433_v46 = vld [vmem:[%s1016_s12 + $0xfc] sm:$0x3]  ;;  %v2209_v58 = vmax.f32 %v1022_v1, %v1031_v4 }
  0x48   : > { %2191 = vst [vmem:[#allocation75_spill] sm:$0xff] %v1430_v9  ;;  %2192 = vst [vmem:[#allocation76_spill] sm:$0xff] %v1433_v46  ;;  %v1436_v20 = vld [vmem:[%s1016_s12 + $0xfe] sm:$0x3]  ;;  %v1447_v19 = vld [vmem:[%s1016_s12 + $0x100] sm:$0x3] }
  0x49   : > { %2193 = vst [vmem:[#allocation77_spill] sm:$0xff] %v1436_v20  ;;  %2194 = vst [vmem:[#allocation78_spill] sm:$0xff] %v1447_v19  ;;  %v1450_v21 = vld [vmem:[%s1016_s12 + $0x102] sm:$0x3]  ;;  %v1453_v28 = vld [vmem:[%s1016_s12 + $0x104] sm:$0x3] }
  0x4a   : > { %2195 = vst [vmem:[#allocation79_spill] sm:$0xff] %v1450_v21  ;;  %2196 = vst [vmem:[#allocation80_spill] sm:$0xff] %v1453_v28  ;;  %v1464_v37 = vld [vmem:[%s1016_s12 + $0x106] sm:$0x3]  ;;  %v1467_v24 = vld [vmem:[%s1016_s12 + $0x108] sm:$0x3] }
  0x4b   : > { %2197 = vst [vmem:[#allocation81_spill] sm:$0xff] %v1464_v37  ;;  %2198 = vst [vmem:[#allocation82_spill] sm:$0xff] %v1467_v24  ;;  %v1470_v27 = vld [vmem:[%s1016_s12 + $0x10a] sm:$0x3]  ;;  %v1481_v44 = vld [vmem:[%s1016_s12 + $0x10e] sm:$0x3] }
  0x4c   : > { %2199 = vst [vmem:[#allocation83_spill] sm:$0xff] %v1470_v27  ;;  %2200 = vst [vmem:[#allocation84_spill] sm:$0xff] %v1481_v44  ;;  %v1484_v42 = vld [vmem:[%s1016_s12 + $0x110] sm:$0x3]  ;;  %v1487_v35 = vld [vmem:[%s1016_s12 + $0x112] sm:$0x3] }
  0x4d   : > { %2201 = vst [vmem:[#allocation85_spill] sm:$0xff] %v1484_v42  ;;  %2202 = vst [vmem:[#allocation86_spill] sm:$0xff] %v1487_v35  ;;  %v1498_v53 = vld [vmem:[%s1016_s12 + $0x114] sm:$0x3]  ;;  %v1501_v40 = vld [vmem:[%s1016_s12 + $0x116] sm:$0x3]  ;;  %v2213_v35 = vmax.f32 %v1040_v7, %v2212_v48 }
  0x4e   : > { %2203 = vst [vmem:[#allocation87_spill] sm:$0xff] %v1498_v53  ;;  %2204 = vst [vmem:[#allocation88_spill] sm:$0xff] %v1501_v40  ;;  %v1504_v50 = vld [vmem:[%s1016_s12 + $0x118] sm:$0x3]  ;;  %v1515_v62 = vld [vmem:[%s1016_s12 + $0x11a] sm:$0x3] }
  0x4f   : > { %2205 = vst [vmem:[#allocation89_spill] sm:$0xff] %v1504_v50  ;;  %2206 = vst [vmem:[#allocation90_spill] sm:$0xff] %v1515_v62  ;;  %v1518_v41 = vld [vmem:[%s1016_s12 + $0x11c] sm:$0x3]  ;;  %v317_v19 = vrot.slane %v316_v57, 4  ;;  %v323_v51 = vsel %vm315_vm0, %v2209_v58, -inf }
  0x50   : > { %2207 = vst [vmem:[#allocation91_spill] sm:$0xff] %v1518_v41  ;;  %v324_v40 = vrot.slane %v323_v51, 4  ;;  %v330_v0 = vsel %vm315_vm0, %v2210_v32, -inf  ;;  %v344_v41 = vsel %vm315_vm0, %v2213_v35, -inf  ;;  %v338_v4 = vrot.slane %v337_v60, 4  ;;  %v2214_v24 = vld [vmem:[#allocation2_spill] sm:$0xff] }
  0x51   : > { %v318_v27 = vmax.f32 %v316_v57, %v317_v19  ;;  %v331_v1 = vrot.slane %v330_v0, 4  ;;  %v345_v58 = vrot.slane %v344_v41, 4  ;;  %v2215_v50 = vld [vmem:[#allocation5_spill] sm:$0xff]  ;;  %v2217_v32 = vld [vmem:[#allocation3_spill] sm:$0xff]  ;;  %v2218_v37 = vld [vmem:[#allocation6_spill] sm:$0xff] }
  0x52   : > { %v325_v62 = vmax.f32 %v323_v51, %v324_v40  ;;  %v2216_v2 = vmax.f32 %v2214_v24, %v2215_v50  ;;  %v2219_v6 = vmax.f32 %v2217_v32, %v2218_v37  ;;  %v2221_v28 = vld [vmem:[#allocation8_spill] sm:$0xff]  ;;  %v339_v57 = vmax.f32 %v337_v60, %v338_v4  ;;  %v2255_v59 = vld [vmem:[#allocation25_spill] sm:$0xff] }
  0x53   : > { %v2222_v7 = vmax.f32 %v2220_v3, %v2221_v28  ;;  %v319_v19 = vrot.slane %v318_v27, 2  ;;  %v332_v48 = vmax.f32 %v330_v0, %v331_v1  ;;  %v346_v53 = vmax.f32 %v344_v41, %v345_v58 }
  0x54   : > { %v351_v5 = vsel %vm315_vm0, %v2216_v2, -inf  ;;  %v358_v10 = vsel %vm315_vm0, %v2219_v6, -inf  ;;  %v326_v40 = vrot.slane %v325_v62, 2  ;;  %v340_v42 = vrot.slane %v339_v57, 2 }
  0x55   : > { %v365_v35 = vsel %vm315_vm0, %v2222_v7, -inf  ;;  %v352_v51 = vrot.slane %v351_v5, 4  ;;  %v359_v21 = vrot.slane %v358_v10, 4  ;;  %v320_v50 = vmax.f32 %v318_v27, %v319_v19 }
  0x56   : > { %v366_v24 = vrot.slane %v365_v35, 4  ;;  %v333_v2 = vrot.slane %v332_v48, 2  ;;  %v347_v20 = vrot.slane %v346_v53, 2  ;;  %v327_v37 = vmax.f32 %v325_v62, %v326_v40 }
  0x57   : > { %v353_v32 = vmax.f32 %v351_v5, %v352_v51  ;;  %v360_v6 = vmax.f32 %v358_v10, %v359_v21  ;;  %v321_v46 = vrot.slane %v320_v50, 1  ;;  %v341_v3 = vmax.f32 %v339_v57, %v340_v42 }
  0x58   : > { %v367_v44 = vmax.f32 %v365_v35, %v366_v24  ;;  %v334_v28 = vmax.f32 %v332_v48, %v333_v2  ;;  %v348_v7 = vmax.f32 %v346_v53, %v347_v20  ;;  %v328_v9 = vrot.slane %v327_v37, 1  ;;  %v2228_v20 = vld [vmem:[#allocation9_spill] sm:$0xff]  ;;  %v2229_v53 = vld [vmem:[#allocation12_spill] sm:$0xff]  ;;  %v2234_v2 = vld [vmem:[#allocation11_spill] sm:$0xff] }
  0x59   : > { %v354_v0 = vrot.slane %v353_v32, 2  ;;  %v361_v60 = vrot.slane %v360_v6, 2  ;;  %v1562_v1 = vmax.f32 %v320_v50, %v321_v46  ;;  %v342_v58 = vrot.slane %v341_v3, 1  ;;  %v2232_v24 = vld [vmem:[#allocation13_spill] sm:$0xff] }
  0x5a   : > { %v368_v41 = vrot.slane %v367_v44, 2  ;;  %v335_v4 = vrot.slane %v334_v28, 1  ;;  %v349_v27 = vrot.slane %v348_v7, 1  ;;  %v1564_v19 = vmax.f32 %v327_v37, %v328_v9  ;;  %v2231_v9 = vld [vmem:[#allocation10_spill] sm:$0xff] }
  0x5b   : > { %2223 = vst [vmem:[#allocation4_spill] sm:$0xff] %v1562_v1  ;;  %v355_v63 = vmax.f32 %v353_v32, %v354_v0  ;;  %v362_v62 = vmax.f32 %v360_v6, %v361_v60  ;;  %v1568_v10 = vmax.f32 %v341_v3, %v342_v58  ;;  %v2230_v35 = vmax.f32 %v2228_v20, %v2229_v53  ;;  %v2235_v37 = vld [vmem:[#allocation14_spill] sm:$0xff]  ;;  %v2238_v3 = vld [vmem:[#allocation19_spill] sm:$0xff]  ;;  %v2240_v60 = vld [vmem:[#allocation16_spill] sm:$0xff] }
  0x5c   : > { %2224 = vst [vmem:[#allocation2_spill] sm:$0xff] %v1564_v19  ;;  %v369_v5 = vmax.f32 %v367_v44, %v368_v41  ;;  %v1566_v21 = vmax.f32 %v334_v28, %v335_v4  ;;  %v1570_v42 = vmax.f32 %v348_v7, %v349_v27  ;;  %v2233_v50 = vmax.f32 %v2231_v9, %v2232_v24  ;;  %v2237_v28 = vld [vmem:[#allocation15_spill] sm:$0xff]  ;;  %v2241_v41 = vld [vmem:[#allocation20_spill] sm:$0xff] }
  0x5d   : > { %2226 = vst [vmem:[#allocation3_spill] sm:$0xff] %v1568_v10  ;;  %v372_v46 = vsel %vm315_vm0, %v2230_v35, -inf  ;;  %v356_v48 = vrot.slane %v355_v63, 1  ;;  %v363_v57 = vrot.slane %v362_v62, 1  ;;  %v2236_v32 = vmax.f32 %v2234_v2, %v2235_v37 }
  0x5e   : > { %2225 = vst [vmem:[#allocation5_spill] sm:$0xff] %v1566_v21  ;;  %2227 = vst [vmem:[#allocation6_spill] sm:$0xff] %v1570_v42  ;;  %v370_v40 = vrot.slane %v369_v5, 1  ;;  %v373_v51 = vrot.slane %v372_v46, 4  ;;  %v379_v44 = vsel %vm315_vm0, %v2233_v50, -inf  ;;  %v2239_v7 = vmax.f32 %v2237_v28, %v2238_v3  ;;  %v2247_v28 = vld [vmem:[#allocation21_spill] sm:$0xff] }
  0x5f   : > { %v386_v6 = vsel %vm315_vm0, %v2236_v32, -inf  ;;  %v2242_v4 = vmax.f32 %v2240_v60, %v2241_v41  ;;  %v1592_v27 = vmax.f32 %v355_v63, %v356_v48  ;;  %v1594_v20 = vmax.f32 %v362_v62, %v363_v57  ;;  %v2246_v32 = vld [vmem:[#allocation17_spill] sm:$0xff]  ;;  %v2249_v60 = vld [vmem:[#allocation18_spill] sm:$0xff]  ;;  %v2252_v62 = vld [vmem:[#allocation23_spill] sm:$0xff] }
  0x60   : > { %v393_v0 = vsel %vm315_vm0, %v2239_v7, -inf  ;;  %v1596_v53 = vmax.f32 %v369_v5, %v370_v40  ;;  %v374_v35 = vmax.f32 %v372_v46, %v373_v51  ;;  %v380_v9 = vrot.slane %v379_v44, 4  ;;  %v2250_v41 = vld [vmem:[#allocation22_spill] sm:$0xff]  ;;  %v2253_v48 = vld [vmem:[#allocation24_spill] sm:$0xff] }
  0x61   : > { %v400_v58 = vsel %vm315_vm0, %v2242_v4, -inf  ;;  %2243 = vst [vmem:[#allocation7_spill] sm:$0xff] %v1592_v27  ;;  %2244 = vst [vmem:[#allocation8_spill] sm:$0xff] %v1594_v20  ;;  %v387_v24 = vrot.slane %v386_v6, 4  ;;  %v394_v50 = vrot.slane %v393_v0, 4  ;;  %v2248_v3 = vmax.f32 %v2246_v32, %v2247_v28 }
  0x62   : > { %2245 = vst [vmem:[#allocation9_spill] sm:$0xff] %v1596_v53  ;;  %v401_v2 = vrot.slane %v400_v58, 4  ;;  %v375_v37 = vrot.slane %v374_v35, 2  ;;  %v2251_v4 = vmax.f32 %v2249_v60, %v2250_v41  ;;  %v2254_v5 = vmax.f32 %v2252_v62, %v2253_v48 }
  0x63   : > { %v407_v7 = vsel %vm315_vm0, %v2248_v3, -inf  ;;  %v381_v57 = vmax.f32 %v379_v44, %v380_v9  ;;  %v388_v40 = vmax.f32 %v386_v6, %v387_v24  ;;  %v395_v51 = vmax.f32 %v393_v0, %v394_v50 }
  0x64   : > { %v414_v63 = vsel %vm315_vm0, %v2251_v4, -inf  ;;  %v421_v46 = vsel %vm315_vm0, %v2254_v5, -inf  ;;  %v402_v53 = vmax.f32 %v400_v58, %v401_v2  ;;  %v376_v20 = vmax.f32 %v374_v35, %v375_v37 }
  0x65   : > { %v408_v27 = vrot.slane %v407_v7, 4  ;;  %v415_v42 = vrot.slane %v414_v63, 4  ;;  %v422_v32 = vrot.slane %v421_v46, 4  ;;  %v382_v28 = vrot.slane %v381_v57, 2 }
  0x66   : > { %v389_v3 = vrot.slane %v388_v40, 2  ;;  %v396_v10 = vrot.slane %v395_v51, 2  ;;  %v403_v21 = vrot.slane %v402_v53, 2  ;;  %v377_v60 = vrot.slane %v376_v20, 1 }
  0x67   : > { %v409_v41 = vmax.f32 %v407_v7, %v408_v27  ;;  %v416_v4 = vmax.f32 %v414_v63, %v415_v42  ;;  %v423_v19 = vmax.f32 %v421_v46, %v422_v32  ;;  %v383_v1 = vmax.f32 %v381_v57, %v382_v28  ;;  %v2256_v27 = vld [vmem:[#allocation28_spill] sm:$0xff]  ;;  %v2263_v32 = vld [vmem:[#allocation29_spill] sm:$0xff] }
  0x68   : > { %v390_v62 = vmax.f32 %v388_v40, %v389_v3  ;;  %v397_v48 = vmax.f32 %v395_v51, %v396_v10  ;;  %v404_v5 = vmax.f32 %v402_v53, %v403_v21  ;;  %v1610_v44 = vmax.f32 %v376_v20, %v377_v60  ;;  %v2262_v51 = vld [vmem:[#allocation26_spill] sm:$0xff] }
  0x69   : > { %v410_v6 = vrot.slane %v409_v41, 2  ;;  %v417_v0 = vrot.slane %v416_v4, 2  ;;  %v424_v58 = vrot.slane %v423_v19, 2  ;;  %v384_v35 = vrot.slane %v383_v1, 1  ;;  %v2266_v3 = vld [vmem:[#allocation30_spill] sm:$0xff] }
  0x6a   : > { %v391_v9 = vrot.slane %v390_v62, 1  ;;  %v398_v24 = vrot.slane %v397_v48, 1  ;;  %v405_v50 = vrot.slane %v404_v5, 1  ;;  %v2257_v42 = vmax.f32 %v2255_v59, %v2256_v27  ;;  %v2265_v59 = vld [vmem:[#allocation27_spill] sm:$0xff] }
  0x6b   : > { %v411_v2 = vmax.f32 %v409_v41, %v410_v6  ;;  %v418_v37 = vmax.f32 %v416_v4, %v417_v0  ;;  %v425_v54 = vmax.f32 %v423_v19, %v424_v58  ;;  %v1616_v63 = vmax.f32 %v383_v1, %v384_v35  ;;  %v2268_v41 = vld [vmem:[#allocation31_spill] sm:$0xff]  ;;  %v2272_v6 = vld [vmem:[#allocation36_spill] sm:$0xff] }
  0x6c   : > { %v428_v7 = vsel %vm315_vm0, %v2257_v42, -inf  ;;  %v1618_v21 = vmax.f32 %v390_v62, %v391_v9  ;;  %v1620_v10 = vmax.f32 %v397_v48, %v398_v24  ;;  %v1622_v20 = vmax.f32 %v404_v5, %v405_v50  ;;  %v2269_v4 = vld [vmem:[#allocation35_spill] sm:$0xff]  ;;  %v2271_v5 = vld [vmem:[#allocation32_spill] sm:$0xff] }
  0x6d   : > { %2258 = vst [vmem:[#allocation12_spill] sm:$0xff] %v1616_v63  ;;  %v412_v53 = vrot.slane %v411_v2, 1  ;;  %v419_v46 = vrot.slane %v418_v37, 1  ;;  %v426_v57 = vrot.slane %v425_v54, 1  ;;  %v429_v40 = vrot.slane %v428_v7, 4  ;;  %v2285_v63 = vld [vmem:[#allocation40_spill] sm:$0xff] }
  0x6e   : > { %2259 = vst [vmem:[#allocation10_spill] sm:$0xff] %v1618_v21  ;;  %2260 = vst [vmem:[#allocation13_spill] sm:$0xff] %v1620_v10  ;;  %v2264_v19 = vmax.f32 %v2262_v51, %v2263_v32  ;;  %v2267_v60 = vmax.f32 %v2265_v59, %v2266_v3  ;;  %v2270_v62 = vmax.f32 %v2268_v41, %v2269_v4  ;;  %v2277_v59 = vld [vmem:[#allocation33_spill] sm:$0xff]  ;;  %v2280_v4 = vld [vmem:[#allocation34_spill] sm:$0xff] }
  0x6f   : > { %2261 = vst [vmem:[#allocation11_spill] sm:$0xff] %v1622_v20  ;;  %v2273_v0 = vmax.f32 %v2271_v5, %v2272_v6  ;;  %v1640_v35 = vmax.f32 %v411_v2, %v412_v53  ;;  %v1642_v9 = vmax.f32 %v418_v37, %v419_v46  ;;  %v1644_v24 = vmax.f32 %v425_v54, %v426_v57  ;;  %v2278_v3 = vld [vmem:[#allocation37_spill] sm:$0xff]  ;;  %v2283_v37 = vld [vmem:[#allocation39_spill] sm:$0xff] }
  0x70   : > { %v435_v28 = vsel %vm315_vm0, %v2264_v19, -inf  ;;  %v442_v1 = vsel %vm315_vm0, %v2267_v60, -inf  ;;  %v449_v48 = vsel %vm315_vm0, %v2270_v62, -inf  ;;  %v430_v50 = vmax.f32 %v428_v7, %v429_v40  ;;  %v2281_v62 = vld [vmem:[#allocation38_spill] sm:$0xff] }
  0x71   : > { %v456_v58 = vsel %vm315_vm0, %v2273_v0, -inf  ;;  %2274 = vst [vmem:[#allocation14_spill] sm:$0xff] %v1640_v35  ;;  %2275 = vst [vmem:[#allocation15_spill] sm:$0xff] %v1642_v9  ;;  %v436_v27 = vrot.slane %v435_v28, 4  ;;  %v443_v42 = vrot.slane %v442_v1, 4  ;;  %v450_v51 = vrot.slane %v449_v48, 4 }
  0x72   : > { %2276 = vst [vmem:[#allocation19_spill] sm:$0xff] %v1644_v24  ;;  %v457_v32 = vrot.slane %v456_v58, 4  ;;  %v431_v19 = vrot.slane %v430_v50, 2  ;;  %v2279_v60 = vmax.f32 %v2277_v59, %v2278_v3  ;;  %v2282_v5 = vmax.f32 %v2280_v4, %v2281_v62 }
  0x73   : > { %v2284_v54 = vmax.f32 %v1163_v49, %v2283_v37  ;;  %v437_v53 = vmax.f32 %v435_v28, %v436_v27  ;;  %v444_v46 = vmax.f32 %v442_v1, %v443_v42  ;;  %v451_v57 = vmax.f32 %v449_v48, %v450_v51 }
  0x74   : > { %v463_v41 = vsel %vm315_vm0, %v2279_v60, -inf  ;;  %v470_v2 = vsel %vm315_vm0, %v2282_v5, -inf  ;;  %v458_v40 = vmax.f32 %v456_v58, %v457_v32  ;;  %v432_v6 = vmax.f32 %v430_v50, %v431_v19 }
  0x75   : > { %v477_v7 = vsel %vm315_vm0, %v2284_v54, -inf  ;;  %v464_v0 = vrot.slane %v463_v41, 4  ;;  %v471_v24 = vrot.slane %v470_v2, 4  ;;  %v438_v3 = vrot.slane %v437_v53, 2 }
  0x76   : > { %v478_v59 = vrot.slane %v477_v7, 4  ;;  %v445_v60 = vrot.slane %v444_v46, 2  ;;  %v452_v9 = vrot.slane %v451_v57, 2  ;;  %v459_v35 = vrot.slane %v458_v40, 2 }
  0x77   : > { %v433_v4 = vrot.slane %v432_v6, 1  ;;  %v465_v62 = vmax.f32 %v463_v41, %v464_v0  ;;  %v472_v5 = vmax.f32 %v470_v2, %v471_v24  ;;  %v439_v10 = vmax.f32 %v437_v53, %v438_v3  ;;  %v2286_v41 = vld [vmem:[#allocation43_spill] sm:$0xff]  ;;  %v2289_v0 = vld [vmem:[#allocation41_spill] sm:$0xff] }
  0x78   : > { %v479_v20 = vmax.f32 %v477_v7, %v478_v59  ;;  %v446_v49 = vmax.f32 %v444_v46, %v445_v60  ;;  %v453_v37 = vmax.f32 %v451_v57, %v452_v9  ;;  %v460_v54 = vmax.f32 %v458_v40, %v459_v35  ;;  %v2290_v59 = vld [vmem:[#allocation44_spill] sm:$0xff]  ;;  %v2293_v60 = vld [vmem:[#allocation45_spill] sm:$0xff] }
  0x79   : > { %v1658_v28 = vmax.f32 %v432_v6, %v433_v4  ;;  %v466_v1 = vrot.slane %v465_v62, 2  ;;  %v473_v48 = vrot.slane %v472_v5, 2  ;;  %v440_v50 = vrot.slane %v439_v10, 1 }
  0x7a   : > { %v480_v58 = vrot.slane %v479_v20, 2  ;;  %v447_v27 = vrot.slane %v446_v49, 1  ;;  %v454_v42 = vrot.slane %v453_v37, 1  ;;  %v461_v51 = vrot.slane %v460_v54, 1 }
  0x7b   : > { %v467_v32 = vmax.f32 %v465_v62, %v466_v1  ;;  %v474_v19 = vmax.f32 %v472_v5, %v473_v48  ;;  %v2287_v24 = vmax.f32 %v2285_v63, %v2286_v41  ;;  %v1664_v7 = vmax.f32 %v439_v10, %v440_v50  ;;  %v2292_v63 = vld [vmem:[#allocation42_spill] sm:$0xff]  ;;  %v2295_v62 = vld [vmem:[#allocation49_spill] sm:$0xff] }
  0x7c   : > { %v481_v21 = vmax.f32 %v479_v20, %v480_v58  ;;  %v1666_v35 = vmax.f32 %v446_v49, %v447_v27  ;;  %v1668_v9 = vmax.f32 %v453_v37, %v454_v42  ;;  %v1670_v53 = vmax.f32 %v460_v54, %v461_v51  ;;  %v2297_v37 = vld [vmem:[#allocation46_spill] sm:$0xff] }
  0x7d   : > { %v484_v2 = vsel %vm315_vm0, %v2287_v24, -inf  ;;  %v468_v46 = vrot.slane %v467_v32, 1  ;;  %v475_v57 = vrot.slane %v474_v19, 1  ;;  %v2291_v20 = vmax.f32 %v2289_v0, %v2290_v59  ;;  %v2298_v54 = vld [vmem:[#allocation50_spill] sm:$0xff] }
  0x7e   : > { %2288 = vst [vmem:[#allocation16_spill] sm:$0xff] %v1670_v53  ;;  %v482_v40 = vrot.slane %v481_v21, 1  ;;  %v485_v6 = vrot.slane %v484_v2, 4  ;;  %v2294_v4 = vmax.f32 %v2292_v63, %v2293_v60  ;;  %v2296_v5 = vmax.f32 %v1195_v61, %v2295_v62  ;;  %v2303_v61 = vld [vmem:[#allocation47_spill] sm:$0xff]  ;;  %v2307_v62 = vld [vmem:[#allocation52_spill] sm:$0xff] }
  0x7f   : > { %v491_v3 = vsel %vm315_vm0, %v2291_v20, -inf  ;;  %v2299_v1 = vmax.f32 %v2297_v37, %v2298_v54  ;;  %v1688_v58 = vmax.f32 %v467_v32, %v468_v46  ;;  %v1690_v50 = vmax.f32 %v474_v19, %v475_v57  ;;  %v2304_v20 = vld [vmem:[#allocation51_spill] sm:$0xff] }
  0x80   : > { %v498_v10 = vsel %vm315_vm0, %v2294_v4, -inf  ;;  %v505_v49 = vsel %vm315_vm0, %v2296_v5, -inf  ;;  %v1692_v27 = vmax.f32 %v481_v21, %v482_v40  ;;  %v486_v42 = vmax.f32 %v484_v2, %v485_v6  ;;  %v2306_v4 = vld [vmem:[#allocation48_spill] sm:$0xff] }
  0x81   : > { %v512_v48 = vsel %vm315_vm0, %v2299_v1, -inf  ;;  %2300 = vst [vmem:[#allocation20_spill] sm:$0xff] %v1688_v58  ;;  %2301 = vst [vmem:[#allocation17_spill] sm:$0xff] %v1690_v50  ;;  %v492_v51 = vrot.slane %v491_v3, 4  ;;  %v499_v41 = vrot.slane %v498_v10, 4  ;;  %v506_v24 = vrot.slane %v505_v49, 4 }
  0x82   : > { %2302 = vst [vmem:[#allocation21_spill] sm:$0xff] %v1692_v27  ;;  %v513_v0 = vrot.slane %v512_v48, 4  ;;  %v487_v59 = vrot.slane %v486_v42, 2  ;;  %v2305_v63 = vmax.f32 %v2303_v61, %v2304_v20  ;;  %v2308_v5 = vmax.f32 %v2306_v4, %v2307_v62 }
  0x83   : > { %v2309_v21 = vmax.f32 %v1227_v12, %v1230_v8  ;;  %v493_v2 = vmax.f32 %v491_v3, %v492_v51  ;;  %v500_v46 = vmax.f32 %v498_v10, %v499_v41  ;;  %v507_v57 = vmax.f32 %v505_v49, %v506_v24 }
  0x84   : > { %v519_v60 = vsel %vm315_vm0, %v2305_v63, -inf  ;;  %v526_v32 = vsel %vm315_vm0, %v2308_v5, -inf  ;;  %v514_v40 = vmax.f32 %v512_v48, %v513_v0  ;;  %v488_v6 = vmax.f32 %v486_v42, %v487_v59 }
  0x85   : > { %v533_v19 = vsel %vm315_vm0, %v2309_v21, -inf  ;;  %v520_v37 = vrot.slane %v519_v60, 4  ;;  %v527_v54 = vrot.slane %v526_v32, 4  ;;  %v494_v61 = vrot.slane %v493_v2, 2 }
  0x86   : > { %v534_v1 = vrot.slane %v533_v19, 4  ;;  %v501_v20 = vrot.slane %v500_v46, 2  ;;  %v508_v63 = vrot.slane %v507_v57, 2  ;;  %v515_v27 = vrot.slane %v514_v40, 2 }
  0x87   : > { %v489_v4 = vrot.slane %v488_v6, 1  ;;  %v521_v62 = vmax.f32 %v519_v60, %v520_v37  ;;  %v528_v5 = vmax.f32 %v526_v32, %v527_v54  ;;  %v495_v58 = vmax.f32 %v493_v2, %v494_v61  ;;  %v2311_v54 = vld [vmem:[#allocation54_spill] sm:$0xff] }
  0x88   : > { %v535_v50 = vmax.f32 %v533_v19, %v534_v1  ;;  %v502_v8 = vmax.f32 %v500_v46, %v501_v20  ;;  %v509_v12 = vmax.f32 %v507_v57, %v508_v63  ;;  %v516_v21 = vmax.f32 %v514_v40, %v515_v27 }
  0x89   : > { %v1706_v3 = vmax.f32 %v488_v6, %v489_v4  ;;  %v522_v10 = vrot.slane %v521_v62, 2  ;;  %v529_v49 = vrot.slane %v528_v5, 2  ;;  %v496_v42 = vrot.slane %v495_v58, 1 }
  0x8a   : > { %v536_v48 = vrot.slane %v535_v50, 2  ;;  %v503_v51 = vrot.slane %v502_v8, 1  ;;  %v510_v41 = vrot.slane %v509_v12, 1  ;;  %v517_v24 = vrot.slane %v516_v21, 1 }
  0x8b   : > { %v523_v0 = vmax.f32 %v521_v62, %v522_v10  ;;  %v530_v59 = vmax.f32 %v528_v5, %v529_v49  ;;  %v2310_v60 = vmax.f32 %v1233_v47, %v1242_v13  ;;  %v1712_v19 = vmax.f32 %v495_v58, %v496_v42  ;;  %v2313_v13 = vld [vmem:[#allocation53_spill] sm:$0xff]  ;;  %v2314_v47 = vld [vmem:[#allocation55_spill] sm:$0xff] }
  0x8c   : > { %v537_v53 = vmax.f32 %v535_v50, %v536_v48  ;;  %v1714_v27 = vmax.f32 %v502_v8, %v503_v51  ;;  %v1716_v2 = vmax.f32 %v509_v12, %v510_v41  ;;  %v1718_v46 = vmax.f32 %v516_v21, %v517_v24 }
  0x8d   : > { %v540_v32 = vsel %vm315_vm0, %v2310_v60, -inf  ;;  %v524_v57 = vrot.slane %v523_v0, 1  ;;  %v531_v40 = vrot.slane %v530_v59, 1  ;;  %v2312_v50 = vmax.f32 %v1236_v15, %v2311_v54 }
  0x8e   : > { %v538_v6 = vrot.slane %v537_v53, 1  ;;  %v541_v37 = vrot.slane %v540_v32, 4  ;;  %v2315_v61 = vmax.f32 %v2313_v13, %v2314_v47  ;;  %v2316_v20 = vmax.f32 %v1259_v16, %v1271_v18  ;;  %v2318_v16 = vld [vmem:[#allocation57_spill] sm:$0xff] }
  0x8f   : > { %v547_v1 = vsel %vm315_vm0, %v2312_v50, -inf  ;;  %v2317_v4 = vmax.f32 %v1262_v14, %v1274_v17  ;;  %v1736_v5 = vmax.f32 %v523_v0, %v524_v57  ;;  %v1738_v15 = vmax.f32 %v530_v59, %v531_v40  ;;  %v2320_v14 = vld [vmem:[#allocation56_spill] sm:$0xff]  ;;  %v2321_v17 = vld [vmem:[#allocation58_spill] sm:$0xff] }
  0x90   : > { %v554_v58 = vsel %vm315_vm0, %v2315_v61, -inf  ;;  %v561_v63 = vsel %vm315_vm0, %v2316_v20, -inf  ;;  %v1740_v8 = vmax.f32 %v537_v53, %v538_v6  ;;  %v542_v12 = vmax.f32 %v540_v32, %v541_v37 }
  0x91   : > { %v568_v62 = vsel %vm315_vm0, %v2317_v4, -inf  ;;  %v548_v21 = vrot.slane %v547_v1, 4  ;;  %v555_v10 = vrot.slane %v554_v58, 4  ;;  %v562_v49 = vrot.slane %v561_v63, 4 }
  0x92   : > { %v569_v48 = vrot.slane %v568_v62, 4  ;;  %v543_v42 = vrot.slane %v542_v12, 2  ;;  %v2319_v18 = vmax.f32 %v1265_v11, %v2318_v16  ;;  %v2322_v41 = vmax.f32 %v2320_v14, %v2321_v17 }
  0x93   : > { %v2323_v53 = vmax.f32 %v1291_v23, %v1294_v26  ;;  %v549_v59 = vmax.f32 %v547_v1, %v548_v21  ;;  %v556_v60 = vmax.f32 %v554_v58, %v555_v10  ;;  %v563_v32 = vmax.f32 %v561_v63, %v562_v49 }
  0x94   : > { %v575_v51 = vsel %vm315_vm0, %v2319_v18, -inf  ;;  %v582_v24 = vsel %vm315_vm0, %v2322_v41, -inf  ;;  %v570_v57 = vmax.f32 %v568_v62, %v569_v48  ;;  %v544_v40 = vmax.f32 %v542_v12, %v543_v42 }
  0x95   : > { %v589_v0 = vsel %vm315_vm0, %v2323_v53, -inf  ;;  %v576_v6 = vrot.slane %v575_v51, 4  ;;  %v583_v37 = vrot.slane %v582_v24, 4  ;;  %v550_v54 = vrot.slane %v549_v59, 2 }
  0x96   : > { %v590_v11 = vrot.slane %v589_v0, 4  ;;  %v557_v50 = vrot.slane %v556_v60, 2  ;;  %v564_v13 = vrot.slane %v563_v32, 2  ;;  %v571_v47 = vrot.slane %v570_v57, 2 }
  0x97   : > { %v545_v61 = vrot.slane %v544_v40, 1  ;;  %v577_v20 = vmax.f32 %v575_v51, %v576_v6  ;;  %v584_v4 = vmax.f32 %v582_v24, %v583_v37  ;;  %v551_v18 = vmax.f32 %v549_v59, %v550_v54  ;;  %v2325_v6 = vld [vmem:[#allocation60_spill] sm:$0xff] }
  0x98   : > { %v591_v16 = vmax.f32 %v589_v0, %v590_v11  ;;  %v558_v23 = vmax.f32 %v556_v60, %v557_v50  ;;  %v565_v26 = vmax.f32 %v563_v32, %v564_v13  ;;  %v572_v14 = vmax.f32 %v570_v57, %v571_v47 }
  0x99   : > { %v1754_v1 = vmax.f32 %v544_v40, %v545_v61  ;;  %v578_v58 = vrot.slane %v577_v20, 2  ;;  %v585_v63 = vrot.slane %v584_v4, 2  ;;  %v552_v12 = vrot.slane %v551_v18, 1 }
  0x9a   : > { %v592_v62 = vrot.slane %v591_v16, 2  ;;  %v559_v21 = vrot.slane %v558_v23, 1  ;;  %v566_v10 = vrot.slane %v565_v26, 1  ;;  %v573_v49 = vrot.slane %v572_v14, 1 }
  0x9b   : > { %v579_v48 = vmax.f32 %v577_v20, %v578_v58  ;;  %v586_v42 = vmax.f32 %v584_v4, %v585_v63  ;;  %v2324_v51 = vmax.f32 %v1297_v29, %v1306_v36  ;;  %v1760_v24 = vmax.f32 %v551_v18, %v552_v12  ;;  %v2327_v29 = vld [vmem:[#allocation59_spill] sm:$0xff]  ;;  %v2328_v36 = vld [vmem:[#allocation61_spill] sm:$0xff] }
  0x9c   : > { %v593_v17 = vmax.f32 %v591_v16, %v592_v62  ;;  %v1762_v53 = vmax.f32 %v558_v23, %v559_v21  ;;  %v1764_v0 = vmax.f32 %v565_v26, %v566_v10  ;;  %v1766_v59 = vmax.f32 %v572_v14, %v573_v49 }
  0x9d   : > { %v596_v41 = vsel %vm315_vm0, %v2324_v51, -inf  ;;  %v580_v60 = vrot.slane %v579_v48, 1  ;;  %v587_v32 = vrot.slane %v586_v42, 1  ;;  %v2326_v37 = vmax.f32 %v1300_v25, %v2325_v6 }
  0x9e   : > { %v594_v57 = vrot.slane %v593_v17, 1  ;;  %v597_v40 = vrot.slane %v596_v41, 4  ;;  %v2329_v54 = vmax.f32 %v2327_v29, %v2328_v36  ;;  %v2330_v13 = vmax.f32 %v1323_v31, %v1335_v33  ;;  %v2332_v31 = vld [vmem:[#allocation63_spill] sm:$0xff] }
  0x9f   : > { %v603_v11 = vsel %vm315_vm0, %v2326_v37, -inf  ;;  %v2331_v61 = vmax.f32 %v1326_v30, %v1338_v43  ;;  %v1784_v4 = vmax.f32 %v579_v48, %v580_v60  ;;  %v1786_v25 = vmax.f32 %v586_v42, %v587_v32  ;;  %v2334_v30 = vld [vmem:[#allocation62_spill] sm:$0xff]  ;;  %v2335_v43 = vld [vmem:[#allocation64_spill] sm:$0xff] }
  0xa0   : > { %v610_v50 = vsel %vm315_vm0, %v2329_v54, -inf  ;;  %v617_v47 = vsel %vm315_vm0, %v2330_v13, -inf  ;;  %v1788_v16 = vmax.f32 %v593_v17, %v594_v57  ;;  %v598_v18 = vmax.f32 %v596_v41, %v597_v40 }
  0xa1   : > { %v624_v20 = vsel %vm315_vm0, %v2331_v61, -inf  ;;  %v604_v23 = vrot.slane %v603_v11, 4  ;;  %v611_v26 = vrot.slane %v610_v50, 4  ;;  %v618_v14 = vrot.slane %v617_v47, 4 }
  0xa2   : > { %v625_v58 = vrot.slane %v624_v20, 4  ;;  %v599_v63 = vrot.slane %v598_v18, 2  ;;  %v2333_v33 = vmax.f32 %v1329_v34, %v2332_v31  ;;  %v2336_v12 = vmax.f32 %v2334_v30, %v2335_v43 }
  0xa3   : > { %v2337_v10 = vmax.f32 %v1355_v39, %v1358_v38  ;;  %v605_v48 = vmax.f32 %v603_v11, %v604_v23  ;;  %v612_v42 = vmax.f32 %v610_v50, %v611_v26  ;;  %v619_v17 = vmax.f32 %v617_v47, %v618_v14 }
  0xa4   : > { %v631_v62 = vsel %vm315_vm0, %v2333_v33, -inf  ;;  %v638_v21 = vsel %vm315_vm0, %v2336_v12, -inf  ;;  %v626_v51 = vmax.f32 %v624_v20, %v625_v58  ;;  %v600_v41 = vmax.f32 %v598_v18, %v599_v63 }
  0xa5   : > { %v645_v49 = vsel %vm315_vm0, %v2337_v10, -inf  ;;  %v632_v60 = vrot.slane %v631_v62, 4  ;;  %v639_v32 = vrot.slane %v638_v21, 4  ;;  %v606_v57 = vrot.slane %v605_v48, 2 }
  0xa6   : > { %v646_v34 = vrot.slane %v645_v49, 4  ;;  %v613_v40 = vrot.slane %v612_v42, 2  ;;  %v620_v6 = vrot.slane %v619_v17, 2  ;;  %v627_v37 = vrot.slane %v626_v51, 2 }
  0xa7   : > { %v601_v29 = vrot.slane %v600_v41, 1  ;;  %v633_v36 = vmax.f32 %v631_v62, %v632_v60  ;;  %v640_v54 = vmax.f32 %v638_v21, %v639_v32  ;;  %v607_v61 = vmax.f32 %v605_v48, %v606_v57 }
  0xa8   : > { %v647_v13 = vmax.f32 %v645_v49, %v646_v34  ;;  %v614_v38 = vmax.f32 %v612_v42, %v613_v40  ;;  %v621_v39 = vmax.f32 %v619_v17, %v620_v6  ;;  %v628_v31 = vmax.f32 %v626_v51, %v627_v37  ;;  %v2339_v51 = vld [vmem:[#allocation65_spill] sm:$0xff]  ;;  %v2346_v37 = vld [vmem:[#allocation72_spill] sm:$0xff] }
  0xa9   : > { %v1802_v11 = vmax.f32 %v600_v41, %v601_v29  ;;  %v634_v50 = vrot.slane %v633_v36, 2  ;;  %v641_v47 = vrot.slane %v640_v54, 2  ;;  %v608_v18 = vrot.slane %v607_v61, 1  ;;  %v2340_v41 = vld [vmem:[#allocation69_spill] sm:$0xff] }
  0xaa   : > { %v648_v20 = vrot.slane %v647_v13, 2  ;;  %v615_v23 = vrot.slane %v614_v38, 1  ;;  %v622_v26 = vrot.slane %v621_v39, 1  ;;  %v629_v14 = vrot.slane %v628_v31, 1 }
  0xab   : > { %v635_v58 = vmax.f32 %v633_v36, %v634_v50  ;;  %v642_v63 = vmax.f32 %v640_v54, %v641_v47  ;;  %v2338_v62 = vmax.f32 %v1361_v22, %v1370_v45  ;;  %v1808_v43 = vmax.f32 %v607_v61, %v608_v18  ;;  %v2342_v22 = vld [vmem:[#allocation66_spill] sm:$0xff] }
  0xac   : > { %v649_v33 = vmax.f32 %v647_v13, %v648_v20  ;;  %v1810_v12 = vmax.f32 %v614_v38, %v615_v23  ;;  %v1812_v21 = vmax.f32 %v621_v39, %v622_v26  ;;  %v1814_v10 = vmax.f32 %v628_v31, %v629_v14  ;;  %v2343_v45 = vld [vmem:[#allocation70_spill] sm:$0xff] }
  0xad   : > { %v652_v30 = vsel %vm315_vm0, %v2338_v62, -inf  ;;  %v636_v49 = vrot.slane %v635_v58, 1  ;;  %v643_v48 = vrot.slane %v642_v63, 1  ;;  %v2341_v60 = vmax.f32 %v2339_v51, %v2340_v41  ;;  %v2355_v26 = vld [vmem:[#allocation74_spill] sm:$0xff]  ;;  %v2358_v62 = vld [vmem:[#allocation75_spill] sm:$0xff] }
  0xae   : > { %v650_v42 = vrot.slane %v649_v33, 1  ;;  %v653_v17 = vrot.slane %v652_v30, 4  ;;  %v2344_v34 = vmax.f32 %v2342_v22, %v2343_v45  ;;  %v2345_v40 = vmax.f32 %v1381_v55, %v1399_v56  ;;  %v2351_v55 = vld [vmem:[#allocation67_spill] sm:$0xff]  ;;  %v2352_v56 = vld [vmem:[#allocation73_spill] sm:$0xff] }
  0xaf   : > { %v659_v32 = vsel %vm315_vm0, %v2341_v60, -inf  ;;  %v2347_v29 = vmax.f32 %v1384_v52, %v2346_v37  ;;  %v1832_v54 = vmax.f32 %v635_v58, %v636_v49  ;;  %v1834_v13 = vmax.f32 %v642_v63, %v643_v48  ;;  %v2354_v52 = vld [vmem:[#allocation68_spill] sm:$0xff]  ;;  %v2357_v63 = vld [vmem:[#allocation71_spill] sm:$0xff] }
  0xb0   : > { %v666_v57 = vsel %vm315_vm0, %v2344_v34, -inf  ;;  %v673_v6 = vsel %vm315_vm0, %v2345_v40, -inf  ;;  %v1836_v61 = vmax.f32 %v649_v33, %v650_v42  ;;  %v654_v38 = vmax.f32 %v652_v30, %v653_v17 }
  0xb1   : > { %v680_v36 = vsel %vm315_vm0, %v2347_v29, -inf  ;;  %2348 = vst [vmem:[#allocation18_spill] sm:$0xff] %v1832_v54  ;;  %2349 = vst [vmem:[#allocation22_spill] sm:$0xff] %v1834_v13  ;;  %v660_v39 = vrot.slane %v659_v32, 4  ;;  %v667_v31 = vrot.slane %v666_v57, 4  ;;  %v674_v50 = vrot.slane %v673_v6, 4 }
  0xb2   : > { %2350 = vst [vmem:[#allocation23_spill] sm:$0xff] %v1836_v61  ;;  %v681_v47 = vrot.slane %v680_v36, 4  ;;  %v655_v20 = vrot.slane %v654_v38, 2  ;;  %v2353_v18 = vmax.f32 %v2351_v55, %v2352_v56  ;;  %v2356_v14 = vmax.f32 %v2354_v52, %v2355_v26 }
  0xb3   : > { %v2359_v33 = vmax.f32 %v2357_v63, %v2358_v62  ;;  %v661_v49 = vmax.f32 %v659_v32, %v660_v39  ;;  %v668_v48 = vmax.f32 %v666_v57, %v667_v31  ;;  %v675_v42 = vmax.f32 %v673_v6, %v674_v50 }
  0xb4   : > { %v687_v23 = vsel %vm315_vm0, %v2353_v18, -inf  ;;  %v694_v58 = vsel %vm315_vm0, %v2356_v14, -inf  ;;  %v682_v17 = vmax.f32 %v680_v36, %v681_v47  ;;  %v656_v51 = vmax.f32 %v654_v38, %v655_v20 }
  0xb5   : > { %v701_v30 = vsel %vm315_vm0, %v2359_v33, -inf  ;;  %v688_v41 = vrot.slane %v687_v23, 4  ;;  %v695_v60 = vrot.slane %v694_v58, 4  ;;  %v662_v45 = vrot.slane %v661_v49, 2  ;;  %v2360_v33 = vld [vmem:[#allocation76_spill] sm:$0xff] }
  0xb6   : > { %v702_v22 = vrot.slane %v701_v30, 4  ;;  %v669_v34 = vrot.slane %v668_v48, 2  ;;  %v676_v40 = vrot.slane %v675_v42, 2  ;;  %v683_v37 = vrot.slane %v682_v17, 2 }
  0xb7   : > { %v657_v29 = vrot.slane %v656_v51, 1  ;;  %v689_v55 = vmax.f32 %v687_v23, %v688_v41  ;;  %v696_v56 = vmax.f32 %v694_v58, %v695_v60  ;;  %v663_v52 = vmax.f32 %v661_v49, %v662_v45  ;;  %v2361_v23 = vld [vmem:[#allocation84_spill] sm:$0xff]  ;;  %v2364_v45 = vld [vmem:[#allocation77_spill] sm:$0xff] }
  0xb8   : > { %v703_v18 = vmax.f32 %v701_v30, %v702_v22  ;;  %v670_v26 = vmax.f32 %v668_v48, %v669_v34  ;;  %v677_v14 = vmax.f32 %v675_v42, %v676_v40  ;;  %v684_v63 = vmax.f32 %v682_v17, %v683_v37  ;;  %v2365_v34 = vld [vmem:[#allocation85_spill] sm:$0xff] }
  0xb9   : > { %v1850_v32 = vmax.f32 %v656_v51, %v657_v29  ;;  %v690_v57 = vrot.slane %v689_v55, 2  ;;  %v697_v6 = vrot.slane %v696_v56, 2  ;;  %v664_v38 = vrot.slane %v663_v52, 1  ;;  %v2367_v29 = vld [vmem:[#allocation78_spill] sm:$0xff] }
  0xba   : > { %v704_v36 = vrot.slane %v703_v18, 2  ;;  %v671_v39 = vrot.slane %v670_v26, 1  ;;  %v678_v31 = vrot.slane %v677_v14, 1  ;;  %v685_v50 = vrot.slane %v684_v63, 1 }
  0xbb   : > { %v691_v47 = vmax.f32 %v689_v55, %v690_v57  ;;  %v698_v20 = vmax.f32 %v696_v56, %v697_v6  ;;  %v2362_v58 = vmax.f32 %v2360_v33, %v2361_v23  ;;  %v1856_v49 = vmax.f32 %v663_v52, %v664_v38  ;;  %v2368_v55 = vld [vmem:[#allocation86_spill] sm:$0xff]  ;;  %v2370_v52 = vld [vmem:[#allocation79_spill] sm:$0xff]  ;;  %v2373_v57 = vld [vmem:[#allocation80_spill] sm:$0xff] }
  0xbc   : > { %v705_v62 = vmax.f32 %v703_v18, %v704_v36  ;;  %v1858_v48 = vmax.f32 %v670_v26, %v671_v39  ;;  %v1860_v42 = vmax.f32 %v677_v14, %v678_v31  ;;  %v1862_v17 = vmax.f32 %v684_v63, %v685_v50  ;;  %v2371_v26 = vld [vmem:[#allocation87_spill] sm:$0xff]  ;;  %v2374_v6 = vld [vmem:[#allocation88_spill] sm:$0xff] }
  0xbd   : > { %v708_v30 = vsel %vm315_vm0, %v2362_v58, -inf  ;;  %v692_v51 = vrot.slane %v691_v47, 1  ;;  %v699_v41 = vrot.slane %v698_v20, 1  ;;  %v2366_v40 = vmax.f32 %v2364_v45, %v2365_v34 }
  0xbe   : > { %2363 = vst [vmem:[#allocation24_spill] sm:$0xff] %v1862_v17  ;;  %v706_v60 = vrot.slane %v705_v62, 1  ;;  %v709_v22 = vrot.slane %v708_v30, 4  ;;  %v2369_v56 = vmax.f32 %v2367_v29, %v2368_v55  ;;  %v2372_v14 = vmax.f32 %v2370_v52, %v2371_v26  ;;  %v2379_v29 = vld [vmem:[#allocation81_spill] sm:$0xff]  ;;  %v2382_v26 = vld [vmem:[#allocation82_spill] sm:$0xff] }
  0xbf   : > { %v715_v37 = vsel %vm315_vm0, %v2366_v40, -inf  ;;  %v2375_v36 = vmax.f32 %v2373_v57, %v2374_v6  ;;  %v1880_v39 = vmax.f32 %v691_v47, %v692_v51  ;;  %v1882_v31 = vmax.f32 %v698_v20, %v699_v41  ;;  %v2380_v55 = vld [vmem:[#allocation89_spill] sm:$0xff]  ;;  %v2385_v20 = vld [vmem:[#allocation83_spill] sm:$0xff] }
  0xc0   : > { %v722_v18 = vsel %vm315_vm0, %v2369_v56, -inf  ;;  %v729_v63 = vsel %vm315_vm0, %v2372_v14, -inf  ;;  %v1884_v50 = vmax.f32 %v705_v62, %v706_v60  ;;  %v710_v33 = vmax.f32 %v708_v30, %v709_v22  ;;  %v2383_v14 = vld [vmem:[#allocation90_spill] sm:$0xff]  ;;  %v2386_v51 = vld [vmem:[#allocation91_spill] sm:$0xff] }
  0xc1   : > { %v736_v38 = vsel %vm315_vm0, %v2375_v36, -inf  ;;  %2376 = vst [vmem:[#allocation25_spill] sm:$0xff] %v1880_v39  ;;  %2377 = vst [vmem:[#allocation28_spill] sm:$0xff] %v1882_v31  ;;  %v716_v23 = vrot.slane %v715_v37, 4  ;;  %v723_v58 = vrot.slane %v722_v18, 4  ;;  %v730_v45 = vrot.slane %v729_v63, 4 }
  0xc2   : > { %2378 = vst [vmem:[#allocation26_spill] sm:$0xff] %v1884_v50  ;;  %v737_v34 = vrot.slane %v736_v38, 4  ;;  %v711_v40 = vrot.slane %v710_v33, 2  ;;  %v2381_v56 = vmax.f32 %v2379_v29, %v2380_v55  ;;  %v2384_v57 = vmax.f32 %v2382_v26, %v2383_v14 }
  0xc3   : > { %v2387_v62 = vmax.f32 %v2385_v20, %v2386_v51  ;;  %v717_v41 = vmax.f32 %v715_v37, %v716_v23  ;;  %v724_v60 = vmax.f32 %v722_v18, %v723_v58  ;;  %v731_v22 = vmax.f32 %v729_v63, %v730_v45 }
  0xc4   : > { %v743_v52 = vsel %vm315_vm0, %v2381_v56, -inf  ;;  %v750_v47 = vsel %vm315_vm0, %v2384_v57, -inf  ;;  %v738_v6 = vmax.f32 %v736_v38, %v737_v34  ;;  %v712_v36 = vmax.f32 %v710_v33, %v711_v40 }
  0xc5   : > { %v757_v30 = vsel %vm315_vm0, %v2387_v62, -inf  ;;  %v744_v50 = vrot.slane %v743_v52, 4  ;;  %v751_v31 = vrot.slane %v750_v47, 4  ;;  %v718_v55 = vrot.slane %v717_v41, 2 }
  0xc6   : > { %v758_v29 = vrot.slane %v757_v30, 4  ;;  %v725_v56 = vrot.slane %v724_v60, 2  ;;  %v732_v61 = vrot.slane %v731_v22, 2  ;;  %v739_v39 = vrot.slane %v738_v6, 2 }
  0xc7   : > { %v713_v26 = vrot.slane %v712_v36, 1  ;;  %v745_v14 = vmax.f32 %v743_v52, %v744_v50  ;;  %v752_v57 = vmax.f32 %v750_v47, %v751_v31  ;;  %v719_v17 = vmax.f32 %v717_v41, %v718_v55  ;;  %v2388_v41 = vld [vmem:[#allocation4_spill] sm:$0xff]  ;;  %v2391_v55 = vld [vmem:[#allocation3_spill] sm:$0xff] }
  0xc8   : > { %v759_v13 = vmax.f32 %v757_v30, %v758_v29  ;;  %v726_v20 = vmax.f32 %v724_v60, %v725_v56  ;;  %v733_v51 = vmax.f32 %v731_v22, %v732_v61  ;;  %v740_v62 = vmax.f32 %v738_v6, %v739_v39  ;;  %v2389_v60 = vld [vmem:[#allocation2_spill] sm:$0xff] }
  0xc9   : > { %v1898_v37 = vmax.f32 %v712_v36, %v713_v26  ;;  %v746_v18 = vrot.slane %v745_v14, 2  ;;  %v753_v63 = vrot.slane %v752_v57, 2  ;;  %v720_v33 = vrot.slane %v719_v17, 1  ;;  %v2392_v26 = vld [vmem:[#allocation12_spill] sm:$0xff] }
  0xca   : > { %v760_v38 = vrot.slane %v759_v13, 2  ;;  %v727_v23 = vrot.slane %v726_v20, 1  ;;  %v734_v58 = vrot.slane %v733_v51, 1  ;;  %v741_v45 = vrot.slane %v740_v62, 1 }
  0xcb   : > { %v747_v34 = vmax.f32 %v745_v14, %v746_v18  ;;  %v754_v40 = vmax.f32 %v752_v57, %v753_v63  ;;  %v721_v50 = vmax.f32 %v719_v17, %v720_v33  ;;  %v829_v22 = vsel %vm828_vm1, %v2389_v60, %v2388_v41  ;;  %v2390_v17 = vld [vmem:[#allocation5_spill] sm:$0xff]  ;;  %v2393_v57 = vld [vmem:[#allocation6_spill] sm:$0xff]  ;;  %v2395_v63 = vld [vmem:[#allocation7_spill] sm:$0xff] }
  0xcc   : > { %v761_v54 = vmax.f32 %v759_v13, %v760_v38  ;;  %v728_v31 = vmax.f32 %v726_v20, %v727_v23  ;;  %v735_v52 = vmax.f32 %v733_v51, %v734_v58  ;;  %v1900_v47 = vmax.f32 %v740_v62, %v741_v45  ;;  %v2394_v51 = vld [vmem:[#allocation10_spill] sm:$0xff]  ;;  %v2396_v33 = vld [vmem:[#allocation13_spill] sm:$0xff]  ;;  %v2397_v45 = vld [vmem:[#allocation8_spill] sm:$0xff] }
  0xcd   : > { %v748_v61 = vrot.slane %v747_v34, 1  ;;  %v755_v39 = vrot.slane %v754_v40, 1  ;;  %v831_v29 = vsel %vm830_vm2, %v2390_v17, %v829_v22  ;;  %v842_v14 = vsel %vm828_vm1, %v2392_v26, %v1610_v44  ;;  %v2402_v60 = vld [vmem:[#allocation15_spill] sm:$0xff]  ;;  %v2403_v17 = vld [vmem:[#allocation20_spill] sm:$0xff]  ;;  %v2405_v26 = vld [vmem:[#allocation17_spill] sm:$0xff] }
  0xce   : > { %v762_v30 = vrot.slane %v761_v54, 1  ;;  %v833_v56 = vsel %vm832_vm3, %v2391_v55, %v831_v29  ;;  %v843_v62 = vsel %vm830_vm2, %v2394_v51, %v842_v14  ;;  %v856_v18 = vsel %vm828_vm1, %v1712_v19, %v1706_v3  ;;  %v2404_v55 = vld [vmem:[#allocation19_spill] sm:$0xff] }
  0xcf   : > { %v749_v6 = vmax.f32 %v747_v34, %v748_v61  ;;  %v756_v36 = vmax.f32 %v754_v40, %v755_v39  ;;  %v835_v20 = vsel %vm834_vm4, %v2393_v57, %v833_v56  ;;  %v844_v44 = vsel %vm832_vm3, %v2396_v33, %v843_v62  ;;  %v2399_v40 = vld [vmem:[#allocation9_spill] sm:$0xff] }
  0xd0   : > { %v1905_v13 = vmax.f32 %v761_v54, %v762_v30  ;;  %v849_v54 = vsel %vm828_vm1, %v1664_v7, %v1658_v28  ;;  %v837_v38 = vsel %vm836_vm5, %v2395_v63, %v835_v20  ;;  %v857_v58 = vsel %vm830_vm2, %v1714_v27, %v856_v18  ;;  %v2398_v28 = vld [vmem:[#allocation11_spill] sm:$0xff]  ;;  %v2401_v27 = vld [vmem:[#allocation16_spill] sm:$0xff]  ;;  %v2406_v20 = vld [vmem:[#allocation21_spill] sm:$0xff] }
  0xd1   : > { %v850_v23 = vsel %vm830_vm2, %v1666_v35, %v849_v54  ;;  %v839_v34 = vsel %vm838_vm6, %v2397_v45, %v837_v38  ;;  %v845_v7 = vsel %vm834_vm4, %v2398_v28, %v844_v44  ;;  %v858_v19 = vsel %vm832_vm3, %v1716_v2, %v857_v58  ;;  %v2400_v35 = vld [vmem:[#allocation14_spill] sm:$0xff]  ;;  %v2410_v18 = vld [vmem:[#allocation25_spill] sm:$0xff]  ;;  %v2411_v63 = vld [vmem:[#allocation23_spill] sm:$0xff] }
  0xd2   : > { %v851_v3 = vsel %vm832_vm3, %v1668_v9, %v850_v23  ;;  %v841_v61 = vsel %vm840_vm7, %v2399_v40, %v839_v34  ;;  %v846_v39 = vsel %vm836_vm5, %v2400_v35, %v845_v7  ;;  %v859_v41 = vsel %vm834_vm4, %v1718_v46, %v858_v19  ;;  %v2412_v38 = vld [vmem:[#allocation28_spill] sm:$0xff] }
  0xd3   : > { %v852_v30 = vsel %vm834_vm4, %v2401_v27, %v851_v3  ;;  %v847_v22 = vsel %vm838_vm6, %v2402_v60, %v846_v39  ;;  %v860_v2 = vsel %vm836_vm5, %v1736_v5, %v859_v41  ;;  %v863_v29 = vsel %vm828_vm1, %v1760_v24, %v1754_v1  ;;  %900 = vst.msk [vmem:[%s121_s16] sm:$0xff] %vm899_vm8, %v841_v61 }
  0xd4   : > { %v853_v9 = vsel %vm836_vm5, %v2403_v17, %v852_v30  ;;  %v848_v56 = vsel %vm840_vm7, %v2404_v55, %v847_v22  ;;  %v861_v46 = vsel %vm838_vm6, %v1738_v15, %v860_v2  ;;  %v864_v57 = vsel %vm830_vm2, %v1762_v53, %v863_v29 }
  0xd5   : > { %v854_v14 = vsel %vm838_vm6, %v2405_v26, %v853_v9  ;;  %v862_v51 = vsel %vm840_vm7, %v1740_v8, %v861_v46  ;;  %v865_v1 = vsel %vm832_vm3, %v1764_v0, %v864_v57  ;;  %v870_v24 = vsel %vm828_vm1, %v1808_v43, %v1802_v11  ;;  %901 = vst.msk [vmem:[%s121_s16 + $0x8] sm:$0xff] %vm899_vm8, %v848_v56 }
  0xd6   : > { %v855_v5 = vsel %vm840_vm7, %v2406_v20, %v854_v14  ;;  %v866_v15 = vsel %vm834_vm4, %v1766_v59, %v865_v1  ;;  %v871_v53 = vsel %vm830_vm2, %v1810_v12, %v870_v24  ;;  %v877_v62 = vsel %vm828_vm1, %v1856_v49, %v1850_v32  ;;  %v2407_v49 = vld [vmem:[#allocation18_spill] sm:$0xff]  ;;  %903 = vst.msk [vmem:[%s121_s16 + $0x18] sm:$0xff] %vm899_vm8, %v862_v51 }
  0xd7   : > { %v884_v8 = vsel %vm828_vm1, %v721_v50, %v1898_v37  ;;  %v867_v0 = vsel %vm836_vm5, %v1784_v4, %v866_v15  ;;  %v872_v54 = vsel %vm832_vm3, %v1812_v21, %v871_v53  ;;  %v878_v11 = vsel %vm830_vm2, %v1858_v48, %v877_v62  ;;  %v2408_v37 = vld [vmem:[#allocation24_spill] sm:$0xff]  ;;  %902 = vst.msk [vmem:[%s121_s16 + $0x10] sm:$0xff] %vm899_vm8, %v855_v5 }
  0xd8   : > { %v885_v59 = vsel %vm830_vm2, %v728_v31, %v884_v8  ;;  %v868_v43 = vsel %vm838_vm6, %v1786_v25, %v867_v0  ;;  %v873_v12 = vsel %vm834_vm4, %v1814_v10, %v872_v54  ;;  %v879_v4 = vsel %vm832_vm3, %v1860_v42, %v878_v11  ;;  %v2409_v31 = vld [vmem:[#allocation22_spill] sm:$0xff] }
  0xd9   : > { %v886_v21 = vsel %vm832_vm3, %v735_v52, %v885_v59  ;;  %v869_v32 = vsel %vm840_vm7, %v1788_v16, %v868_v43  ;;  %v874_v48 = vsel %vm836_vm5, %v2407_v49, %v873_v12  ;;  %v880_v50 = vsel %vm834_vm4, %v2408_v37, %v879_v4 }
  0xda   : > { %v887_v25 = vsel %vm834_vm4, %v1900_v47, %v886_v21  ;;  %v875_v10 = vsel %vm838_vm6, %v2409_v31, %v874_v48  ;;  %v881_v42 = vsel %vm836_vm5, %v2410_v18, %v880_v50  ;;  %904 = vst.msk [vmem:[%s121_s16 + $0x20] sm:$0xff] %vm899_vm8, %v869_v32  ;;  %v2413_v47 = vld [vmem:[#allocation26_spill] sm:$0xff] }
  0xdb   : > { %v888_v52 = vsel %vm836_vm5, %v749_v6, %v887_v25  ;;  %v876_v16 = vsel %vm840_vm7, %v2411_v63, %v875_v10  ;;  %v882_v33 = vsel %vm838_vm6, %v2412_v38, %v881_v42 }
  0xdc   : > { %v889_v44 = vsel %vm838_vm6, %v756_v36, %v888_v52  ;;  %v883_v23 = vsel %vm840_vm7, %v2413_v47, %v882_v33  ;;  %905 = vst.msk [vmem:[%s121_s16 + $0x28] sm:$0xff] %vm899_vm8, %v876_v16 }
  0xdd   : > { %v890_v6 = vsel %vm840_vm7, %v1905_v13, %v889_v44  ;;  %906 = vst.msk [vmem:[%s121_s16 + $0x30] sm:$0xff] %vm899_vm8, %v883_v23 }
  0xde   : > { %907 = vst.msk [vmem:[%s121_s16 + $0x38] sm:$0xff] %vm899_vm8, %v890_v6 }
  0xdf PF: > { %s11_s6 = sadd.s32 1, %s990_s6  }
  0xe0   : > { %p8_p4 = scmp.ge.s32.totalorder %s11_s6, 4  }
  0xe2   :  { %10 = sbr.rel (!%p8_p4) target bundleno = 1 (0x1), region = 54 }

// kernel: encoder_forward.12
= control target key start
LH: loop header
LB: loop body
LE: loop exit
PB: predicated region body
PF: predicated region fallthrough
CT: control target
= control target key end

     0   :  { %s418_s6 = smov 0   ;;  %s511_s0 = inlined_call_operand.vmem [shape: f32[8,2,5,2,16], index: 0, kind: input, shape index: {}]   ;;  %s512_s1 = inlined_call_operand.vmem [shape: f32[8,4,16], index: 1, kind: output, shape index: {}]  }
   0x1 LB: > { %s380_s7 = sadd.s32 4294967295, %s406_s6   ;;  %p384_p0 = scmp.ge.s32.totalorder %s406_s6, 1  ;;  %s406_s6 = sphi %s418_s6, %s11_s6  }
   0x2   : > { %p89_p1 = scmp.lt.s32.totalorder %s406_s6, 3 }
   0x4   : > { %p90_p2 = pnand %p384_p0, %p89_p1 }
   0x5   : > { %s385_s8 = sshll.u32 (!%p90_p2), %s380_s7, 2  ;;  %vm171_vm0 = vcmask (!%p90_p2), 123904   ;;  %vm300_vm1 = vcmask (!%p90_p2), 1041409   ;;  %vm302_vm2 = vcmask (!%p90_p2), 1042434   ;;  %vm304_vm3 = vcmask (!%p90_p2), 1043459  }
   0x6   : > { %93 = sbr.rel (%p90_p2) target bundleno = 62 (0x3e), region = 24  ;;  %p111_p3 = scmp.lt.s32.totalorder (!%p90_p2), %s385_s8, 7  ;;  %vm319_vm4 = vcmask (!%p90_p2), 125952  }
   0xd   : > { %s514_s8 = smov (!%p111_p3, %s385_s8), 7 }
   0xe   : > { %s391_s9 = smul.u32 20, %s514_s8  ;;  %s388_s13 = sshll.u32 %s514_s8, 2 }
   0xf   : > { %s468_s16 = scalar_lea.vmem %s512_s1, %s388_s13 }
  0x10   : > { %s432_s12 = scalar_lea.vmem %s511_s0, %s391_s9 }
  0x11   : > { %v123_v0 = vld [vmem:[%s432_s12] sm:$0x3]  ;;  %v124_v1 = vld [vmem:[%s432_s12 + $0x2] sm:$0x3]  ;;  %v125_v2 = vld [vmem:[%s432_s12 + $0x4] sm:$0x3] }
  0x12   : > { %v126_v3 = vld [vmem:[%s432_s12 + $0x6] sm:$0x3]  ;;  %v127_v4 = vld [vmem:[%s432_s12 + $0xa] sm:$0x3]  ;;  %v128_v5 = vld [vmem:[%s432_s12 + $0xc] sm:$0x3] }
  0x13   : > { %v129_v6 = vld [vmem:[%s432_s12 + $0xe] sm:$0x3]  ;;  %v130_v7 = vld [vmem:[%s432_s12 + $0x10] sm:$0x3]  ;;  %v155_v8 = vmax.f32 %v123_v0, %v127_v4  ;;  %v156_v9 = vmax.f32 %v124_v1, %v128_v5  ;;  %v131_v10 = vld [vmem:[%s432_s12 + $0x14] sm:$0x3] }
  0x14   : > { %v157_v11 = vmax.f32 %v125_v2, %v129_v6  ;;  %v158_v12 = vmax.f32 %v126_v3, %v130_v7  ;;  %v132_v13 = vld [vmem:[%s432_s12 + $0x16] sm:$0x3]  ;;  %v133_v14 = vld [vmem:[%s432_s12 + $0x18] sm:$0x3]  ;;  %v134_v15 = vld [vmem:[%s432_s12 + $0x1a] sm:$0x3] }
  0x15   : > { %v172_v16 = vsel %vm171_vm0, %v155_v8, -inf  ;;  %v179_v17 = vsel %vm171_vm0, %v156_v9, -inf  ;;  %v135_v18 = vld [vmem:[%s432_s12 + $0x1e] sm:$0x3]  ;;  %v136_v19 = vld [vmem:[%s432_s12 + $0x20] sm:$0x3] }
  0x16   : > { %v173_v20 = vrot.slane %v172_v16, 4  ;;  %v180_v21 = vrot.slane %v179_v17, 4  ;;  %v186_v22 = vsel %vm171_vm0, %v157_v11, -inf  ;;  %v193_v23 = vsel %vm171_vm0, %v158_v12, -inf  ;;  %v137_v24 = vld [vmem:[%s432_s12 + $0x22] sm:$0x3] }
  0x17   : > { %v187_v25 = vrot.slane %v186_v22, 4  ;;  %v194_v26 = vrot.slane %v193_v23, 4  ;;  %v138_v27 = vld [vmem:[%s432_s12 + $0x24] sm:$0x3]  ;;  %v159_v28 = vmax.f32 %v131_v10, %v135_v18  ;;  %v160_v29 = vmax.f32 %v132_v13, %v136_v19  ;;  %v139_v62 = vld [vmem:[%s432_s12 + $0x28] sm:$0x3] }
  0x18   : > { %v174_v30 = vmax.f32 %v172_v16, %v173_v20  ;;  %v181_v31 = vmax.f32 %v179_v17, %v180_v21  ;;  %v161_v32 = vmax.f32 %v133_v14, %v137_v24  ;;  %v162_v33 = vmax.f32 %v134_v15, %v138_v27  ;;  %v143_v63 = vld [vmem:[%s432_s12 + $0x32] sm:$0x3]  ;;  %v140_v4 = vld [vmem:[%s432_s12 + $0x2a] sm:$0x3]  ;;  %v144_v5 = vld [vmem:[%s432_s12 + $0x34] sm:$0x3] }
  0x19   : > { %v188_v34 = vmax.f32 %v186_v22, %v187_v25  ;;  %v195_v35 = vmax.f32 %v193_v23, %v194_v26  ;;  %v200_v36 = vsel %vm171_vm0, %v159_v28, -inf  ;;  %v207_v37 = vsel %vm171_vm0, %v160_v29, -inf  ;;  %v141_v10 = vld [vmem:[%s432_s12 + $0x2c] sm:$0x3]  ;;  %v145_v11 = vld [vmem:[%s432_s12 + $0x36] sm:$0x3] }
  0x1a   : > { %v175_v38 = vrot.slane %v174_v30, 2  ;;  %v182_v39 = vrot.slane %v181_v31, 2  ;;  %v201_v40 = vrot.slane %v200_v36, 4  ;;  %v208_v41 = vrot.slane %v207_v37, 4  ;;  %v142_v15 = vld [vmem:[%s432_s12 + $0x2e] sm:$0x3] }
  0x1b   : > { %v189_v42 = vrot.slane %v188_v34, 2  ;;  %v196_v43 = vrot.slane %v195_v35, 2  ;;  %v214_v44 = vsel %vm171_vm0, %v161_v32, -inf  ;;  %v221_v45 = vsel %vm171_vm0, %v162_v33, -inf  ;;  %v146_v16 = vld [vmem:[%s432_s12 + $0x38] sm:$0x3] }
  0x1c   : > { %v176_v46 = vmax.f32 %v174_v30, %v175_v38  ;;  %v183_v47 = vmax.f32 %v181_v31, %v182_v39  ;;  %v202_v48 = vmax.f32 %v200_v36, %v201_v40  ;;  %v209_v49 = vmax.f32 %v207_v37, %v208_v41  ;;  %v147_v26 = vld [vmem:[%s432_s12 + $0x3c] sm:$0x3]  ;;  %v148_v27 = vld [vmem:[%s432_s12 + $0x3e] sm:$0x3]  ;;  %v151_v28 = vld [vmem:[%s432_s12 + $0x46] sm:$0x3] }
  0x1d   : > { %v190_v50 = vmax.f32 %v188_v34, %v189_v42  ;;  %v197_v51 = vmax.f32 %v195_v35, %v196_v43  ;;  %v215_v52 = vrot.slane %v214_v44, 4  ;;  %v222_v53 = vrot.slane %v221_v45, 4  ;;  %v149_v33 = vld [vmem:[%s432_s12 + $0x40] sm:$0x3]  ;;  %v152_v34 = vld [vmem:[%s432_s12 + $0x48] sm:$0x3] }
  0x1e   : > { %v177_v54 = vrot.slane %v176_v46, 1  ;;  %v184_v55 = vrot.slane %v183_v47, 1  ;;  %v203_v56 = vrot.slane %v202_v48, 2  ;;  %v210_v57 = vrot.slane %v209_v49, 2  ;;  %v150_v39 = vld [vmem:[%s432_s12 + $0x42] sm:$0x3] }
  0x1f   : > { %v191_v58 = vrot.slane %v190_v50, 1  ;;  %v198_v59 = vrot.slane %v197_v51, 1  ;;  %v216_v60 = vmax.f32 %v214_v44, %v215_v52  ;;  %v223_v61 = vmax.f32 %v221_v45, %v222_v53  ;;  %v153_v44 = vld [vmem:[%s432_s12 + $0x4a] sm:$0x3]  ;;  %v154_v45 = vld [vmem:[%s432_s12 + $0x4c] sm:$0x3] }
  0x20   : > { %v178_v0 = vmax.f32 %v176_v46, %v177_v54  ;;  %v185_v1 = vmax.f32 %v183_v47, %v184_v55  ;;  %v204_v2 = vmax.f32 %v202_v48, %v203_v56  ;;  %v211_v3 = vmax.f32 %v209_v49, %v210_v57 }
  0x21   : > { %v192_v6 = vmax.f32 %v190_v50, %v191_v58  ;;  %v199_v7 = vmax.f32 %v197_v51, %v198_v59  ;;  %v217_v8 = vrot.slane %v216_v60, 2  ;;  %v224_v9 = vrot.slane %v223_v61, 2 }
  0x22   : > { %v301_v12 = vsel %vm300_vm1, %v185_v1, %v178_v0  ;;  %v205_v13 = vrot.slane %v204_v2, 1  ;;  %v212_v14 = vrot.slane %v211_v3, 1  ;;  %v163_v17 = vmax.f32 %v139_v62, %v143_v63 }
  0x23   : > { %v303_v18 = vsel %vm302_vm2, %v192_v6, %v301_v12  ;;  %v218_v19 = vmax.f32 %v216_v60, %v217_v8  ;;  %v225_v20 = vmax.f32 %v223_v61, %v224_v9  ;;  %v164_v21 = vmax.f32 %v140_v4, %v144_v5 }
  0x24   : > { %v305_v22 = vsel %vm304_vm3, %v199_v7, %v303_v18  ;;  %v206_v23 = vmax.f32 %v204_v2, %v205_v13  ;;  %v213_v24 = vmax.f32 %v211_v3, %v212_v14  ;;  %v165_v25 = vmax.f32 %v141_v10, %v145_v11 }
  0x25   : > { %320 = vst.msk [vmem:[%s468_s16] sm:$0xf] %vm319_vm4, %v305_v22  ;;  %v219_v29 = vrot.slane %v218_v19, 1  ;;  %v226_v30 = vrot.slane %v225_v20, 1  ;;  %v166_v31 = vmax.f32 %v142_v15, %v146_v16  ;;  %v228_v32 = vsel %vm171_vm0, %v163_v17, -inf }
  0x26   : > { %v306_v35 = vsel %vm300_vm1, %v213_v24, %v206_v23  ;;  %v229_v36 = vrot.slane %v228_v32, 4  ;;  %v235_v37 = vsel %vm171_vm0, %v164_v21, -inf  ;;  %v242_v38 = vsel %vm171_vm0, %v165_v25, -inf }
  0x27   : > { %v220_v40 = vmax.f32 %v218_v19, %v219_v29  ;;  %v227_v41 = vmax.f32 %v225_v20, %v226_v30  ;;  %v236_v42 = vrot.slane %v235_v37, 4  ;;  %v243_v43 = vrot.slane %v242_v38, 4 }
  0x28   : > { %v230_v46 = vmax.f32 %v228_v32, %v229_v36  ;;  %v249_v47 = vsel %vm171_vm0, %v166_v31, -inf  ;;  %v167_v48 = vmax.f32 %v147_v26, %v151_v28  ;;  %v168_v49 = vmax.f32 %v148_v27, %v152_v34 }
  0x29   : > { %v307_v50 = vsel %vm302_vm2, %v220_v40, %v306_v35  ;;  %v237_v51 = vmax.f32 %v235_v37, %v236_v42  ;;  %v244_v52 = vmax.f32 %v242_v38, %v243_v43  ;;  %v250_v53 = vrot.slane %v249_v47, 4 }
  0x2a   : > { %v308_v54 = vsel %vm304_vm3, %v227_v41, %v307_v50  ;;  %v231_v55 = vrot.slane %v230_v46, 2  ;;  %v169_v56 = vmax.f32 %v149_v33, %v153_v44  ;;  %v170_v57 = vmax.f32 %v150_v39, %v154_v45 }
  0x2b   : > { %321 = vst.msk [vmem:[%s468_s16 + $0x4] sm:$0xf] %vm319_vm4, %v308_v54  ;;  %v238_v58 = vrot.slane %v237_v51, 2  ;;  %v245_v59 = vrot.slane %v244_v52, 2  ;;  %v251_v60 = vmax.f32 %v249_v47, %v250_v53  ;;  %v256_v61 = vsel %vm171_vm0, %v167_v48, -inf }
  0x2c   : > { %v232_v62 = vmax.f32 %v230_v46, %v231_v55  ;;  %v257_v63 = vrot.slane %v256_v61, 4  ;;  %v263_v0 = vsel %vm171_vm0, %v168_v49, -inf  ;;  %v270_v1 = vsel %vm171_vm0, %v169_v56, -inf }
  0x2d   : > { %v239_v2 = vmax.f32 %v237_v51, %v238_v58  ;;  %v246_v3 = vmax.f32 %v244_v52, %v245_v59  ;;  %v252_v4 = vrot.slane %v251_v60, 2  ;;  %v264_v5 = vrot.slane %v263_v0, 4 }
  0x2e   : > { %v233_v6 = vrot.slane %v232_v62, 1  ;;  %v258_v7 = vmax.f32 %v256_v61, %v257_v63  ;;  %v271_v8 = vrot.slane %v270_v1, 4  ;;  %v277_v9 = vsel %vm171_vm0, %v170_v57, -inf }
  0x2f   : > { %v240_v10 = vrot.slane %v239_v2, 1  ;;  %v247_v11 = vrot.slane %v246_v3, 1  ;;  %v253_v12 = vmax.f32 %v251_v60, %v252_v4  ;;  %v265_v13 = vmax.f32 %v263_v0, %v264_v5 }
  0x30   : > { %v234_v14 = vmax.f32 %v232_v62, %v233_v6  ;;  %v259_v15 = vrot.slane %v258_v7, 2  ;;  %v272_v16 = vmax.f32 %v270_v1, %v271_v8  ;;  %v278_v17 = vrot.slane %v277_v9, 4 }
  0x31   : > { %v241_v18 = vmax.f32 %v239_v2, %v240_v10  ;;  %v248_v19 = vmax.f32 %v246_v3, %v247_v11  ;;  %v254_v20 = vrot.slane %v253_v12, 1  ;;  %v266_v21 = vrot.slane %v265_v13, 2 }
  0x32   : > { %v260_v22 = vmax.f32 %v258_v7, %v259_v15  ;;  %v273_v23 = vrot.slane %v272_v16, 2  ;;  %v279_v24 = vmax.f32 %v277_v9, %v278_v17 }
  0x33   : > { %v255_v25 = vmax.f32 %v253_v12, %v254_v20  ;;  %v309_v26 = vsel %vm300_vm1, %v241_v18, %v234_v14  ;;  %v267_v27 = vmax.f32 %v265_v13, %v266_v21 }
  0x34   : > { %v310_v28 = vsel %vm302_vm2, %v248_v19, %v309_v26  ;;  %v261_v29 = vrot.slane %v260_v22, 1  ;;  %v274_v30 = vmax.f32 %v272_v16, %v273_v23  ;;  %v280_v31 = vrot.slane %v279_v24, 2 }
  0x35   : > { %v311_v32 = vsel %vm304_vm3, %v255_v25, %v310_v28  ;;  %v268_v33 = vrot.slane %v267_v27, 1 }
  0x36   : > { %322 = vst.msk [vmem:[%s468_s16 + $0x8] sm:$0xf] %vm319_vm4, %v311_v32  ;;  %v262_v34 = vmax.f32 %v260_v22, %v261_v29  ;;  %v275_v35 = vrot.slane %v274_v30, 1  ;;  %v281_v36 = vmax.f32 %v279_v24, %v280_v31 }
  0x37   : > { %v269_v37 = vmax.f32 %v267_v27, %v268_v33 }
  0x38   : > { %v276_v38 = vmax.f32 %v274_v30, %v275_v35  ;;  %v282_v39 = vrot.slane %v281_v36, 1 }
  0x39   : > { %v312_v40 = vsel %vm300_vm1, %v269_v37, %v262_v34 }
  0x3a   : > { %v283_v41 = vmax.f32 %v281_v36, %v282_v39  ;;  %v313_v42 = vsel %vm302_vm2, %v276_v38, %v312_v40 }
  0x3c   : > { %v314_v43 = vsel %vm304_vm3, %v283_v41, %v313_v42 }
  0x3d   : > { %323 = vst.msk [vmem:[%s468_s16 + $0xc] sm:$0xf] %vm319_vm4, %v314_v43 }
  0x3e PF: > { %s11_s6 = sadd.s32 1, %s406_s6  }
  0x3f   : > { %p8_p4 = scmp.ge.s32.totalorder %s11_s6, 4  }
  0x41   :  { %10 = sbr.rel (!%p8_p4) target bundleno = 1 (0x1), region = 54 }

// kernel: encoder_forward.14
= control target key start
LH: loop header
LB: loop body
LE: loop exit
PB: predicated region body
PF: predicated region fallthrough
CT: control target
= control target key end

     0   :  { %s269_s6 = smov 0   ;;  %s296_s0 = inlined_call_operand.vmem [shape: f32[4,2,3,2,32], index: 0, kind: input, shape index: {}]   ;;  %s297_s1 = inlined_call_operand.vmem [shape: f32[4,2,32], index: 1, kind: output, shape index: {}]  }
   0x1 LB: > { %s231_s7 = sadd.s32 4294967295, %s257_s6   ;;  %p235_p0 = scmp.ge.s32.totalorder %s257_s6, 1  ;;  %s257_s6 = sphi %s269_s6, %s11_s6  }
   0x2   : > { %p89_p1 = scmp.lt.s32.totalorder %s257_s6, 3 }
   0x4   : > { %p90_p2 = pnand %p235_p0, %p89_p1 }
   0x5   : > { %s236_s8 = sshll.u32 (!%p90_p2), %s231_s7, 1  ;;  %vm135_vm0 = vcmask (!%p90_p2), 254976   ;;  %vm168_vm1 = vcmask (!%p90_p2), 1041409  }
   0x6   : > { %93 = sbr.rel (%p90_p2) target bundleno = 37 (0x25), region = 24  ;;  %p111_p3 = scmp.lt.s32.totalorder (!%p90_p2), %s236_s8, 3 }
   0xd   : > { %s299_s8 = smov (!%p111_p3, %s236_s8), 3 }
   0xe   : > { %s242_s9 = smul.u32 12, %s299_s8  ;;  %s239_s13 = sshll.u32 %s299_s8, 1 }
   0xf   : > { %s121_s16 = scalar_lea.vmem %s297_s1, %s239_s13 }
  0x10   : > { %s115_s12 = scalar_lea.vmem %s296_s0, %s242_s9 }
  0x11   : > { %v123_v0 = vld [vmem:[%s115_s12] sm:$0x3]  ;;  %v124_v1 = vld [vmem:[%s115_s12 + $0x2] sm:$0x3]  ;;  %v125_v2 = vld [vmem:[%s115_s12 + $0x6] sm:$0x3] }
  0x12   : > { %v126_v3 = vld [vmem:[%s115_s12 + $0x8] sm:$0x3]  ;;  %v131_v4 = vmax.f32 %v123_v0, %v125_v2  ;;  %v127_v5 = vld [vmem:[%s115_s12 + $0xc] sm:$0x3]  ;;  %v128_v6 = vld [vmem:[%s115_s12 + $0xe] sm:$0x3] }
  0x13   : > { %v132_v7 = vmax.f32 %v124_v1, %v126_v3  ;;  %v129_v8 = vld [vmem:[%s115_s12 + $0x12] sm:$0x3]  ;;  %v130_v9 = vld [vmem:[%s115_s12 + $0x14] sm:$0x3] }
  0x14   : > { %v136_v10 = vsel %vm135_vm0, %v131_v4, -inf  ;;  %v133_v11 = vmax.f32 %v127_v5, %v129_v8  ;;  %v134_v12 = vmax.f32 %v128_v6, %v130_v9 }
  0x15   : > { %v137_v13 = vrot.slane %v136_v10, 4  ;;  %v143_v14 = vsel %vm135_vm0, %v132_v7, -inf }
  0x16   : > { %v144_v15 = vrot.slane %v143_v14, 4  ;;  %v150_v16 = vsel %vm135_vm0, %v133_v11, -inf  ;;  %v157_v17 = vsel %vm135_vm0, %v134_v12, -inf }
  0x17   : > { %v138_v18 = vmax.f32 %v136_v10, %v137_v13  ;;  %v151_v19 = vrot.slane %v150_v16, 4  ;;  %v158_v20 = vrot.slane %v157_v17, 4 }
  0x18   : > { %v145_v21 = vmax.f32 %v143_v14, %v144_v15 }
  0x19   : > { %v139_v22 = vrot.slane %v138_v18, 2  ;;  %v152_v23 = vmax.f32 %v150_v16, %v151_v19  ;;  %v159_v24 = vmax.f32 %v157_v17, %v158_v20 }
  0x1a   : > { %v146_v25 = vrot.slane %v145_v21, 2 }
  0x1b   : > { %v140_v26 = vmax.f32 %v138_v18, %v139_v22  ;;  %v153_v27 = vrot.slane %v152_v23, 2  ;;  %v160_v28 = vrot.slane %v159_v24, 2 }
  0x1c   : > { %v147_v29 = vmax.f32 %v145_v21, %v146_v25 }
  0x1d   : > { %v141_v30 = vrot.slane %v140_v26, 1  ;;  %v154_v31 = vmax.f32 %v152_v23, %v153_v27  ;;  %v161_v32 = vmax.f32 %v159_v24, %v160_v28 }
  0x1e   : > { %v148_v33 = vrot.slane %v147_v29, 1 }
  0x1f   : > { %v142_v34 = vmax.f32 %v140_v26, %v141_v30  ;;  %v155_v35 = vrot.slane %v154_v31, 1  ;;  %v162_v36 = vrot.slane %v161_v32, 1 }
  0x20   : > { %v149_v37 = vmax.f32 %v147_v29, %v148_v33 }
  0x21   : > { %v156_v38 = vmax.f32 %v154_v31, %v155_v35  ;;  %v163_v39 = vmax.f32 %v161_v32, %v162_v36 }
  0x22   : > { %v169_v40 = vsel %vm168_vm1, %v149_v37, %v142_v34 }
  0x23   : > { %173 = vst.msk [vmem:[%s121_s16] sm:$0x3] %vm135_vm0, %v169_v40  ;;  %v170_v41 = vsel %vm168_vm1, %v163_v39, %v156_v38 }
  0x24   : > { %174 = vst.msk [vmem:[%s121_s16 + $0x2] sm:$0x3] %vm135_vm0, %v170_v41 }
  0x25 PF: > { %s11_s6 = sadd.s32 1, %s257_s6  }
  0x26   : > { %p8_p4 = scmp.ge.s32.totalorder %s11_s6, 4  }
  0x28   :  { %10 = sbr.rel (!%p8_p4) target bundleno = 1 (0x1), region = 54 }

// kernel: encoder_forward.11
= control target key start
LH: loop header
LB: loop body
LE: loop exit
PB: predicated region body
PF: predicated region fallthrough
CT: control target
= control target key end

     0   :  { %s3652_s18 = smov 0   ;;  %s4246_s0 = inlined_call_operand.vmem [shape: f32[2,110,8], index: 0, kind: input, shape index: {}]   ;;  %s4247_s1 = inlined_call_operand.vmem [shape: bf16[9,8,16], index: 1, kind: input, shape index: {}]   ;;  %s4248_s2 = inlined_call_operand.vmem [shape: bf16[9,16,16], index: 2, kind: input, shape index: {}]   ;;  %s4249_s3 = inlined_call_operand.vmem [shape: f32[4,16], index: 3, kind: input, shape index: {}]   ;;  %s4250_s4 = inlined_call_operand.vmem [shape: f32[80,1], index: 4, kind: input, shape index: {}]   ;;  %s4251_s5 = inlined_call_operand.vmem [shape: f32[2,80,16], index: 5, kind: output, shape index: {}]  }
   0x1 LB: > { %s2627_s19 = sadd.s32 4294967295, %s3617_s18   ;;  %p2631_p0 = scmp.ge.s32.totalorder %s3617_s18, 1  ;;  %s3617_s18 = sphi %s3652_s18, %s15_s18  }
   0x2   : > { %p187_p1 = scmp.lt.s32.totalorder %s3617_s18, 3 }
   0x4   : > { %p188_p2 = pnand %p2631_p0, %p187_p1 }
   0x5   : > { %v2634_v0 = vld [vmem:[%s4247_s1 + $0x4] sm:$0xf] (!%p188_p2)  ;;  %vm275_vm0 = vcmask (!%p188_p2), 1043456   ;;  %p215_p3 = scmp.lt.s32.totalorder (!%p188_p2), %s2627_s19, 1  ;;  %v3619_v1 = vmov (!%p188_p2), 0.0   ;;  %vm3620_vm1 = vmmov (!%p188_p2), 0  }
   0x6   : > { %191 = sbr.rel (%p188_p2) target bundleno = 1145 (0x479), region = 40  ;;  %2871 = vmatprep.subr.bf16.mxu0 (!%p188_p2), %v3619_v1  ;;  %v277_v2 = vsel (!%p188_p2), %vm275_vm0, %v2634_v0, 0  ;;  %2873 = vmatprep.mubr.msk.bf16.mxu0 (!%p188_p2), %vm3620_vm1, %v3619_v1  ;;  %v241_v3 = vld [vmem:[%s4247_s1] sm:$0xf] (!%p188_p2)  ;;  %vm259_vm2 = vcmask (!%p188_p2), 64512   ;;  %vm1329_vm3 = vcmask (!%p188_p2), 130048  }
   0x7   : > { %2872 = vmatpush3.bf16.msra.mxu0 (!%p188_p2), %v277_v2  ;;  %3069 = vmatprep.subr.bf16.mxu1 (!%p188_p2), %v3619_v1  ;;  %v368_v7 = vsel (!%p188_p2), %vm275_vm0, %v241_v3, 0  ;;  %v2645_v22 = vld [vmem:[%s4247_s1 + $0x8] sm:$0xf] (!%p188_p2)  ;;  %v2651_v39 = vld [vmem:[%s4247_s1 + $0xc] sm:$0xf] (!%p188_p2)  ;;  %1331 = vst.msk [vmem:[#allocation2 + $0x8] sm:$0xff] (!%p188_p2), %vm1329_vm3, %v3619_v1 }
   0x8   : > { %2893 = vmatprep.subr.bf16.mxu0 (!%p188_p2), %v3619_v1  ;;  %3071 = vmatprep.mubr.msk.bf16.mxu1 (!%p188_p2), %vm3620_vm1, %v3619_v1  ;;  %v476_v24 = vsel (!%p188_p2), %vm275_vm0, %v2645_v22, 0  ;;  %v594_v41 = vsel (!%p188_p2), %vm275_vm0, %v2651_v39, 0  ;;  %v2657_v54 = vld [vmem:[%s4247_s1 + $0x10] sm:$0xf] (!%p188_p2)  ;;  %v2663_v0 = vld [vmem:[%s4247_s1 + $0x14] sm:$0xf] (!%p188_p2) }
   0x9   : > { %v712_v56 = vsel (!%p188_p2), %vm275_vm0, %v2657_v54, 0  ;;  %v830_v3 = vsel (!%p188_p2), %vm275_vm0, %v2663_v0, 0  ;;  %v1350_v39 = vld [vmem:[%s4250_s4 + $0x28] sm:$0xff] (!%p188_p2)  ;;  %v2681_v54 = vld [vmem:[%s4247_s1 + $0x20] sm:$0xf] (!%p188_p2)  ;;  %1332 = vst.msk [vmem:[#allocation2 + $0x10] sm:$0xff] (!%p188_p2), %vm1329_vm3, %v3619_v1 }
   0xa   : > { %1330 = vst.msk [vmem:[#allocation2] sm:$0xff] (!%p188_p2), %vm1329_vm3, %v3619_v1  ;;  %1333 = vst.msk [vmem:[#allocation2 + $0x18] sm:$0xff] (!%p188_p2), %vm1329_vm3, %v3619_v1 }
   0xb   : > { %1334 = vst.msk [vmem:[#allocation2 + $0x20] sm:$0xff] (!%p188_p2), %vm1329_vm3, %v3619_v1  ;;  %1335 = vst.msk [vmem:[#allocation2 + $0x28] sm:$0xff] (!%p188_p2), %vm1329_vm3, %v3619_v1 }
   0xc   : > { %1336 = vst.msk [vmem:[#allocation2 + $0x30] sm:$0xff] (!%p188_p2), %vm1329_vm3, %v3619_v1  ;;  %1337 = vst.msk [vmem:[#allocation2 + $0x38] sm:$0xff] (!%p188_p2), %vm1329_vm3, %v3619_v1 }
   0xd   : > { %s4253_s19 = smov (!%p215_p3, %s2627_s19), 1  ;;  %1338 = vst.msk [vmem:[#allocation2 + $0x40] sm:$0xff] %vm1329_vm3, %v3619_v1  ;;  %1339 = vst.msk [vmem:[#allocation2 + $0x48] sm:$0xff] %vm1329_vm3, %v3619_v1 }
   0xe   : > { %s3587_s24 = smul.u32 112, %s4253_s19  ;;  %1340 = vst.msk [vmem:[#allocation2 + $0x50] sm:$0xff] %vm1329_vm3, %v3619_v1  ;;  %1341 = vst.msk [vmem:[#allocation2 + $0x58] sm:$0xff] %vm1329_vm3, %v3619_v1 }
   0xf   : > { %1342 = vst.msk [vmem:[#allocation2 + $0x60] sm:$0xff] %vm1329_vm3, %v3619_v1  ;;  %s3588_s17 = smul.u32 80, %s4253_s19 }
  0x10   : > { %s3680_s27 = scalar_lea.vmem %s4246_s0, %s3587_s24 }
  0x11   : > { %v242_v4 = vld [vmem:[%s3680_s27 + $0x1] sm:$0xff]  ;;  %v243_v5 = vld [vmem:[%s3680_s27 + $0x9] sm:$0xff]  ;;  %v244_v8 = vld [vmem:[%s3680_s27 + $0x11] sm:$0xff]  ;;  %s4204_s22 = scalar_lea.vmem %s4251_s5, %s3588_s17 }
  0x12   : > { %v252_v6 = vpack.c.bf16 %v243_v5, %v242_v4  ;;  %v245_v9 = vld [vmem:[%s3680_s27 + $0x19] sm:$0xff]  ;;  %v246_v11 = vld [vmem:[%s3680_s27 + $0x21] sm:$0xff]  ;;  %v247_v12 = vld [vmem:[%s3680_s27 + $0x29] sm:$0xff] }
  0x13   : > { %v253_v10 = vpack.c.bf16 %v245_v9, %v244_v8  ;;  %v254_v13 = vpack.c.bf16 %v247_v12, %v246_v11  ;;  %v248_v14 = vld [vmem:[%s3680_s27 + $0x31] sm:$0xff]  ;;  %v249_v15 = vld [vmem:[%s3680_s27 + $0x39] sm:$0xff]  ;;  %v250_v17 = vld [vmem:[%s3680_s27 + $0x41] sm:$0xff] }
  0x14   : > { %2874 = vmatmul.mubr.msk.bf16.vlgmr.msra.gmra.mrb[0].mxu0 %vm259_vm2, %v252_v6  ;;  %v255_v16 = vpack.c.bf16 %v249_v15, %v248_v14  ;;  %v251_v18 = vld [vmem:[%s3680_s27 + $0x49] sm:$0xff]  ;;  %v226_v20 = vld [vmem:[%s3680_s27] sm:$0xff]  ;;  %v229_v26 = vld [vmem:[%s3680_s27 + $0x18] sm:$0xff] }
  0x15   : > { %2894 = vmatpush3.bf16.msra.mxu0 %v368_v7  ;;  %2877 = vmatprep.mubr.msk.bf16.mxu0 %vm3620_vm1, %v3619_v1  ;;  %v256_v19 = vpack.c.bf16 %v251_v18, %v250_v17  ;;  %v227_v21 = vld [vmem:[%s3680_s27 + $0x8] sm:$0xff]  ;;  %v228_v25 = vld [vmem:[%s3680_s27 + $0x10] sm:$0xff]  ;;  %v230_v28 = vld [vmem:[%s3680_s27 + $0x20] sm:$0xff] }
  0x16   : > { %2915 = vmatprep.subr.bf16.mxu0 %v3619_v1  ;;  %v236_v23 = vpack.c.bf16 %v227_v21, %v226_v20  ;;  %v237_v27 = vpack.c.bf16 %v229_v26, %v228_v25  ;;  %v231_v29 = vld [vmem:[%s3680_s27 + $0x28] sm:$0xff]  ;;  %v232_v31 = vld [vmem:[%s3680_s27 + $0x30] sm:$0xff]  ;;  %v233_v32 = vld [vmem:[%s3680_s27 + $0x38] sm:$0xff] }
  0x17   : > { %v238_v30 = vpack.c.bf16 %v231_v29, %v230_v28  ;;  %v239_v33 = vpack.c.bf16 %v233_v32, %v232_v31  ;;  %v234_v34 = vld [vmem:[%s3680_s27 + $0x40] sm:$0xff]  ;;  %v235_v35 = vld [vmem:[%s3680_s27 + $0x48] sm:$0xff]  ;;  %v445_v42 = vld [vmem:[%s3680_s27 + $0x12] sm:$0xff] }
  0x18   : > { %v240_v36 = vpack.c.bf16 %v235_v35, %v234_v34  ;;  %v443_v37 = vld [vmem:[%s3680_s27 + $0x2] sm:$0xff]  ;;  %v444_v38 = vld [vmem:[%s3680_s27 + $0xa] sm:$0xff]  ;;  %v446_v43 = vld [vmem:[%s3680_s27 + $0x1a] sm:$0xff]  ;;  %v3621_v34 = vmov 0  }
  0x19   : > { %v453_v40 = vpack.c.bf16 %v444_v38, %v443_v37  ;;  %v454_v44 = vpack.c.bf16 %v446_v43, %v445_v42  ;;  %v447_v45 = vld [vmem:[%s3680_s27 + $0x22] sm:$0xff]  ;;  %v448_v46 = vld [vmem:[%s3680_s27 + $0x2a] sm:$0xff]  ;;  %v449_v48 = vld [vmem:[%s3680_s27 + $0x32] sm:$0xff]  ;;  %v571_v55 = vpack.c.bf16 %v445_v42, %v444_v38  ;;  %3600 = vset.pattern.permute.xlu0 %v3621_v34  ;;  %3601 = vset.pattern.permute.xlu1 %v3621_v34 }
  0x1a   : > { %v455_v47 = vpack.c.bf16 %v448_v46, %v447_v45  ;;  %v450_v49 = vld [vmem:[%s3680_s27 + $0x3a] sm:$0xff]  ;;  %v451_v51 = vld [vmem:[%s3680_s27 + $0x42] sm:$0xff]  ;;  %v452_v52 = vld [vmem:[%s3680_s27 + $0x4a] sm:$0xff]  ;;  %v572_v57 = vpack.c.bf16 %v447_v45, %v446_v43  ;;  %v573_v58 = vpack.c.bf16 %v449_v48, %v448_v46 }
  0x1b   : > { %v456_v50 = vpack.c.bf16 %v450_v49, %v449_v48  ;;  %v457_v53 = vpack.c.bf16 %v452_v52, %v451_v51  ;;  %v574_v59 = vpack.c.bf16 %v451_v51, %v450_v49  ;;  %v570_v60 = vld [vmem:[%s3680_s27 + $0x52] sm:$0xff]  ;;  %v681_v4 = vld [vmem:[%s3680_s27 + $0x1b] sm:$0xff]  ;;  %v682_v5 = vld [vmem:[%s3680_s27 + $0x23] sm:$0xff] }
  0x1c   : > { %2878 = vmatmul.mubr.msk.bf16.gmra.mrb[4].mxu0 %vm259_vm2, %v253_v10  ;;  %v575_v61 = vpack.c.bf16 %v570_v60, %v452_v52  ;;  %v679_v62 = vld [vmem:[%s3680_s27 + $0xb] sm:$0xff]  ;;  %v680_v63 = vld [vmem:[%s3680_s27 + $0x13] sm:$0xff]  ;;  %v690_v6 = vpack.c.bf16 %v682_v5, %v681_v4  ;;  %v685_v10 = vld [vmem:[%s3680_s27 + $0x3b] sm:$0xff] }
  0x1d   : > { %2881 = vmatprep.mubr.msk.bf16.mxu0 %vm3620_vm1, %v3619_v1  ;;  %v689_v2 = vpack.c.bf16 %v680_v63, %v679_v62  ;;  %v683_v7 = vld [vmem:[%s3680_s27 + $0x2b] sm:$0xff]  ;;  %v684_v8 = vld [vmem:[%s3680_s27 + $0x33] sm:$0xff]  ;;  %v686_v11 = vld [vmem:[%s3680_s27 + $0x43] sm:$0xff] }
  0x1e   : > { %v691_v9 = vpack.c.bf16 %v684_v8, %v683_v7  ;;  %v692_v12 = vpack.c.bf16 %v686_v11, %v685_v10  ;;  %v688_v14 = vld [vmem:[%s3680_s27 + $0x53] sm:$0xff]  ;;  %v799_v21 = vld [vmem:[%s3680_s27 + $0x1c] sm:$0xff]  ;;  %v800_v22 = vld [vmem:[%s3680_s27 + $0x24] sm:$0xff] }
  0x1f   : > { %v798_v17 = vld [vmem:[%s3680_s27 + $0x14] sm:$0xff]  ;;  %v804_v28 = vld [vmem:[%s3680_s27 + $0x44] sm:$0xff]  ;;  %v805_v32 = vld [vmem:[%s3680_s27 + $0x4c] sm:$0xff] }
  0x20   : > { %v2669_v18 = vld [vmem:[%s4247_s1 + $0x18] sm:$0xf]  ;;  %v1347_v31 = vld [vmem:[%s4250_s4 + $0x10] sm:$0xff]  ;;  %v1346_v35 = vld [vmem:[%s4250_s4 + $0x8] sm:$0xff]  ;;  %v925_v42 = vpack.c.bf16 %v799_v21, %v798_v17  ;;  %v928_v49 = vpack.c.bf16 %v805_v32, %v804_v28 }
  0x21   : > { %v948_v20 = vsel %vm275_vm0, %v2669_v18, 0  ;;  %v802_v25 = vld [vmem:[%s3680_s27 + $0x34] sm:$0xff]  ;;  %1367 = vperm.xlu1 %3601, %v1347_v31   ;;  %v1349_v38 = vld [vmem:[%s4250_s4 + $0x20] sm:$0xff]  ;;  %v1354_v46 = vld [vmem:[%s4250_s4 + $0x48] sm:$0xff] }
  0x22   : > { %v1348_v37 = vld [vmem:[%s4250_s4 + $0x18] sm:$0xff]  ;;  %v1353_v45 = vld [vmem:[%s4250_s4 + $0x40] sm:$0xff]  ;;  %v1040_v0 = vld [vmem:[%s3680_s27 + $0x4d] sm:$0xff] }
  0x23   : > { %v1352_v43 = vld [vmem:[%s4250_s4 + $0x38] sm:$0xff]  ;;  %v1039_v63 = vld [vmem:[%s3680_s27 + $0x45] sm:$0xff]  ;;  %v1154_v10 = vld [vmem:[%s3680_s27 + $0x2e] sm:$0xff] }
  0x24   : > { %2882 = vmatmul.mubr.msk.bf16.gmra.mrb[8].mxu0 %vm259_vm2, %v254_v13  ;;  %v687_v13 = vld [vmem:[%s3680_s27 + $0x4b] sm:$0xff]  ;;  %v1033_v52 = vld [vmem:[%s3680_s27 + $0x15] sm:$0xff]  ;;  %v1042_v4 = vld [vmem:[%s3680_s27 + $0x5d] sm:$0xff] }
  0x25   : > { %2885 = vmatprep.mubr.msk.bf16.mxu0 %vm3620_vm1, %v3619_v1  ;;  %v693_v15 = vpack.c.bf16 %v688_v14, %v687_v13  ;;  %1372 = vperm.xlu1 %3601, %v1348_v37   ;;  %v1037_v60 = vld [vmem:[%s3680_s27 + $0x35] sm:$0xff]  ;;  %v1152_v7 = vld [vmem:[%s3680_s27 + $0x1e] sm:$0xff] }
  0x26   : > { %v1156_v13 = vld [vmem:[%s3680_s27 + $0x3e] sm:$0xff]  ;;  %v1159_v18 = vld [vmem:[%s3680_s27 + $0x56] sm:$0xff] }
  0x29   : > { %1382 = vperm.xlu1 %3601, %v1350_v39  }
  0x2c   : > { %2886 = vmatmul.mubr.msk.bf16.gmra.mrb[12].mxu0 %vm259_vm2, %v255_v16  ;;  %v797_v16 = vld [vmem:[%s3680_s27 + $0xc] sm:$0xff] }
  0x2d   : > { %2889 = vmatprep.mubr.msk.bf16.mxu0 %vm3620_vm1, %v3619_v1  ;;  %1392 = vperm.xlu1 %3601, %v1352_v43  }
  0x31   : > { %1402 = vperm.xlu1 %3601, %v1354_v46  }
  0x34   : > { %2890 = vmatmul.mubr.msk.bf16.gmra.mrb[16].mxu0 %vm259_vm2, %v256_v19  ;;  %v807_v19 = vpack.c.bf16 %v798_v17, %v797_v16  ;;  %v1158_v16 = vld [vmem:[%s3680_s27 + $0x4e] sm:$0xff] }
  0x35   : > { %2895 = vmatprep.mubr.msk.bf16.mxu0 %vm3620_vm1, %v3619_v1 }
  0x3c   : > { %2896 = vmatmul.mubr.msk.bf16.vlgmr.msra.gmra.mrb[0].mxu0 %vm259_vm2, %v236_v23  ;;  %v808_v23 = vpack.c.bf16 %v800_v22, %v799_v21  ;;  %v3602_v21 = vld [vmem:[%s4248_s2 + $0x8] sm:$0xff]  }
  0x3d   : > { %2916 = vmatpush3.bf16.msra.mxu0 %v476_v24  ;;  %2899 = vmatprep.mubr.msk.bf16.mxu0 %vm3620_vm1, %v3619_v1  ;;  %v801_v24 = vld [vmem:[%s3680_s27 + $0x2c] sm:$0xff] }
  0x3e   : > { %2937 = vmatprep.subr.bf16.mxu0 %v3619_v1  ;;  %v809_v26 = vpack.c.bf16 %v802_v25, %v801_v24  ;;  %3070 = vmatpush3.bf16.msra.mxu1 %v3602_v21 }
  0x3f   : > { %3091 = vmatprep.subr.bf16.mxu1 %v3619_v1 }
  0x44   : > { %2900 = vmatmul.mubr.msk.bf16.gmra.mrb[4].mxu0 %vm259_vm2, %v237_v27  ;;  %v803_v27 = vld [vmem:[%s3680_s27 + $0x3c] sm:$0xff] }
  0x45   : > { %2903 = vmatprep.mubr.msk.bf16.mxu0 %vm3620_vm1, %v3619_v1  ;;  %v810_v29 = vpack.c.bf16 %v804_v28, %v803_v27  ;;  %v927_v48 = vpack.c.bf16 %v803_v27, %v802_v25 }
  0x4c   : > { %2904 = vmatmul.mubr.msk.bf16.gmra.mrb[8].mxu0 %vm259_vm2, %v238_v30  ;;  %v1345_v30 = vld [vmem:[%s4250_s4] sm:$0xff] }
  0x4d   : > { %2907 = vmatprep.mubr.msk.bf16.mxu0 %vm3620_vm1, %v3619_v1  ;;  %1357 = vperm.xlu0 %3600, %v1345_v30  }
  0x51   : > { %1362 = vperm.xlu0 %3600, %v1346_v35  }
  0x54   : > { %2908 = vmatmul.mubr.msk.bf16.gmra.mrb[12].mxu0 %vm259_vm2, %v239_v33  ;;  %v806_v33 = vld [vmem:[%s3680_s27 + $0x54] sm:$0xff] }
  0x55   : > { %2911 = vmatprep.mubr.msk.bf16.mxu0 %vm3620_vm1, %v3619_v1  ;;  %1377 = vperm.xlu0 %3600, %v1349_v38  }
  0x5c   : > { %2912 = vmatmul.mubr.msk.bf16.gmra.mrb[16].mxu0 %vm259_vm2, %v240_v36  ;;  %v811_v36 = vpack.c.bf16 %v806_v33, %v805_v32 }
  0x5d   : > { %2917 = vmatprep.mubr.msk.bf16.mxu0 %vm3620_vm1, %v3619_v1 }
  0x64   : > { %2918 = vmatmul.mubr.msk.bf16.vlgmr.msra.gmra.mrb[0].mxu0 %vm259_vm2, %v453_v40  ;;  %v2675_v40 = vld [vmem:[%s4247_s1 + $0x1c] sm:$0xf] }
  0x65   : > { %2938 = vmatpush3.bf16.msra.mxu0 %v594_v41  ;;  %2921 = vmatprep.mubr.msk.bf16.mxu0 %vm3620_vm1, %v3619_v1  ;;  %v1351_v41 = vld [vmem:[%s4250_s4 + $0x30] sm:$0xff] }
  0x66   : > { %2959 = vmatprep.subr.bf16.mxu0 %v3619_v1  ;;  %1387 = vperm.xlu0 %3600, %v1351_v41  }
  0x6a   : > { %1397 = vperm.xlu0 %3600, %v1353_v45  }
  0x6c   : > { %2922 = vmatmul.mubr.msk.bf16.gmra.mrb[4].mxu0 %vm259_vm2, %v454_v44  ;;  %v1066_v44 = vsel %vm275_vm0, %v2675_v40, 0 }
  0x6d   : > { %2925 = vmatprep.mubr.msk.bf16.mxu0 %vm3620_vm1, %v3619_v1 }
  0x74   : > { %2926 = vmatmul.mubr.msk.bf16.gmra.mrb[8].mxu0 %vm259_vm2, %v455_v47  ;;  %v926_v47 = vpack.c.bf16 %v801_v24, %v800_v22  ;;  %v3986_v22 = vld [vmem:[%s4249_s3] ss:$0 sm:$0xff]  ;;  %v3991_v24 = vld [vmem:[%s4249_s3 + $0x1] ss:$0 sm:$0xff] }
  0x75   : > { %2929 = vmatprep.mubr.msk.bf16.mxu0 %vm3620_vm1, %v3619_v1 }
  0x7c   : > { %2930 = vmatmul.mubr.msk.bf16.gmra.mrb[12].mxu0 %vm259_vm2, %v456_v50  ;;  %v924_v50 = vld [vmem:[%s3680_s27 + $0x5c] sm:$0xff] }
  0x7d   : > { %2933 = vmatprep.mubr.msk.bf16.mxu0 %vm3620_vm1, %v3619_v1  ;;  %v929_v51 = vpack.c.bf16 %v924_v50, %v806_v33 }
  0x84   : > { %2934 = vmatmul.mubr.msk.bf16.gmra.mrb[16].mxu0 %vm259_vm2, %v457_v53  ;;  %v1034_v53 = vld [vmem:[%s3680_s27 + $0x1d] sm:$0xff] }
  0x85   : > { %2939 = vmatprep.mubr.msk.bf16.mxu0 %vm3620_vm1, %v3619_v1 }
  0x8c   : > { %2940 = vmatmul.mubr.msk.bf16.vlgmr.msra.gmra.mrb[0].mxu0 %vm259_vm2, %v571_v55  ;;  %v1043_v55 = vpack.c.bf16 %v1034_v53, %v1033_v52  ;;  %v1442_v52 = vld [vmem:[#allocation2 + $0x1] sm:$0xff] }
  0x8d   : > { %2960 = vmatpush3.bf16.msra.mxu0 %v712_v56  ;;  %2943 = vmatprep.mubr.msk.bf16.mxu0 %vm3620_vm1, %v3619_v1  ;;  %v1184_v56 = vsel %vm275_vm0, %v2681_v54, 0 }
  0x8e   : > { %2981 = vmatprep.subr.bf16.mxu0 %v3619_v1 }
  0x94   : > { %2944 = vmatmul.mubr.msk.bf16.gmra.mrb[4].mxu0 %vm259_vm2, %v572_v57  ;;  %v1035_v57 = vld [vmem:[%s3680_s27 + $0x25] sm:$0xff] }
  0x95   : > { %2947 = vmatprep.mubr.msk.bf16.mxu0 %vm3620_vm1, %v3619_v1 }
  0x9c   : > { %2948 = vmatmul.mubr.msk.bf16.gmra.mrb[8].mxu0 %vm259_vm2, %v573_v58  ;;  %v1036_v58 = vld [vmem:[%s3680_s27 + $0x2d] sm:$0xff] }
  0x9d   : > { %2951 = vmatprep.mubr.msk.bf16.mxu0 %vm3620_vm1, %v3619_v1 }
  0xa4   : > { %2952 = vmatmul.mubr.msk.bf16.gmra.mrb[12].mxu0 %vm259_vm2, %v574_v59  ;;  %v1044_v59 = vpack.c.bf16 %v1036_v58, %v1035_v57 }
  0xa5   : > { %2955 = vmatprep.mubr.msk.bf16.mxu0 %vm3620_vm1, %v3619_v1 }
  0xac   : > { %2956 = vmatmul.mubr.msk.bf16.gmra.mrb[16].mxu0 %vm259_vm2, %v575_v61  ;;  %v1038_v61 = vld [vmem:[%s3680_s27 + $0x3d] sm:$0xff] }
  0xad   : > { %2961 = vmatprep.mubr.msk.bf16.mxu0 %vm3620_vm1, %v3619_v1  ;;  %v1045_v62 = vpack.c.bf16 %v1038_v61, %v1037_v60  ;;  %v3603_v60 = vld [vmem:[%s4248_s2] sm:$0xff]  }
  0xb4   : > { %2962 = vmatmul.mubr.msk.bf16.vlgmr.msra.gmra.mrb[0].mxu0 %vm259_vm2, %v689_v2  ;;  %v1046_v2 = vpack.c.bf16 %v1040_v0, %v1039_v63 }
  0xb5   : > { %2982 = vmatpush3.bf16.msra.mxu0 %v830_v3  ;;  %2965 = vmatprep.mubr.msk.bf16.mxu0 %vm3620_vm1, %v3619_v1  ;;  %v1041_v3 = vld [vmem:[%s3680_s27 + $0x55] sm:$0xff] }
  0xb6   : > { %3003 = vmatprep.subr.bf16.mxu0 %v3619_v1  ;;  %v1047_v5 = vpack.c.bf16 %v1042_v4, %v1041_v3 }
  0xbc   : > { %2966 = vmatmul.mubr.msk.bf16.gmra.mrb[4].mxu0 %vm259_vm2, %v690_v6  ;;  %v1151_v6 = vld [vmem:[%s3680_s27 + $0x16] sm:$0xff] }
  0xbd   : > { %2969 = vmatprep.mubr.msk.bf16.mxu0 %vm3620_vm1, %v3619_v1  ;;  %v1161_v8 = vpack.c.bf16 %v1152_v7, %v1151_v6 }
  0xc4   : > { %2970 = vmatmul.mubr.msk.bf16.gmra.mrb[8].mxu0 %vm259_vm2, %v691_v9  ;;  %v1153_v9 = vld [vmem:[%s3680_s27 + $0x26] sm:$0xff] }
  0xc5   : > { %2973 = vmatprep.mubr.msk.bf16.mxu0 %vm3620_vm1, %v3619_v1  ;;  %v1162_v11 = vpack.c.bf16 %v1154_v10, %v1153_v9 }
  0xcc   : > { %2974 = vmatmul.mubr.msk.bf16.gmra.mrb[12].mxu0 %vm259_vm2, %v692_v12  ;;  %v1155_v12 = vld [vmem:[%s3680_s27 + $0x36] sm:$0xff]  ;;  %v1358_v28 = vpop.permute.xlu0 %1357 }
  0xcd   : > { %2977 = vmatprep.mubr.msk.bf16.mxu0 %vm3620_vm1, %v3619_v1  ;;  %v1163_v14 = vpack.c.bf16 %v1156_v13, %v1155_v12 }
  0xd0   : > { %v1363_v38 = vpop.permute.xlu0 %1362 }
  0xd4   : > { %2978 = vmatmul.mubr.msk.bf16.gmra.mrb[16].mxu0 %vm259_vm2, %v693_v15  ;;  %v1157_v15 = vld [vmem:[%s3680_s27 + $0x46] sm:$0xff]  ;;  %v1378_v6 = vpop.permute.xlu0 %1377 }
  0xd5   : > { %2983 = vmatprep.mubr.msk.bf16.mxu0 %vm3620_vm1, %v3619_v1  ;;  %v1164_v17 = vpack.c.bf16 %v1158_v16, %v1157_v15 }
  0xdc   : > { %2984 = vmatmul.mubr.msk.bf16.vlgmr.msra.gmra.mrb[0].mxu0 %vm259_vm2, %v807_v19  ;;  %v1160_v19 = vld [vmem:[%s3680_s27 + $0x5e] sm:$0xff] }
  0xdd   : > { %3004 = vmatpush3.bf16.msra.mxu0 %v948_v20  ;;  %2987 = vmatprep.mubr.msk.bf16.mxu0 %vm3620_vm1, %v3619_v1  ;;  %v1165_v20 = vpack.c.bf16 %v1160_v19, %v1159_v18 }
  0xde   : > { %3025 = vmatprep.subr.bf16.mxu0 %v3619_v1 }
  0xe4   : > { %2988 = vmatmul.mubr.msk.bf16.gmra.mrb[4].mxu0 %vm259_vm2, %v808_v23 }
  0xe5   : > { %2991 = vmatprep.mubr.msk.bf16.mxu0 %vm3620_vm1, %v3619_v1 }
  0xec   : > { %2992 = vmatmul.mubr.msk.bf16.gmra.mrb[8].mxu0 %vm259_vm2, %v809_v26 }
  0xed   : > { %2995 = vmatprep.mubr.msk.bf16.mxu0 %vm3620_vm1, %v3619_v1 }
  0xf4   : > { %2996 = vmatmul.mubr.msk.bf16.gmra.mrb[12].mxu0 %vm259_vm2, %v810_v29 }
  0xf5   : > { %2999 = vmatprep.mubr.msk.bf16.mxu0 %vm3620_vm1, %v3619_v1 }
  0xfc   : > { %3000 = vmatmul.mubr.msk.bf16.gmra.mrb[16].mxu0 %vm259_vm2, %v811_v36 }
  0xfd   : > { %3005 = vmatprep.mubr.msk.bf16.mxu0 %vm3620_vm1, %v3619_v1 }
 0x104   : > { %3006 = vmatmul.mubr.msk.bf16.vlgmr.msra.gmra.mrb[0].mxu0 %vm259_vm2, %v925_v42 }
 0x105   : > { %3026 = vmatpush3.bf16.msra.mxu0 %v1066_v44  ;;  %3009 = vmatprep.mubr.msk.bf16.mxu0 %vm3620_vm1, %v3619_v1  ;;  %v1368_v44 = vpop.permute.xlu1 %1367 }
 0x106   : > { %3047 = vmatprep.subr.bf16.mxu0 %v3619_v1 }
 0x10c   : > { %3010 = vmatmul.mubr.msk.bf16.gmra.mrb[4].mxu0 %vm259_vm2, %v926_v47 }
 0x10d   : > { %3013 = vmatprep.mubr.msk.bf16.mxu0 %vm3620_vm1, %v3619_v1 }
 0x114   : > { %3014 = vmatmul.mubr.msk.bf16.gmra.mrb[8].mxu0 %vm259_vm2, %v927_v48 }
 0x115   : > { %3017 = vmatprep.mubr.msk.bf16.mxu0 %vm3620_vm1, %v3619_v1 }
 0x11c   : > { %3018 = vmatmul.mubr.msk.bf16.gmra.mrb[12].mxu0 %vm259_vm2, %v928_v49 }
 0x11d   : > { %3021 = vmatprep.mubr.msk.bf16.mxu0 %vm3620_vm1, %v3619_v1 }
 0x124   : > { %3022 = vmatmul.mubr.msk.bf16.gmra.mrb[16].mxu0 %vm259_vm2, %v929_v51 }
 0x125   : > { %3027 = vmatprep.mubr.msk.bf16.mxu0 %vm3620_vm1, %v3619_v1 }
 0x12c   : > { %3028 = vmatmul.mubr.msk.bf16.vlgmr.msra.gmra.mrb[0].mxu0 %vm259_vm2, %v1043_v55  ;;  %v1373_v55 = vpop.permute.xlu1 %1372 }
 0x12d   : > { %3048 = vmatpush3.bf16.msra.mxu0 %v1184_v56  ;;  %3031 = vmatprep.mubr.msk.bf16.mxu0 %vm3620_vm1, %v3619_v1 }
 0x134   : > { %3032 = vmatmul.mubr.msk.bf16.gmra.mrb[4].mxu0 %vm259_vm2, %v1044_v59 }
 0x135   : > { %3035 = vmatprep.mubr.msk.bf16.mxu0 %vm3620_vm1, %v3619_v1 }
 0x13c   : > { %3036 = vmatmul.mubr.msk.bf16.gmra.mrb[8].mxu0 %vm259_vm2, %v1045_v62 }
 0x13d   : > { %3039 = vmatprep.mubr.msk.bf16.mxu0 %vm3620_vm1, %v3619_v1 }
 0x144   : > { %3040 = vmatmul.mubr.msk.bf16.gmra.mrb[12].mxu0 %vm259_vm2, %v1046_v2 }
 0x145   : > { %3043 = vmatprep.mubr.msk.bf16.mxu0 %vm3620_vm1, %v3619_v1 }
 0x14c   : > { %3044 = vmatmul.mubr.msk.bf16.gmra.mrb[16].mxu0 %vm259_vm2, %v1047_v5 }
 0x14d   : > { %3049 = vmatprep.mubr.msk.bf16.mxu0 %vm3620_vm1, %v3619_v1 }
 0x154   : > { %3050 = vmatmul.mubr.msk.bf16.vlgmr.msra.gmra.mrb[0].mxu0 %vm259_vm2, %v1161_v8 }
 0x155   : > { %3053 = vmatprep.mubr.msk.bf16.mxu0 %vm3620_vm1, %v3619_v1 }
 0x15c   : > { %3054 = vmatmul.mubr.msk.bf16.gmra.mrb[4].mxu0 %vm259_vm2, %v1162_v11  ;;  %v1383_v11 = vpop.permute.xlu1 %1382 }
 0x15d   : > { %3057 = vmatprep.mubr.msk.bf16.mxu0 %vm3620_vm1, %v3619_v1 }
 0x164   : > { %3058 = vmatmul.mubr.msk.bf16.gmra.mrb[8].mxu0 %vm259_vm2, %v1163_v14 }
 0x165   : > { %3061 = vmatprep.mubr.msk.bf16.mxu0 %vm3620_vm1, %v3619_v1 }
 0x16c   : > { %3062 = vmatmul.mubr.msk.bf16.gmra.mrb[12].mxu0 %vm259_vm2, %v1164_v17 }
 0x16d   : > { %3065 = vmatprep.mubr.msk.bf16.mxu0 %vm3620_vm1, %v3619_v1 }
 0x174   : > { %3066 = vmatmul.mubr.msk.bf16.gmra.mrb[16].mxu0 %vm259_vm2, %v1165_v20 }
 0x227   : > { %v1220_v23 = vpop.f32.mrb[0].mxu0 }
 0x228   : > { %v1275_v25 = vmul.f32 %v3986_v22, %v1220_v23  ;;  %v3051_v26 = vpop.f32.mrb[1].mxu0 }
 0x229   : > { %v1223_v27 = vpop.f32.mrb[2].mxu0 }
 0x22a   : > { %v1289_v29 = vadd.f32 %v3991_v24, %v1275_v25  ;;  %v1276_v30 = vmul.f32 %v3986_v22, %v1223_v27  ;;  %v3052_v31 = vpop.f32.mrb[3].mxu0  ;;  %v1388_v27 = vpop.permute.xlu0 %1387 }
 0x22c   : > { %vm1299_vm4 = vcmp.ge.f32.partialorder %v1289_v29, 0.0  ;;  %v1309_v32 = vmul.f32 0.01, %v1289_v29  ;;  %v1290_v33 = vadd.f32 %v3991_v24, %v1276_v30 }
 0x22e   : > { %v1319_v34 = vsel %vm1299_vm4, %v1289_v29, %v1309_v32  ;;  %vm1300_vm5 = vcmp.ge.f32.partialorder %v1290_v33, 0.0  ;;  %v1310_v35 = vmul.f32 0.01, %v1290_v33  ;;  %v1393_v32 = vpop.permute.xlu1 %1392 }
 0x22f   : > { %v1405_v36 = vmul.f32 %v1358_v28, %v1319_v34  ;;  %v1228_v37 = vpop.f32.mrb[4].mxu0 }
 0x230   : > { %v1320_v39 = vsel %vm1300_vm5, %v1290_v33, %v1310_v35  ;;  %v1277_v40 = vmul.f32 %v3986_v22, %v1228_v37  ;;  %v3055_v41 = vpop.f32.mrb[5].mxu0 }
 0x231   : > { %1415 = vst.msk [vmem:[#allocation2 + $0xb] sm:$0xff] %vm1329_vm3, %v1405_v36  ;;  %v1406_v42 = vmul.f32 %v1363_v38, %v1320_v39  ;;  %v1231_v43 = vpop.f32.mrb[6].mxu0 }
 0x232   : > { %v1291_v45 = vadd.f32 %v3991_v24, %v1277_v40  ;;  %v1278_v46 = vmul.f32 %v3986_v22, %v1231_v43  ;;  %v3056_v47 = vpop.f32.mrb[7].mxu0 }
 0x233   : > { %1416 = vst.msk [vmem:[#allocation2 + $0x13] sm:$0xff] %vm1329_vm3, %v1406_v42 }
 0x234   : > { %vm1301_vm6 = vcmp.ge.f32.partialorder %v1291_v45, 0.0  ;;  %v1311_v48 = vmul.f32 0.01, %v1291_v45  ;;  %v1292_v49 = vadd.f32 %v3991_v24, %v1278_v46  ;;  %v1398_v46 = vpop.permute.xlu0 %1397 }
 0x236   : > { %v1321_v50 = vsel %vm1301_vm6, %v1291_v45, %v1311_v48  ;;  %vm1302_vm7 = vcmp.ge.f32.partialorder %v1292_v49, 0.0  ;;  %v1312_v51 = vmul.f32 0.01, %v1292_v49 }
 0x237   : > { %v1407_v53 = vmul.f32 %v1368_v44, %v1321_v50  ;;  %v1236_v54 = vpop.f32.mrb[8].mxu0  ;;  %v1403_v50 = vpop.permute.xlu1 %1402 }
 0x238   : > { %v1322_v56 = vsel %vm1302_vm7, %v1292_v49, %v1312_v51  ;;  %v1279_v57 = vmul.f32 %v3986_v22, %v1236_v54  ;;  %v3059_v58 = vpop.f32.mrb[9].mxu0  ;;  %v1443_v59 = vld [vmem:[#allocation2 + $0x9] sm:$0xff] }
 0x239   : > { %1417 = vst.msk [vmem:[#allocation2 + $0x1b] sm:$0xff] %vm1329_vm3, %v1407_v53  ;;  %v1408_v61 = vmul.f32 %v1373_v55, %v1322_v56  ;;  %v1239_v62 = vpop.f32.mrb[10].mxu0  ;;  %v1452_v63 = vpack.c.bf16 %v1443_v59, %v1442_v52  ;;  %v1426_v58 = vld [vmem:[#allocation2 + $0x8] sm:$0xff]  ;;  %v3604_v59 = vld [vmem:[%s4248_s2 + $0x10] sm:$0xff]  }
 0x23a   : > { %v1293_v0 = vadd.f32 %v3991_v24, %v1279_v57  ;;  %v1280_v2 = vmul.f32 %v3986_v22, %v1239_v62  ;;  %v3060_v3 = vpop.f32.mrb[11].mxu0  ;;  %v1444_v15 = vld [vmem:[#allocation2 + $0x11] sm:$0xff]  ;;  %v1425_v57 = vld [vmem:[#allocation2] sm:$0xff] }
 0x23b   : > { %1418 = vst.msk [vmem:[#allocation2 + $0x23] sm:$0xff] %vm1329_vm3, %v1408_v61  ;;  %3072 = vmatmul.mubr.msk.bf16.vlgmr.msra.gmra.mrb[0].mxu1 %vm1329_vm3, %v1452_v63  ;;  %v1427_v62 = vld [vmem:[#allocation2 + $0x10] sm:$0xff] }
 0x23c   : > { %vm1303_vm8 = vcmp.ge.f32.partialorder %v1293_v0, 0.0  ;;  %v1313_v4 = vmul.f32 0.01, %v1293_v0  ;;  %v1294_v5 = vadd.f32 %v3991_v24, %v1280_v2  ;;  %3092 = vmatpush3.bf16.msra.mxu1 %v3603_v60  ;;  %3075 = vmatprep.mubr.msk.bf16.mxu1 %vm3620_vm1, %v3619_v1  ;;  %v1435_v60 = vpack.c.bf16 %v1426_v58, %v1425_v57 }
 0x23d   : > { %3113 = vmatprep.subr.bf16.mxu1 %v3619_v1 }
 0x23e   : > { %v1323_v7 = vsel %vm1303_vm8, %v1293_v0, %v1313_v4  ;;  %vm1304_vm9 = vcmp.ge.f32.partialorder %v1294_v5, 0.0  ;;  %v1314_v8 = vmul.f32 0.01, %v1294_v5 }
 0x23f   : > { %v1409_v9 = vmul.f32 %v1378_v6, %v1323_v7  ;;  %v1244_v10 = vpop.f32.mrb[12].mxu0 }
 0x240   : > { %v1324_v12 = vsel %vm1304_vm9, %v1294_v5, %v1314_v8  ;;  %v1281_v13 = vmul.f32 %v3986_v22, %v1244_v10  ;;  %v3063_v14 = vpop.f32.mrb[13].mxu0  ;;  %v1445_v16 = vld [vmem:[#allocation2 + $0x19] sm:$0xff]  ;;  %v1648_v10 = vld [vmem:[#allocation2 + $0x2] sm:$0xff] }
 0x241   : > { %1419 = vst.msk [vmem:[#allocation2 + $0x2b] sm:$0xff] %vm1329_vm3, %v1409_v9  ;;  %v1410_v17 = vmul.f32 %v1383_v11, %v1324_v12  ;;  %v1247_v18 = vpop.f32.mrb[14].mxu0  ;;  %v1453_v19 = vpack.c.bf16 %v1445_v16, %v1444_v15  ;;  %v1428_v61 = vld [vmem:[#allocation2 + $0x18] sm:$0xff]  ;;  %v1649_v11 = vld [vmem:[#allocation2 + $0xa] sm:$0xff] }
 0x242   : > { %v1295_v20 = vadd.f32 %v3991_v24, %v1281_v13  ;;  %v1282_v21 = vmul.f32 %v3986_v22, %v1247_v18  ;;  %v3064_v23 = vpop.f32.mrb[15].mxu0  ;;  %v1446_v36 = vld [vmem:[#allocation2 + $0x21] sm:$0xff]  ;;  %v1436_v63 = vpack.c.bf16 %v1428_v61, %v1427_v62  ;;  %v3605_v12 = vld [vmem:[%s4248_s2 + $0x18] sm:$0xff]   ;;  %v1658_v13 = vpack.c.bf16 %v1649_v11, %v1648_v10 }
 0x243   : > { %1420 = vst.msk [vmem:[#allocation2 + $0x33] sm:$0xff] %vm1329_vm3, %v1410_v17  ;;  %3076 = vmatmul.mubr.msk.bf16.gmra.mrb[4].mxu1 %vm1329_vm3, %v1453_v19  ;;  %v1429_v2 = vld [vmem:[#allocation2 + $0x20] sm:$0xff]  ;;  %v1650_v15 = vld [vmem:[#allocation2 + $0x12] sm:$0xff] }
 0x244   : > { %vm1305_vm10 = vcmp.ge.f32.partialorder %v1295_v20, 0.0  ;;  %v1315_v25 = vmul.f32 0.01, %v1295_v20  ;;  %v1296_v26 = vadd.f32 %v3991_v24, %v1282_v21  ;;  %3079 = vmatprep.mubr.msk.bf16.mxu1 %vm3620_vm1, %v3619_v1  ;;  %v1651_v14 = vld [vmem:[#allocation2 + $0x1a] sm:$0xff]  ;;  %v1652_v18 = vld [vmem:[#allocation2 + $0x22] sm:$0xff] }
 0x245   : > { %v1659_v16 = vpack.c.bf16 %v1651_v14, %v1650_v15  ;;  %v2258_v10 = vld [vmem:[#allocation2 + $0x15] sm:$0xff] }
 0x246   : > { %v1325_v28 = vsel %vm1305_vm10, %v1295_v20, %v1315_v25  ;;  %vm1306_vm11 = vcmp.ge.f32.partialorder %v1296_v26, 0.0  ;;  %v1316_v29 = vmul.f32 0.01, %v1296_v26 }
 0x247   : > { %v1411_v30 = vmul.f32 %v1388_v27, %v1325_v28  ;;  %v1252_v31 = vpop.f32.mrb[16].mxu0  ;;  %v3606_v28 = vld [vmem:[%s4248_s2 + $0x20] sm:$0xff]  }
 0x248   : > { %v1326_v33 = vsel %vm1306_vm11, %v1296_v26, %v1316_v29  ;;  %v1283_v34 = vmul.f32 %v3986_v22, %v1252_v31  ;;  %v3067_v35 = vpop.f32.mrb[17].mxu0  ;;  %v1447_v37 = vld [vmem:[#allocation2 + $0x29] sm:$0xff]  ;;  %v1780_v29 = vpack.c.bf16 %v1650_v15, %v1649_v11  ;;  %v3610_v11 = vld [vmem:[%s4248_s2 + $0x40] sm:$0xff]  }
 0x249   : > { %1421 = vst.msk [vmem:[#allocation2 + $0x3b] sm:$0xff] %vm1329_vm3, %v1411_v30  ;;  %v1412_v38 = vmul.f32 %v1393_v32, %v1326_v33  ;;  %v1255_v39 = vpop.f32.mrb[18].mxu0  ;;  %v1454_v40 = vpack.c.bf16 %v1447_v37, %v1446_v36  ;;  %v1430_v0 = vld [vmem:[#allocation2 + $0x28] sm:$0xff]  ;;  %v1781_v30 = vpack.c.bf16 %v1652_v18, %v1651_v14  ;;  %v1893_v35 = vld [vmem:[#allocation2 + $0x13] sm:$0xff] }
 0x24a   : > { %v1297_v41 = vadd.f32 %v3991_v24, %v1283_v34  ;;  %v1284_v42 = vmul.f32 %v3986_v22, %v1255_v39  ;;  %v3068_v43 = vpop.f32.mrb[19].mxu0  ;;  %v1448_v22 = vld [vmem:[#allocation2 + $0x31] sm:$0xff]  ;;  %v1437_v3 = vpack.c.bf16 %v1430_v0, %v1429_v2  ;;  %v3607_v37 = vld [vmem:[%s4248_s2 + $0x28] sm:$0xff]  }
 0x24b   : > { %1422 = vst.msk [vmem:[#allocation2 + $0x43] sm:$0xff] %vm1329_vm3, %v1412_v38  ;;  %3080 = vmatmul.mubr.msk.bf16.gmra.mrb[8].mxu1 %vm1329_vm3, %v1454_v40  ;;  %v1431_v5 = vld [vmem:[#allocation2 + $0x30] sm:$0xff]  ;;  %v1895_v39 = vld [vmem:[#allocation2 + $0x23] sm:$0xff]  ;;  %v1894_v40 = vld [vmem:[#allocation2 + $0x1b] sm:$0xff] }
 0x24c   : > { %vm1307_vm12 = vcmp.ge.f32.partialorder %v1297_v41, 0.0  ;;  %v1317_v44 = vmul.f32 0.01, %v1297_v41  ;;  %v1298_v45 = vadd.f32 %v3991_v24, %v1284_v42  ;;  %3083 = vmatprep.mubr.msk.bf16.mxu1 %vm3620_vm1, %v3619_v1  ;;  %v1653_v17 = vld [vmem:[#allocation2 + $0x2a] sm:$0xff]  ;;  %v1654_v21 = vld [vmem:[#allocation2 + $0x32] sm:$0xff] }
 0x24d   : > { %v1660_v19 = vpack.c.bf16 %v1653_v17, %v1652_v18  ;;  %v1782_v31 = vpack.c.bf16 %v1654_v21, %v1653_v17  ;;  %v1892_v36 = vld [vmem:[#allocation2 + $0xb] sm:$0xff]  ;;  %v1897_v42 = vld [vmem:[#allocation2 + $0x33] sm:$0xff] }
 0x24e   : > { %v1327_v47 = vsel %vm1307_vm12, %v1297_v41, %v1317_v44  ;;  %vm1308_vm13 = vcmp.ge.f32.partialorder %v1298_v45, 0.0  ;;  %v1318_v48 = vmul.f32 0.01, %v1298_v45  ;;  %v1902_v38 = vpack.c.bf16 %v1893_v35, %v1892_v36  ;;  %v1896_v43 = vld [vmem:[#allocation2 + $0x2b] sm:$0xff]  ;;  %v3609_v2 = vld [vmem:[%s4248_s2 + $0x38] sm:$0xff]  }
 0x24f   : > { %v1413_v49 = vmul.f32 %v1398_v46, %v1327_v47  ;;  %v1903_v41 = vpack.c.bf16 %v1895_v39, %v1894_v40  ;;  %v1904_v44 = vpack.c.bf16 %v1897_v42, %v1896_v43  ;;  %v2018_v57 = vld [vmem:[#allocation2 + $0x2c] sm:$0xff]  ;;  %v2389_v40 = vld [vmem:[#allocation2 + $0x5e] sm:$0xff] }
 0x250   : > { %v1328_v51 = vsel %vm1308_vm13, %v1298_v45, %v1318_v48  ;;  %v1449_v52 = vld [vmem:[#allocation2 + $0x39] sm:$0xff]  ;;  %v2260_v14 = vld [vmem:[#allocation2 + $0x25] sm:$0xff]  ;;  %v4190_v42 = vld [vmem:[%s4249_s3 + $0x2] ss:$0 sm:$0xff] }
 0x251   : > { %1423 = vst.msk [vmem:[#allocation2 + $0x4b] sm:$0xff] %vm1329_vm3, %v1413_v49  ;;  %v1414_v53 = vmul.f32 %v1403_v50, %v1328_v51  ;;  %v1455_v54 = vpack.c.bf16 %v1449_v52, %v1448_v22  ;;  %v1432_v4 = vld [vmem:[#allocation2 + $0x38] sm:$0xff]  ;;  %v2014_v22 = vld [vmem:[#allocation2 + $0xc] sm:$0xff] }
 0x252   : > { %v1450_v24 = vld [vmem:[#allocation2 + $0x41] sm:$0xff]  ;;  %v1438_v6 = vpack.c.bf16 %v1432_v4, %v1431_v5  ;;  %v2015_v51 = vld [vmem:[#allocation2 + $0x14] sm:$0xff] }
 0x253   : > { %1424 = vst.msk [vmem:[#allocation2 + $0x53] sm:$0xff] %vm1329_vm3, %v1414_v53  ;;  %3084 = vmatmul.mubr.msk.bf16.gmra.mrb[12].mxu1 %vm1329_vm3, %v1455_v54  ;;  %v1433_v8 = vld [vmem:[#allocation2 + $0x40] sm:$0xff]  ;;  %v3608_v52 = vld [vmem:[%s4248_s2 + $0x30] sm:$0xff]   ;;  %v2024_v53 = vpack.c.bf16 %v2015_v51, %v2014_v22 }
 0x254   : > { %3087 = vmatprep.mubr.msk.bf16.mxu1 %vm3620_vm1, %v3619_v1  ;;  %v1655_v20 = vld [vmem:[#allocation2 + $0x3a] sm:$0xff]  ;;  %v1656_v26 = vld [vmem:[#allocation2 + $0x42] sm:$0xff] }
 0x255   : > { %v1661_v23 = vpack.c.bf16 %v1655_v20, %v1654_v21  ;;  %v1783_v32 = vpack.c.bf16 %v1656_v26, %v1655_v20  ;;  %v1899_v45 = vld [vmem:[#allocation2 + $0x43] sm:$0xff]  ;;  %v1898_v46 = vld [vmem:[#allocation2 + $0x3b] sm:$0xff] }
 0x256   : > { %v1905_v47 = vpack.c.bf16 %v1899_v45, %v1898_v46  ;;  %v2017_v54 = vld [vmem:[#allocation2 + $0x24] sm:$0xff]  ;;  %v2262_v17 = vld [vmem:[#allocation2 + $0x35] sm:$0xff] }
 0x257   : > { %v2147_v4 = vpack.c.bf16 %v2018_v57, %v2017_v54 }
 0x258   : > { %v1451_v55 = vld [vmem:[#allocation2 + $0x49] sm:$0xff] }
 0x259   : > { %v1456_v56 = vpack.c.bf16 %v1451_v55, %v1450_v24  ;;  %v1434_v7 = vld [vmem:[#allocation2 + $0x48] sm:$0xff]  ;;  %v2016_v24 = vld [vmem:[#allocation2 + $0x1c] sm:$0xff] }
 0x25a   : > { %v1439_v9 = vpack.c.bf16 %v1434_v7, %v1433_v8  ;;  %v1657_v25 = vld [vmem:[#allocation2 + $0x4a] sm:$0xff]  ;;  %v1779_v33 = vld [vmem:[#allocation2 + $0x52] sm:$0xff]  ;;  %v2025_v55 = vpack.c.bf16 %v2017_v54, %v2016_v24  ;;  %v2145_v7 = vld [vmem:[#allocation2 + $0x5c] sm:$0xff] }
 0x25b   : > { %3088 = vmatmul.mubr.msk.bf16.gmra.mrb[16].mxu1 %vm1329_vm3, %v1456_v56  ;;  %v1662_v27 = vpack.c.bf16 %v1657_v25, %v1656_v26  ;;  %v1784_v34 = vpack.c.bf16 %v1779_v33, %v1657_v25  ;;  %v1901_v48 = vld [vmem:[#allocation2 + $0x53] sm:$0xff]  ;;  %v1900_v49 = vld [vmem:[#allocation2 + $0x4b] sm:$0xff]  ;;  %v2267_v25 = vld [vmem:[#allocation2 + $0x5d] sm:$0xff] }
 0x25c   : > { %3093 = vmatprep.mubr.msk.bf16.mxu1 %vm3620_vm1, %v3619_v1  ;;  %v1906_v50 = vpack.c.bf16 %v1901_v48, %v1900_v49  ;;  %v2019_v56 = vld [vmem:[#allocation2 + $0x34] sm:$0xff]  ;;  %v2022_v62 = vld [vmem:[#allocation2 + $0x4c] sm:$0xff]  ;;  %v2385_v33 = vld [vmem:[#allocation2 + $0x3e] sm:$0xff] }
 0x25d   : > { %v2026_v58 = vpack.c.bf16 %v2019_v56, %v2018_v57  ;;  %v2264_v20 = vld [vmem:[#allocation2 + $0x45] sm:$0xff]  ;;  %v2387_v36 = vld [vmem:[#allocation2 + $0x4e] sm:$0xff]  ;;  %v2388_v39 = vld [vmem:[#allocation2 + $0x56] sm:$0xff] }
 0x263   : > { %3094 = vmatmul.mubr.msk.bf16.vlgmr.msra.gmra.mrb[0].mxu1 %vm1329_vm3, %v1435_v60  ;;  %v2020_v60 = vld [vmem:[#allocation2 + $0x3c] sm:$0xff] }
 0x264   : > { %3114 = vmatpush3.bf16.msra.mxu1 %v3604_v59  ;;  %3097 = vmatprep.mubr.msk.bf16.mxu1 %vm3620_vm1, %v3619_v1  ;;  %v2021_v59 = vld [vmem:[#allocation2 + $0x44] sm:$0xff]  ;;  %v2148_v5 = vpack.c.bf16 %v2020_v60, %v2019_v56 }
 0x265   : > { %3135 = vmatprep.subr.bf16.mxu1 %v3619_v1  ;;  %v2027_v61 = vpack.c.bf16 %v2021_v59, %v2020_v60 }
 0x26b   : > { %3098 = vmatmul.mubr.msk.bf16.gmra.mrb[4].mxu1 %vm1329_vm3, %v1436_v63  ;;  %v2023_v63 = vld [vmem:[#allocation2 + $0x54] sm:$0xff] }
 0x26c   : > { %3101 = vmatprep.mubr.msk.bf16.mxu1 %vm3620_vm1, %v3619_v1  ;;  %v2028_v0 = vpack.c.bf16 %v2023_v63, %v2022_v62  ;;  %v2150_v8 = vpack.c.bf16 %v2145_v7, %v2023_v63 }
 0x273   : > { %3102 = vmatmul.mubr.msk.bf16.gmra.mrb[8].mxu1 %vm1329_vm3, %v1437_v3  ;;  %v2146_v3 = vpack.c.bf16 %v2016_v24, %v2015_v51 }
 0x274   : > { %3105 = vmatprep.mubr.msk.bf16.mxu1 %vm3620_vm1, %v3619_v1 }
 0x27b   : > { %3106 = vmatmul.mubr.msk.bf16.gmra.mrb[12].mxu1 %vm1329_vm3, %v1438_v6  ;;  %v2149_v6 = vpack.c.bf16 %v2022_v62, %v2021_v59 }
 0x27c   : > { %3109 = vmatprep.mubr.msk.bf16.mxu1 %vm3620_vm1, %v3619_v1 }
 0x283   : > { %3110 = vmatmul.mubr.msk.bf16.gmra.mrb[16].mxu1 %vm1329_vm3, %v1439_v9  ;;  %v2259_v9 = vld [vmem:[#allocation2 + $0x1d] sm:$0xff] }
 0x284   : > { %3115 = vmatprep.mubr.msk.bf16.mxu1 %vm3620_vm1, %v3619_v1 }
 0x28b   : > { %3116 = vmatmul.mubr.msk.bf16.vlgmr.msra.gmra.mrb[0].mxu1 %vm1329_vm3, %v1658_v13  ;;  %v2261_v13 = vld [vmem:[#allocation2 + $0x2d] sm:$0xff] }
 0x28c   : > { %3136 = vmatpush3.bf16.msra.mxu1 %v3605_v12  ;;  %3119 = vmatprep.mubr.msk.bf16.mxu1 %vm3620_vm1, %v3619_v1  ;;  %v2268_v12 = vpack.c.bf16 %v2259_v9, %v2258_v10  ;;  %v2269_v15 = vpack.c.bf16 %v2261_v13, %v2260_v14 }
 0x28d   : > { %3157 = vmatprep.subr.bf16.mxu1 %v3619_v1 }
 0x293   : > { %3120 = vmatmul.mubr.msk.bf16.gmra.mrb[4].mxu1 %vm1329_vm3, %v1659_v16  ;;  %v2263_v16 = vld [vmem:[#allocation2 + $0x3d] sm:$0xff] }
 0x294   : > { %3123 = vmatprep.mubr.msk.bf16.mxu1 %vm3620_vm1, %v3619_v1  ;;  %v2270_v18 = vpack.c.bf16 %v2263_v16, %v2262_v17 }
 0x29b   : > { %3124 = vmatmul.mubr.msk.bf16.gmra.mrb[8].mxu1 %vm1329_vm3, %v1660_v19  ;;  %v2265_v19 = vld [vmem:[#allocation2 + $0x4d] sm:$0xff] }
 0x29c   : > { %3127 = vmatprep.mubr.msk.bf16.mxu1 %vm3620_vm1, %v3619_v1  ;;  %v2271_v21 = vpack.c.bf16 %v2265_v19, %v2264_v20 }
 0x2a3   : > { %3128 = vmatmul.mubr.msk.bf16.gmra.mrb[12].mxu1 %vm1329_vm3, %v1661_v23  ;;  %v2266_v23 = vld [vmem:[#allocation2 + $0x55] sm:$0xff] }
 0x2a4   : > { %3131 = vmatprep.mubr.msk.bf16.mxu1 %vm3620_vm1, %v3619_v1  ;;  %v2272_v26 = vpack.c.bf16 %v2267_v25, %v2266_v23 }
 0x2ab   : > { %3132 = vmatmul.mubr.msk.bf16.gmra.mrb[16].mxu1 %vm1329_vm3, %v1662_v27  ;;  %v2381_v27 = vld [vmem:[#allocation2 + $0x1e] sm:$0xff] }
 0x2ac   : > { %3137 = vmatprep.mubr.msk.bf16.mxu1 %vm3620_vm1, %v3619_v1 }
 0x2b3   : > { %3138 = vmatmul.mubr.msk.bf16.vlgmr.msra.gmra.mrb[0].mxu1 %vm1329_vm3, %v1780_v29 }
 0x2b4   : > { %3158 = vmatpush3.bf16.msra.mxu1 %v3606_v28  ;;  %3141 = vmatprep.mubr.msk.bf16.mxu1 %vm3620_vm1, %v3619_v1  ;;  %v2380_v28 = vld [vmem:[#allocation2 + $0x16] sm:$0xff] }
 0x2b5   : > { %3179 = vmatprep.subr.bf16.mxu1 %v3619_v1  ;;  %v2390_v29 = vpack.c.bf16 %v2381_v27, %v2380_v28 }
 0x2bb   : > { %3142 = vmatmul.mubr.msk.bf16.gmra.mrb[4].mxu1 %vm1329_vm3, %v1781_v30  ;;  %v2383_v30 = vld [vmem:[#allocation2 + $0x2e] sm:$0xff] }
 0x2bc   : > { %3145 = vmatprep.mubr.msk.bf16.mxu1 %vm3620_vm1, %v3619_v1 }
 0x2c3   : > { %3146 = vmatmul.mubr.msk.bf16.gmra.mrb[8].mxu1 %vm1329_vm3, %v1782_v31  ;;  %v2382_v31 = vld [vmem:[#allocation2 + $0x26] sm:$0xff] }
 0x2c4   : > { %3149 = vmatprep.mubr.msk.bf16.mxu1 %vm3620_vm1, %v3619_v1 }
 0x2cb   : > { %3150 = vmatmul.mubr.msk.bf16.gmra.mrb[12].mxu1 %vm1329_vm3, %v1783_v32  ;;  %v2391_v32 = vpack.c.bf16 %v2383_v30, %v2382_v31 }
 0x2cc   : > { %3153 = vmatprep.mubr.msk.bf16.mxu1 %vm3620_vm1, %v3619_v1 }
 0x2d3   : > { %3154 = vmatmul.mubr.msk.bf16.gmra.mrb[16].mxu1 %vm1329_vm3, %v1784_v34  ;;  %v2384_v34 = vld [vmem:[#allocation2 + $0x36] sm:$0xff] }
 0x2d4   : > { %3159 = vmatprep.mubr.msk.bf16.mxu1 %vm3620_vm1, %v3619_v1  ;;  %v2392_v35 = vpack.c.bf16 %v2385_v33, %v2384_v34 }
 0x2db   : > { %3160 = vmatmul.mubr.msk.bf16.vlgmr.msra.gmra.mrb[0].mxu1 %vm1329_vm3, %v1902_v38 }
 0x2dc   : > { %3180 = vmatpush3.bf16.msra.mxu1 %v3607_v37  ;;  %3163 = vmatprep.mubr.msk.bf16.mxu1 %vm3620_vm1, %v3619_v1  ;;  %v2386_v37 = vld [vmem:[#allocation2 + $0x46] sm:$0xff] }
 0x2dd   : > { %3201 = vmatprep.subr.bf16.mxu1 %v3619_v1  ;;  %v2393_v38 = vpack.c.bf16 %v2387_v36, %v2386_v37 }
 0x2e3   : > { %3164 = vmatmul.mubr.msk.bf16.gmra.mrb[4].mxu1 %vm1329_vm3, %v1903_v41  ;;  %v2394_v41 = vpack.c.bf16 %v2389_v40, %v2388_v39 }
 0x2e4   : > { %3167 = vmatprep.mubr.msk.bf16.mxu1 %vm3620_vm1, %v3619_v1 }
 0x2eb   : > { %3168 = vmatmul.mubr.msk.bf16.gmra.mrb[8].mxu1 %vm1329_vm3, %v1904_v44  ;;  %v4195_v44 = vld [vmem:[%s4249_s3 + $0x3] ss:$0 sm:$0xff] }
 0x2ec   : > { %3171 = vmatprep.mubr.msk.bf16.mxu1 %vm3620_vm1, %v3619_v1 }
 0x2f3   : > { %3172 = vmatmul.mubr.msk.bf16.gmra.mrb[12].mxu1 %vm1329_vm3, %v1905_v47 }
 0x2f4   : > { %3175 = vmatprep.mubr.msk.bf16.mxu1 %vm3620_vm1, %v3619_v1 }
 0x2fb   : > { %3176 = vmatmul.mubr.msk.bf16.gmra.mrb[16].mxu1 %vm1329_vm3, %v1906_v50 }
 0x2fc   : > { %3181 = vmatprep.mubr.msk.bf16.mxu1 %vm3620_vm1, %v3619_v1 }
 0x303   : > { %3182 = vmatmul.mubr.msk.bf16.vlgmr.msra.gmra.mrb[0].mxu1 %vm1329_vm3, %v2024_v53 }
 0x304   : > { %3202 = vmatpush3.bf16.msra.mxu1 %v3608_v52  ;;  %3185 = vmatprep.mubr.msk.bf16.mxu1 %vm3620_vm1, %v3619_v1 }
 0x305   : > { %3223 = vmatprep.subr.bf16.mxu1 %v3619_v1 }
 0x30b   : > { %3186 = vmatmul.mubr.msk.bf16.gmra.mrb[4].mxu1 %vm1329_vm3, %v2025_v55 }
 0x30c   : > { %3189 = vmatprep.mubr.msk.bf16.mxu1 %vm3620_vm1, %v3619_v1 }
 0x313   : > { %3190 = vmatmul.mubr.msk.bf16.gmra.mrb[8].mxu1 %vm1329_vm3, %v2026_v58 }
 0x314   : > { %3193 = vmatprep.mubr.msk.bf16.mxu1 %vm3620_vm1, %v3619_v1 }
 0x31b   : > { %3194 = vmatmul.mubr.msk.bf16.gmra.mrb[12].mxu1 %vm1329_vm3, %v2027_v61 }
 0x31c   : > { %3197 = vmatprep.mubr.msk.bf16.mxu1 %vm3620_vm1, %v3619_v1 }
 0x323   : > { %3198 = vmatmul.mubr.msk.bf16.gmra.mrb[16].mxu1 %vm1329_vm3, %v2028_v0 }
 0x324   : > { %3203 = vmatprep.mubr.msk.bf16.mxu1 %vm3620_vm1, %v3619_v1 }
 0x32b   : > { %3204 = vmatmul.mubr.msk.bf16.vlgmr.msra.gmra.mrb[0].mxu1 %vm1329_vm3, %v2146_v3 }
 0x32c   : > { %3224 = vmatpush3.bf16.msra.mxu1 %v3609_v2  ;;  %3207 = vmatprep.mubr.msk.bf16.mxu1 %vm3620_vm1, %v3619_v1 }
 0x32d   : > { %3245 = vmatprep.subr.bf16.mxu1 %v3619_v1 }
 0x333   : > { %3208 = vmatmul.mubr.msk.bf16.gmra.mrb[4].mxu1 %vm1329_vm3, %v2147_v4 }
 0x334   : > { %3211 = vmatprep.mubr.msk.bf16.mxu1 %vm3620_vm1, %v3619_v1 }
 0x33b   : > { %3212 = vmatmul.mubr.msk.bf16.gmra.mrb[8].mxu1 %vm1329_vm3, %v2148_v5 }
 0x33c   : > { %3215 = vmatprep.mubr.msk.bf16.mxu1 %vm3620_vm1, %v3619_v1 }
 0x343   : > { %3216 = vmatmul.mubr.msk.bf16.gmra.mrb[12].mxu1 %vm1329_vm3, %v2149_v6 }
 0x344   : > { %3219 = vmatprep.mubr.msk.bf16.mxu1 %vm3620_vm1, %v3619_v1 }
 0x34b   : > { %3220 = vmatmul.mubr.msk.bf16.gmra.mrb[16].mxu1 %vm1329_vm3, %v2150_v8 }
 0x34c   : > { %3225 = vmatprep.mubr.msk.bf16.mxu1 %vm3620_vm1, %v3619_v1 }
 0x353   : > { %3226 = vmatmul.mubr.msk.bf16.vlgmr.msra.gmra.mrb[0].mxu1 %vm1329_vm3, %v2268_v12 }
 0x354   : > { %3246 = vmatpush3.bf16.msra.mxu1 %v3610_v11  ;;  %3229 = vmatprep.mubr.msk.bf16.mxu1 %vm3620_vm1, %v3619_v1 }
 0x35b   : > { %3230 = vmatmul.mubr.msk.bf16.gmra.mrb[4].mxu1 %vm1329_vm3, %v2269_v15 }
 0x35c   : > { %3233 = vmatprep.mubr.msk.bf16.mxu1 %vm3620_vm1, %v3619_v1 }
 0x363   : > { %3234 = vmatmul.mubr.msk.bf16.gmra.mrb[8].mxu1 %vm1329_vm3, %v2270_v18 }
 0x364   : > { %3237 = vmatprep.mubr.msk.bf16.mxu1 %vm3620_vm1, %v3619_v1 }
 0x36b   : > { %3238 = vmatmul.mubr.msk.bf16.gmra.mrb[12].mxu1 %vm1329_vm3, %v2271_v21 }
 0x36c   : > { %3241 = vmatprep.mubr.msk.bf16.mxu1 %vm3620_vm1, %v3619_v1 }
 0x373   : > { %3242 = vmatmul.mubr.msk.bf16.gmra.mrb[16].mxu1 %vm1329_vm3, %v2272_v26 }
 0x374   : > { %3247 = vmatprep.mubr.msk.bf16.mxu1 %vm3620_vm1, %v3619_v1 }
 0x37b   : > { %3248 = vmatmul.mubr.msk.bf16.vlgmr.msra.gmra.mrb[0].mxu1 %vm1329_vm3, %v2390_v29 }
 0x37c   : > { %3251 = vmatprep.mubr.msk.bf16.mxu1 %vm3620_vm1, %v3619_v1 }
 0x383   : > { %3252 = vmatmul.mubr.msk.bf16.gmra.mrb[4].mxu1 %vm1329_vm3, %v2391_v32 }
 0x384   : > { %3255 = vmatprep.mubr.msk.bf16.mxu1 %vm3620_vm1, %v3619_v1 }
 0x38b   : > { %3256 = vmatmul.mubr.msk.bf16.gmra.mrb[8].mxu1 %vm1329_vm3, %v2392_v35 }
 0x38c   : > { %3259 = vmatprep.mubr.msk.bf16.mxu1 %vm3620_vm1, %v3619_v1 }
 0x393   : > { %3260 = vmatmul.mubr.msk.bf16.gmra.mrb[12].mxu1 %vm1329_vm3, %v2393_v38 }
 0x394   : > { %3263 = vmatprep.mubr.msk.bf16.mxu1 %vm3620_vm1, %v3619_v1 }
 0x39b   : > { %3264 = vmatmul.mubr.msk.bf16.gmra.mrb[16].mxu1 %vm1329_vm3, %v2394_v41 }
 0x44e   : > { %v2453_v43 = vpop.f32.mrb[0].mxu1 }
 0x44f   : > { %v2508_v45 = vmul.f32 %v4190_v42, %v2453_v43  ;;  %v3249_v1 = vpop.f32.mrb[1].mxu1 }
 0x450   : > { %v2456_v46 = vpop.f32.mrb[2].mxu1 }
 0x451   : > { %v2522_v47 = vadd.f32 %v4195_v44, %v2508_v45  ;;  %v2509_v48 = vmul.f32 %v4190_v42, %v2456_v46  ;;  %v3250_v49 = vpop.f32.mrb[3].mxu1 }
 0x453   : > { %vm2532_vm14 = vcmp.ge.f32.partialorder %v2522_v47, 0.0  ;;  %v2542_v50 = vmul.f32 0.01, %v2522_v47  ;;  %v2523_v51 = vadd.f32 %v4195_v44, %v2509_v48 }
 0x455   : > { %v2552_v22 = vsel %vm2532_vm14, %v2522_v47, %v2542_v50  ;;  %vm2533_vm15 = vcmp.ge.f32.partialorder %v2523_v51, 0.0  ;;  %v2543_v52 = vmul.f32 0.01, %v2523_v51 }
 0x456   : > { %2562 = vst.msk [vmem:[%s4204_s22] sm:$0xff] %vm1329_vm3, %v2552_v22  ;;  %v2461_v53 = vpop.f32.mrb[4].mxu1 }
 0x457   : > { %v2553_v54 = vsel %vm2533_vm15, %v2523_v51, %v2543_v52  ;;  %v2510_v24 = vmul.f32 %v4190_v42, %v2461_v53  ;;  %v3253_v55 = vpop.f32.mrb[5].mxu1 }
 0x458   : > { %2563 = vst.msk [vmem:[%s4204_s22 + $0x8] sm:$0xff] %vm1329_vm3, %v2553_v54  ;;  %v2464_v56 = vpop.f32.mrb[6].mxu1 }
 0x459   : > { %v2524_v57 = vadd.f32 %v4195_v44, %v2510_v24  ;;  %v2511_v58 = vmul.f32 %v4190_v42, %v2464_v56  ;;  %v3254_v59 = vpop.f32.mrb[7].mxu1 }
 0x45b   : > { %vm2534_vm0 = vcmp.ge.f32.partialorder %v2524_v57, 0.0  ;;  %v2544_v60 = vmul.f32 0.01, %v2524_v57  ;;  %v2525_v61 = vadd.f32 %v4195_v44, %v2511_v58 }
 0x45d   : > { %v2554_v62 = vsel %vm2534_vm0, %v2524_v57, %v2544_v60  ;;  %vm2535_vm1 = vcmp.ge.f32.partialorder %v2525_v61, 0.0  ;;  %v2545_v63 = vmul.f32 0.01, %v2525_v61 }
 0x45e   : > { %2564 = vst.msk [vmem:[%s4204_s22 + $0x10] sm:$0xff] %vm1329_vm3, %v2554_v62  ;;  %v2469_v0 = vpop.f32.mrb[8].mxu1 }
 0x45f   : > { %v2555_v2 = vsel %vm2535_vm1, %v2525_v61, %v2545_v63  ;;  %v2512_v3 = vmul.f32 %v4190_v42, %v2469_v0  ;;  %v3257_v4 = vpop.f32.mrb[9].mxu1 }
 0x460   : > { %2565 = vst.msk [vmem:[%s4204_s22 + $0x18] sm:$0xff] %vm1329_vm3, %v2555_v2  ;;  %v2472_v5 = vpop.f32.mrb[10].mxu1 }
 0x461   : > { %v2526_v6 = vadd.f32 %v4195_v44, %v2512_v3  ;;  %v2513_v7 = vmul.f32 %v4190_v42, %v2472_v5  ;;  %v3258_v8 = vpop.f32.mrb[11].mxu1 }
 0x463   : > { %vm2536_vm2 = vcmp.ge.f32.partialorder %v2526_v6, 0.0  ;;  %v2546_v9 = vmul.f32 0.01, %v2526_v6  ;;  %v2527_v10 = vadd.f32 %v4195_v44, %v2513_v7 }
 0x465   : > { %v2556_v11 = vsel %vm2536_vm2, %v2526_v6, %v2546_v9  ;;  %vm2537_vm4 = vcmp.ge.f32.partialorder %v2527_v10, 0.0  ;;  %v2547_v12 = vmul.f32 0.01, %v2527_v10 }
 0x466   : > { %2566 = vst.msk [vmem:[%s4204_s22 + $0x20] sm:$0xff] %vm1329_vm3, %v2556_v11  ;;  %v2477_v13 = vpop.f32.mrb[12].mxu1 }
 0x467   : > { %v2557_v14 = vsel %vm2537_vm4, %v2527_v10, %v2547_v12  ;;  %v2514_v15 = vmul.f32 %v4190_v42, %v2477_v13  ;;  %v3261_v16 = vpop.f32.mrb[13].mxu1 }
 0x468   : > { %2567 = vst.msk [vmem:[%s4204_s22 + $0x28] sm:$0xff] %vm1329_vm3, %v2557_v14  ;;  %v2480_v17 = vpop.f32.mrb[14].mxu1 }
 0x469   : > { %v2528_v18 = vadd.f32 %v4195_v44, %v2514_v15  ;;  %v2515_v19 = vmul.f32 %v4190_v42, %v2480_v17  ;;  %v3262_v20 = vpop.f32.mrb[15].mxu1 }
 0x46b   : > { %vm2538_vm5 = vcmp.ge.f32.partialorder %v2528_v18, 0.0  ;;  %v2548_v21 = vmul.f32 0.01, %v2528_v18  ;;  %v2529_v23 = vadd.f32 %v4195_v44, %v2515_v19 }
 0x46d   : > { %v2558_v25 = vsel %vm2538_vm5, %v2528_v18, %v2548_v21  ;;  %vm2539_vm6 = vcmp.ge.f32.partialorder %v2529_v23, 0.0  ;;  %v2549_v26 = vmul.f32 0.01, %v2529_v23 }
 0x46e   : > { %2568 = vst.msk [vmem:[%s4204_s22 + $0x30] sm:$0xff] %vm1329_vm3, %v2558_v25  ;;  %v2485_v27 = vpop.f32.mrb[16].mxu1 }
 0x46f   : > { %v2559_v28 = vsel %vm2539_vm6, %v2529_v23, %v2549_v26  ;;  %v2516_v29 = vmul.f32 %v4190_v42, %v2485_v27  ;;  %v3265_v30 = vpop.f32.mrb[17].mxu1 }
 0x470   : > { %2569 = vst.msk [vmem:[%s4204_s22 + $0x38] sm:$0xff] %vm1329_vm3, %v2559_v28  ;;  %v2488_v31 = vpop.f32.mrb[18].mxu1 }
 0x471   : > { %v2530_v32 = vadd.f32 %v4195_v44, %v2516_v29  ;;  %v2517_v33 = vmul.f32 %v4190_v42, %v2488_v31  ;;  %v3266_v34 = vpop.f32.mrb[19].mxu1 }
 0x473   : > { %vm2540_vm7 = vcmp.ge.f32.partialorder %v2530_v32, 0.0  ;;  %v2550_v35 = vmul.f32 0.01, %v2530_v32  ;;  %v2531_v36 = vadd.f32 %v4195_v44, %v2517_v33 }
 0x475   : > { %v2560_v37 = vsel %vm2540_vm7, %v2530_v32, %v2550_v35  ;;  %vm2541_vm8 = vcmp.ge.f32.partialorder %v2531_v36, 0.0  ;;  %v2551_v38 = vmul.f32 0.01, %v2531_v36 }
 0x476   : > { %2570 = vst.msk [vmem:[%s4204_s22 + $0x40] sm:$0xff] %vm1329_vm3, %v2560_v37 }
 0x477   : > { %v2561_v39 = vsel %vm2541_vm8, %v2531_v36, %v2551_v38 }
 0x478   : > { %2571 = vst.msk [vmem:[%s4204_s22 + $0x48] sm:$0xff] %vm1329_vm3, %v2561_v39 }
 0x479 PF: > { %s15_s18 = sadd.s32 1, %s3617_s18  }
 0x47a   : > { %p12_p4 = scmp.ge.s32.totalorder %s15_s18, 4  }
 0x47c   :  { %14 = sbr.rel (!%p12_p4) target bundleno = 1 (0x1), region = 86 }

// kernel: encoder_forward.13
= control target key start
LH: loop header
LB: loop body
LE: loop exit
PB: predicated region body
PF: predicated region fallthrough
CT: control target
= control target key end

     0   :  { %s2161_s18 = smov 0   ;;  %s2360_s0 = inlined_call_operand.vmem [shape: f32[2,42,16], index: 0, kind: input, shape index: {}]   ;;  %s2361_s1 = inlined_call_operand.vmem [shape: bf16[9,16,32], index: 1, kind: input, shape index: {}]   ;;  %s2362_s2 = inlined_call_operand.vmem [shape: bf16[9,32,32], index: 2, kind: input, shape index: {}]   ;;  %s2363_s3 = inlined_call_operand.vmem [shape: f32[4,32], index: 3, kind: input, shape index: {}]   ;;  %s2364_s4 = inlined_call_operand.vmem [shape: f32[24,1], index: 4, kind: input, shape index: {}]   ;;  %s2365_s5 = inlined_call_operand.vmem [shape: f32[2,24,32], index: 5, kind: output, shape index: {}]  }
   0x1 LB: > { %s1703_s19 = sadd.s32 4294967295, %s2127_s18   ;;  %p1707_p0 = scmp.ge.s32.totalorder %s2127_s18, 1  ;;  %s2127_s18 = sphi %s2161_s18, %s15_s18  }
   0x2   : > { %p187_p1 = scmp.lt.s32.totalorder %s2127_s18, 3 }
   0x4   : > { %p188_p2 = pnand %p1707_p0, %p187_p1 }
   0x5   : > { %v2094_v0 = vld [vmem:[%s2361_s1 + $0x8] sm:$0xff] (!%p188_p2)   ;;  %p215_p3 = scmp.lt.s32.totalorder (!%p188_p2), %s1703_s19, 1  ;;  %v2095_v1 = vld [vmem:[%s2361_s1] sm:$0xff] (!%p188_p2)   ;;  %v2129_v2 = vmov (!%p188_p2), 0   ;;  %vm247_vm0 = vcmask (!%p188_p2), 130048   ;;  %v2096_v11 = vld [vmem:[%s2361_s1 + $0x10] sm:$0xff] (!%p188_p2)  }
   0x6   : > { %191 = sbr.rel (%p188_p2) target bundleno = 671 (0x29f), region = 40  ;;  %1890 = vmatprep.subr.bf16.mxu0 (!%p188_p2), %v2094_v0  ;;  %2092 = vset.pattern.permute.xlu0 (!%p188_p2), %v2129_v2  ;;  %v892_v15 = vld [vmem:[%s2364_s4] sm:$0xff] (!%p188_p2)  ;;  %v893_v16 = vld [vmem:[%s2364_s4 + $0x8] sm:$0xff] (!%p188_p2)  ;;  %v894_v17 = vld [vmem:[%s2364_s4 + $0x10] sm:$0xff] (!%p188_p2)  ;;  %vm884_vm1 = vcmask (!%p188_p2), 261120   ;;  %v2130_v54 = vmov (!%p188_p2), 0.0  }
   0x7   : > { %1891 = vmatpush3.bf16.msra.mxu0 (!%p188_p2), %v2094_v0  ;;  %2093 = vset.pattern.permute.xlu1 (!%p188_p2), %v2129_v2  ;;  %v2097_v19 = vld [vmem:[%s2361_s1 + $0x18] sm:$0xff] (!%p188_p2)   ;;  %v2098_v26 = vld [vmem:[%s2361_s1 + $0x20] sm:$0xff] (!%p188_p2)   ;;  %v2099_v32 = vld [vmem:[%s2361_s1 + $0x28] sm:$0xff] (!%p188_p2)   ;;  %885 = vst.msk [vmem:[#allocation2] sm:$0xff] (!%p188_p2), %vm884_vm1, %v2130_v54 }
   0x8   : > { %1896 = vmatprep.subr.bf16.mxu0 (!%p188_p2), %v2095_v1  ;;  %897 = vperm.xlu0 (!%p188_p2), %2092, %v892_v15   ;;  %v2100_v36 = vld [vmem:[%s2361_s1 + $0x30] sm:$0xff] (!%p188_p2)   ;;  %v2101_v42 = vld [vmem:[%s2361_s1 + $0x38] sm:$0xff] (!%p188_p2)   ;;  %v2102_v48 = vld [vmem:[%s2361_s1 + $0x40] sm:$0xff] (!%p188_p2)   ;;  %886 = vst.msk [vmem:[#allocation2 + $0x8] sm:$0xff] (!%p188_p2), %vm884_vm1, %v2130_v54 }
   0x9   : > { %907 = vperm.xlu1 (!%p188_p2), %2093, %v894_v17   ;;  %889 = vst.msk [vmem:[#allocation2 + $0x20] sm:$0xff] (!%p188_p2), %vm884_vm1, %v2130_v54  ;;  %887 = vst.msk [vmem:[#allocation2 + $0x10] sm:$0xff] (!%p188_p2), %vm884_vm1, %v2130_v54  ;;  %v2103_v55 = vld [vmem:[%s2362_s2 + $0x10] sm:$0xff] (!%p188_p2)   ;;  %v2104_v56 = vld [vmem:[%s2362_s2 + $0x18] sm:$0xff] (!%p188_p2)  }
   0xa   : > { %888 = vst.msk [vmem:[#allocation2 + $0x18] sm:$0xff] (!%p188_p2), %vm884_vm1, %v2130_v54  ;;  %1944 = vmatprep.subr.bf16.mxu1 (!%p188_p2), %v2103_v55  ;;  %v2105_v57 = vld [vmem:[%s2362_s2] sm:$0xff] (!%p188_p2)  }
   0xb   : > { %1945 = vmatpush3.bf16.msra.mxu1 (!%p188_p2), %v2103_v55  ;;  %v1753_v58 = vld [vmem:[%s2363_s3] ss:$0 sm:$0xff] (!%p188_p2)  ;;  %v1754_v60 = vld [vmem:[%s2363_s3 + $0x1] ss:$0 sm:$0xff] (!%p188_p2) }
   0xc   : > { %902 = vperm.xlu0 (!%p188_p2), %2092, %v893_v16   ;;  %1946 = vmatprep.subr.bf16.mxu1 (!%p188_p2), %v2104_v56 }
   0xd   : > { %s2367_s19 = smov (!%p215_p3, %s1703_s19), 1 }
   0xe   : > { %s2080_s24 = smul.u32 48, %s2367_s19 }
   0xf   : > { %1947 = vmatpush3.bf16.msra.mxu1 %v2104_v56  ;;  %s2081_s23 = smul.u32 24, %s2367_s19 }
  0x10   : > { %s2181_s27 = scalar_lea.vmem %s2360_s0, %s2080_s24  ;;  %1952 = vmatprep.subr.bf16.mxu1 %v2105_v57 }
  0x11   : > { %v233_v3 = vld [vmem:[%s2181_s27 + $0x1] sm:$0xff]  ;;  %v234_v4 = vld [vmem:[%s2181_s27 + $0x9] sm:$0xff]  ;;  %v235_v5 = vld [vmem:[%s2181_s27 + $0x11] sm:$0xff]  ;;  %s224_s26 = scalar_lea.vmem %s2365_s5, %s2081_s23 }
  0x12   : > { %v236_v6 = vpack.c.bf16 %v234_v4, %v233_v3  ;;  %v237_v7 = vpack.c.bf16 %v235_v5, %v235_v5  ;;  %v226_v8 = vld [vmem:[%s2181_s27] sm:$0xff]  ;;  %v227_v9 = vld [vmem:[%s2181_s27 + $0x8] sm:$0xff]  ;;  %v228_v12 = vld [vmem:[%s2181_s27 + $0x10] sm:$0xff] }
  0x13   : > { %v229_v10 = vpack.c.bf16 %v227_v9, %v226_v8  ;;  %v362_v13 = vld [vmem:[%s2181_s27 + $0x2] sm:$0xff]  ;;  %v363_v14 = vld [vmem:[%s2181_s27 + $0xa] sm:$0xff]  ;;  %v230_v18 = vpack.c.bf16 %v228_v12, %v228_v12  ;;  %v364_v21 = vld [vmem:[%s2181_s27 + $0x12] sm:$0xff]  ;;  %v578_v35 = vpack.c.bf16 %v228_v12, %v227_v9 }
  0x14   : > { %1892 = vmatprep.mubr.msk.bf16.mxu0 %vm247_vm0, %v236_v6  ;;  %v365_v20 = vpack.c.bf16 %v363_v14, %v362_v13  ;;  %v433_v22 = vld [vmem:[%s2181_s27 + $0x6] sm:$0xff]  ;;  %v434_v23 = vld [vmem:[%s2181_s27 + $0xe] sm:$0xff]  ;;  %v366_v24 = vpack.c.bf16 %v364_v21, %v364_v21  ;;  %v435_v27 = vld [vmem:[%s2181_s27 + $0x16] sm:$0xff] }
  0x15   : > { %1893 = vmatmul.mubr.msk.bf16.vlgmr.msra.gmra.mrb[0].mxu0 %vm247_vm0, %v237_v7  ;;  %v436_v25 = vpack.c.bf16 %v434_v23, %v433_v22  ;;  %v504_v28 = vld [vmem:[%s2181_s27 + $0x7] sm:$0xff]  ;;  %v505_v29 = vld [vmem:[%s2181_s27 + $0xf] sm:$0xff]  ;;  %v437_v30 = vpack.c.bf16 %v435_v27, %v435_v27  ;;  %v506_v33 = vld [vmem:[%s2181_s27 + $0x17] sm:$0xff]  ;;  %v791_v51 = vpack.c.bf16 %v435_v27, %v434_v23 }
  0x16   : > { %1897 = vmatpush3.bf16.msra.mxu0 %v2095_v1  ;;  %1898 = vmatprep.mubr.msk.bf16.mxu0 %vm247_vm0, %v229_v10  ;;  %v507_v31 = vpack.c.bf16 %v505_v29, %v504_v28  ;;  %v508_v34 = vpack.c.bf16 %v506_v33, %v506_v33  ;;  %v577_v37 = vld [vmem:[%s2181_s27 + $0x18] sm:$0xff]  ;;  %v646_v38 = vld [vmem:[%s2181_s27 + $0xc] sm:$0xff]  ;;  %v2107_v27 = vld [vmem:[%s2362_s2 + $0x20] sm:$0xff]  }
  0x17   : > { %1902 = vmatprep.subr.bf16.mxu0 %v2096_v11  ;;  %v647_v39 = vld [vmem:[%s2181_s27 + $0x14] sm:$0xff]  ;;  %v579_v40 = vpack.c.bf16 %v577_v37, %v577_v37  ;;  %v648_v43 = vld [vmem:[%s2181_s27 + $0x1c] sm:$0xff] }
  0x18   : > { %v649_v41 = vpack.c.bf16 %v647_v39, %v646_v38  ;;  %v717_v44 = vld [vmem:[%s2181_s27 + $0xd] sm:$0xff]  ;;  %v718_v45 = vld [vmem:[%s2181_s27 + $0x15] sm:$0xff]  ;;  %v650_v46 = vpack.c.bf16 %v648_v43, %v648_v43  ;;  %v719_v49 = vld [vmem:[%s2181_s27 + $0x1d] sm:$0xff] }
  0x19   : > { %v720_v47 = vpack.c.bf16 %v718_v45, %v717_v44  ;;  %v721_v50 = vpack.c.bf16 %v719_v49, %v719_v49  ;;  %v790_v52 = vld [vmem:[%s2181_s27 + $0x1e] sm:$0xff] }
  0x1a   : > { %v792_v53 = vpack.c.bf16 %v790_v52, %v790_v52  ;;  %v2110_v39 = vld [vmem:[%s2362_s2 + $0x38] sm:$0xff]  }
  0x21   : > { %1899 = vmatmul.mubr.msk.bf16.vlgmr.msra.gmra.mrb[0].mxu0 %vm247_vm0, %v230_v18 }
  0x22   : > { %1903 = vmatpush3.bf16.msra.mxu0 %v2096_v11  ;;  %1904 = vmatprep.mubr.msk.bf16.mxu0 %vm247_vm0, %v365_v20 }
  0x23   : > { %1908 = vmatprep.subr.bf16.mxu0 %v2097_v19 }
  0x2d   : > { %1905 = vmatmul.mubr.msk.bf16.vlgmr.msra.gmra.mrb[0].mxu0 %vm247_vm0, %v366_v24 }
  0x2e   : > { %1909 = vmatpush3.bf16.msra.mxu0 %v2097_v19  ;;  %1910 = vmatprep.mubr.msk.bf16.mxu0 %vm247_vm0, %v436_v25  ;;  %v2106_v25 = vld [vmem:[%s2362_s2 + $0x8] sm:$0xff]  }
  0x2f   : > { %1914 = vmatprep.subr.bf16.mxu0 %v2098_v26 }
  0x39   : > { %1911 = vmatmul.mubr.msk.bf16.vlgmr.msra.gmra.mrb[0].mxu0 %vm247_vm0, %v437_v30 }
  0x3a   : > { %1915 = vmatpush3.bf16.msra.mxu0 %v2098_v26  ;;  %1916 = vmatprep.mubr.msk.bf16.mxu0 %vm247_vm0, %v507_v31 }
  0x3b   : > { %1920 = vmatprep.subr.bf16.mxu0 %v2099_v32 }
  0x45   : > { %1917 = vmatmul.mubr.msk.bf16.vlgmr.msra.gmra.mrb[0].mxu0 %vm247_vm0, %v508_v34  ;;  %v2109_v34 = vld [vmem:[%s2362_s2 + $0x30] sm:$0xff]  }
  0x46   : > { %1921 = vmatpush3.bf16.msra.mxu0 %v2099_v32  ;;  %1922 = vmatprep.mubr.msk.bf16.mxu0 %vm247_vm0, %v578_v35  ;;  %v2108_v32 = vld [vmem:[%s2362_s2 + $0x28] sm:$0xff]  }
  0x47   : > { %1926 = vmatprep.subr.bf16.mxu0 %v2100_v36 }
  0x51   : > { %1923 = vmatmul.mubr.msk.bf16.vlgmr.msra.gmra.mrb[0].mxu0 %vm247_vm0, %v579_v40 }
  0x52   : > { %1927 = vmatpush3.bf16.msra.mxu0 %v2100_v36  ;;  %1928 = vmatprep.mubr.msk.bf16.mxu0 %vm247_vm0, %v649_v41  ;;  %v2111_v41 = vld [vmem:[%s2362_s2 + $0x40] sm:$0xff]  }
  0x53   : > { %1932 = vmatprep.subr.bf16.mxu0 %v2101_v42 }
  0x5d   : > { %1929 = vmatmul.mubr.msk.bf16.vlgmr.msra.gmra.mrb[0].mxu0 %vm247_vm0, %v650_v46  ;;  %v2112_v46 = vld [vmem:[%s2362_s2 + $0x48] sm:$0xff]  }
  0x5e   : > { %1933 = vmatpush3.bf16.msra.mxu0 %v2101_v42  ;;  %1934 = vmatprep.mubr.msk.bf16.mxu0 %vm247_vm0, %v720_v47 }
  0x5f   : > { %1938 = vmatprep.subr.bf16.mxu0 %v2102_v48 }
  0x69   : > { %1935 = vmatmul.mubr.msk.bf16.vlgmr.msra.gmra.mrb[0].mxu0 %vm247_vm0, %v721_v50 }
  0x6a   : > { %1939 = vmatpush3.bf16.msra.mxu0 %v2102_v48  ;;  %1940 = vmatprep.mubr.msk.bf16.mxu0 %vm247_vm0, %v791_v51  ;;  %v2113_v48 = vld [vmem:[%s2362_s2 + $0x50] sm:$0xff]   ;;  %v2114_v51 = vld [vmem:[%s2362_s2 + $0x58] sm:$0xff]  }
  0x75   : > { %1941 = vmatmul.mubr.msk.bf16.vlgmr.msra.gmra.mrb[0].mxu0 %vm247_vm0, %v792_v53  ;;  %v2115_v53 = vld [vmem:[%s2362_s2 + $0x60] sm:$0xff]  }
  0x87   : > { %v898_v4 = vpop.permute.xlu0 %897 }
  0x88   : > { %v908_v6 = vpop.permute.xlu1 %907 }
  0x8b   : > { %v903_v15 = vpop.permute.xlu0 %902 }
 0x148   : > { %v1942_v59 = vpop.f32.mrb[0].mxu0 }
 0x149   : > { %v867_v61 = vmul.f32 %v1942_v59, %v1753_v58  ;;  %v842_v62 = vpop.f32.mrb[1].mxu0 }
 0x14a   : > { %v865_v63 = vmul.f32 %v1753_v58, %v842_v62  ;;  %v1943_v0 = vpop.f32.mrb[2].mxu0 }
 0x14b   : > { %v874_v1 = vadd.f32 %v1754_v60, %v867_v61  ;;  %v845_v2 = vpop.f32.mrb[3].mxu0 }
 0x14c   : > { %v872_v3 = vadd.f32 %v1754_v60, %v865_v63  ;;  %v866_v5 = vmul.f32 %v1753_v58, %v845_v2  ;;  %v2116_v58 = vld [vmem:[%s2362_s2 + $0x68] sm:$0xff]  }
 0x14d   : > { %vm877_vm2 = vcmp.ge.f32.partialorder %v874_v1, 0.0  ;;  %v880_v7 = vmul.f32 0.01, %v874_v1 }
 0x14e   : > { %vm875_vm3 = vcmp.ge.f32.partialorder %v872_v3, 0.0  ;;  %v878_v8 = vmul.f32 0.01, %v872_v3  ;;  %v873_v9 = vadd.f32 %v1754_v60, %v866_v5  ;;  %v2117_v60 = vld [vmem:[%s2362_s2 + $0x70] sm:$0xff]  }
 0x14f   : > { %v883_v10 = vsel %vm877_vm2, %v874_v1, %v880_v7  ;;  %v2118_v1 = vld [vmem:[%s2362_s2 + $0x78] sm:$0xff]  }
 0x150   : > { %v881_v11 = vsel %vm875_vm3, %v872_v3, %v878_v8  ;;  %vm876_vm4 = vcmp.ge.f32.partialorder %v873_v9, 0.0  ;;  %v879_v12 = vmul.f32 0.01, %v873_v9  ;;  %v912_v13 = vmul.f32 %v908_v6, %v883_v10  ;;  %v2119_v3 = vld [vmem:[%s2362_s2 + $0x80] sm:$0xff]   ;;  %v2120_v6 = vld [vmem:[%s2362_s2 + $0x88] sm:$0xff]  }
 0x151   : > { %v910_v14 = vmul.f32 %v898_v4, %v881_v11  ;;  %v1823_v10 = vld [vmem:[%s2363_s3 + $0x2] ss:$0 sm:$0xff] }
 0x152   : > { %v882_v16 = vsel %vm876_vm4, %v873_v9, %v879_v12  ;;  %915 = vst.msk [vmem:[#allocation2 + $0x17] sm:$0xff] %vm884_vm1, %v912_v13  ;;  %v1824_v12 = vld [vmem:[%s2363_s3 + $0x3] ss:$0 sm:$0xff] }
 0x153   : > { %913 = vst.msk [vmem:[#allocation2 + $0x7] sm:$0xff] %vm884_vm1, %v910_v14  ;;  %v911_v17 = vmul.f32 %v903_v15, %v882_v16 }
 0x155   : > { %914 = vst.msk [vmem:[#allocation2 + $0xf] sm:$0xff] %vm884_vm1, %v911_v17 }
 0x159   : > { %v1227_v49 = vld [vmem:[#allocation2 + $0x17] sm:$0xff] }
 0x15a   : > { %v925_v18 = vld [vmem:[#allocation2 + $0x1] sm:$0xff]  ;;  %v1229_v50 = vpack.c.bf16 %v1227_v49, %v1227_v49  ;;  %v1306_v54 = vld [vmem:[#allocation2 + $0x18] sm:$0xff] }
 0x15b   : > { %v916_v24 = vld [vmem:[#allocation2] sm:$0xff] }
 0x15c   : > { %v926_v19 = vld [vmem:[#allocation2 + $0x9] sm:$0xff]  ;;  %v927_v20 = vld [vmem:[#allocation2 + $0x11] sm:$0xff]  ;;  %v1385_v61 = vld [vmem:[#allocation2 + $0x1c] sm:$0xff] }
 0x15d   : > { %v917_v21 = vld [vmem:[#allocation2 + $0x8] sm:$0xff]  ;;  %v928_v22 = vpack.c.bf16 %v926_v19, %v925_v18  ;;  %v929_v23 = vpack.c.bf16 %v927_v20, %v927_v20  ;;  %v918_v28 = vld [vmem:[#allocation2 + $0x10] sm:$0xff]  ;;  %v1387_v0 = vpack.c.bf16 %v1385_v61, %v1385_v61  ;;  %v1464_v4 = vld [vmem:[#allocation2 + $0x1d] sm:$0xff] }
 0x15e   : > { %v919_v26 = vpack.c.bf16 %v917_v21, %v916_v24  ;;  %v1068_v29 = vld [vmem:[#allocation2 + $0xa] sm:$0xff]  ;;  %v920_v30 = vpack.c.bf16 %v918_v28, %v918_v28  ;;  %v1067_v31 = vld [vmem:[#allocation2 + $0x2] sm:$0xff]  ;;  %v1069_v35 = vld [vmem:[#allocation2 + $0x12] sm:$0xff]  ;;  %v1307_v52 = vpack.c.bf16 %v918_v28, %v917_v21  ;;  %v1466_v5 = vpack.c.bf16 %v1464_v4, %v1464_v4 }
 0x15f   : > { %1948 = vmatprep.mubr.msk.bf16.mxu1 %vm884_vm1, %v928_v22  ;;  %v1070_v33 = vpack.c.bf16 %v1068_v29, %v1067_v31  ;;  %v2294_v36 = vld [vmem:[#allocation2 + $0xe] sm:$0xff]  ;;  %v1071_v37 = vpack.c.bf16 %v1069_v35, %v1069_v35  ;;  %v1146_v38 = vld [vmem:[#allocation2 + $0x6] sm:$0xff]  ;;  %v1148_v42 = vld [vmem:[#allocation2 + $0x16] sm:$0xff] }
 0x160   : > { %1949 = vmatmul.mubr.msk.bf16.vlgmr.msra.gmra.mrb[0].mxu1 %vm884_vm1, %v929_v23  ;;  %v1149_v40 = vpack.c.bf16 %v2294_v36, %v1146_v38  ;;  %v1226_v43 = vld [vmem:[#allocation2 + $0xf] sm:$0xff]  ;;  %v1150_v44 = vpack.c.bf16 %v1148_v42, %v1148_v42  ;;  %v1225_v45 = vld [vmem:[#allocation2 + $0x7] sm:$0xff]  ;;  %v1544_v7 = vpack.c.bf16 %v1148_v42, %v2294_v36  ;;  %v1543_v8 = vld [vmem:[#allocation2 + $0x1e] sm:$0xff] }
 0x161   : > { %1953 = vmatpush3.bf16.msra.mxu1 %v2105_v57  ;;  %1956 = vmatprep.mubr.msk.bf16.mxu1 %vm884_vm1, %v919_v26  ;;  %v1228_v47 = vpack.c.bf16 %v1226_v43, %v1225_v45  ;;  %v1383_v55 = vld [vmem:[#allocation2 + $0xc] sm:$0xff]  ;;  %v1384_v56 = vld [vmem:[#allocation2 + $0x14] sm:$0xff]  ;;  %v1308_v57 = vpack.c.bf16 %v1306_v54, %v1306_v54  ;;  %v1545_v9 = vpack.c.bf16 %v1543_v8, %v1543_v8 }
 0x162   : > { %1954 = vmatprep.subr.bf16.mxu1 %v2106_v25  ;;  %v1386_v59 = vpack.c.bf16 %v1384_v56, %v1383_v55  ;;  %v1462_v62 = vld [vmem:[#allocation2 + $0xd] sm:$0xff]  ;;  %v1463_v63 = vld [vmem:[#allocation2 + $0x15] sm:$0xff] }
 0x163   : > { %v1465_v2 = vpack.c.bf16 %v1463_v63, %v1462_v62 }
 0x165   : > { %1955 = vmatpush3.bf16.msra.mxu1 %v2106_v25 }
 0x166   : > { %1960 = vmatprep.subr.bf16.mxu1 %v2107_v27 }
 0x16c   : > { %1957 = vmatmul.mubr.msk.bf16.vlgmr.msra.gmra.mrb[0].mxu1 %vm884_vm1, %v920_v30 }
 0x16d   : > { %1961 = vmatpush3.bf16.msra.mxu1 %v2107_v27  ;;  %1964 = vmatprep.mubr.msk.bf16.mxu1 %vm884_vm1, %v1070_v33 }
 0x16e   : > { %1962 = vmatprep.subr.bf16.mxu1 %v2108_v32 }
 0x171   : > { %1963 = vmatpush3.bf16.msra.mxu1 %v2108_v32 }
 0x172   : > { %1968 = vmatprep.subr.bf16.mxu1 %v2109_v34 }
 0x178   : > { %1965 = vmatmul.mubr.msk.bf16.vlgmr.msra.gmra.mrb[0].mxu1 %vm884_vm1, %v1071_v37 }
 0x179   : > { %1969 = vmatpush3.bf16.msra.mxu1 %v2109_v34  ;;  %1972 = vmatprep.mubr.msk.bf16.mxu1 %vm884_vm1, %v1149_v40 }
 0x17a   : > { %1970 = vmatprep.subr.bf16.mxu1 %v2110_v39 }
 0x17d   : > { %1971 = vmatpush3.bf16.msra.mxu1 %v2110_v39 }
 0x17e   : > { %1976 = vmatprep.subr.bf16.mxu1 %v2111_v41 }
 0x184   : > { %1973 = vmatmul.mubr.msk.bf16.vlgmr.msra.gmra.mrb[0].mxu1 %vm884_vm1, %v1150_v44 }
 0x185   : > { %1977 = vmatpush3.bf16.msra.mxu1 %v2111_v41  ;;  %1980 = vmatprep.mubr.msk.bf16.mxu1 %vm884_vm1, %v1228_v47 }
 0x186   : > { %1978 = vmatprep.subr.bf16.mxu1 %v2112_v46 }
 0x189   : > { %1979 = vmatpush3.bf16.msra.mxu1 %v2112_v46 }
 0x18a   : > { %1984 = vmatprep.subr.bf16.mxu1 %v2113_v48 }
 0x190   : > { %1981 = vmatmul.mubr.msk.bf16.vlgmr.msra.gmra.mrb[0].mxu1 %vm884_vm1, %v1229_v50 }
 0x191   : > { %1985 = vmatpush3.bf16.msra.mxu1 %v2113_v48  ;;  %1988 = vmatprep.mubr.msk.bf16.mxu1 %vm884_vm1, %v1307_v52 }
 0x192   : > { %1986 = vmatprep.subr.bf16.mxu1 %v2114_v51 }
 0x195   : > { %1987 = vmatpush3.bf16.msra.mxu1 %v2114_v51 }
 0x196   : > { %1992 = vmatprep.subr.bf16.mxu1 %v2115_v53 }
 0x19c   : > { %1989 = vmatmul.mubr.msk.bf16.vlgmr.msra.gmra.mrb[0].mxu1 %vm884_vm1, %v1308_v57 }
 0x19d   : > { %1993 = vmatpush3.bf16.msra.mxu1 %v2115_v53  ;;  %1996 = vmatprep.mubr.msk.bf16.mxu1 %vm884_vm1, %v1386_v59 }
 0x19e   : > { %1994 = vmatprep.subr.bf16.mxu1 %v2116_v58 }
 0x1a1   : > { %1995 = vmatpush3.bf16.msra.mxu1 %v2116_v58 }
 0x1a2   : > { %2000 = vmatprep.subr.bf16.mxu1 %v2117_v60 }
 0x1a8   : > { %1997 = vmatmul.mubr.msk.bf16.vlgmr.msra.gmra.mrb[0].mxu1 %vm884_vm1, %v1387_v0 }
 0x1a9   : > { %2001 = vmatpush3.bf16.msra.mxu1 %v2117_v60  ;;  %2004 = vmatprep.mubr.msk.bf16.mxu1 %vm884_vm1, %v1465_v2 }
 0x1aa   : > { %2002 = vmatprep.subr.bf16.mxu1 %v2118_v1 }
 0x1ad   : > { %2003 = vmatpush3.bf16.msra.mxu1 %v2118_v1 }
 0x1ae   : > { %2008 = vmatprep.subr.bf16.mxu1 %v2119_v3 }
 0x1b4   : > { %2005 = vmatmul.mubr.msk.bf16.vlgmr.msra.gmra.mrb[0].mxu1 %vm884_vm1, %v1466_v5 }
 0x1b5   : > { %2009 = vmatpush3.bf16.msra.mxu1 %v2119_v3  ;;  %2012 = vmatprep.mubr.msk.bf16.mxu1 %vm884_vm1, %v1544_v7 }
 0x1b6   : > { %2010 = vmatprep.subr.bf16.mxu1 %v2120_v6 }
 0x1b9   : > { %2011 = vmatpush3.bf16.msra.mxu1 %v2120_v6 }
 0x1c0   : > { %2013 = vmatmul.mubr.msk.bf16.vlgmr.msra.gmra.mrb[0].mxu1 %vm884_vm1, %v1545_v9 }
 0x293   : > { %v2014_v11 = vpop.f32.mrb[0].mxu1 }
 0x294   : > { %v1628_v13 = vmul.f32 %v2014_v11, %v1823_v10  ;;  %v1603_v14 = vpop.f32.mrb[1].mxu1 }
 0x295   : > { %v1626_v15 = vmul.f32 %v1823_v10, %v1603_v14  ;;  %v2015_v16 = vpop.f32.mrb[2].mxu1 }
 0x296   : > { %v1635_v17 = vadd.f32 %v1824_v12, %v1628_v13  ;;  %v1606_v18 = vpop.f32.mrb[3].mxu1 }
 0x297   : > { %v1633_v19 = vadd.f32 %v1824_v12, %v1626_v15  ;;  %v1627_v20 = vmul.f32 %v1823_v10, %v1606_v18 }
 0x298   : > { %vm1638_vm5 = vcmp.ge.f32.partialorder %v1635_v17, 0.0  ;;  %v1641_v21 = vmul.f32 0.01, %v1635_v17 }
 0x299   : > { %vm1636_vm6 = vcmp.ge.f32.partialorder %v1633_v19, 0.0  ;;  %v1639_v22 = vmul.f32 0.01, %v1633_v19  ;;  %v1634_v23 = vadd.f32 %v1824_v12, %v1627_v20 }
 0x29a   : > { %v1644_v24 = vsel %vm1638_vm5, %v1635_v17, %v1641_v21 }
 0x29b   : > { %1647 = vst.msk [vmem:[%s224_s26 + $0x10] sm:$0xff] %vm884_vm1, %v1644_v24  ;;  %v1642_v25 = vsel %vm1636_vm6, %v1633_v19, %v1639_v22  ;;  %vm1637_vm7 = vcmp.ge.f32.partialorder %v1634_v23, 0.0  ;;  %v1640_v26 = vmul.f32 0.01, %v1634_v23 }
 0x29c   : > { %1645 = vst.msk [vmem:[%s224_s26] sm:$0xff] %vm884_vm1, %v1642_v25 }
 0x29d   : > { %v1643_v27 = vsel %vm1637_vm7, %v1634_v23, %v1640_v26 }
 0x29e   : > { %1646 = vst.msk [vmem:[%s224_s26 + $0x8] sm:$0xff] %vm884_vm1, %v1643_v27 }
 0x29f PF: > { %s15_s18 = sadd.s32 1, %s2127_s18  }
 0x2a0   : > { %p12_p4 = scmp.ge.s32.totalorder %s15_s18, 4  }
 0x2a2   :  { %14 = sbr.rel (!%p12_p4) target bundleno = 1 (0x1), region = 86 }

// kernel: encoder_forward.16
= control target key start
LH: loop header
LB: loop body
LE: loop exit
PB: predicated region body
PF: predicated region fallthrough
CT: control target
= control target key end

     0   :  { %s209_s6 = smov 0   ;;  %s220_s0 = inlined_call_operand.vmem [shape: f32[2,2,2,2,64], index: 0, kind: input, shape index: {}]   ;;  %s221_s1 = inlined_call_operand.vmem [shape: f32[2,1,64], index: 1, kind: output, shape index: {}]  }
   0x1 LB: > { %s173_s7 = sadd.s32 4294967295, %s197_s6   ;;  %p177_p0 = scmp.ge.s32.totalorder %s197_s6, 1  ;;  %s197_s6 = sphi %s209_s6, %s11_s6  }
   0x2   : > { %p87_p1 = scmp.lt.s32.totalorder %s197_s6, 3 }
   0x4   : > { %p88_p2 = pnand %p177_p0, %p87_p1 }
   0x5   : > { %p105_p3 = scmp.lt.s32.totalorder (!%p88_p2), %s173_s7, 1  ;;  %vm116_vm0 = vcmask (!%p88_p2), 517120   ;;  %vm124_vm1 = vcmask (!%p88_p2), 516096  }
   0x6   : > { %91 = sbr.rel (%p88_p2) target bundleno = 33 (0x21), region = 24 }
   0xd   : > { %s223_s7 = smov (!%p105_p3, %s173_s7), 1 }
   0xe   : > { %s182_s8 = sshll.u32 %s223_s7, 3  ;;  %s112_s14 = scalar_lea.vmem %s221_s1, %s223_s7 }
   0xf   : > { %s109_s11 = scalar_lea.vmem %s220_s0, %s182_s8 }
  0x10   : > { %v113_v0 = vld [vmem:[%s109_s11] sm:$0x3]  ;;  %v114_v1 = vld [vmem:[%s109_s11 + $0x4] sm:$0x3] }
  0x11   : > { %v115_v2 = vmax.f32 %v113_v0, %v114_v1 }
  0x13   : > { %v117_v3 = vsel %vm116_vm0, %v115_v2, -inf }
  0x14   : > { %v118_v4 = vrot.slane %v117_v3, 4 }
  0x16   : > { %v119_v5 = vmax.f32 %v117_v3, %v118_v4 }
  0x18   : > { %v120_v6 = vrot.slane %v119_v5, 2 }
  0x1a   : > { %v121_v7 = vmax.f32 %v119_v5, %v120_v6 }
  0x1c   : > { %v122_v8 = vrot.slane %v121_v7, 1 }
  0x1e   : > { %v123_v9 = vmax.f32 %v121_v7, %v122_v8 }
  0x20   : > { %125 = vst.msk [vmem:[%s112_s14] sm:$0x1] %vm124_vm1, %v123_v9 }
  0x21 PF: > { %s11_s6 = sadd.s32 1, %s197_s6  }
  0x22   : > { %p8_p4 = scmp.ge.s32.totalorder %s11_s6, 4  }
  0x24   :  { %10 = sbr.rel (!%p8_p4) target bundleno = 1 (0x1), region = 54 }

// kernel: encoder_forward.9
= control target key start
LH: loop header
LB: loop body
LE: loop exit
PB: predicated region body
PF: predicated region fallthrough
CT: control target
= control target key end

     0   :  { %s8782_s18 = smov 0   ;;  %s10050_s0 = inlined_call_operand.vmem [shape: f32[2,342,4], index: 0, kind: input, shape index: {}]   ;;  %s10051_s1 = inlined_call_operand.vmem [shape: bf16[9,4,8], index: 1, kind: input, shape index: {}]   ;;  %s10052_s2 = inlined_call_operand.vmem [shape: bf16[9,8,8], index: 2, kind: input, shape index: {}]   ;;  %s10053_s3 = inlined_call_operand.vmem [shape: f32[4,8], index: 3, kind: input, shape index: {}]   ;;  %s10054_s4 = inlined_call_operand.vmem [shape: f32[288,1], index: 4, kind: input, shape index: {}]   ;;  %s10055_s5 = inlined_call_operand.vmem [shape: f32[2,288,8], index: 5, kind: output, shape index: {}]  }
   0x1 LB: > { %s6755_s19 = sadd.s32 4294967295, %s8748_s18   ;;  %p6759_p0 = scmp.ge.s32.totalorder %s8748_s18, 1  ;;  %s8748_s18 = sphi %s8782_s18, %s15_s18  }
   0x2   : > { %p187_p1 = scmp.lt.s32.totalorder %s8748_s18, 3 }
   0x4   : > { %p188_p2 = pnand %p6759_p0, %p187_p1 }
   0x5   : > { %v6762_v0 = vld [vmem:[%s10051_s1 + $0x2] sm:$0x3] (!%p188_p2)  ;;  %vm392_vm0 = vcmask (!%p188_p2), 1041408   ;;  %p215_p3 = scmp.lt.s32.totalorder (!%p188_p2), %s6755_s19, 1  ;;  %v280_v2 = vld [vmem:[%s10051_s1] sm:$0x3] (!%p188_p2) }
   0x6   : > { %191 = sbr.rel (%p188_p2) target bundleno = 1694 (0x69e), region = 40  ;;  %8710 = vmatprep.subr.msk.bf16.mxu0 (!%p188_p2), %vm392_vm0, %v6762_v0  ;;  %v394_v1 = vsel (!%p188_p2), %vm392_vm0, %v6762_v0, 0  ;;  %vm337_vm1 = vcmask (!%p188_p2), 31744   ;;  %v628_v11 = vsel (!%p188_p2), %vm392_vm0, %v280_v2, 0  ;;  %v8818_v13 = vld [vmem:[%s10051_s1 + $0x4] sm:$0x3] (!%p188_p2) }
   0x7   : > { %7451 = vmatpush3.bf16.msra.mxu0 (!%p188_p2), %v394_v1  ;;  %vm3279_vm2 = vcmask (!%p188_p2), 64512   ;;  %vm3777_vm3 = vcmask (!%p188_p2), 1043456  }
   0x8   : > { %8711 = vmatprep.subr.msk.bf16.mxu0 (!%p188_p2), %vm392_vm0, %v280_v2 }
   0xd   : > { %s10057_s19 = smov (!%p215_p3, %s6755_s19), 1 }
   0xe   : > { %s8728_s24 = smul.u32 344, %s10057_s19 }
   0xf   : > { %s8729_s28 = smul.u32 288, %s10057_s19 }
  0x10   : > { %s8805_s27 = scalar_lea.vmem %s10050_s0, %s8728_s24 }
  0x11   : > { %v281_v3 = vld [vmem:[%s8805_s27 + $0x1] sm:$0xff]  ;;  %v282_v4 = vld [vmem:[%s8805_s27 + $0x9] sm:$0xff]  ;;  %v283_v5 = vld [vmem:[%s8805_s27 + $0x11] sm:$0xff]  ;;  %s9907_s6 = scalar_lea.vmem %s10055_s5, %s8729_s28 }
  0x12   : > { %v317_v6 = vpack.c.bf16 %v282_v4, %v281_v3  ;;  %v284_v7 = vld [vmem:[%s8805_s27 + $0x19] sm:$0xff]  ;;  %v285_v8 = vld [vmem:[%s8805_s27 + $0x21] sm:$0xff]  ;;  %v286_v9 = vld [vmem:[%s8805_s27 + $0x29] sm:$0xff]  ;;  %v918_v4 = vsel %vm392_vm0, %v8818_v13, 0 }
  0x13   : > { %v318_v10 = vpack.c.bf16 %v284_v7, %v283_v5  ;;  %v319_v12 = vpack.c.bf16 %v286_v9, %v285_v8  ;;  %v287_v14 = vld [vmem:[%s8805_s27 + $0x31] sm:$0xff]  ;;  %v288_v15 = vld [vmem:[%s8805_s27 + $0x39] sm:$0xff]  ;;  %v289_v16 = vld [vmem:[%s8805_s27 + $0x41] sm:$0xff] }
  0x14   : > { %7452 = vmatprep.mubr.msk.bf16.mxu0 %vm337_vm1, %v317_v6  ;;  %v290_v17 = vld [vmem:[%s8805_s27 + $0x49] sm:$0xff]  ;;  %v320_v18 = vpack.c.bf16 %v288_v15, %v287_v14  ;;  %v291_v20 = vld [vmem:[%s8805_s27 + $0x51] sm:$0xff]  ;;  %v292_v21 = vld [vmem:[%s8805_s27 + $0x59] sm:$0xff] }
  0x15   : > { %7453 = vmatmul.mubr.msk.bf16.vlgmr.msra.gmra.mrb[0].mxu0 %vm337_vm1, %v318_v10  ;;  %v321_v19 = vpack.c.bf16 %v290_v17, %v289_v16  ;;  %v293_v22 = vld [vmem:[%s8805_s27 + $0x61] sm:$0xff]  ;;  %v294_v23 = vld [vmem:[%s8805_s27 + $0x69] sm:$0xff]  ;;  %v322_v24 = vpack.c.bf16 %v292_v21, %v291_v20  ;;  %v295_v26 = vld [vmem:[%s8805_s27 + $0x71] sm:$0xff] }
  0x16   : > { %7489 = vmatpush3.bf16.msra.mxu0 %v628_v11  ;;  %7456 = vmatprep.mubr.msk.bf16.mxu0 %vm337_vm1, %v319_v12  ;;  %v323_v25 = vpack.c.bf16 %v294_v23, %v293_v22  ;;  %v296_v27 = vld [vmem:[%s8805_s27 + $0x79] sm:$0xff]  ;;  %v297_v28 = vld [vmem:[%s8805_s27 + $0x81] sm:$0xff]  ;;  %v298_v29 = vld [vmem:[%s8805_s27 + $0x89] sm:$0xff] }
  0x17   : > { %8712 = vmatprep.subr.msk.bf16.mxu0 %vm392_vm0, %v8818_v13  ;;  %v324_v30 = vpack.c.bf16 %v296_v27, %v295_v26  ;;  %v325_v31 = vpack.c.bf16 %v298_v29, %v297_v28  ;;  %v299_v32 = vld [vmem:[%s8805_s27 + $0x91] sm:$0xff]  ;;  %v300_v33 = vld [vmem:[%s8805_s27 + $0x99] sm:$0xff]  ;;  %v301_v34 = vld [vmem:[%s8805_s27 + $0xa1] sm:$0xff] }
  0x18   : > { %v302_v35 = vld [vmem:[%s8805_s27 + $0xa9] sm:$0xff]  ;;  %v326_v36 = vpack.c.bf16 %v300_v33, %v299_v32  ;;  %v303_v38 = vld [vmem:[%s8805_s27 + $0xb1] sm:$0xff]  ;;  %v304_v39 = vld [vmem:[%s8805_s27 + $0xb9] sm:$0xff] }
  0x19   : > { %v327_v37 = vpack.c.bf16 %v302_v35, %v301_v34  ;;  %v305_v40 = vld [vmem:[%s8805_s27 + $0xc1] sm:$0xff]  ;;  %v306_v41 = vld [vmem:[%s8805_s27 + $0xc9] sm:$0xff]  ;;  %v328_v42 = vpack.c.bf16 %v304_v39, %v303_v38  ;;  %v307_v44 = vld [vmem:[%s8805_s27 + $0xd1] sm:$0xff] }
  0x1a   : > { %v329_v43 = vpack.c.bf16 %v306_v41, %v305_v40  ;;  %v308_v45 = vld [vmem:[%s8805_s27 + $0xd9] sm:$0xff]  ;;  %v309_v46 = vld [vmem:[%s8805_s27 + $0xe1] sm:$0xff]  ;;  %v310_v47 = vld [vmem:[%s8805_s27 + $0xe9] sm:$0xff] }
  0x1b   : > { %v330_v48 = vpack.c.bf16 %v308_v45, %v307_v44  ;;  %v331_v49 = vpack.c.bf16 %v310_v47, %v309_v46  ;;  %v311_v50 = vld [vmem:[%s8805_s27 + $0xf1] sm:$0xff]  ;;  %v312_v51 = vld [vmem:[%s8805_s27 + $0xf9] sm:$0xff]  ;;  %v313_v52 = vld [vmem:[%s8805_s27 + $0x101] sm:$0xff] }
  0x1c   : > { %v314_v53 = vld [vmem:[%s8805_s27 + $0x109] sm:$0xff]  ;;  %v332_v54 = vpack.c.bf16 %v312_v51, %v311_v50  ;;  %v315_v56 = vld [vmem:[%s8805_s27 + $0x111] sm:$0xff]  ;;  %v316_v57 = vld [vmem:[%s8805_s27 + $0x119] sm:$0xff] }
  0x1d   : > { %7457 = vmatmul.mubr.msk.bf16.gmra.mrb[4].mxu0 %vm337_vm1, %v320_v18  ;;  %v333_v55 = vpack.c.bf16 %v314_v53, %v313_v52  ;;  %v226_v58 = vld [vmem:[%s8805_s27] sm:$0xff]  ;;  %v227_v59 = vld [vmem:[%s8805_s27 + $0x8] sm:$0xff]  ;;  %v334_v60 = vpack.c.bf16 %v316_v57, %v315_v56  ;;  %v228_v62 = vld [vmem:[%s8805_s27 + $0x10] sm:$0xff] }
  0x1e   : > { %7460 = vmatprep.mubr.msk.bf16.mxu0 %vm337_vm1, %v321_v19  ;;  %v262_v61 = vpack.c.bf16 %v227_v59, %v226_v58  ;;  %v229_v63 = vld [vmem:[%s8805_s27 + $0x18] sm:$0xff]  ;;  %v230_v0 = vld [vmem:[%s8805_s27 + $0x20] sm:$0xff]  ;;  %v231_v1 = vld [vmem:[%s8805_s27 + $0x28] sm:$0xff] }
  0x1f   : > { %v263_v2 = vpack.c.bf16 %v229_v63, %v228_v62  ;;  %v264_v3 = vpack.c.bf16 %v231_v1, %v230_v0  ;;  %v8881_v5 = vld [vmem:[%s10051_s1 + $0x6] sm:$0x3]  ;;  %v232_v6 = vld [vmem:[%s8805_s27 + $0x30] sm:$0xff]  ;;  %v233_v7 = vld [vmem:[%s8805_s27 + $0x38] sm:$0xff] }
  0x20   : > { %v234_v8 = vld [vmem:[%s8805_s27 + $0x40] sm:$0xff]  ;;  %v235_v9 = vld [vmem:[%s8805_s27 + $0x48] sm:$0xff]  ;;  %v265_v10 = vpack.c.bf16 %v233_v7, %v232_v6  ;;  %v236_v12 = vld [vmem:[%s8805_s27 + $0x50] sm:$0xff] }
  0x21   : > { %v266_v11 = vpack.c.bf16 %v235_v9, %v234_v8  ;;  %v237_v13 = vld [vmem:[%s8805_s27 + $0x58] sm:$0xff]  ;;  %v238_v14 = vld [vmem:[%s8805_s27 + $0x60] sm:$0xff]  ;;  %v239_v15 = vld [vmem:[%s8805_s27 + $0x68] sm:$0xff] }
  0x22   : > { %v267_v16 = vpack.c.bf16 %v237_v13, %v236_v12  ;;  %v268_v17 = vpack.c.bf16 %v239_v15, %v238_v14  ;;  %v240_v18 = vld [vmem:[%s8805_s27 + $0x70] sm:$0xff]  ;;  %v241_v19 = vld [vmem:[%s8805_s27 + $0x78] sm:$0xff]  ;;  %v242_v20 = vld [vmem:[%s8805_s27 + $0x80] sm:$0xff] }
  0x23   : > { %v243_v21 = vld [vmem:[%s8805_s27 + $0x88] sm:$0xff]  ;;  %v269_v22 = vpack.c.bf16 %v241_v19, %v240_v18  ;;  %v246_v26 = vld [vmem:[%s8805_s27 + $0xa0] sm:$0xff]  ;;  %v813_v62 = vld [vmem:[%s8805_s27 + $0x32] sm:$0xff] }
  0x24   : > { %v270_v23 = vpack.c.bf16 %v243_v21, %v242_v20  ;;  %v247_v27 = vld [vmem:[%s8805_s27 + $0xa8] sm:$0xff]  ;;  %v250_v32 = vld [vmem:[%s8805_s27 + $0xc0] sm:$0xff] }
  0x25   : > { %7461 = vmatmul.mubr.msk.bf16.gmra.mrb[8].mxu0 %vm337_vm1, %v322_v24  ;;  %v244_v24 = vld [vmem:[%s8805_s27 + $0x90] sm:$0xff]  ;;  %v272_v29 = vpack.c.bf16 %v247_v27, %v246_v26  ;;  %v251_v33 = vld [vmem:[%s8805_s27 + $0xc8] sm:$0xff]  ;;  %v254_v38 = vld [vmem:[%s8805_s27 + $0xe0] sm:$0xff] }
  0x26   : > { %7464 = vmatprep.mubr.msk.bf16.mxu0 %vm337_vm1, %v323_v25  ;;  %v245_v25 = vld [vmem:[%s8805_s27 + $0x98] sm:$0xff]  ;;  %v274_v35 = vpack.c.bf16 %v251_v33, %v250_v32  ;;  %v255_v39 = vld [vmem:[%s8805_s27 + $0xe8] sm:$0xff]  ;;  %v258_v44 = vld [vmem:[%s8805_s27 + $0x100] sm:$0xff] }
  0x27   : > { %v271_v28 = vpack.c.bf16 %v245_v25, %v244_v24  ;;  %v276_v41 = vpack.c.bf16 %v255_v39, %v254_v38  ;;  %v259_v45 = vld [vmem:[%s8805_s27 + $0x108] sm:$0xff]  ;;  %v814_v63 = vld [vmem:[%s8805_s27 + $0x3a] sm:$0xff] }
  0x28   : > { %v278_v47 = vpack.c.bf16 %v259_v45, %v258_v44  ;;  %v807_v50 = vld [vmem:[%s8805_s27 + $0x2] sm:$0xff]  ;;  %v808_v51 = vld [vmem:[%s8805_s27 + $0xa] sm:$0xff] }
  0x29   : > { %v843_v53 = vpack.c.bf16 %v808_v51, %v807_v50  ;;  %v811_v56 = vld [vmem:[%s8805_s27 + $0x22] sm:$0xff]  ;;  %v812_v57 = vld [vmem:[%s8805_s27 + $0x2a] sm:$0xff] }
  0x2a   : > { %v8941_v59 = vpack.c.bf16 %v812_v57, %v811_v56  ;;  %v815_v0 = vld [vmem:[%s8805_s27 + $0x42] sm:$0xff]  ;;  %v816_v1 = vld [vmem:[%s8805_s27 + $0x4a] sm:$0xff] }
  0x2b   : > { %v819_v6 = vld [vmem:[%s8805_s27 + $0x62] sm:$0xff]  ;;  %v820_v7 = vld [vmem:[%s8805_s27 + $0x6a] sm:$0xff] }
  0x2c   : > { %v849_v9 = vpack.c.bf16 %v820_v7, %v819_v6  ;;  %v823_v12 = vld [vmem:[%s8805_s27 + $0x82] sm:$0xff]  ;;  %v824_v13 = vld [vmem:[%s8805_s27 + $0x8a] sm:$0xff] }
  0x2d   : > { %7465 = vmatmul.mubr.msk.bf16.gmra.mrb[12].mxu0 %vm337_vm1, %v324_v30  ;;  %v248_v30 = vld [vmem:[%s8805_s27 + $0xb0] sm:$0xff]  ;;  %v851_v15 = vpack.c.bf16 %v824_v13, %v823_v12  ;;  %v827_v18 = vld [vmem:[%s8805_s27 + $0xa2] sm:$0xff]  ;;  %v6856_v44 = vld [vmem:[%s10051_s1 + $0xa] sm:$0x3] }
  0x2e   : > { %7468 = vmatprep.mubr.msk.bf16.mxu0 %vm337_vm1, %v325_v31  ;;  %v249_v31 = vld [vmem:[%s8805_s27 + $0xb8] sm:$0xff]  ;;  %v828_v19 = vld [vmem:[%s8805_s27 + $0xaa] sm:$0xff]  ;;  %v831_v24 = vld [vmem:[%s8805_s27 + $0xc2] sm:$0xff]  ;;  %v1896_v57 = vsel %vm392_vm0, %v6856_v44, 0 }
  0x2f   : > { %v273_v34 = vpack.c.bf16 %v249_v31, %v248_v30  ;;  %v853_v21 = vpack.c.bf16 %v828_v19, %v827_v18  ;;  %v832_v25 = vld [vmem:[%s8805_s27 + $0xca] sm:$0xff]  ;;  %v835_v30 = vld [vmem:[%s8805_s27 + $0xe2] sm:$0xff] }
  0x30   : > { %v855_v27 = vpack.c.bf16 %v832_v25, %v831_v24  ;;  %v836_v31 = vld [vmem:[%s8805_s27 + $0xea] sm:$0xff]  ;;  %v1167_v45 = vld [vmem:[%s8805_s27 + $0x122] sm:$0xff] }
  0x31   : > { %v857_v33 = vpack.c.bf16 %v836_v31, %v835_v30  ;;  %v1461_v51 = vld [vmem:[%s8805_s27 + $0x23] sm:$0xff] }
  0x32   : > { %v1473_v7 = vld [vmem:[%s8805_s27 + $0x83] sm:$0xff] }
  0x33   : > { %v1477_v13 = vld [vmem:[%s8805_s27 + $0xa3] sm:$0xff] }
  0x34   : > { %v1481_v19 = vld [vmem:[%s8805_s27 + $0xc3] sm:$0xff] }
  0x35   : > { %7469 = vmatmul.mubr.msk.bf16.gmra.mrb[16].mxu0 %vm337_vm1, %v326_v36  ;;  %v252_v36 = vld [vmem:[%s8805_s27 + $0xd0] sm:$0xff]  ;;  %v1485_v25 = vld [vmem:[%s8805_s27 + $0xe3] sm:$0xff] }
  0x36   : > { %7472 = vmatprep.mubr.msk.bf16.mxu0 %vm337_vm1, %v327_v37  ;;  %v253_v37 = vld [vmem:[%s8805_s27 + $0xd8] sm:$0xff]  ;;  %v1489_v31 = vld [vmem:[%s8805_s27 + $0x103] sm:$0xff] }
  0x37   : > { %v275_v40 = vpack.c.bf16 %v253_v37, %v252_v36  ;;  %v839_v36 = vld [vmem:[%s8805_s27 + $0x102] sm:$0xff]  ;;  %v840_v37 = vld [vmem:[%s8805_s27 + $0x10a] sm:$0xff] }
  0x38   : > { %v859_v39 = vpack.c.bf16 %v840_v37, %v839_v36  ;;  %v1493_v37 = vld [vmem:[%s8805_s27 + $0x123] sm:$0xff] }
  0x3d   : > { %7473 = vmatmul.mubr.msk.bf16.gmra.mrb[20].mxu0 %vm337_vm1, %v328_v42  ;;  %v256_v42 = vld [vmem:[%s8805_s27 + $0xf0] sm:$0xff] }
  0x3e   : > { %7476 = vmatprep.mubr.msk.bf16.mxu0 %vm337_vm1, %v329_v43  ;;  %v257_v43 = vld [vmem:[%s8805_s27 + $0xf8] sm:$0xff] }
  0x3f   : > { %v277_v46 = vpack.c.bf16 %v257_v43, %v256_v42 }
  0x45   : > { %7477 = vmatmul.mubr.msk.bf16.gmra.mrb[24].mxu0 %vm337_vm1, %v330_v48  ;;  %v260_v48 = vld [vmem:[%s8805_s27 + $0x110] sm:$0xff] }
  0x46   : > { %7480 = vmatprep.mubr.msk.bf16.mxu0 %vm337_vm1, %v331_v49  ;;  %v261_v49 = vld [vmem:[%s8805_s27 + $0x118] sm:$0xff] }
  0x47   : > { %v279_v52 = vpack.c.bf16 %v261_v49, %v260_v48  ;;  %v1460_v48 = vld [vmem:[%s8805_s27 + $0x1b] sm:$0xff] }
  0x4d   : > { %7481 = vmatmul.mubr.msk.bf16.gmra.mrb[28].mxu0 %vm337_vm1, %v332_v54  ;;  %v809_v54 = vld [vmem:[%s8805_s27 + $0x12] sm:$0xff] }
  0x4e   : > { %7484 = vmatprep.mubr.msk.bf16.mxu0 %vm337_vm1, %v333_v55  ;;  %v810_v55 = vld [vmem:[%s8805_s27 + $0x1a] sm:$0xff] }
  0x4f   : > { %v8939_v58 = vpack.c.bf16 %v810_v55, %v809_v54  ;;  %v1464_v54 = vld [vmem:[%s8805_s27 + $0x3b] sm:$0xff] }
  0x55   : > { %7485 = vmatmul.mubr.msk.bf16.gmra.mrb[32].mxu0 %vm337_vm1, %v334_v60  ;;  %v1244_v60 = vsel %vm392_vm0, %v8881_v5, 0 }
  0x56   : > { %7490 = vmatprep.mubr.msk.bf16.mxu0 %vm337_vm1, %v262_v61  ;;  %v8948_v61 = vld [vmem:[%s10051_s1 + $0x8] sm:$0x3] }
  0x57   : > { %v1570_v43 = vsel %vm392_vm0, %v8948_v61, 0 }
  0x5d   : > { %7491 = vmatmul.mubr.msk.bf16.vlgmr.msra.gmra.mrb[0].mxu0 %vm337_vm1, %v263_v2  ;;  %v846_v2 = vpack.c.bf16 %v814_v63, %v813_v62  ;;  %v1468_v62 = vld [vmem:[%s8805_s27 + $0x5b] sm:$0xff] }
  0x5e   : > { %7527 = vmatpush3.bf16.msra.mxu0 %v918_v4  ;;  %7494 = vmatprep.mubr.msk.bf16.mxu0 %vm337_vm1, %v264_v3  ;;  %v847_v3 = vpack.c.bf16 %v816_v1, %v815_v0  ;;  %v817_v4 = vld [vmem:[%s8805_s27 + $0x52] sm:$0xff]  ;;  %v1469_v1 = vld [vmem:[%s8805_s27 + $0x63] sm:$0xff] }
  0x5f   : > { %8713 = vmatprep.subr.msk.bf16.mxu0 %vm392_vm0, %v8881_v5  ;;  %v818_v5 = vld [vmem:[%s8805_s27 + $0x5a] sm:$0xff] }
  0x60   : > { %v848_v8 = vpack.c.bf16 %v818_v5, %v817_v4  ;;  %v1472_v4 = vld [vmem:[%s8805_s27 + $0x7b] sm:$0xff] }
  0x65   : > { %7495 = vmatmul.mubr.msk.bf16.gmra.mrb[4].mxu0 %vm337_vm1, %v265_v10  ;;  %v821_v10 = vld [vmem:[%s8805_s27 + $0x72] sm:$0xff] }
  0x66   : > { %7498 = vmatprep.mubr.msk.bf16.mxu0 %vm337_vm1, %v266_v11  ;;  %v822_v11 = vld [vmem:[%s8805_s27 + $0x7a] sm:$0xff] }
  0x67   : > { %v850_v14 = vpack.c.bf16 %v822_v11, %v821_v10  ;;  %v1476_v10 = vld [vmem:[%s8805_s27 + $0x9b] sm:$0xff] }
  0x6d   : > { %7499 = vmatmul.mubr.msk.bf16.gmra.mrb[8].mxu0 %vm337_vm1, %v267_v16  ;;  %v825_v16 = vld [vmem:[%s8805_s27 + $0x92] sm:$0xff] }
  0x6e   : > { %7502 = vmatprep.mubr.msk.bf16.mxu0 %vm337_vm1, %v268_v17  ;;  %v826_v17 = vld [vmem:[%s8805_s27 + $0x9a] sm:$0xff] }
  0x6f   : > { %v852_v20 = vpack.c.bf16 %v826_v17, %v825_v16  ;;  %v1480_v16 = vld [vmem:[%s8805_s27 + $0xbb] sm:$0xff] }
  0x75   : > { %7503 = vmatmul.mubr.msk.bf16.gmra.mrb[12].mxu0 %vm337_vm1, %v269_v22  ;;  %v829_v22 = vld [vmem:[%s8805_s27 + $0xb2] sm:$0xff] }
  0x76   : > { %7506 = vmatprep.mubr.msk.bf16.mxu0 %vm337_vm1, %v270_v23  ;;  %v830_v23 = vld [vmem:[%s8805_s27 + $0xba] sm:$0xff] }
  0x77   : > { %v854_v26 = vpack.c.bf16 %v830_v23, %v829_v22  ;;  %v1484_v22 = vld [vmem:[%s8805_s27 + $0xdb] sm:$0xff] }
  0x7d   : > { %7507 = vmatmul.mubr.msk.bf16.gmra.mrb[16].mxu0 %vm337_vm1, %v271_v28  ;;  %v833_v28 = vld [vmem:[%s8805_s27 + $0xd2] sm:$0xff] }
  0x7e   : > { %7510 = vmatprep.mubr.msk.bf16.mxu0 %vm337_vm1, %v272_v29  ;;  %v834_v29 = vld [vmem:[%s8805_s27 + $0xda] sm:$0xff] }
  0x7f   : > { %v856_v32 = vpack.c.bf16 %v834_v29, %v833_v28  ;;  %v1488_v28 = vld [vmem:[%s8805_s27 + $0xfb] sm:$0xff] }
  0x85   : > { %7511 = vmatmul.mubr.msk.bf16.gmra.mrb[20].mxu0 %vm337_vm1, %v273_v34  ;;  %v837_v34 = vld [vmem:[%s8805_s27 + $0xf2] sm:$0xff] }
  0x86   : > { %7514 = vmatprep.mubr.msk.bf16.mxu0 %vm337_vm1, %v274_v35  ;;  %v838_v35 = vld [vmem:[%s8805_s27 + $0xfa] sm:$0xff] }
  0x87   : > { %v858_v38 = vpack.c.bf16 %v838_v35, %v837_v34  ;;  %v1492_v34 = vld [vmem:[%s8805_s27 + $0x11b] sm:$0xff] }
  0x8d   : > { %7515 = vmatmul.mubr.msk.bf16.gmra.mrb[24].mxu0 %vm337_vm1, %v275_v40  ;;  %v841_v40 = vld [vmem:[%s8805_s27 + $0x112] sm:$0xff] }
  0x8e   : > { %7518 = vmatprep.mubr.msk.bf16.mxu0 %vm337_vm1, %v276_v41  ;;  %v842_v41 = vld [vmem:[%s8805_s27 + $0x11a] sm:$0xff] }
  0x8f   : > { %v860_v42 = vpack.c.bf16 %v842_v41, %v841_v40  ;;  %v1786_v40 = vld [vmem:[%s8805_s27 + $0x1c] sm:$0xff] }
  0x95   : > { %7519 = vmatmul.mubr.msk.bf16.gmra.mrb[28].mxu0 %vm337_vm1, %v277_v46  ;;  %v1168_v46 = vld [vmem:[%s8805_s27 + $0x12a] sm:$0xff] }
  0x96   : > { %7522 = vmatprep.mubr.msk.bf16.mxu0 %vm337_vm1, %v278_v47  ;;  %v1459_v47 = vld [vmem:[%s8805_s27 + $0x13] sm:$0xff]  ;;  %v1186_v49 = vpack.c.bf16 %v1168_v46, %v1167_v45  ;;  %v1790_v46 = vld [vmem:[%s8805_s27 + $0x3c] sm:$0xff] }
  0x97   : > { %v1495_v50 = vpack.c.bf16 %v1460_v48, %v1459_v47  ;;  %v1789_v45 = vld [vmem:[%s8805_s27 + $0x34] sm:$0xff] }
  0x98   : > { %v9100_v48 = vpack.c.bf16 %v1790_v46, %v1789_v45  ;;  %v3334_v45 = vld [vmem:[%s10054_s4 + $0x50] sm:$0xff] }
  0x99   : > { %v2145_v46 = vld [vmem:[%s8805_s27 + $0x134] sm:$0xff] }
  0x9d   : > { %7523 = vmatmul.mubr.msk.bf16.gmra.mrb[32].mxu0 %vm337_vm1, %v279_v52  ;;  %v1462_v52 = vld [vmem:[%s8805_s27 + $0x2b] sm:$0xff] }
  0x9e   : > { %7528 = vmatprep.mubr.msk.bf16.mxu0 %vm337_vm1, %v843_v53  ;;  %v1463_v53 = vld [vmem:[%s8805_s27 + $0x33] sm:$0xff]  ;;  %v1496_v55 = vpack.c.bf16 %v1462_v52, %v1461_v51  ;;  %v1791_v51 = vld [vmem:[%s8805_s27 + $0x44] sm:$0xff] }
  0x9f   : > { %v1497_v56 = vpack.c.bf16 %v1464_v54, %v1463_v53  ;;  %v1792_v52 = vld [vmem:[%s8805_s27 + $0x4c] sm:$0xff]  ;;  %v1793_v53 = vld [vmem:[%s8805_s27 + $0x54] sm:$0xff]  ;;  %v1794_v54 = vld [vmem:[%s8805_s27 + $0x5c] sm:$0xff] }
  0xa5   : > { %7529 = vmatmul.mubr.msk.bf16.vlgmr.msra.gmra.mrb[0].mxu0 %vm337_vm1, %v8939_v58 }
  0xa6   : > { %7565 = vmatpush3.bf16.msra.mxu0 %v1244_v60  ;;  %7532 = vmatprep.mubr.msk.bf16.mxu0 %vm337_vm1, %v8941_v59  ;;  %v1466_v60 = vld [vmem:[%s8805_s27 + $0x4b] sm:$0xff] }
  0xa7   : > { %8714 = vmatprep.subr.msk.bf16.mxu0 %vm392_vm0, %v8948_v61  ;;  %v1467_v61 = vld [vmem:[%s8805_s27 + $0x53] sm:$0xff] }
  0xa8   : > { %v1499_v0 = vpack.c.bf16 %v1468_v62, %v1467_v61 }
  0xad   : > { %7533 = vmatmul.mubr.msk.bf16.gmra.mrb[4].mxu0 %vm337_vm1, %v846_v2 }
  0xae   : > { %7536 = vmatprep.mubr.msk.bf16.mxu0 %vm337_vm1, %v847_v3 }
  0xb5   : > { %7537 = vmatmul.mubr.msk.bf16.gmra.mrb[8].mxu0 %vm337_vm1, %v848_v8 }
  0xb6   : > { %7540 = vmatprep.mubr.msk.bf16.mxu0 %vm337_vm1, %v849_v9 }
  0xbd   : > { %7541 = vmatmul.mubr.msk.bf16.gmra.mrb[12].mxu0 %vm337_vm1, %v850_v14 }
  0xbe   : > { %7544 = vmatprep.mubr.msk.bf16.mxu0 %vm337_vm1, %v851_v15 }
  0xc5   : > { %7545 = vmatmul.mubr.msk.bf16.gmra.mrb[16].mxu0 %vm337_vm1, %v852_v20 }
  0xc6   : > { %7548 = vmatprep.mubr.msk.bf16.mxu0 %vm337_vm1, %v853_v21 }
  0xcd   : > { %7549 = vmatmul.mubr.msk.bf16.gmra.mrb[20].mxu0 %vm337_vm1, %v854_v26 }
  0xce   : > { %7552 = vmatprep.mubr.msk.bf16.mxu0 %vm337_vm1, %v855_v27 }
  0xd5   : > { %7553 = vmatmul.mubr.msk.bf16.gmra.mrb[24].mxu0 %vm337_vm1, %v856_v32 }
  0xd6   : > { %7556 = vmatprep.mubr.msk.bf16.mxu0 %vm337_vm1, %v857_v33 }
  0xdd   : > { %7557 = vmatmul.mubr.msk.bf16.gmra.mrb[28].mxu0 %vm337_vm1, %v858_v38 }
  0xde   : > { %7560 = vmatprep.mubr.msk.bf16.mxu0 %vm337_vm1, %v859_v39 }
  0xe5   : > { %7561 = vmatmul.mubr.msk.bf16.gmra.mrb[32].mxu0 %vm337_vm1, %v860_v42 }
  0xe6   : > { %7566 = vmatprep.mubr.msk.bf16.mxu0 %vm337_vm1, %v8939_v58  ;;  %v9040_v58 = vld [vmem:[%s10051_s1 + $0xc] sm:$0x3] }
  0xed   : > { %7567 = vmatmul.mubr.msk.bf16.vlgmr.msra.gmra.mrb[0].mxu0 %vm337_vm1, %v8941_v59  ;;  %v1465_v59 = vld [vmem:[%s8805_s27 + $0x43] sm:$0xff] }
  0xee   : > { %7603 = vmatpush3.bf16.msra.mxu0 %v1570_v43  ;;  %7570 = vmatprep.mubr.msk.bf16.mxu0 %vm337_vm1, %v846_v2  ;;  %v1498_v63 = vpack.c.bf16 %v1466_v60, %v1465_v59  ;;  %v1470_v2 = vld [vmem:[%s8805_s27 + $0x6b] sm:$0xff]  ;;  %v1797_v59 = vld [vmem:[%s8805_s27 + $0x74] sm:$0xff]  ;;  %v1798_v60 = vld [vmem:[%s8805_s27 + $0x7c] sm:$0xff] }
  0xef   : > { %8715 = vmatprep.subr.msk.bf16.mxu0 %vm392_vm0, %v6856_v44  ;;  %v1500_v5 = vpack.c.bf16 %v1470_v2, %v1469_v1  ;;  %v1787_v43 = vld [vmem:[%s8805_s27 + $0x24] sm:$0xff]  ;;  %v1788_v44 = vld [vmem:[%s8805_s27 + $0x2c] sm:$0xff]  ;;  %v1827_v62 = vpack.c.bf16 %v1798_v60, %v1797_v59  ;;  %v1801_v1 = vld [vmem:[%s8805_s27 + $0x94] sm:$0xff] }
  0xf0   : > { %v9098_v47 = vpack.c.bf16 %v1788_v44, %v1787_v43  ;;  %v1802_v2 = vld [vmem:[%s8805_s27 + $0x9c] sm:$0xff]  ;;  %v3333_v44 = vld [vmem:[%s10054_s4 + $0x48] sm:$0xff] }
  0xf1   : > { %v3332_v43 = vld [vmem:[%s10054_s4 + $0x40] sm:$0xff]  ;;  %v2442_v59 = vld [vmem:[%s8805_s27 + $0x4d] sm:$0xff]  ;;  %v3339_v60 = vld [vmem:[%s10054_s4 + $0x78] sm:$0xff] }
  0xf5   : > { %7571 = vmatmul.mubr.msk.bf16.gmra.mrb[4].mxu0 %vm337_vm1, %v847_v3  ;;  %v1471_v3 = vld [vmem:[%s8805_s27 + $0x73] sm:$0xff] }
  0xf6   : > { %7574 = vmatprep.mubr.msk.bf16.mxu0 %vm337_vm1, %v848_v8  ;;  %v1501_v6 = vpack.c.bf16 %v1472_v4, %v1471_v3  ;;  %v1474_v8 = vld [vmem:[%s8805_s27 + $0x8b] sm:$0xff]  ;;  %v1829_v4 = vpack.c.bf16 %v1802_v2, %v1801_v1 }
  0xf7   : > { %v1502_v11 = vpack.c.bf16 %v1474_v8, %v1473_v7  ;;  %v1805_v7 = vld [vmem:[%s8805_s27 + $0xb4] sm:$0xff]  ;;  %v1806_v8 = vld [vmem:[%s8805_s27 + $0xbc] sm:$0xff]  ;;  %v3341_v1 = vld [vmem:[%s10054_s4 + $0x88] sm:$0xff] }
  0xf8   : > { %v3342_v2 = vld [vmem:[%s10054_s4 + $0x90] sm:$0xff] }
  0xfd   : > { %7575 = vmatmul.mubr.msk.bf16.gmra.mrb[8].mxu0 %vm337_vm1, %v849_v9  ;;  %v1475_v9 = vld [vmem:[%s8805_s27 + $0x93] sm:$0xff] }
  0xfe   : > { %7578 = vmatprep.mubr.msk.bf16.mxu0 %vm337_vm1, %v850_v14  ;;  %v1503_v12 = vpack.c.bf16 %v1476_v10, %v1475_v9  ;;  %v1478_v14 = vld [vmem:[%s8805_s27 + $0xab] sm:$0xff]  ;;  %v1831_v10 = vpack.c.bf16 %v1806_v8, %v1805_v7  ;;  %v3343_v7 = vld [vmem:[%s10054_s4 + $0x98] sm:$0xff]  ;;  %v3344_v8 = vld [vmem:[%s10054_s4 + $0xa0] sm:$0xff] }
  0xff   : > { %v1504_v17 = vpack.c.bf16 %v1478_v14, %v1477_v13  ;;  %v1809_v13 = vld [vmem:[%s8805_s27 + $0xd4] sm:$0xff]  ;;  %v1810_v14 = vld [vmem:[%s8805_s27 + $0xdc] sm:$0xff] }
 0x105   : > { %7579 = vmatmul.mubr.msk.bf16.gmra.mrb[12].mxu0 %vm337_vm1, %v851_v15  ;;  %v1479_v15 = vld [vmem:[%s8805_s27 + $0xb3] sm:$0xff] }
 0x106   : > { %7582 = vmatprep.mubr.msk.bf16.mxu0 %vm337_vm1, %v852_v20  ;;  %v1505_v18 = vpack.c.bf16 %v1480_v16, %v1479_v15  ;;  %v1482_v20 = vld [vmem:[%s8805_s27 + $0xcb] sm:$0xff]  ;;  %v1833_v16 = vpack.c.bf16 %v1810_v14, %v1809_v13  ;;  %v2447_v13 = vld [vmem:[%s8805_s27 + $0x75] sm:$0xff]  ;;  %v2448_v14 = vld [vmem:[%s8805_s27 + $0x7d] sm:$0xff] }
 0x107   : > { %v1506_v23 = vpack.c.bf16 %v1482_v20, %v1481_v19  ;;  %v1813_v19 = vld [vmem:[%s8805_s27 + $0xf4] sm:$0xff]  ;;  %v1814_v20 = vld [vmem:[%s8805_s27 + $0xfc] sm:$0xff] }
 0x10d   : > { %7583 = vmatmul.mubr.msk.bf16.gmra.mrb[16].mxu0 %vm337_vm1, %v853_v21  ;;  %v1483_v21 = vld [vmem:[%s8805_s27 + $0xd3] sm:$0xff] }
 0x10e   : > { %7586 = vmatprep.mubr.msk.bf16.mxu0 %vm337_vm1, %v854_v26  ;;  %v1507_v24 = vpack.c.bf16 %v1484_v22, %v1483_v21  ;;  %v1486_v26 = vld [vmem:[%s8805_s27 + $0xeb] sm:$0xff]  ;;  %v1835_v22 = vpack.c.bf16 %v1814_v20, %v1813_v19  ;;  %v2478_v19 = vpack.c.bf16 %v2448_v14, %v2447_v13 }
 0x10f   : > { %v1508_v29 = vpack.c.bf16 %v1486_v26, %v1485_v25  ;;  %v1817_v25 = vld [vmem:[%s8805_s27 + $0x114] sm:$0xff]  ;;  %v1818_v26 = vld [vmem:[%s8805_s27 + $0x11c] sm:$0xff] }
 0x110   : > { %v2772_v13 = vld [vmem:[%s8805_s27 + $0x6e] sm:$0xff] }
 0x115   : > { %7587 = vmatmul.mubr.msk.bf16.gmra.mrb[20].mxu0 %vm337_vm1, %v855_v27  ;;  %v1487_v27 = vld [vmem:[%s8805_s27 + $0xf3] sm:$0xff] }
 0x116   : > { %7590 = vmatprep.mubr.msk.bf16.mxu0 %vm337_vm1, %v856_v32  ;;  %v1509_v30 = vpack.c.bf16 %v1488_v28, %v1487_v27  ;;  %v1490_v32 = vld [vmem:[%s8805_s27 + $0x10b] sm:$0xff]  ;;  %v1837_v28 = vpack.c.bf16 %v1818_v26, %v1817_v25 }
 0x117   : > { %v1510_v35 = vpack.c.bf16 %v1490_v32, %v1489_v31  ;;  %v2453_v25 = vld [vmem:[%s8805_s27 + $0xa5] sm:$0xff]  ;;  %v2454_v26 = vld [vmem:[%s8805_s27 + $0xad] sm:$0xff] }
 0x11d   : > { %7591 = vmatmul.mubr.msk.bf16.gmra.mrb[24].mxu0 %vm337_vm1, %v857_v33  ;;  %v1491_v33 = vld [vmem:[%s8805_s27 + $0x113] sm:$0xff] }
 0x11e   : > { %7594 = vmatprep.mubr.msk.bf16.mxu0 %vm337_vm1, %v858_v38  ;;  %v1511_v36 = vpack.c.bf16 %v1492_v34, %v1491_v33  ;;  %v1494_v38 = vld [vmem:[%s8805_s27 + $0x12b] sm:$0xff]  ;;  %v3324_v34 = vld [vmem:[%s10054_s4] sm:$0xff] }
 0x11f   : > { %v1512_v41 = vpack.c.bf16 %v1494_v38, %v1493_v37  ;;  %v9167_v33 = vld [vmem:[%s10051_s1 + $0x10] sm:$0x3]  ;;  %v3325_v37 = vld [vmem:[%s10054_s4 + $0x8] sm:$0xff]  ;;  %v3327_v38 = vld [vmem:[%s10054_s4 + $0x18] sm:$0xff] }
 0x125   : > { %7595 = vmatmul.mubr.msk.bf16.gmra.mrb[28].mxu0 %vm337_vm1, %v859_v39  ;;  %v1785_v39 = vld [vmem:[%s8805_s27 + $0x14] sm:$0xff] }
 0x126   : > { %7598 = vmatprep.mubr.msk.bf16.mxu0 %vm337_vm1, %v860_v42  ;;  %v1821_v42 = vpack.c.bf16 %v1786_v40, %v1785_v39  ;;  %v3328_v39 = vld [vmem:[%s10054_s4 + $0x20] sm:$0xff]  ;;  %v3329_v40 = vld [vmem:[%s10054_s4 + $0x28] sm:$0xff] }
 0x12d   : > { %7599 = vmatmul.mubr.msk.bf16.gmra.mrb[32].mxu0 %vm337_vm1, %v1186_v49  ;;  %v2222_v49 = vsel %vm392_vm0, %v9040_v58, 0 }
 0x12e   : > { %7604 = vmatprep.mubr.msk.bf16.mxu0 %vm337_vm1, %v1495_v50  ;;  %v9107_v50 = vld [vmem:[%s10051_s1 + $0xe] sm:$0x3] }
 0x12f   : > { %v2548_v32 = vsel %vm392_vm0, %v9107_v50, 0 }
 0x135   : > { %7605 = vmatmul.mubr.msk.bf16.vlgmr.msra.gmra.mrb[0].mxu0 %vm337_vm1, %v1496_v55  ;;  %v1824_v55 = vpack.c.bf16 %v1792_v52, %v1791_v51  ;;  %v3336_v51 = vld [vmem:[%s10054_s4 + $0x60] sm:$0xff] }
 0x136   : > { %7641 = vmatpush3.bf16.msra.mxu0 %v1896_v57  ;;  %7608 = vmatprep.mubr.msk.bf16.mxu0 %vm337_vm1, %v1497_v56  ;;  %v1825_v56 = vpack.c.bf16 %v1794_v54, %v1793_v53  ;;  %v1795_v57 = vld [vmem:[%s8805_s27 + $0x64] sm:$0xff] }
 0x137   : > { %8716 = vmatprep.subr.msk.bf16.mxu0 %vm392_vm0, %v9040_v58  ;;  %v1796_v58 = vld [vmem:[%s8805_s27 + $0x6c] sm:$0xff] }
 0x138   : > { %v1826_v61 = vpack.c.bf16 %v1796_v58, %v1795_v57  ;;  %v3337_v54 = vld [vmem:[%s10054_s4 + $0x68] sm:$0xff]  ;;  %v2440_v57 = vld [vmem:[%s8805_s27 + $0x3d] sm:$0xff] }
 0x139   : > { %v2441_v58 = vld [vmem:[%s8805_s27 + $0x45] sm:$0xff] }
 0x13d   : > { %7609 = vmatmul.mubr.msk.bf16.gmra.mrb[4].mxu0 %vm337_vm1, %v1498_v63  ;;  %v1799_v63 = vld [vmem:[%s8805_s27 + $0x84] sm:$0xff] }
 0x13e   : > { %7612 = vmatprep.mubr.msk.bf16.mxu0 %vm337_vm1, %v1499_v0  ;;  %v1800_v0 = vld [vmem:[%s8805_s27 + $0x8c] sm:$0xff] }
 0x13f   : > { %v1828_v3 = vpack.c.bf16 %v1800_v0, %v1799_v63  ;;  %v2475_v63 = vpack.c.bf16 %v2442_v59, %v2441_v58  ;;  %v2874_v0 = vsel %vm392_vm0, %v9167_v33, 0  ;;  %v2469_v58 = vld [vmem:[%s8805_s27 + $0x125] sm:$0xff]  ;;  %v2470_v59 = vld [vmem:[%s8805_s27 + $0x12d] sm:$0xff] }
 0x145   : > { %7613 = vmatmul.mubr.msk.bf16.gmra.mrb[8].mxu0 %vm337_vm1, %v1500_v5  ;;  %v1803_v5 = vld [vmem:[%s8805_s27 + $0xa4] sm:$0xff] }
 0x146   : > { %7616 = vmatprep.mubr.msk.bf16.mxu0 %vm337_vm1, %v1501_v6  ;;  %v1804_v6 = vld [vmem:[%s8805_s27 + $0xac] sm:$0xff] }
 0x147   : > { %v1830_v9 = vpack.c.bf16 %v1804_v6, %v1803_v5  ;;  %v2445_v5 = vld [vmem:[%s8805_s27 + $0x65] sm:$0xff]  ;;  %v2446_v6 = vld [vmem:[%s8805_s27 + $0x6d] sm:$0xff] }
 0x14d   : > { %7617 = vmatmul.mubr.msk.bf16.gmra.mrb[12].mxu0 %vm337_vm1, %v1502_v11  ;;  %v1807_v11 = vld [vmem:[%s8805_s27 + $0xc4] sm:$0xff] }
 0x14e   : > { %7620 = vmatprep.mubr.msk.bf16.mxu0 %vm337_vm1, %v1503_v12  ;;  %v1808_v12 = vld [vmem:[%s8805_s27 + $0xcc] sm:$0xff] }
 0x14f   : > { %v1832_v15 = vpack.c.bf16 %v1808_v12, %v1807_v11  ;;  %v3345_v11 = vld [vmem:[%s10054_s4 + $0xa8] sm:$0xff]  ;;  %v3346_v12 = vld [vmem:[%s10054_s4 + $0xb0] sm:$0xff] }
 0x155   : > { %7621 = vmatmul.mubr.msk.bf16.gmra.mrb[16].mxu0 %vm337_vm1, %v1504_v17  ;;  %v1811_v17 = vld [vmem:[%s8805_s27 + $0xe4] sm:$0xff] }
 0x156   : > { %7624 = vmatprep.mubr.msk.bf16.mxu0 %vm337_vm1, %v1505_v18  ;;  %v1812_v18 = vld [vmem:[%s8805_s27 + $0xec] sm:$0xff] }
 0x157   : > { %v1834_v21 = vpack.c.bf16 %v1812_v18, %v1811_v17  ;;  %v3347_v17 = vld [vmem:[%s10054_s4 + $0xb8] sm:$0xff]  ;;  %v3348_v18 = vld [vmem:[%s10054_s4 + $0xc0] sm:$0xff] }
 0x15d   : > { %7625 = vmatmul.mubr.msk.bf16.gmra.mrb[20].mxu0 %vm337_vm1, %v1506_v23  ;;  %v1815_v23 = vld [vmem:[%s8805_s27 + $0x104] sm:$0xff] }
 0x15e   : > { %7628 = vmatprep.mubr.msk.bf16.mxu0 %vm337_vm1, %v1507_v24  ;;  %v1816_v24 = vld [vmem:[%s8805_s27 + $0x10c] sm:$0xff] }
 0x15f   : > { %v1836_v27 = vpack.c.bf16 %v1816_v24, %v1815_v23  ;;  %v2451_v23 = vld [vmem:[%s8805_s27 + $0x95] sm:$0xff]  ;;  %v2452_v24 = vld [vmem:[%s8805_s27 + $0x9d] sm:$0xff] }
 0x165   : > { %7629 = vmatmul.mubr.msk.bf16.gmra.mrb[24].mxu0 %vm337_vm1, %v1508_v29  ;;  %v1819_v29 = vld [vmem:[%s8805_s27 + $0x124] sm:$0xff] }
 0x166   : > { %7632 = vmatprep.mubr.msk.bf16.mxu0 %vm337_vm1, %v1509_v30  ;;  %v1820_v30 = vld [vmem:[%s8805_s27 + $0x12c] sm:$0xff] }
 0x167   : > { %v1838_v31 = vpack.c.bf16 %v1820_v30, %v1819_v29  ;;  %v2480_v29 = vpack.c.bf16 %v2452_v24, %v2451_v23  ;;  %v2481_v30 = vpack.c.bf16 %v2454_v26, %v2453_v25  ;;  %v2778_v23 = vld [vmem:[%s8805_s27 + $0x9e] sm:$0xff]  ;;  %v2779_v24 = vld [vmem:[%s8805_s27 + $0xa6] sm:$0xff]  ;;  %v2780_v25 = vld [vmem:[%s8805_s27 + $0xae] sm:$0xff] }
 0x16d   : > { %7633 = vmatmul.mubr.msk.bf16.gmra.mrb[28].mxu0 %vm337_vm1, %v1510_v35  ;;  %v8750_v35 = vmov 0  }
 0x16e   : > { %7636 = vmatprep.mubr.msk.bf16.mxu0 %vm337_vm1, %v1511_v36  ;;  %8740 = vset.pattern.permute.xlu0 %v8750_v35  ;;  %v3326_v36 = vld [vmem:[%s10054_s4 + $0x10] sm:$0xff] }
 0x16f   : > { %3362 = vperm.xlu0 %8740, %v3324_v34   ;;  %8741 = vset.pattern.permute.xlu1 %v8750_v35  ;;  %v2456_v34 = vld [vmem:[%s8805_s27 + $0xbd] sm:$0xff]  ;;  %v2457_v35 = vld [vmem:[%s8805_s27 + $0xc5] sm:$0xff] }
 0x170   : > { %3372 = vperm.xlu1 %8741, %v3326_v36   ;;  %v2458_v36 = vld [vmem:[%s8805_s27 + $0xcd] sm:$0xff] }
 0x173   : > { %3367 = vperm.xlu0 %8740, %v3325_v37   ;;  %v3355_v37 = vld [vmem:[%s10054_s4 + $0xf8] sm:$0xff] }
 0x174   : > { %3377 = vperm.xlu1 %8741, %v3327_v38   ;;  %v3356_v38 = vld [vmem:[%s10054_s4 + $0x100] sm:$0xff] }
 0x175   : > { %7637 = vmatmul.mubr.msk.bf16.gmra.mrb[32].mxu0 %vm337_vm1, %v1512_v41  ;;  %v3330_v41 = vld [vmem:[%s10054_s4 + $0x30] sm:$0xff] }
 0x176   : > { %7642 = vmatprep.mubr.msk.bf16.mxu0 %vm337_vm1, %v1821_v42  ;;  %v3331_v42 = vld [vmem:[%s10054_s4 + $0x38] sm:$0xff] }
 0x177   : > { %3382 = vperm.xlu0 %8740, %v3328_v39  }
 0x178   : > { %3387 = vperm.xlu1 %8741, %v3329_v40   ;;  %v2483_v40 = vpack.c.bf16 %v2458_v36, %v2457_v35  ;;  %v2786_v35 = vld [vmem:[%s8805_s27 + $0xde] sm:$0xff]  ;;  %v2787_v36 = vld [vmem:[%s8805_s27 + $0xe6] sm:$0xff] }
 0x17b   : > { %3392 = vperm.xlu0 %8740, %v3330_v41   ;;  %v3357_v41 = vld [vmem:[%s10054_s4 + $0x108] sm:$0xff] }
 0x17c   : > { %3397 = vperm.xlu1 %8741, %v3331_v42   ;;  %v3358_v42 = vld [vmem:[%s10054_s4 + $0x110] sm:$0xff] }
 0x17d   : > { %7643 = vmatmul.mubr.msk.bf16.vlgmr.msra.gmra.mrb[0].mxu0 %vm337_vm1, %v9098_v47 }
 0x17e   : > { %7679 = vmatpush3.bf16.msra.mxu0 %v2222_v49  ;;  %7646 = vmatprep.mubr.msk.bf16.mxu0 %vm337_vm1, %v9100_v48  ;;  %v2438_v49 = vld [vmem:[%s8805_s27 + $0x2d] sm:$0xff] }
 0x17f   : > { %8717 = vmatprep.subr.msk.bf16.mxu0 %vm392_vm0, %v9107_v50  ;;  %3402 = vperm.xlu0 %8740, %v3332_v43   ;;  %v3335_v50 = vld [vmem:[%s10054_s4 + $0x58] sm:$0xff] }
 0x180   : > { %3407 = vperm.xlu1 %8741, %v3333_v44   ;;  %v2459_v43 = vld [vmem:[%s8805_s27 + $0xd5] sm:$0xff]  ;;  %v2460_v44 = vld [vmem:[%s8805_s27 + $0xdd] sm:$0xff] }
 0x183   : > { %3412 = vperm.xlu0 %8740, %v3334_v45   ;;  %v2461_v45 = vld [vmem:[%s8805_s27 + $0xe5] sm:$0xff] }
 0x184   : > { %3417 = vperm.xlu1 %8741, %v3335_v50   ;;  %v2463_v50 = vld [vmem:[%s8805_s27 + $0xf5] sm:$0xff] }
 0x185   : > { %7647 = vmatmul.mubr.msk.bf16.gmra.mrb[4].mxu0 %vm337_vm1, %v1824_v55 }
 0x186   : > { %7650 = vmatprep.mubr.msk.bf16.mxu0 %vm337_vm1, %v1825_v56 }
 0x187   : > { %3422 = vperm.xlu0 %8740, %v3336_v51   ;;  %v2464_v51 = vld [vmem:[%s8805_s27 + $0xfd] sm:$0xff] }
 0x188   : > { %3427 = vperm.xlu1 %8741, %v3337_v54   ;;  %v2486_v54 = vpack.c.bf16 %v2464_v51, %v2463_v50 }
 0x18c   : > { %3437 = vperm.xlu1 %8741, %v3339_v60  }
 0x18d   : > { %7651 = vmatmul.mubr.msk.bf16.gmra.mrb[8].mxu0 %vm337_vm1, %v1826_v61 }
 0x18e   : > { %7654 = vmatprep.mubr.msk.bf16.mxu0 %vm337_vm1, %v1827_v62 }
 0x190   : > { %3447 = vperm.xlu1 %8741, %v3341_v1   ;;  %v2764_v1 = vld [vmem:[%s8805_s27 + $0x2e] sm:$0xff] }
 0x194   : > { %3457 = vperm.xlu1 %8741, %v3343_v7   ;;  %v2768_v7 = vld [vmem:[%s8805_s27 + $0x4e] sm:$0xff] }
 0x195   : > { %7655 = vmatmul.mubr.msk.bf16.gmra.mrb[12].mxu0 %vm337_vm1, %v1828_v3 }
 0x196   : > { %7658 = vmatprep.mubr.msk.bf16.mxu0 %vm337_vm1, %v1829_v4 }
 0x198   : > { %3467 = vperm.xlu1 %8741, %v3345_v11   ;;  %v2770_v11 = vld [vmem:[%s8805_s27 + $0x5e] sm:$0xff] }
 0x19c   : > { %3477 = vperm.xlu1 %8741, %v3347_v17   ;;  %v2774_v17 = vld [vmem:[%s8805_s27 + $0x7e] sm:$0xff] }
 0x19d   : > { %7659 = vmatmul.mubr.msk.bf16.gmra.mrb[16].mxu0 %vm337_vm1, %v1830_v9 }
 0x19e   : > { %7662 = vmatprep.mubr.msk.bf16.mxu0 %vm337_vm1, %v1831_v10 }
 0x1a5   : > { %7663 = vmatmul.mubr.msk.bf16.gmra.mrb[20].mxu0 %vm337_vm1, %v1832_v15 }
 0x1a6   : > { %7666 = vmatprep.mubr.msk.bf16.mxu0 %vm337_vm1, %v1833_v16 }
 0x1ad   : > { %7667 = vmatmul.mubr.msk.bf16.gmra.mrb[24].mxu0 %vm337_vm1, %v1834_v21 }
 0x1ae   : > { %7670 = vmatprep.mubr.msk.bf16.mxu0 %vm337_vm1, %v1835_v22 }
 0x1b5   : > { %7671 = vmatmul.mubr.msk.bf16.gmra.mrb[28].mxu0 %vm337_vm1, %v1836_v27 }
 0x1b6   : > { %7674 = vmatprep.mubr.msk.bf16.mxu0 %vm337_vm1, %v1837_v28 }
 0x1bd   : > { %7675 = vmatmul.mubr.msk.bf16.gmra.mrb[32].mxu0 %vm337_vm1, %v1838_v31 }
 0x1be   : > { %7680 = vmatprep.mubr.msk.bf16.mxu0 %vm337_vm1, %v9098_v47  ;;  %v2146_v47 = vld [vmem:[%s8805_s27 + $0x13c] sm:$0xff] }
 0x1bf   : > { %v2164_v52 = vpack.c.bf16 %v2146_v47, %v2145_v46  ;;  %v2462_v46 = vld [vmem:[%s8805_s27 + $0xed] sm:$0xff]  ;;  %v3359_v47 = vld [vmem:[%s10054_s4 + $0x118] sm:$0xff] }
 0x1c5   : > { %7681 = vmatmul.mubr.msk.bf16.vlgmr.msra.gmra.mrb[0].mxu0 %vm337_vm1, %v9100_v48  ;;  %v2437_v48 = vld [vmem:[%s8805_s27 + $0x25] sm:$0xff] }
 0x1c6   : > { %7717 = vmatpush3.bf16.msra.mxu0 %v2548_v32  ;;  %7684 = vmatprep.mubr.msk.bf16.mxu0 %vm337_vm1, %v1824_v55  ;;  %v2473_v53 = vpack.c.bf16 %v2438_v49, %v2437_v48  ;;  %v3338_v55 = vld [vmem:[%s10054_s4 + $0x70] sm:$0xff]  ;;  %v2484_v48 = vpack.c.bf16 %v2460_v44, %v2459_v43  ;;  %v2485_v49 = vpack.c.bf16 %v2462_v46, %v2461_v45 }
 0x1c7   : > { %8718 = vmatprep.subr.msk.bf16.mxu0 %vm392_vm0, %v9167_v33  ;;  %3432 = vperm.xlu0 %8740, %v3338_v55   ;;  %v3354_v32 = vld [vmem:[%s10054_s4 + $0xf0] sm:$0xff] }
 0x1c8   : > { %v2455_v33 = vld [vmem:[%s8805_s27 + $0xb5] sm:$0xff] }
 0x1c9   : > { %v2482_v39 = vpack.c.bf16 %v2456_v34, %v2455_v33  ;;  %v2785_v34 = vld [vmem:[%s8805_s27 + $0xd6] sm:$0xff]  ;;  %v2792_v43 = vld [vmem:[%s8805_s27 + $0x10e] sm:$0xff] }
 0x1ca   : > { %v2793_v46 = vld [vmem:[%s8805_s27 + $0x116] sm:$0xff] }
 0x1cd   : > { %7685 = vmatmul.mubr.msk.bf16.gmra.mrb[4].mxu0 %vm337_vm1, %v1825_v56  ;;  %v2439_v56 = vld [vmem:[%s8805_s27 + $0x35] sm:$0xff] }
 0x1ce   : > { %7688 = vmatprep.mubr.msk.bf16.mxu0 %vm337_vm1, %v1826_v61  ;;  %v3340_v61 = vld [vmem:[%s10054_s4 + $0x80] sm:$0xff] }
 0x1cf   : > { %3442 = vperm.xlu0 %8740, %v3340_v61   ;;  %v2489_v61 = vpack.c.bf16 %v2470_v59, %v2469_v58 }
 0x1d3   : > { %3452 = vperm.xlu0 %8740, %v3342_v2  }
 0x1d5   : > { %7689 = vmatmul.mubr.msk.bf16.gmra.mrb[8].mxu0 %vm337_vm1, %v1827_v62  ;;  %v2474_v62 = vpack.c.bf16 %v2440_v57, %v2439_v56  ;;  %v2467_v56 = vld [vmem:[%s8805_s27 + $0x115] sm:$0xff]  ;;  %v2468_v57 = vld [vmem:[%s8805_s27 + $0x11d] sm:$0xff] }
 0x1d6   : > { %7692 = vmatprep.mubr.msk.bf16.mxu0 %vm337_vm1, %v1828_v3  ;;  %v2443_v3 = vld [vmem:[%s8805_s27 + $0x55] sm:$0xff]  ;;  %v2488_v60 = vpack.c.bf16 %v2468_v57, %v2467_v56  ;;  %v6934_v56 = vld [vmem:[%s10052_s2 + $0x4] sm:$0xf] }
 0x1d7   : > { %3462 = vperm.xlu0 %8740, %v3344_v8   ;;  %8719 = vmatprep.subr.msk.bf16.mxu1 %vm3777_vm3, %v6934_v56  ;;  %v3779_v57 = vsel %vm3777_vm3, %v6934_v56, 0 }
 0x1d8   : > { %7793 = vmatpush3.bf16.msra.mxu1 %v3779_v57 }
 0x1db   : > { %3472 = vperm.xlu0 %8740, %v3346_v12   ;;  %v2771_v12 = vld [vmem:[%s8805_s27 + $0x66] sm:$0xff] }
 0x1dd   : > { %7693 = vmatmul.mubr.msk.bf16.gmra.mrb[12].mxu0 %vm337_vm1, %v1829_v4  ;;  %v2444_v4 = vld [vmem:[%s8805_s27 + $0x5d] sm:$0xff] }
 0x1de   : > { %7696 = vmatprep.mubr.msk.bf16.mxu0 %vm337_vm1, %v1830_v9  ;;  %v2476_v9 = vpack.c.bf16 %v2444_v4, %v2443_v3  ;;  %v2765_v4 = vld [vmem:[%s8805_s27 + $0x36] sm:$0xff] }
 0x1df   : > { %3482 = vperm.xlu0 %8740, %v3348_v18   ;;  %v2775_v18 = vld [vmem:[%s8805_s27 + $0x86] sm:$0xff] }
 0x1e5   : > { %7697 = vmatmul.mubr.msk.bf16.gmra.mrb[16].mxu0 %vm337_vm1, %v1831_v10  ;;  %v2477_v10 = vpack.c.bf16 %v2446_v6, %v2445_v5  ;;  %v2766_v5 = vld [vmem:[%s8805_s27 + $0x3e] sm:$0xff]  ;;  %v2767_v6 = vld [vmem:[%s8805_s27 + $0x46] sm:$0xff] }
 0x1e6   : > { %7700 = vmatprep.mubr.msk.bf16.mxu0 %vm337_vm1, %v1832_v15  ;;  %v2449_v15 = vld [vmem:[%s8805_s27 + $0x85] sm:$0xff]  ;;  %v2800_v8 = vpack.c.bf16 %v2766_v5, %v2765_v4 }
 0x1ed   : > { %7701 = vmatmul.mubr.msk.bf16.gmra.mrb[20].mxu0 %vm337_vm1, %v1833_v16  ;;  %v2450_v16 = vld [vmem:[%s8805_s27 + $0x8d] sm:$0xff] }
 0x1ee   : > { %7704 = vmatprep.mubr.msk.bf16.mxu0 %vm337_vm1, %v1834_v21  ;;  %v2479_v20 = vpack.c.bf16 %v2450_v16, %v2449_v15  ;;  %v3349_v21 = vld [vmem:[%s10054_s4 + $0xc8] sm:$0xff]  ;;  %v2803_v15 = vpack.c.bf16 %v2772_v13, %v2771_v12  ;;  %v2773_v16 = vld [vmem:[%s8805_s27 + $0x76] sm:$0xff] }
 0x1ef   : > { %3487 = vperm.xlu1 %8741, %v3349_v21  }
 0x1f5   : > { %7705 = vmatmul.mubr.msk.bf16.gmra.mrb[24].mxu0 %vm337_vm1, %v1835_v22  ;;  %v3350_v22 = vld [vmem:[%s10054_s4 + $0xd0] sm:$0xff] }
 0x1f6   : > { %7708 = vmatprep.mubr.msk.bf16.mxu0 %vm337_vm1, %v1836_v27  ;;  %3492 = vperm.xlu0 %8740, %v3350_v22   ;;  %v3351_v27 = vld [vmem:[%s10054_s4 + $0xd8] sm:$0xff] }
 0x1f7   : > { %3497 = vperm.xlu1 %8741, %v3351_v27   ;;  %v2777_v22 = vld [vmem:[%s8805_s27 + $0x96] sm:$0xff]  ;;  %v2807_v27 = vpack.c.bf16 %v2780_v25, %v2779_v24 }
 0x1f8   : > { %v2806_v26 = vpack.c.bf16 %v2778_v23, %v2777_v22 }
 0x1fd   : > { %7709 = vmatmul.mubr.msk.bf16.gmra.mrb[28].mxu0 %vm337_vm1, %v1837_v28  ;;  %v3352_v28 = vld [vmem:[%s10054_s4 + $0xe0] sm:$0xff] }
 0x1fe   : > { %7712 = vmatprep.mubr.msk.bf16.mxu0 %vm337_vm1, %v1838_v31  ;;  %3502 = vperm.xlu0 %8740, %v3352_v28   ;;  %v3353_v31 = vld [vmem:[%s10054_s4 + $0xe8] sm:$0xff]  ;;  %v2781_v28 = vld [vmem:[%s8805_s27 + $0xb6] sm:$0xff] }
 0x1ff   : > { %3507 = vperm.xlu1 %8741, %v3353_v31   ;;  %v2784_v31 = vld [vmem:[%s8805_s27 + $0xce] sm:$0xff] }
 0x202   : > { %3512 = vperm.xlu0 %8740, %v3354_v32  }
 0x203   : > { %3517 = vperm.xlu1 %8741, %v3355_v37   ;;  %v2788_v37 = vld [vmem:[%s8805_s27 + $0xee] sm:$0xff] }
 0x205   : > { %7713 = vmatmul.mubr.msk.bf16.gmra.mrb[32].mxu0 %vm337_vm1, %v2164_v52  ;;  %v2465_v52 = vld [vmem:[%s8805_s27 + $0x105] sm:$0xff] }
 0x206   : > { %7718 = vmatprep.mubr.msk.bf16.mxu0 %vm337_vm1, %v2473_v53  ;;  %3522 = vperm.xlu0 %8740, %v3356_v38   ;;  %v2466_v53 = vld [vmem:[%s8805_s27 + $0x10d] sm:$0xff]  ;;  %v2810_v38 = vpack.c.bf16 %v2786_v35, %v2785_v34 }
 0x207   : > { %3527 = vperm.xlu1 %8741, %v3357_v41   ;;  %v2487_v55 = vpack.c.bf16 %v2466_v53, %v2465_v52  ;;  %v2790_v41 = vld [vmem:[%s8805_s27 + $0xfe] sm:$0xff]  ;;  %v2797_v52 = vld [vmem:[%s8805_s27 + $0x136] sm:$0xff] }
 0x208   : > { %v2798_v53 = vld [vmem:[%s8805_s27 + $0x13e] sm:$0xff] }
 0x20a   : > { %3532 = vperm.xlu0 %8740, %v3358_v42   ;;  %v2791_v42 = vld [vmem:[%s8805_s27 + $0x106] sm:$0xff] }
 0x20b   : > { %3537 = vperm.xlu1 %8741, %v3359_v47   ;;  %v2813_v45 = vpack.c.bf16 %v2792_v43, %v2791_v42  ;;  %v2794_v47 = vld [vmem:[%s8805_s27 + $0x11e] sm:$0xff] }
 0x20c   : > { %v2814_v50 = vpack.c.bf16 %v2794_v47, %v2793_v46 }
 0x20d   : > { %7719 = vmatmul.mubr.msk.bf16.vlgmr.msra.gmra.mrb[0].mxu0 %vm337_vm1, %v2474_v62  ;;  %v2471_v62 = vld [vmem:[%s8805_s27 + $0x135] sm:$0xff] }
 0x20e   : > { %7755 = vmatpush3.bf16.msra.mxu0 %v2874_v0  ;;  %7722 = vmatprep.mubr.msk.bf16.mxu0 %vm337_vm1, %v2475_v63  ;;  %v2472_v63 = vld [vmem:[%s8805_s27 + $0x13d] sm:$0xff]  ;;  %v2763_v0 = vld [vmem:[%s8805_s27 + $0x26] sm:$0xff] }
 0x20f   : > { %v2490_v2 = vpack.c.bf16 %v2472_v63, %v2471_v62  ;;  %v2799_v3 = vpack.c.bf16 %v2764_v1, %v2763_v0  ;;  %v3363_v62 = vpop.permute.xlu0 %3362  ;;  %v3373_v63 = vpop.permute.xlu1 %3372 }
 0x213   : > { %v3368_v0 = vpop.permute.xlu0 %3367  ;;  %v3378_v1 = vpop.permute.xlu1 %3377 }
 0x215   : > { %7723 = vmatmul.mubr.msk.bf16.gmra.mrb[4].mxu0 %vm337_vm1, %v2476_v9  ;;  %v2801_v9 = vpack.c.bf16 %v2768_v7, %v2767_v6 }
 0x216   : > { %7726 = vmatprep.mubr.msk.bf16.mxu0 %vm337_vm1, %v2477_v10  ;;  %v2769_v10 = vld [vmem:[%s8805_s27 + $0x56] sm:$0xff] }
 0x217   : > { %v2802_v14 = vpack.c.bf16 %v2770_v11, %v2769_v10  ;;  %v9485_v11 = vld [vmem:[%s10053_s3 + $0x1] ss:$0 sm:$0xff] }
 0x21d   : > { %7727 = vmatmul.mubr.msk.bf16.gmra.mrb[8].mxu0 %vm337_vm1, %v2478_v19  ;;  %v2776_v19 = vld [vmem:[%s8805_s27 + $0x8e] sm:$0xff] }
 0x21e   : > { %7730 = vmatprep.mubr.msk.bf16.mxu0 %vm337_vm1, %v2479_v20  ;;  %v2804_v20 = vpack.c.bf16 %v2774_v17, %v2773_v16  ;;  %v2805_v21 = vpack.c.bf16 %v2776_v19, %v2775_v18 }
 0x225   : > { %7731 = vmatmul.mubr.msk.bf16.gmra.mrb[12].mxu0 %vm337_vm1, %v2480_v29  ;;  %v2782_v29 = vld [vmem:[%s8805_s27 + $0xbe] sm:$0xff] }
 0x226   : > { %7734 = vmatprep.mubr.msk.bf16.mxu0 %vm337_vm1, %v2481_v30  ;;  %v2783_v30 = vld [vmem:[%s8805_s27 + $0xc6] sm:$0xff]  ;;  %v2808_v32 = vpack.c.bf16 %v2782_v29, %v2781_v28 }
 0x227   : > { %v2809_v33 = vpack.c.bf16 %v2784_v31, %v2783_v30 }
 0x22d   : > { %7735 = vmatmul.mubr.msk.bf16.gmra.mrb[16].mxu0 %vm337_vm1, %v2482_v39  ;;  %v2811_v39 = vpack.c.bf16 %v2788_v37, %v2787_v36 }
 0x22e   : > { %7738 = vmatprep.mubr.msk.bf16.mxu0 %vm337_vm1, %v2483_v40  ;;  %v2789_v40 = vld [vmem:[%s8805_s27 + $0xf6] sm:$0xff] }
 0x22f   : > { %v2812_v44 = vpack.c.bf16 %v2790_v41, %v2789_v40 }
 0x235   : > { %7739 = vmatmul.mubr.msk.bf16.gmra.mrb[20].mxu0 %vm337_vm1, %v2484_v48  ;;  %v2795_v48 = vld [vmem:[%s8805_s27 + $0x126] sm:$0xff] }
 0x236   : > { %7742 = vmatprep.mubr.msk.bf16.mxu0 %vm337_vm1, %v2485_v49  ;;  %v2796_v49 = vld [vmem:[%s8805_s27 + $0x12e] sm:$0xff] }
 0x237   : > { %v2815_v51 = vpack.c.bf16 %v2796_v49, %v2795_v48 }
 0x23d   : > { %7743 = vmatmul.mubr.msk.bf16.gmra.mrb[24].mxu0 %vm337_vm1, %v2486_v54  ;;  %v2816_v54 = vpack.c.bf16 %v2798_v53, %v2797_v52 }
 0x23e   : > { %7746 = vmatprep.mubr.msk.bf16.mxu0 %vm337_vm1, %v2487_v55  ;;  %v8751_v55 = vmov 0.0  }
 0x23f   : > { %3284 = vst.msk [vmem:[#allocation2 + $0x20] sm:$0xff] %vm3279_vm2, %v8751_v55  ;;  %3285 = vst.msk [vmem:[#allocation2 + $0x28] sm:$0xff] %vm3279_vm2, %v8751_v55 }
 0x240   : > { %3280 = vst.msk [vmem:[#allocation2] sm:$0xff] %vm3279_vm2, %v8751_v55  ;;  %3281 = vst.msk [vmem:[#allocation2 + $0x8] sm:$0xff] %vm3279_vm2, %v8751_v55 }
 0x241   : > { %3282 = vst.msk [vmem:[#allocation2 + $0x10] sm:$0xff] %vm3279_vm2, %v8751_v55  ;;  %3283 = vst.msk [vmem:[#allocation2 + $0x18] sm:$0xff] %vm3279_vm2, %v8751_v55 }
 0x242   : > { %3286 = vst.msk [vmem:[#allocation2 + $0x30] sm:$0xff] %vm3279_vm2, %v8751_v55  ;;  %3287 = vst.msk [vmem:[#allocation2 + $0x38] sm:$0xff] %vm3279_vm2, %v8751_v55 }
 0x243   : > { %3288 = vst.msk [vmem:[#allocation2 + $0x40] sm:$0xff] %vm3279_vm2, %v8751_v55  ;;  %3289 = vst.msk [vmem:[#allocation2 + $0x48] sm:$0xff] %vm3279_vm2, %v8751_v55 }
 0x244   : > { %3290 = vst.msk [vmem:[#allocation2 + $0x50] sm:$0xff] %vm3279_vm2, %v8751_v55  ;;  %3291 = vst.msk [vmem:[#allocation2 + $0x58] sm:$0xff] %vm3279_vm2, %v8751_v55 }
 0x245   : > { %7747 = vmatmul.mubr.msk.bf16.gmra.mrb[28].mxu0 %vm337_vm1, %v2488_v60  ;;  %3292 = vst.msk [vmem:[#allocation2 + $0x60] sm:$0xff] %vm3279_vm2, %v8751_v55  ;;  %3293 = vst.msk [vmem:[#allocation2 + $0x68] sm:$0xff] %vm3279_vm2, %v8751_v55 }
 0x246   : > { %7750 = vmatprep.mubr.msk.bf16.mxu0 %vm337_vm1, %v2489_v61  ;;  %3294 = vst.msk [vmem:[#allocation2 + $0x70] sm:$0xff] %vm3279_vm2, %v8751_v55  ;;  %3295 = vst.msk [vmem:[#allocation2 + $0x78] sm:$0xff] %vm3279_vm2, %v8751_v55  ;;  %v9459_v61 = vld [vmem:[%s10052_s2] sm:$0xf] }
 0x247   : > { %3296 = vst.msk [vmem:[#allocation2 + $0x80] sm:$0xff] %vm3279_vm2, %v8751_v55  ;;  %3297 = vst.msk [vmem:[#allocation2 + $0x88] sm:$0xff] %vm3279_vm2, %v8751_v55  ;;  %v3667_v58 = vld [vmem:[#allocation2 + $0x1] sm:$0xff]  ;;  %8720 = vmatprep.subr.msk.bf16.mxu1 %vm3777_vm3, %v9459_v61 }
 0x248   : > { %3298 = vst.msk [vmem:[#allocation2 + $0x90] sm:$0xff] %vm3279_vm2, %v8751_v55  ;;  %3299 = vst.msk [vmem:[#allocation2 + $0x98] sm:$0xff] %vm3279_vm2, %v8751_v55  ;;  %v3668_v59 = vld [vmem:[#allocation2 + $0x9] sm:$0xff] }
 0x249   : > { %3300 = vst.msk [vmem:[#allocation2 + $0xa0] sm:$0xff] %vm3279_vm2, %v8751_v55  ;;  %3301 = vst.msk [vmem:[#allocation2 + $0xa8] sm:$0xff] %vm3279_vm2, %v8751_v55  ;;  %v3703_v60 = vpack.c.bf16 %v3668_v59, %v3667_v58 }
 0x24a   : > { %3302 = vst.msk [vmem:[#allocation2 + $0xb0] sm:$0xff] %vm3279_vm2, %v8751_v55  ;;  %3303 = vst.msk [vmem:[#allocation2 + $0xb8] sm:$0xff] %vm3279_vm2, %v8751_v55 }
 0x24b   : > { %3304 = vst.msk [vmem:[#allocation2 + $0xc0] sm:$0xff] %vm3279_vm2, %v8751_v55  ;;  %3305 = vst.msk [vmem:[#allocation2 + $0xc8] sm:$0xff] %vm3279_vm2, %v8751_v55  ;;  %7794 = vmatprep.mubr.msk.bf16.mxu1 %vm3279_vm2, %v3703_v60 }
 0x24c   : > { %3306 = vst.msk [vmem:[#allocation2 + $0xd0] sm:$0xff] %vm3279_vm2, %v8751_v55  ;;  %3307 = vst.msk [vmem:[#allocation2 + $0xd8] sm:$0xff] %vm3279_vm2, %v8751_v55 }
 0x24d   : > { %7751 = vmatmul.mubr.msk.bf16.gmra.mrb[32].mxu0 %vm337_vm1, %v2490_v2  ;;  %3308 = vst.msk [vmem:[#allocation2 + $0xe0] sm:$0xff] %vm3279_vm2, %v8751_v55  ;;  %3309 = vst.msk [vmem:[#allocation2 + $0xe8] sm:$0xff] %vm3279_vm2, %v8751_v55  ;;  %v9463_v2 = vpop.permute.xlu0 %3382 }
 0x24e   : > { %7756 = vmatprep.mubr.msk.bf16.mxu0 %vm337_vm1, %v2799_v3  ;;  %3310 = vst.msk [vmem:[#allocation2 + $0xf0] sm:$0xff] %vm3279_vm2, %v8751_v55  ;;  %3311 = vst.msk [vmem:[#allocation2 + $0xf8] sm:$0xff] %vm3279_vm2, %v8751_v55  ;;  %v9465_v3 = vpop.permute.xlu1 %3387 }
 0x24f   : > { %3312 = vst.msk [vmem:[#allocation2 + $0x100] sm:$0xff] %vm3279_vm2, %v8751_v55  ;;  %3313 = vst.msk [vmem:[#allocation2 + $0x108] sm:$0xff] %vm3279_vm2, %v8751_v55 }
 0x250   : > { %3314 = vst.msk [vmem:[#allocation2 + $0x110] sm:$0xff] %vm3279_vm2, %v8751_v55  ;;  %3315 = vst.msk [vmem:[#allocation2 + $0x118] sm:$0xff] %vm3279_vm2, %v8751_v55 }
 0x251   : > { %3316 = vst.msk [vmem:[#allocation2 + $0x120] sm:$0xff] %vm3279_vm2, %v8751_v55  ;;  %3317 = vst.msk [vmem:[#allocation2 + $0x128] sm:$0xff] %vm3279_vm2, %v8751_v55  ;;  %v9467_v4 = vpop.permute.xlu0 %3392 }
 0x252   : > { %3318 = vst.msk [vmem:[#allocation2 + $0x130] sm:$0xff] %vm3279_vm2, %v8751_v55  ;;  %3319 = vst.msk [vmem:[#allocation2 + $0x138] sm:$0xff] %vm3279_vm2, %v8751_v55  ;;  %v9469_v5 = vpop.permute.xlu1 %3397 }
 0x253   : > { %3320 = vst.msk [vmem:[#allocation2 + $0x140] sm:$0xff] %vm3279_vm2, %v8751_v55 }
 0x255   : > { %7757 = vmatmul.mubr.msk.bf16.vlgmr.msra.gmra.mrb[0].mxu0 %vm337_vm1, %v2800_v8  ;;  %v9471_v6 = vpop.permute.xlu0 %3402  ;;  %v9478_v8 = vld [vmem:[%s10053_s3] ss:$0 sm:$0xff] }
 0x256   : > { %7760 = vmatprep.mubr.msk.bf16.mxu0 %vm337_vm1, %v2801_v9  ;;  %v9473_v7 = vpop.permute.xlu1 %3407 }
 0x259   : > { %v9480_v9 = vpop.permute.xlu0 %3412 }
 0x25a   : > { %v9487_v12 = vpop.permute.xlu1 %3417 }
 0x25d   : > { %7761 = vmatmul.mubr.msk.bf16.gmra.mrb[4].mxu0 %vm337_vm1, %v2802_v14  ;;  %v9495_v22 = vpop.permute.xlu0 %3422 }
 0x25e   : > { %7764 = vmatprep.mubr.msk.bf16.mxu0 %vm337_vm1, %v2803_v15 }
 0x261   : > { %v9504_v42 = vpop.permute.xlu0 %3432 }
 0x265   : > { %7765 = vmatmul.mubr.msk.bf16.gmra.mrb[8].mxu0 %vm337_vm1, %v2804_v20  ;;  %v9518_v60 = vpop.permute.xlu0 %3442 }
 0x266   : > { %7768 = vmatprep.mubr.msk.bf16.mxu0 %vm337_vm1, %v2805_v21 }
 0x26d   : > { %7769 = vmatmul.mubr.msk.bf16.gmra.mrb[12].mxu0 %vm337_vm1, %v2806_v26 }
 0x26e   : > { %7772 = vmatprep.mubr.msk.bf16.mxu0 %vm337_vm1, %v2807_v27  ;;  %v9499_v27 = vpop.permute.xlu1 %3427 }
 0x272   : > { %v9512_v49 = vpop.permute.xlu1 %3437 }
 0x275   : > { %7773 = vmatmul.mubr.msk.bf16.gmra.mrb[16].mxu0 %vm337_vm1, %v2808_v32 }
 0x276   : > { %7776 = vmatprep.mubr.msk.bf16.mxu0 %vm337_vm1, %v2809_v33 }
 0x27d   : > { %7777 = vmatmul.mubr.msk.bf16.gmra.mrb[20].mxu0 %vm337_vm1, %v2810_v38 }
 0x27e   : > { %7780 = vmatprep.mubr.msk.bf16.mxu0 %vm337_vm1, %v2811_v39 }
 0x285   : > { %7781 = vmatmul.mubr.msk.bf16.gmra.mrb[24].mxu0 %vm337_vm1, %v2812_v44 }
 0x286   : > { %7784 = vmatprep.mubr.msk.bf16.mxu0 %vm337_vm1, %v2813_v45 }
 0x28d   : > { %7785 = vmatmul.mubr.msk.bf16.gmra.mrb[28].mxu0 %vm337_vm1, %v2814_v50 }
 0x28e   : > { %7788 = vmatprep.mubr.msk.bf16.mxu0 %vm337_vm1, %v2815_v51 }
 0x295   : > { %7789 = vmatmul.mubr.msk.bf16.gmra.mrb[32].mxu0 %vm337_vm1, %v2816_v54 }
 0x328   : > { %v7758_v10 = vpop.f32.mrb[0].mxu0 }
 0x329   : > { %v3097_v13 = vmul.f32 %v7758_v10, %v9478_v8  ;;  %v2910_v14 = vpop.f32.mrb[1].mxu0 }
 0x32a   : > { %v3095_v15 = vmul.f32 %v9478_v8, %v2910_v14  ;;  %v7759_v16 = vpop.f32.mrb[2].mxu0 }
 0x32b   : > { %v3137_v17 = vadd.f32 %v9485_v11, %v3097_v13  ;;  %v3098_v18 = vmul.f32 %v7759_v16, %v9478_v8  ;;  %v2913_v19 = vpop.f32.mrb[3].mxu0 }
 0x32c   : > { %v3135_v20 = vadd.f32 %v9485_v11, %v3095_v15  ;;  %v3096_v21 = vmul.f32 %v9478_v8, %v2913_v19  ;;  %v9525_v15 = vpop.permute.xlu1 %3447 }
 0x32d   : > { %vm3173_vm4 = vcmp.ge.f32.partialorder %v3137_v17, 0.0  ;;  %v3209_v23 = vmul.f32 0.01, %v3137_v17  ;;  %v3138_v24 = vadd.f32 %v9485_v11, %v3098_v18 }
 0x32e   : > { %vm3171_vm5 = vcmp.ge.f32.partialorder %v3135_v20, 0.0  ;;  %v3207_v25 = vmul.f32 0.01, %v3135_v20  ;;  %v3136_v26 = vadd.f32 %v9485_v11, %v3096_v21 }
 0x32f   : > { %v3245_v28 = vsel %vm3173_vm4, %v3137_v17, %v3209_v23  ;;  %vm3174_vm6 = vcmp.ge.f32.partialorder %v3138_v24, 0.0  ;;  %v3210_v29 = vmul.f32 0.01, %v3138_v24 }
 0x330   : > { %v3542_v30 = vmul.f32 %v3373_v63, %v3245_v28  ;;  %v3243_v31 = vsel %vm3171_vm5, %v3135_v20, %v3207_v25  ;;  %vm3172_vm7 = vcmp.ge.f32.partialorder %v3136_v26, 0.0  ;;  %v3208_v32 = vmul.f32 0.01, %v3136_v26  ;;  %v7762_v33 = vpop.f32.mrb[4].mxu0 }
 0x331   : > { %v3540_v34 = vmul.f32 %v3363_v62, %v3243_v31  ;;  %v3246_v35 = vsel %vm3174_vm6, %v3138_v24, %v3210_v29  ;;  %v3101_v36 = vmul.f32 %v7762_v33, %v9478_v8  ;;  %v2926_v37 = vpop.f32.mrb[5].mxu0  ;;  %v4013_v24 = vsel %vm3777_vm3, %v9459_v61, 0  ;;  %v9544_v33 = vpop.permute.xlu0 %3452 }
 0x332   : > { %3578 = vst.msk [vmem:[#allocation2 + $0x23] sm:$0xff] %vm3279_vm2, %v3542_v30  ;;  %v3543_v38 = vmul.f32 %v3378_v1, %v3246_v35  ;;  %v3244_v39 = vsel %vm3172_vm7, %v3136_v26, %v3208_v32  ;;  %v3099_v40 = vmul.f32 %v9478_v8, %v2926_v37  ;;  %v7763_v41 = vpop.f32.mrb[6].mxu0  ;;  %v9542_v32 = vld [vmem:[%s10052_s2 + $0x8] sm:$0xf] }
 0x333   : > { %3576 = vst.msk [vmem:[#allocation2 + $0x13] sm:$0xff] %vm3279_vm2, %v3540_v34  ;;  %v3541_v43 = vmul.f32 %v3368_v0, %v3244_v39  ;;  %v3141_v44 = vadd.f32 %v9485_v11, %v3101_v36  ;;  %v3102_v45 = vmul.f32 %v7763_v41, %v9478_v8  ;;  %v2929_v46 = vpop.f32.mrb[7].mxu0  ;;  %v9549_v39 = vpop.permute.xlu1 %3457 }
 0x334   : > { %3579 = vst.msk [vmem:[#allocation2 + $0x2b] sm:$0xff] %vm3279_vm2, %v3543_v38  ;;  %v3139_v47 = vadd.f32 %v9485_v11, %v3099_v40  ;;  %v3100_v48 = vmul.f32 %v9478_v8, %v2929_v46 }
 0x335   : > { %3577 = vst.msk [vmem:[#allocation2 + $0x1b] sm:$0xff] %vm3279_vm2, %v3541_v43  ;;  %vm3177_vm8 = vcmp.ge.f32.partialorder %v3141_v44, 0.0  ;;  %v3213_v50 = vmul.f32 0.01, %v3141_v44  ;;  %v3142_v51 = vadd.f32 %v9485_v11, %v3102_v45 }
 0x336   : > { %vm3175_vm9 = vcmp.ge.f32.partialorder %v3139_v47, 0.0  ;;  %v3211_v52 = vmul.f32 0.01, %v3139_v47  ;;  %v3140_v53 = vadd.f32 %v9485_v11, %v3100_v48 }
 0x337   : > { %v3249_v54 = vsel %vm3177_vm8, %v3141_v44, %v3213_v50  ;;  %vm3178_vm10 = vcmp.ge.f32.partialorder %v3142_v51, 0.0  ;;  %v3214_v55 = vmul.f32 0.01, %v3142_v51 }
 0x338   : > { %v3546_v56 = vmul.f32 %v9467_v4, %v3249_v54  ;;  %v3247_v57 = vsel %vm3175_vm9, %v3139_v47, %v3211_v52  ;;  %vm3176_vm11 = vcmp.ge.f32.partialorder %v3140_v53, 0.0  ;;  %v3212_v58 = vmul.f32 0.01, %v3140_v53  ;;  %v7766_v59 = vpop.f32.mrb[8].mxu0 }
 0x339   : > { %v3544_v62 = vmul.f32 %v9463_v2, %v3247_v57  ;;  %v3250_v63 = vsel %vm3178_vm10, %v3142_v51, %v3214_v55  ;;  %v3105_v0 = vmul.f32 %v7766_v59, %v9478_v8  ;;  %v2942_v1 = vpop.f32.mrb[9].mxu0  ;;  %v9565_v57 = vpop.permute.xlu0 %3462 }
 0x33a   : > { %3582 = vst.msk [vmem:[#allocation2 + $0x43] sm:$0xff] %vm3279_vm2, %v3546_v56  ;;  %v3547_v10 = vmul.f32 %v9469_v5, %v3250_v63  ;;  %v3248_v13 = vsel %vm3176_vm11, %v3140_v53, %v3212_v58  ;;  %v3103_v14 = vmul.f32 %v9478_v8, %v2942_v1  ;;  %v7767_v4 = vpop.f32.mrb[10].mxu0  ;;  %v3669_v21 = vld [vmem:[#allocation2 + $0x11] sm:$0xff]  ;;  %v9570_v1 = vpop.permute.xlu1 %3467 }
 0x33b   : > { %3580 = vst.msk [vmem:[#allocation2 + $0x33] sm:$0xff] %vm3279_vm2, %v3544_v62  ;;  %v3545_v16 = vmul.f32 %v9465_v3, %v3248_v13  ;;  %v3145_v2 = vadd.f32 %v9485_v11, %v3105_v0  ;;  %v3106_v17 = vmul.f32 %v7767_v4, %v9478_v8  ;;  %v2945_v18 = vpop.f32.mrb[11].mxu0  ;;  %v3672_v19 = vld [vmem:[#allocation2 + $0x29] sm:$0xff] }
 0x33c   : > { %3583 = vst.msk [vmem:[#allocation2 + $0x4b] sm:$0xff] %vm3279_vm2, %v3547_v10  ;;  %v3143_v5 = vadd.f32 %v9485_v11, %v3103_v14  ;;  %v3104_v20 = vmul.f32 %v9478_v8, %v2945_v18  ;;  %v3670_v23 = vld [vmem:[#allocation2 + $0x19] sm:$0xff]  ;;  %v3671_v25 = vld [vmem:[#allocation2 + $0x21] sm:$0xff] }
 0x33d   : > { %3581 = vst.msk [vmem:[#allocation2 + $0x3b] sm:$0xff] %vm3279_vm2, %v3545_v16  ;;  %vm3181_vm12 = vcmp.ge.f32.partialorder %v3145_v2, 0.0  ;;  %v3217_v3 = vmul.f32 0.01, %v3145_v2  ;;  %v3146_v26 = vadd.f32 %v9485_v11, %v3106_v17  ;;  %v3704_v28 = vpack.c.bf16 %v3670_v23, %v3669_v21 }
 0x33e   : > { %vm3179_vm13 = vcmp.ge.f32.partialorder %v3143_v5, 0.0  ;;  %v3215_v29 = vmul.f32 0.01, %v3143_v5  ;;  %v3144_v30 = vadd.f32 %v9485_v11, %v3104_v20  ;;  %v3705_v31 = vpack.c.bf16 %v3672_v19, %v3671_v25 }
 0x33f   : > { %v3253_v61 = vsel %vm3181_vm12, %v3145_v2, %v3217_v3  ;;  %vm3182_vm14 = vcmp.ge.f32.partialorder %v3146_v26, 0.0  ;;  %v3218_v34 = vmul.f32 0.01, %v3146_v26  ;;  %7795 = vmatmul.mubr.msk.bf16.vlgmr.msra.gmra.mrb[0].mxu1 %vm3279_vm2, %v3704_v28 }
 0x340   : > { %v3550_v35 = vmul.f32 %v9480_v9, %v3253_v61  ;;  %v3251_v36 = vsel %vm3179_vm13, %v3143_v5, %v3215_v29  ;;  %vm3180_vm15 = vcmp.ge.f32.partialorder %v3144_v30, 0.0  ;;  %v3216_v37 = vmul.f32 0.01, %v3144_v30  ;;  %7831 = vmatpush3.bf16.msra.mxu1 %v4013_v24  ;;  %v7770_v38 = vpop.f32.mrb[12].mxu0  ;;  %7798 = vmatprep.mubr.msk.bf16.mxu1 %vm3279_vm2, %v3705_v31  ;;  %v9580_v24 = vpop.permute.xlu0 %3472 }
 0x341   : > { %v3548_v40 = vmul.f32 %v9471_v6, %v3251_v36  ;;  %v3254_v41 = vsel %vm3182_vm14, %v3146_v26, %v3218_v34  ;;  %v3109_v43 = vmul.f32 %v7770_v38, %v9478_v8  ;;  %v2958_v44 = vpop.f32.mrb[13].mxu0  ;;  %8721 = vmatprep.subr.msk.bf16.mxu1 %vm3777_vm3, %v9542_v32  ;;  %v9589_v34 = vpop.permute.xlu1 %3477 }
 0x342   : > { %3586 = vst.msk [vmem:[#allocation2 + $0x63] sm:$0xff] %vm3279_vm2, %v3550_v35  ;;  %v3551_v9 = vmul.f32 %v9487_v12, %v3254_v41  ;;  %v3252_v45 = vsel %vm3180_vm15, %v3144_v30, %v3216_v37  ;;  %v3107_v46 = vmul.f32 %v9478_v8, %v2958_v44  ;;  %v7771_v47 = vpop.f32.mrb[14].mxu0  ;;  %v3673_v54 = vld [vmem:[#allocation2 + $0x31] sm:$0xff] }
 0x343   : > { %3584 = vst.msk [vmem:[#allocation2 + $0x53] sm:$0xff] %vm3279_vm2, %v3548_v40  ;;  %v3549_v48 = vmul.f32 %v9473_v7, %v3252_v45  ;;  %v3149_v6 = vadd.f32 %v9485_v11, %v3109_v43  ;;  %v3110_v50 = vmul.f32 %v7771_v47, %v9478_v8  ;;  %v2961_v51 = vpop.f32.mrb[15].mxu0  ;;  %v3676_v52 = vld [vmem:[#allocation2 + $0x49] sm:$0xff] }
 0x344   : > { %3587 = vst.msk [vmem:[#allocation2 + $0x6b] sm:$0xff] %vm3279_vm2, %v3551_v9  ;;  %v3147_v53 = vadd.f32 %v9485_v11, %v3107_v46  ;;  %v3108_v12 = vmul.f32 %v9478_v8, %v2961_v51  ;;  %v3674_v55 = vld [vmem:[#allocation2 + $0x39] sm:$0xff]  ;;  %v3675_v56 = vld [vmem:[#allocation2 + $0x41] sm:$0xff]  ;;  %v9597_v47 = vpop.permute.xlu0 %3482 }
 0x345   : > { %3585 = vst.msk [vmem:[#allocation2 + $0x5b] sm:$0xff] %vm3279_vm2, %v3549_v48  ;;  %vm3185_vm0 = vcmp.ge.f32.partialorder %v3149_v6, 0.0  ;;  %v3221_v7 = vmul.f32 0.01, %v3149_v6  ;;  %v3150_v58 = vadd.f32 %v9485_v11, %v3110_v50  ;;  %v3706_v59 = vpack.c.bf16 %v3674_v55, %v3673_v54  ;;  %v9604_v54 = vpop.permute.xlu1 %3487 }
 0x346   : > { %vm3183_vm1 = vcmp.ge.f32.partialorder %v3147_v53, 0.0  ;;  %v3219_v62 = vmul.f32 0.01, %v3147_v53  ;;  %v3148_v63 = vadd.f32 %v9485_v11, %v3108_v12  ;;  %v3707_v0 = vpack.c.bf16 %v3676_v52, %v3675_v56 }
 0x347   : > { %v3257_v10 = vsel %vm3185_vm0, %v3149_v6, %v3221_v7  ;;  %vm3186_vm4 = vcmp.ge.f32.partialorder %v3150_v58, 0.0  ;;  %v3222_v13 = vmul.f32 0.01, %v3150_v58  ;;  %7799 = vmatmul.mubr.msk.bf16.gmra.mrb[4].mxu1 %vm3279_vm2, %v3706_v59 }
 0x348   : > { %v3554_v14 = vmul.f32 %v9504_v42, %v3257_v10  ;;  %v3255_v4 = vsel %vm3183_vm1, %v3147_v53, %v3219_v62  ;;  %vm3184_vm5 = vcmp.ge.f32.partialorder %v3148_v63, 0.0  ;;  %v3220_v16 = vmul.f32 0.01, %v3148_v63  ;;  %v7774_v2 = vpop.f32.mrb[16].mxu0  ;;  %7802 = vmatprep.mubr.msk.bf16.mxu1 %vm3279_vm2, %v3707_v0 }
 0x349   : > { %v3552_v17 = vmul.f32 %v9495_v22, %v3255_v4  ;;  %v3258_v18 = vsel %vm3186_vm4, %v3150_v58, %v3222_v13  ;;  %v3113_v19 = vmul.f32 %v7774_v2, %v9478_v8  ;;  %v2974_v5 = vpop.f32.mrb[17].mxu0  ;;  %v3493_v2 = vpop.permute.xlu0 %3492 }
 0x34a   : > { %3590 = vst.msk [vmem:[#allocation2 + $0x83] sm:$0xff] %vm3279_vm2, %v3554_v14  ;;  %v3555_v20 = vmul.f32 %v9512_v49, %v3258_v18  ;;  %v3256_v21 = vsel %vm3184_vm5, %v3148_v63, %v3220_v16  ;;  %v3111_v23 = vmul.f32 %v9478_v8, %v2974_v5  ;;  %v7775_v42 = vpop.f32.mrb[18].mxu0  ;;  %v3677_v30 = vld [vmem:[#allocation2 + $0x51] sm:$0xff] }
 0x34b   : > { %3588 = vst.msk [vmem:[#allocation2 + $0x73] sm:$0xff] %vm3279_vm2, %v3552_v17  ;;  %v3553_v25 = vmul.f32 %v9499_v27, %v3256_v21  ;;  %v3153_v22 = vadd.f32 %v9485_v11, %v3113_v19  ;;  %v3114_v3 = vmul.f32 %v7775_v42, %v9478_v8  ;;  %v2977_v26 = vpop.f32.mrb[19].mxu0  ;;  %v3680_v28 = vld [vmem:[#allocation2 + $0x69] sm:$0xff] }
 0x34c   : > { %3591 = vst.msk [vmem:[#allocation2 + $0x8b] sm:$0xff] %vm3279_vm2, %v3555_v20  ;;  %v3151_v49 = vadd.f32 %v9485_v11, %v3111_v23  ;;  %v3112_v29 = vmul.f32 %v9478_v8, %v2977_v26  ;;  %v3678_v31 = vld [vmem:[#allocation2 + $0x59] sm:$0xff]  ;;  %v3679_v61 = vld [vmem:[#allocation2 + $0x61] sm:$0xff]  ;;  %v3498_v23 = vpop.permute.xlu1 %3497 }
 0x34d   : > { %3589 = vst.msk [vmem:[#allocation2 + $0x7b] sm:$0xff] %vm3279_vm2, %v3553_v25  ;;  %vm3189_vm6 = vcmp.ge.f32.partialorder %v3153_v22, 0.0  ;;  %v3225_v27 = vmul.f32 0.01, %v3153_v22  ;;  %v3154_v35 = vadd.f32 %v9485_v11, %v3114_v3  ;;  %v3708_v36 = vpack.c.bf16 %v3678_v31, %v3677_v30 }
 0x34e   : > { %vm3187_vm7 = vcmp.ge.f32.partialorder %v3151_v49, 0.0  ;;  %v3223_v37 = vmul.f32 0.01, %v3151_v49  ;;  %v3152_v38 = vadd.f32 %v9485_v11, %v3112_v29  ;;  %v3709_v40 = vpack.c.bf16 %v3680_v28, %v3679_v61 }
 0x34f   : > { %v3261_v41 = vsel %vm3189_vm6, %v3153_v22, %v3225_v27  ;;  %vm3190_vm8 = vcmp.ge.f32.partialorder %v3154_v35, 0.0  ;;  %v3226_v43 = vmul.f32 0.01, %v3154_v35  ;;  %7803 = vmatmul.mubr.msk.bf16.gmra.mrb[8].mxu1 %vm3279_vm2, %v3708_v36 }
 0x350   : > { %v3558_v44 = vmul.f32 %v9544_v33, %v3261_v41  ;;  %v3259_v9 = vsel %vm3187_vm7, %v3151_v49, %v3223_v37  ;;  %vm3188_vm9 = vcmp.ge.f32.partialorder %v3152_v38, 0.0  ;;  %v3224_v45 = vmul.f32 0.01, %v3152_v38  ;;  %v7778_v46 = vpop.f32.mrb[20].mxu0  ;;  %7806 = vmatprep.mubr.msk.bf16.mxu1 %vm3279_vm2, %v3709_v40 }
 0x351   : > { %v3556_v48 = vmul.f32 %v9518_v60, %v3259_v9  ;;  %v3262_v6 = vsel %vm3190_vm8, %v3154_v35, %v3226_v43  ;;  %v3117_v50 = vmul.f32 %v7778_v46, %v9478_v8  ;;  %v2990_v51 = vpop.f32.mrb[21].mxu0 }
 0x352   : > { %3594 = vst.msk [vmem:[#allocation2 + $0xa3] sm:$0xff] %vm3279_vm2, %v3558_v44  ;;  %v3559_v52 = vmul.f32 %v9549_v39, %v3262_v6  ;;  %v3260_v53 = vsel %vm3188_vm9, %v3152_v38, %v3224_v45  ;;  %v3115_v33 = vmul.f32 %v9478_v8, %v2990_v51  ;;  %v7779_v12 = vpop.f32.mrb[22].mxu0  ;;  %v3681_v62 = vld [vmem:[#allocation2 + $0x71] sm:$0xff]  ;;  %v9631_v38 = vpop.permute.xlu0 %3502 }
 0x353   : > { %3592 = vst.msk [vmem:[#allocation2 + $0x93] sm:$0xff] %vm3279_vm2, %v3556_v48  ;;  %v3557_v55 = vmul.f32 %v9525_v15, %v3260_v53  ;;  %v3157_v60 = vadd.f32 %v9485_v11, %v3117_v50  ;;  %v3118_v56 = vmul.f32 %v7779_v12, %v9478_v8  ;;  %v2993_v7 = vpop.f32.mrb[23].mxu0  ;;  %v3684_v58 = vld [vmem:[#allocation2 + $0x89] sm:$0xff]  ;;  %v9636_v45 = vpop.permute.xlu1 %3507 }
 0x354   : > { %3595 = vst.msk [vmem:[#allocation2 + $0xab] sm:$0xff] %vm3279_vm2, %v3559_v52  ;;  %v3155_v39 = vadd.f32 %v9485_v11, %v3115_v33  ;;  %v3116_v59 = vmul.f32 %v9478_v8, %v2993_v7  ;;  %v3682_v63 = vld [vmem:[#allocation2 + $0x79] sm:$0xff]  ;;  %v3683_v0 = vld [vmem:[#allocation2 + $0x81] sm:$0xff] }
 0x355   : > { %3593 = vst.msk [vmem:[#allocation2 + $0x9b] sm:$0xff] %vm3279_vm2, %v3557_v55  ;;  %vm3193_vm10 = vcmp.ge.f32.partialorder %v3157_v60, 0.0  ;;  %v3229_v10 = vmul.f32 0.01, %v3157_v60  ;;  %v3158_v15 = vadd.f32 %v9485_v11, %v3118_v56  ;;  %v3710_v13 = vpack.c.bf16 %v3682_v63, %v3681_v62 }
 0x356   : > { %vm3191_vm11 = vcmp.ge.f32.partialorder %v3155_v39, 0.0  ;;  %v3227_v14 = vmul.f32 0.01, %v3155_v39  ;;  %v3156_v4 = vadd.f32 %v9485_v11, %v3116_v59  ;;  %v3711_v16 = vpack.c.bf16 %v3684_v58, %v3683_v0 }
 0x357   : > { %v3265_v17 = vsel %vm3193_vm10, %v3157_v60, %v3229_v10  ;;  %vm3194_vm12 = vcmp.ge.f32.partialorder %v3158_v15, 0.0  ;;  %v3230_v18 = vmul.f32 0.01, %v3158_v15  ;;  %7807 = vmatmul.mubr.msk.bf16.gmra.mrb[12].mxu1 %vm3279_vm2, %v3710_v13 }
 0x358   : > { %v3562_v19 = vmul.f32 %v9580_v24, %v3265_v17  ;;  %v3263_v5 = vsel %vm3191_vm11, %v3155_v39, %v3227_v14  ;;  %vm3192_vm13 = vcmp.ge.f32.partialorder %v3156_v4, 0.0  ;;  %v3228_v20 = vmul.f32 0.01, %v3156_v4  ;;  %v7782_v21 = vpop.f32.mrb[24].mxu0  ;;  %7810 = vmatprep.mubr.msk.bf16.mxu1 %vm3279_vm2, %v3711_v16  ;;  %v3513_v39 = vpop.permute.xlu0 %3512 }
 0x359   : > { %v3560_v42 = vmul.f32 %v9565_v57, %v3263_v5  ;;  %v3266_v25 = vsel %vm3194_vm12, %v3158_v15, %v3230_v18  ;;  %v3121_v22 = vmul.f32 %v7782_v21, %v9478_v8  ;;  %v3006_v3 = vpop.f32.mrb[25].mxu0  ;;  %v3518_v16 = vpop.permute.xlu1 %3517 }
 0x35a   : > { %3598 = vst.msk [vmem:[#allocation2 + $0xc3] sm:$0xff] %vm3279_vm2, %v3562_v19  ;;  %v3563_v26 = vmul.f32 %v9589_v34, %v3266_v25  ;;  %v3264_v28 = vsel %vm3192_vm13, %v3156_v4, %v3228_v20  ;;  %v3119_v24 = vmul.f32 %v9478_v8, %v3006_v3  ;;  %v7783_v49 = vpop.f32.mrb[26].mxu0  ;;  %v3685_v35 = vld [vmem:[#allocation2 + $0x91] sm:$0xff] }
 0x35b   : > { %3596 = vst.msk [vmem:[#allocation2 + $0xb3] sm:$0xff] %vm3279_vm2, %v3560_v42  ;;  %v3561_v29 = vmul.f32 %v9570_v1, %v3264_v28  ;;  %v3161_v30 = vadd.f32 %v9485_v11, %v3121_v22  ;;  %v3122_v57 = vmul.f32 %v7783_v49, %v9478_v8  ;;  %v3009_v31 = vpop.f32.mrb[27].mxu0  ;;  %v3688_v61 = vld [vmem:[#allocation2 + $0xa9] sm:$0xff] }
 0x35c   : > { %3599 = vst.msk [vmem:[#allocation2 + $0xcb] sm:$0xff] %vm3279_vm2, %v3563_v26  ;;  %v3159_v27 = vadd.f32 %v9485_v11, %v3119_v24  ;;  %v3120_v34 = vmul.f32 %v9478_v8, %v3009_v31  ;;  %v3686_v36 = vld [vmem:[#allocation2 + $0x99] sm:$0xff]  ;;  %v3687_v37 = vld [vmem:[#allocation2 + $0xa1] sm:$0xff]  ;;  %v3523_v3 = vpop.permute.xlu0 %3522 }
 0x35d   : > { %3597 = vst.msk [vmem:[#allocation2 + $0xbb] sm:$0xff] %vm3279_vm2, %v3561_v29  ;;  %vm3197_vm14 = vcmp.ge.f32.partialorder %v3161_v30, 0.0  ;;  %v3233_v1 = vmul.f32 0.01, %v3161_v30  ;;  %v3162_v40 = vadd.f32 %v9485_v11, %v3122_v57  ;;  %v3712_v41 = vpack.c.bf16 %v3686_v36, %v3685_v35 }
 0x35e   : > { %vm3195_vm15 = vcmp.ge.f32.partialorder %v3159_v27, 0.0  ;;  %v3231_v43 = vmul.f32 0.01, %v3159_v27  ;;  %v3160_v44 = vadd.f32 %v9485_v11, %v3120_v34  ;;  %v3713_v9 = vpack.c.bf16 %v3688_v61, %v3687_v37  ;;  %v3528_v61 = vpop.permute.xlu1 %3527 }
 0x35f   : > { %v3269_v46 = vsel %vm3197_vm14, %v3161_v30, %v3233_v1  ;;  %vm3198_vm0 = vcmp.ge.f32.partialorder %v3162_v40, 0.0  ;;  %v3234_v48 = vmul.f32 0.01, %v3162_v40  ;;  %7811 = vmatmul.mubr.msk.bf16.gmra.mrb[16].mxu1 %vm3279_vm2, %v3712_v41 }
 0x360   : > { %v3566_v6 = vmul.f32 %v3493_v2, %v3269_v46  ;;  %v3267_v50 = vsel %vm3195_vm15, %v3159_v27, %v3231_v43  ;;  %vm3196_vm1 = vcmp.ge.f32.partialorder %v3160_v44, 0.0  ;;  %v3232_v51 = vmul.f32 0.01, %v3160_v44  ;;  %v7786_v52 = vpop.f32.mrb[28].mxu0  ;;  %7814 = vmatprep.mubr.msk.bf16.mxu1 %vm3279_vm2, %v3713_v9 }
 0x361   : > { %v3564_v53 = vmul.f32 %v9597_v47, %v3267_v50  ;;  %v3270_v33 = vsel %vm3198_vm0, %v3162_v40, %v3234_v48  ;;  %v3125_v12 = vmul.f32 %v7786_v52, %v9478_v8  ;;  %v3022_v55 = vpop.f32.mrb[29].mxu0  ;;  %v3533_v50 = vpop.permute.xlu0 %3532 }
 0x362   : > { %3602 = vst.msk [vmem:[#allocation2 + $0xe3] sm:$0xff] %vm3279_vm2, %v3566_v6  ;;  %v3567_v60 = vmul.f32 %v3498_v23, %v3270_v33  ;;  %v3268_v56 = vsel %vm3196_vm1, %v3160_v44, %v3232_v51  ;;  %v3123_v7 = vmul.f32 %v9478_v8, %v3022_v55  ;;  %v7787_v58 = vpop.f32.mrb[30].mxu0  ;;  %v3689_v13 = vld [vmem:[#allocation2 + $0xb1] sm:$0xff] }
 0x363   : > { %3600 = vst.msk [vmem:[#allocation2 + $0xd3] sm:$0xff] %vm3279_vm2, %v3564_v53  ;;  %v3565_v59 = vmul.f32 %v9604_v54, %v3268_v56  ;;  %v3165_v62 = vadd.f32 %v9485_v11, %v3125_v12  ;;  %v3126_v47 = vmul.f32 %v7787_v58, %v9478_v8  ;;  %v3025_v63 = vpop.f32.mrb[31].mxu0  ;;  %v3692_v0 = vld [vmem:[#allocation2 + $0xc9] sm:$0xff]  ;;  %v3538_v12 = vpop.permute.xlu1 %3537 }
 0x364   : > { %3603 = vst.msk [vmem:[#allocation2 + $0xeb] sm:$0xff] %vm3279_vm2, %v3567_v60  ;;  %v3163_v10 = vadd.f32 %v9485_v11, %v3123_v7  ;;  %v3124_v15 = vmul.f32 %v9478_v8, %v3025_v63  ;;  %v3690_v14 = vld [vmem:[#allocation2 + $0xb9] sm:$0xff]  ;;  %v3691_v4 = vld [vmem:[#allocation2 + $0xc1] sm:$0xff] }
 0x365   : > { %3601 = vst.msk [vmem:[#allocation2 + $0xdb] sm:$0xff] %vm3279_vm2, %v3565_v59  ;;  %vm3201_vm4 = vcmp.ge.f32.partialorder %v3165_v62, 0.0  ;;  %v3237_v54 = vmul.f32 0.01, %v3165_v62  ;;  %v3166_v2 = vadd.f32 %v9485_v11, %v3126_v47  ;;  %v3714_v17 = vpack.c.bf16 %v3690_v14, %v3689_v13 }
 0x366   : > { %vm3199_vm5 = vcmp.ge.f32.partialorder %v3163_v10, 0.0  ;;  %v3235_v18 = vmul.f32 0.01, %v3163_v10  ;;  %v3164_v19 = vadd.f32 %v9485_v11, %v3124_v15  ;;  %v3715_v5 = vpack.c.bf16 %v3692_v0, %v3691_v4  ;;  %v3612_v0 = vld [vmem:[#allocation2] sm:$0xff] }
 0x367   : > { %v3273_v20 = vsel %vm3201_vm4, %v3165_v62, %v3237_v54  ;;  %vm3202_vm6 = vcmp.ge.f32.partialorder %v3166_v2, 0.0  ;;  %v3238_v21 = vmul.f32 0.01, %v3166_v2  ;;  %7815 = vmatmul.mubr.msk.bf16.gmra.mrb[20].mxu1 %vm3279_vm2, %v3714_v17  ;;  %v3616_v54 = vld [vmem:[#allocation2 + $0x20] sm:$0xff]  ;;  %v3614_v17 = vld [vmem:[#allocation2 + $0x10] sm:$0xff] }
 0x368   : > { %v3570_v23 = vmul.f32 %v3513_v39, %v3273_v20  ;;  %v3271_v42 = vsel %vm3199_vm5, %v3163_v10, %v3235_v18  ;;  %vm3200_vm7 = vcmp.ge.f32.partialorder %v3164_v19, 0.0  ;;  %v3236_v25 = vmul.f32 0.01, %v3164_v19  ;;  %v7790_v22 = vpop.f32.mrb[32].mxu0  ;;  %7818 = vmatprep.mubr.msk.bf16.mxu1 %vm3279_vm2, %v3715_v5  ;;  %v3613_v10 = vld [vmem:[#allocation2 + $0x8] sm:$0xff] }
 0x369   : > { %v3568_v26 = vmul.f32 %v9631_v38, %v3271_v42  ;;  %v3274_v28 = vsel %vm3202_vm6, %v3166_v2, %v3238_v21  ;;  %v3129_v24 = vmul.f32 %v7790_v22, %v9478_v8  ;;  %v3038_v49 = vpop.f32.mrb[33].mxu0  ;;  %v3648_v14 = vpack.c.bf16 %v3613_v10, %v3612_v0  ;;  %v3617_v2 = vld [vmem:[#allocation2 + $0x28] sm:$0xff]  ;;  %v3619_v21 = vld [vmem:[#allocation2 + $0x38] sm:$0xff] }
 0x36a   : > { %3606 = vst.msk [vmem:[#allocation2 + $0x103] sm:$0xff] %vm3279_vm2, %v3570_v23  ;;  %v3571_v29 = vmul.f32 %v3518_v16, %v3274_v28  ;;  %v3272_v30 = vsel %vm3200_vm7, %v3164_v19, %v3236_v25  ;;  %v3127_v57 = vmul.f32 %v9478_v8, %v3038_v49  ;;  %v7791_v31 = vpop.f32.mrb[34].mxu0  ;;  %v3693_v40 = vld [vmem:[#allocation2 + $0xd1] sm:$0xff]  ;;  %v4303_v19 = vsel %vm3777_vm3, %v9542_v32, 0  ;;  %v9685_v20 = vld [vmem:[%s10052_s2 + $0xc] sm:$0xf] }
 0x36b   : > { %3604 = vst.msk [vmem:[#allocation2 + $0xf3] sm:$0xff] %vm3279_vm2, %v3568_v26  ;;  %v3569_v27 = vmul.f32 %v9636_v45, %v3272_v30  ;;  %v3169_v34 = vadd.f32 %v9485_v11, %v3129_v24  ;;  %v3130_v35 = vmul.f32 %v7791_v31, %v9478_v8  ;;  %v3041_v36 = vpop.f32.mrb[35].mxu0  ;;  %v3696_v37 = vld [vmem:[#allocation2 + $0xe9] sm:$0xff]  ;;  %v3615_v16 = vld [vmem:[#allocation2 + $0x18] sm:$0xff]  ;;  %v3650_v5 = vpack.c.bf16 %v3617_v2, %v3616_v54  ;;  %v3620_v23 = vld [vmem:[#allocation2 + $0x40] sm:$0xff] }
 0x36c   : > { %3607 = vst.msk [vmem:[#allocation2 + $0x10b] sm:$0xff] %vm3279_vm2, %v3571_v29  ;;  %v3167_v38 = vadd.f32 %v9485_v11, %v3127_v57  ;;  %v3128_v1 = vmul.f32 %v9478_v8, %v3041_v36  ;;  %v3694_v41 = vld [vmem:[#allocation2 + $0xd9] sm:$0xff]  ;;  %v3695_v43 = vld [vmem:[#allocation2 + $0xe1] sm:$0xff]  ;;  %v3649_v18 = vpack.c.bf16 %v3615_v16, %v3614_v17  ;;  %v3618_v25 = vld [vmem:[#allocation2 + $0x30] sm:$0xff] }
 0x36d   : > { %3605 = vst.msk [vmem:[#allocation2 + $0xfb] sm:$0xff] %vm3279_vm2, %v3569_v27  ;;  %vm3205_vm8 = vcmp.ge.f32.partialorder %v3169_v34, 0.0  ;;  %v3241_v44 = vmul.f32 0.01, %v3169_v34  ;;  %v3170_v9 = vadd.f32 %v9485_v11, %v3130_v35  ;;  %v3716_v45 = vpack.c.bf16 %v3694_v41, %v3693_v40  ;;  %v3621_v42 = vld [vmem:[#allocation2 + $0x48] sm:$0xff]  ;;  %v3624_v26 = vld [vmem:[#allocation2 + $0x60] sm:$0xff] }
 0x36e   : > { %vm3203_vm9 = vcmp.ge.f32.partialorder %v3167_v38, 0.0  ;;  %v3239_v46 = vmul.f32 0.01, %v3167_v38  ;;  %v3168_v48 = vadd.f32 %v9485_v11, %v3128_v1  ;;  %v3717_v6 = vpack.c.bf16 %v3696_v37, %v3695_v43  ;;  %v3625_v28 = vld [vmem:[#allocation2 + $0x68] sm:$0xff]  ;;  %v3622_v24 = vld [vmem:[#allocation2 + $0x50] sm:$0xff]  ;;  %v3627_v30 = vld [vmem:[#allocation2 + $0x78] sm:$0xff] }
 0x36f   : > { %v3277_v51 = vsel %vm3205_vm8, %v3169_v34, %v3241_v44  ;;  %vm3206_vm10 = vcmp.ge.f32.partialorder %v3170_v9, 0.0  ;;  %v3242_v52 = vmul.f32 0.01, %v3170_v9  ;;  %7819 = vmatmul.mubr.msk.bf16.gmra.mrb[24].mxu1 %vm3279_vm2, %v3716_v45  ;;  %v3651_v22 = vpack.c.bf16 %v3619_v21, %v3618_v25  ;;  %v3628_v57 = vld [vmem:[#allocation2 + $0x80] sm:$0xff]  ;;  %v3629_v31 = vld [vmem:[#allocation2 + $0x88] sm:$0xff]  ;;  %v3631_v35 = vld [vmem:[#allocation2 + $0x98] sm:$0xff] }
 0x370   : > { %v3574_v8 = vmul.f32 %v3533_v50, %v3277_v51  ;;  %v3275_v53 = vsel %vm3203_vm9, %v3167_v38, %v3239_v46  ;;  %vm3204_vm11 = vcmp.ge.f32.partialorder %v3168_v48, 0.0  ;;  %v3240_v33 = vmul.f32 0.01, %v3168_v48  ;;  %7822 = vmatprep.mubr.msk.bf16.mxu1 %vm3279_vm2, %v3717_v6  ;;  %v3632_v36 = vld [vmem:[#allocation2 + $0xa0] sm:$0xff]  ;;  %v3633_v37 = vld [vmem:[#allocation2 + $0xa8] sm:$0xff]  ;;  %v3630_v38 = vld [vmem:[#allocation2 + $0x90] sm:$0xff] }
 0x371   : > { %v3572_v55 = vmul.f32 %v3523_v3, %v3275_v53  ;;  %v3278_v60 = vsel %vm3206_vm10, %v3170_v9, %v3242_v52  ;;  %v3652_v32 = vpack.c.bf16 %v3621_v42, %v3620_v23  ;;  %v3623_v3 = vld [vmem:[#allocation2 + $0x58] sm:$0xff]  ;;  %v3654_v29 = vpack.c.bf16 %v3625_v28, %v3624_v26  ;;  %v3636_v43 = vld [vmem:[#allocation2 + $0xc0] sm:$0xff]  ;;  %v3637_v44 = vld [vmem:[#allocation2 + $0xc8] sm:$0xff] }
 0x372   : > { %3610 = vst.msk [vmem:[#allocation2 + $0x123] sm:$0xff] %vm3279_vm2, %v3574_v8  ;;  %v3575_v56 = vmul.f32 %v3538_v12, %v3278_v60  ;;  %v3276_v11 = vsel %vm3204_vm11, %v3168_v48, %v3240_v33  ;;  %v3697_v39 = vld [vmem:[#allocation2 + $0xf1] sm:$0xff]  ;;  %v3653_v49 = vpack.c.bf16 %v3623_v3, %v3622_v24  ;;  %v3656_v34 = vpack.c.bf16 %v3629_v31, %v3628_v57  ;;  %v3640_v6 = vld [vmem:[#allocation2 + $0xe0] sm:$0xff]  ;;  %v3641_v50 = vld [vmem:[#allocation2 + $0xe8] sm:$0xff] }
 0x373   : > { %3608 = vst.msk [vmem:[#allocation2 + $0x113] sm:$0xff] %vm3279_vm2, %v3572_v55  ;;  %v3573_v7 = vmul.f32 %v3528_v61, %v3276_v11  ;;  %v3700_v58 = vld [vmem:[#allocation2 + $0x109] sm:$0xff]  ;;  %v3657_v1 = vpack.c.bf16 %v3631_v35, %v3630_v38  ;;  %v3658_v40 = vpack.c.bf16 %v3633_v37, %v3632_v36  ;;  %v3635_v41 = vld [vmem:[#allocation2 + $0xb8] sm:$0xff]  ;;  %v3660_v46 = vpack.c.bf16 %v3637_v44, %v3636_v43 }
 0x374   : > { %3611 = vst.msk [vmem:[#allocation2 + $0x12b] sm:$0xff] %vm3279_vm2, %v3575_v56  ;;  %v3698_v59 = vld [vmem:[#allocation2 + $0xf9] sm:$0xff]  ;;  %v3699_v62 = vld [vmem:[#allocation2 + $0x101] sm:$0xff]  ;;  %v3626_v61 = vld [vmem:[#allocation2 + $0x70] sm:$0xff]  ;;  %v3662_v8 = vpack.c.bf16 %v3641_v50, %v3640_v6 }
 0x375   : > { %3609 = vst.msk [vmem:[#allocation2 + $0x11b] sm:$0xff] %vm3279_vm2, %v3573_v7  ;;  %v3718_v47 = vpack.c.bf16 %v3698_v59, %v3697_v39  ;;  %v3719_v63 = vpack.c.bf16 %v3700_v58, %v3699_v62  ;;  %v3655_v27 = vpack.c.bf16 %v3627_v30, %v3626_v61  ;;  %v3634_v9 = vld [vmem:[#allocation2 + $0xb0] sm:$0xff]  ;;  %v3639_v48 = vld [vmem:[#allocation2 + $0xd8] sm:$0xff]  ;;  %v3644_v33 = vld [vmem:[#allocation2 + $0x100] sm:$0xff] }
 0x376   : > { %v3659_v45 = vpack.c.bf16 %v3635_v41, %v3634_v9  ;;  %v3638_v51 = vld [vmem:[#allocation2 + $0xd0] sm:$0xff]  ;;  %v3643_v53 = vld [vmem:[#allocation2 + $0xf8] sm:$0xff]  ;;  %v3645_v12 = vld [vmem:[#allocation2 + $0x108] sm:$0xff] }
 0x377   : > { %7823 = vmatmul.mubr.msk.bf16.gmra.mrb[28].mxu1 %vm3279_vm2, %v3718_v47  ;;  %v3661_v52 = vpack.c.bf16 %v3639_v48, %v3638_v51  ;;  %v3642_v55 = vld [vmem:[#allocation2 + $0xf0] sm:$0xff]  ;;  %v3664_v56 = vpack.c.bf16 %v3645_v12, %v3644_v33  ;;  %v4192_v11 = vld [vmem:[#allocation2 + $0x2] sm:$0xff]  ;;  %v4195_v47 = vld [vmem:[#allocation2 + $0x1a] sm:$0xff] }
 0x378   : > { %7826 = vmatprep.mubr.msk.bf16.mxu1 %vm3279_vm2, %v3719_v63  ;;  %v3663_v60 = vpack.c.bf16 %v3643_v53, %v3642_v55  ;;  %v4193_v7 = vld [vmem:[#allocation2 + $0xa] sm:$0xff]  ;;  %v4196_v63 = vld [vmem:[#allocation2 + $0x22] sm:$0xff]  ;;  %v4194_v10 = vld [vmem:[#allocation2 + $0x12] sm:$0xff] }
 0x379   : > { %v4228_v59 = vpack.c.bf16 %v4193_v7, %v4192_v11  ;;  %v4197_v0 = vld [vmem:[#allocation2 + $0x2a] sm:$0xff]  ;;  %v4199_v16 = vld [vmem:[#allocation2 + $0x3a] sm:$0xff]  ;;  %v4200_v54 = vld [vmem:[#allocation2 + $0x42] sm:$0xff] }
 0x37a   : > { %v3701_v15 = vld [vmem:[#allocation2 + $0x111] sm:$0xff] }
 0x37b   : > { %v3646_v39 = vld [vmem:[#allocation2 + $0x110] sm:$0xff] }
 0x37c   : > { %v3702_v13 = vld [vmem:[#allocation2 + $0x119] sm:$0xff]  ;;  %v4201_v2 = vld [vmem:[#allocation2 + $0x4a] sm:$0xff]  ;;  %v7028_v12 = vld [vmem:[%s10052_s2 + $0x14] sm:$0xf] }
 0x37d   : > { %v3720_v4 = vpack.c.bf16 %v3702_v13, %v3701_v15  ;;  %v3647_v58 = vld [vmem:[#allocation2 + $0x118] sm:$0xff]  ;;  %v9707_v15 = vpack.c.bf16 %v4195_v47, %v4194_v10  ;;  %v4629_v13 = vsel %vm3777_vm3, %v9685_v20, 0  ;;  %v4205_v21 = vld [vmem:[#allocation2 + $0x6a] sm:$0xff]  ;;  %v4552_v55 = vld [vmem:[#allocation2 + $0x122] sm:$0xff] }
 0x37e   : > { %v3665_v62 = vpack.c.bf16 %v3647_v58, %v3646_v39  ;;  %v4198_v17 = vld [vmem:[#allocation2 + $0x32] sm:$0xff]  ;;  %v4209_v3 = vld [vmem:[#allocation2 + $0x8a] sm:$0xff] }
 0x37f   : > { %7827 = vmatmul.mubr.msk.bf16.gmra.mrb[32].mxu1 %vm3279_vm2, %v3720_v4  ;;  %v9716_v4 = vld [vmem:[%s10052_s2 + $0x10] sm:$0xf] }
 0x380   : > { %7832 = vmatprep.mubr.msk.bf16.mxu1 %vm3279_vm2, %v3648_v14  ;;  %v9711_v14 = vpack.c.bf16 %v4197_v0, %v4196_v63  ;;  %v4202_v23 = vld [vmem:[#allocation2 + $0x52] sm:$0xff]  ;;  %v4213_v30 = vld [vmem:[#allocation2 + $0xaa] sm:$0xff]  ;;  %v4955_v33 = vsel %vm3777_vm3, %v9716_v4, 0  ;;  %v5281_v63 = vsel %vm3777_vm3, %v7028_v12, 0 }
 0x381   : > { %v4206_v26 = vld [vmem:[#allocation2 + $0x72] sm:$0xff]  ;;  %v4217_v35 = vld [vmem:[#allocation2 + $0xca] sm:$0xff] }
 0x382   : > { %v4210_v57 = vld [vmem:[#allocation2 + $0x92] sm:$0xff]  ;;  %v4221_v41 = vld [vmem:[#allocation2 + $0xea] sm:$0xff] }
 0x383   : > { %v4214_v36 = vld [vmem:[#allocation2 + $0xb2] sm:$0xff]  ;;  %v4225_v48 = vld [vmem:[#allocation2 + $0x10a] sm:$0xff] }
 0x384   : > { %v4218_v43 = vld [vmem:[#allocation2 + $0xd2] sm:$0xff] }
 0x385   : > { %v4222_v6 = vld [vmem:[#allocation2 + $0xf2] sm:$0xff] }
 0x386   : > { %v4844_v7 = vld [vmem:[#allocation2 + $0x13] sm:$0xff]  ;;  %v4847_v39 = vld [vmem:[#allocation2 + $0x2b] sm:$0xff] }
 0x387   : > { %7833 = vmatmul.mubr.msk.bf16.vlgmr.msra.gmra.mrb[0].mxu1 %vm3279_vm2, %v3649_v18  ;;  %v4231_v18 = vpack.c.bf16 %v4199_v16, %v4198_v17  ;;  %v4848_v0 = vld [vmem:[#allocation2 + $0x33] sm:$0xff]  ;;  %v4855_v17 = vld [vmem:[#allocation2 + $0x6b] sm:$0xff] }
 0x388   : > { %7869 = vmatpush3.bf16.msra.mxu1 %v4303_v19  ;;  %7836 = vmatprep.mubr.msk.bf16.mxu1 %vm3279_vm2, %v3650_v5  ;;  %v4232_v19 = vpack.c.bf16 %v4201_v2, %v4200_v54  ;;  %v4203_v5 = vld [vmem:[#allocation2 + $0x5a] sm:$0xff] }
 0x389   : > { %8722 = vmatprep.subr.msk.bf16.mxu1 %vm3777_vm3, %v9685_v20  ;;  %v4204_v20 = vld [vmem:[#allocation2 + $0x62] sm:$0xff]  ;;  %v4233_v42 = vpack.c.bf16 %v4203_v5, %v4202_v23  ;;  %v4852_v54 = vld [vmem:[#allocation2 + $0x53] sm:$0xff]  ;;  %v4859_v23 = vld [vmem:[#allocation2 + $0x8b] sm:$0xff] }
 0x38a   : > { %v4234_v25 = vpack.c.bf16 %v4205_v21, %v4204_v20  ;;  %v4856_v20 = vld [vmem:[#allocation2 + $0x73] sm:$0xff] }
 0x38f   : > { %7837 = vmatmul.mubr.msk.bf16.gmra.mrb[4].mxu1 %vm3279_vm2, %v3651_v22  ;;  %v4207_v22 = vld [vmem:[#allocation2 + $0x7a] sm:$0xff] }
 0x390   : > { %7840 = vmatprep.mubr.msk.bf16.mxu1 %vm3279_vm2, %v3652_v32  ;;  %v4208_v32 = vld [vmem:[#allocation2 + $0x82] sm:$0xff]  ;;  %v4235_v28 = vpack.c.bf16 %v4207_v22, %v4206_v26  ;;  %v4863_v26 = vld [vmem:[#allocation2 + $0xab] sm:$0xff] }
 0x391   : > { %v4236_v24 = vpack.c.bf16 %v4209_v3, %v4208_v32  ;;  %v4860_v32 = vld [vmem:[#allocation2 + $0x93] sm:$0xff] }
 0x397   : > { %7841 = vmatmul.mubr.msk.bf16.gmra.mrb[8].mxu1 %vm3279_vm2, %v3653_v49  ;;  %v4211_v49 = vld [vmem:[#allocation2 + $0x9a] sm:$0xff] }
 0x398   : > { %7844 = vmatprep.mubr.msk.bf16.mxu1 %vm3279_vm2, %v3654_v29  ;;  %v4212_v29 = vld [vmem:[#allocation2 + $0xa2] sm:$0xff]  ;;  %v4237_v31 = vpack.c.bf16 %v4211_v49, %v4210_v57  ;;  %v4867_v57 = vld [vmem:[#allocation2 + $0xcb] sm:$0xff] }
 0x399   : > { %v4238_v61 = vpack.c.bf16 %v4213_v30, %v4212_v29  ;;  %v4864_v29 = vld [vmem:[#allocation2 + $0xb3] sm:$0xff] }
 0x39f   : > { %7845 = vmatmul.mubr.msk.bf16.gmra.mrb[12].mxu1 %vm3279_vm2, %v3655_v27  ;;  %v4215_v27 = vld [vmem:[#allocation2 + $0xba] sm:$0xff] }
 0x3a0   : > { %7848 = vmatprep.mubr.msk.bf16.mxu1 %vm3279_vm2, %v3656_v34  ;;  %v4216_v34 = vld [vmem:[#allocation2 + $0xc2] sm:$0xff]  ;;  %v4239_v37 = vpack.c.bf16 %v4215_v27, %v4214_v36  ;;  %v4871_v36 = vld [vmem:[#allocation2 + $0xeb] sm:$0xff] }
 0x3a1   : > { %v4240_v38 = vpack.c.bf16 %v4217_v35, %v4216_v34  ;;  %v4868_v34 = vld [vmem:[#allocation2 + $0xd3] sm:$0xff] }
 0x3a7   : > { %7849 = vmatmul.mubr.msk.bf16.gmra.mrb[16].mxu1 %vm3279_vm2, %v3657_v1  ;;  %v4219_v1 = vld [vmem:[#allocation2 + $0xda] sm:$0xff] }
 0x3a8   : > { %7852 = vmatprep.mubr.msk.bf16.mxu1 %vm3279_vm2, %v3658_v40  ;;  %v4220_v40 = vld [vmem:[#allocation2 + $0xe2] sm:$0xff]  ;;  %v4241_v44 = vpack.c.bf16 %v4219_v1, %v4218_v43  ;;  %v4875_v43 = vld [vmem:[#allocation2 + $0x10b] sm:$0xff] }
 0x3a9   : > { %v4242_v9 = vpack.c.bf16 %v4221_v41, %v4220_v40  ;;  %v4872_v40 = vld [vmem:[#allocation2 + $0xf3] sm:$0xff] }
 0x3af   : > { %7853 = vmatmul.mubr.msk.bf16.gmra.mrb[20].mxu1 %vm3279_vm2, %v3659_v45  ;;  %v4223_v45 = vld [vmem:[#allocation2 + $0xfa] sm:$0xff] }
 0x3b0   : > { %7856 = vmatprep.mubr.msk.bf16.mxu1 %vm3279_vm2, %v3660_v46  ;;  %v4224_v46 = vld [vmem:[#allocation2 + $0x102] sm:$0xff]  ;;  %v4243_v50 = vpack.c.bf16 %v4223_v45, %v4222_v6  ;;  %v4879_v6 = vld [vmem:[#allocation2 + $0x12b] sm:$0xff] }
 0x3b1   : > { %v4244_v51 = vpack.c.bf16 %v4225_v48, %v4224_v46  ;;  %v4876_v46 = vld [vmem:[#allocation2 + $0x113] sm:$0xff] }
 0x3b7   : > { %7857 = vmatmul.mubr.msk.bf16.gmra.mrb[24].mxu1 %vm3279_vm2, %v3661_v52  ;;  %v4227_v52 = vld [vmem:[#allocation2 + $0x11a] sm:$0xff] }
 0x3b8   : > { %7860 = vmatprep.mubr.msk.bf16.mxu1 %vm3279_vm2, %v3662_v8  ;;  %v4226_v8 = vld [vmem:[#allocation2 + $0x112] sm:$0xff] }
 0x3b9   : > { %v4245_v53 = vpack.c.bf16 %v4227_v52, %v4226_v8  ;;  %v4878_v52 = vld [vmem:[#allocation2 + $0x123] sm:$0xff] }
 0x3ba   : > { %v4897_v8 = vpack.c.bf16 %v4879_v6, %v4878_v52  ;;  %v5823_v6 = vld [vmem:[#allocation2 + $0x2d] sm:$0xff]  ;;  %v5824_v52 = vld [vmem:[#allocation2 + $0x35] sm:$0xff] }
 0x3bf   : > { %7861 = vmatmul.mubr.msk.bf16.gmra.mrb[28].mxu1 %vm3279_vm2, %v3663_v60  ;;  %v4553_v60 = vld [vmem:[#allocation2 + $0x12a] sm:$0xff] }
 0x3c0   : > { %7864 = vmatprep.mubr.msk.bf16.mxu1 %vm3279_vm2, %v3664_v56  ;;  %v4845_v56 = vld [vmem:[#allocation2 + $0x1b] sm:$0xff]  ;;  %v4571_v11 = vpack.c.bf16 %v4553_v60, %v4552_v55  ;;  %v5172_v60 = vld [vmem:[#allocation2 + $0x24] sm:$0xff] }
 0x3c1   : > { %v4880_v58 = vpack.c.bf16 %v4845_v56, %v4844_v7  ;;  %v5175_v55 = vld [vmem:[#allocation2 + $0x3c] sm:$0xff] }
 0x3c7   : > { %7865 = vmatmul.mubr.msk.bf16.gmra.mrb[32].mxu1 %vm3279_vm2, %v3665_v62  ;;  %v4846_v62 = vld [vmem:[#allocation2 + $0x23] sm:$0xff] }
 0x3c8   : > { %7870 = vmatprep.mubr.msk.bf16.mxu1 %vm3279_vm2, %v4228_v59  ;;  %v4849_v59 = vld [vmem:[#allocation2 + $0x3b] sm:$0xff]  ;;  %v4881_v47 = vpack.c.bf16 %v4847_v39, %v4846_v62  ;;  %v5177_v39 = vld [vmem:[#allocation2 + $0x4c] sm:$0xff] }
 0x3c9   : > { %v4882_v10 = vpack.c.bf16 %v4849_v59, %v4848_v0  ;;  %v5178_v59 = vld [vmem:[#allocation2 + $0x54] sm:$0xff]  ;;  %v5179_v62 = vld [vmem:[#allocation2 + $0x5c] sm:$0xff] }
 0x3ca   : > { %v5210_v0 = vpack.c.bf16 %v5179_v62, %v5178_v59  ;;  %v5832_v62 = vld [vmem:[#allocation2 + $0x75] sm:$0xff] }
 0x3cf   : > { %7871 = vmatmul.mubr.msk.bf16.vlgmr.msra.gmra.mrb[0].mxu1 %vm3279_vm2, %v9707_v15 }
 0x3d0   : > { %7907 = vmatpush3.bf16.msra.mxu1 %v4629_v13  ;;  %7874 = vmatprep.mubr.msk.bf16.mxu1 %vm3279_vm2, %v9711_v14  ;;  %v4851_v13 = vld [vmem:[#allocation2 + $0x4b] sm:$0xff] }
 0x3d1   : > { %8723 = vmatprep.subr.msk.bf16.mxu1 %vm3777_vm3, %v9716_v4  ;;  %v4850_v4 = vld [vmem:[#allocation2 + $0x43] sm:$0xff] }
 0x3d2   : > { %v4883_v16 = vpack.c.bf16 %v4851_v13, %v4850_v4  ;;  %v5183_v13 = vld [vmem:[#allocation2 + $0x7c] sm:$0xff] }
 0x3d7   : > { %7875 = vmatmul.mubr.msk.bf16.gmra.mrb[4].mxu1 %vm3279_vm2, %v4231_v18 }
 0x3d8   : > { %7878 = vmatprep.mubr.msk.bf16.mxu1 %vm3279_vm2, %v4232_v19 }
 0x3df   : > { %7879 = vmatmul.mubr.msk.bf16.gmra.mrb[8].mxu1 %vm3279_vm2, %v4233_v42 }
 0x3e0   : > { %7882 = vmatprep.mubr.msk.bf16.mxu1 %vm3279_vm2, %v4234_v25 }
 0x3e7   : > { %7883 = vmatmul.mubr.msk.bf16.gmra.mrb[12].mxu1 %vm3279_vm2, %v4235_v28 }
 0x3e8   : > { %7886 = vmatprep.mubr.msk.bf16.mxu1 %vm3279_vm2, %v4236_v24 }
 0x3ef   : > { %7887 = vmatmul.mubr.msk.bf16.gmra.mrb[16].mxu1 %vm3279_vm2, %v4237_v31 }
 0x3f0   : > { %7890 = vmatprep.mubr.msk.bf16.mxu1 %vm3279_vm2, %v4238_v61 }
 0x3f7   : > { %7891 = vmatmul.mubr.msk.bf16.gmra.mrb[20].mxu1 %vm3279_vm2, %v4239_v37 }
 0x3f8   : > { %7894 = vmatprep.mubr.msk.bf16.mxu1 %vm3279_vm2, %v4240_v38 }
 0x3ff   : > { %7895 = vmatmul.mubr.msk.bf16.gmra.mrb[24].mxu1 %vm3279_vm2, %v4241_v44 }
 0x400   : > { %7898 = vmatprep.mubr.msk.bf16.mxu1 %vm3279_vm2, %v4242_v9 }
 0x407   : > { %7899 = vmatmul.mubr.msk.bf16.gmra.mrb[28].mxu1 %vm3279_vm2, %v4243_v50 }
 0x408   : > { %7902 = vmatprep.mubr.msk.bf16.mxu1 %vm3279_vm2, %v4244_v51 }
 0x40f   : > { %7903 = vmatmul.mubr.msk.bf16.gmra.mrb[32].mxu1 %vm3279_vm2, %v4245_v53 }
 0x410   : > { %7908 = vmatprep.mubr.msk.bf16.mxu1 %vm3279_vm2, %v9707_v15  ;;  %v9770_v15 = vld [vmem:[%s10052_s2 + $0x18] sm:$0xf] }
 0x417   : > { %7909 = vmatmul.mubr.msk.bf16.vlgmr.msra.gmra.mrb[0].mxu1 %vm3279_vm2, %v9711_v14  ;;  %v4853_v14 = vld [vmem:[#allocation2 + $0x5b] sm:$0xff] }
 0x418   : > { %7945 = vmatpush3.bf16.msra.mxu1 %v4955_v33  ;;  %7912 = vmatprep.mubr.msk.bf16.mxu1 %vm3279_vm2, %v4231_v18  ;;  %v4884_v2 = vpack.c.bf16 %v4853_v14, %v4852_v54  ;;  %v4857_v18 = vld [vmem:[#allocation2 + $0x7b] sm:$0xff]  ;;  %v5173_v33 = vld [vmem:[#allocation2 + $0x2c] sm:$0xff]  ;;  %v5180_v14 = vld [vmem:[#allocation2 + $0x64] sm:$0xff] }
 0x419   : > { %8724 = vmatprep.subr.msk.bf16.mxu1 %vm3777_vm3, %v7028_v12  ;;  %v4886_v21 = vpack.c.bf16 %v4857_v18, %v4856_v20  ;;  %v5174_v12 = vld [vmem:[#allocation2 + $0x34] sm:$0xff]  ;;  %v9792_v56 = vpack.c.bf16 %v5173_v33, %v5172_v60  ;;  %v5185_v54 = vld [vmem:[#allocation2 + $0x8c] sm:$0xff]  ;;  %v5184_v18 = vld [vmem:[#allocation2 + $0x84] sm:$0xff] }
 0x41a   : > { %v9796_v7 = vpack.c.bf16 %v5175_v55, %v5174_v12  ;;  %v5189_v20 = vld [vmem:[#allocation2 + $0xac] sm:$0xff] }
 0x41b   : > { %v5826_v55 = vld [vmem:[#allocation2 + $0x45] sm:$0xff] }
 0x41f   : > { %7913 = vmatmul.mubr.msk.bf16.gmra.mrb[4].mxu1 %vm3279_vm2, %v4232_v19  ;;  %v4854_v19 = vld [vmem:[#allocation2 + $0x63] sm:$0xff] }
 0x420   : > { %7916 = vmatprep.mubr.msk.bf16.mxu1 %vm3279_vm2, %v4233_v42  ;;  %v4885_v5 = vpack.c.bf16 %v4855_v17, %v4854_v19  ;;  %v4861_v42 = vld [vmem:[#allocation2 + $0x9b] sm:$0xff]  ;;  %v5213_v19 = vpack.c.bf16 %v5185_v54, %v5184_v18  ;;  %v5838_v54 = vld [vmem:[#allocation2 + $0xa5] sm:$0xff] }
 0x421   : > { %v4888_v3 = vpack.c.bf16 %v4861_v42, %v4860_v32  ;;  %v5187_v17 = vld [vmem:[#allocation2 + $0x9c] sm:$0xff]  ;;  %v5188_v42 = vld [vmem:[#allocation2 + $0xa4] sm:$0xff]  ;;  %v5193_v32 = vld [vmem:[#allocation2 + $0xcc] sm:$0xff] }
 0x422   : > { %v5841_v18 = vld [vmem:[#allocation2 + $0xbd] sm:$0xff] }
 0x427   : > { %7917 = vmatmul.mubr.msk.bf16.gmra.mrb[8].mxu1 %vm3279_vm2, %v4234_v25  ;;  %v4858_v25 = vld [vmem:[#allocation2 + $0x83] sm:$0xff] }
 0x428   : > { %7920 = vmatprep.mubr.msk.bf16.mxu1 %vm3279_vm2, %v4235_v28  ;;  %v4887_v22 = vpack.c.bf16 %v4859_v23, %v4858_v25  ;;  %v4865_v28 = vld [vmem:[#allocation2 + $0xbb] sm:$0xff]  ;;  %v5215_v25 = vpack.c.bf16 %v5189_v20, %v5188_v42  ;;  %v5842_v20 = vld [vmem:[#allocation2 + $0xc5] sm:$0xff] }
 0x429   : > { %v4890_v30 = vpack.c.bf16 %v4865_v28, %v4864_v29  ;;  %v5191_v23 = vld [vmem:[#allocation2 + $0xbc] sm:$0xff]  ;;  %v5192_v28 = vld [vmem:[#allocation2 + $0xc4] sm:$0xff]  ;;  %v5197_v29 = vld [vmem:[#allocation2 + $0xec] sm:$0xff] }
 0x42a   : > { %v5845_v42 = vld [vmem:[#allocation2 + $0xdd] sm:$0xff] }
 0x42f   : > { %7921 = vmatmul.mubr.msk.bf16.gmra.mrb[12].mxu1 %vm3279_vm2, %v4236_v24  ;;  %v4862_v24 = vld [vmem:[#allocation2 + $0xa3] sm:$0xff] }
 0x430   : > { %7924 = vmatprep.mubr.msk.bf16.mxu1 %vm3279_vm2, %v4237_v31  ;;  %v4889_v49 = vpack.c.bf16 %v4863_v26, %v4862_v24  ;;  %v4869_v31 = vld [vmem:[#allocation2 + $0xdb] sm:$0xff]  ;;  %v5217_v24 = vpack.c.bf16 %v5193_v32, %v5192_v28  ;;  %v5846_v32 = vld [vmem:[#allocation2 + $0xe5] sm:$0xff] }
 0x431   : > { %v4892_v35 = vpack.c.bf16 %v4869_v31, %v4868_v34  ;;  %v5195_v26 = vld [vmem:[#allocation2 + $0xdc] sm:$0xff]  ;;  %v5196_v31 = vld [vmem:[#allocation2 + $0xe4] sm:$0xff]  ;;  %v5201_v34 = vld [vmem:[#allocation2 + $0x10c] sm:$0xff] }
 0x432   : > { %v5849_v28 = vld [vmem:[#allocation2 + $0xfd] sm:$0xff] }
 0x437   : > { %7925 = vmatmul.mubr.msk.bf16.gmra.mrb[16].mxu1 %vm3279_vm2, %v4238_v61  ;;  %v4866_v61 = vld [vmem:[#allocation2 + $0xc3] sm:$0xff] }
 0x438   : > { %7928 = vmatprep.mubr.msk.bf16.mxu1 %vm3279_vm2, %v4239_v37  ;;  %v4891_v27 = vpack.c.bf16 %v4867_v57, %v4866_v61  ;;  %v4873_v37 = vld [vmem:[#allocation2 + $0xfb] sm:$0xff]  ;;  %v5219_v61 = vpack.c.bf16 %v5197_v29, %v5196_v31  ;;  %v5850_v29 = vld [vmem:[#allocation2 + $0x105] sm:$0xff] }
 0x439   : > { %v4894_v41 = vpack.c.bf16 %v4873_v37, %v4872_v40  ;;  %v5199_v57 = vld [vmem:[#allocation2 + $0xfc] sm:$0xff]  ;;  %v5200_v37 = vld [vmem:[#allocation2 + $0x104] sm:$0xff] }
 0x43a   : > { %v5204_v40 = vld [vmem:[#allocation2 + $0x124] sm:$0xff] }
 0x43b   : > { %v5853_v31 = vld [vmem:[#allocation2 + $0x11d] sm:$0xff] }
 0x43f   : > { %7929 = vmatmul.mubr.msk.bf16.gmra.mrb[20].mxu1 %vm3279_vm2, %v4240_v38  ;;  %v4870_v38 = vld [vmem:[#allocation2 + $0xe3] sm:$0xff] }
 0x440   : > { %7932 = vmatprep.mubr.msk.bf16.mxu1 %vm3279_vm2, %v4241_v44  ;;  %v4893_v1 = vpack.c.bf16 %v4871_v36, %v4870_v38  ;;  %v4877_v44 = vld [vmem:[#allocation2 + $0x11b] sm:$0xff]  ;;  %v5221_v38 = vpack.c.bf16 %v5201_v34, %v5200_v37 }
 0x441   : > { %v4896_v48 = vpack.c.bf16 %v4877_v44, %v4876_v46  ;;  %v5203_v36 = vld [vmem:[#allocation2 + $0x11c] sm:$0xff] }
 0x442   : > { %v5531_v46 = vld [vmem:[#allocation2 + $0x13c] sm:$0xff] }
 0x443   : > { %v5857_v37 = vld [vmem:[#allocation2 + $0x13d] sm:$0xff] }
 0x447   : > { %7933 = vmatmul.mubr.msk.bf16.gmra.mrb[24].mxu1 %vm3279_vm2, %v4242_v9  ;;  %v4874_v9 = vld [vmem:[#allocation2 + $0x103] sm:$0xff] }
 0x448   : > { %7936 = vmatprep.mubr.msk.bf16.mxu1 %vm3279_vm2, %v4243_v50  ;;  %v4895_v45 = vpack.c.bf16 %v4875_v43, %v4874_v9  ;;  %v5170_v50 = vld [vmem:[#allocation2 + $0x14] sm:$0xff]  ;;  %v7085_v9 = vld [vmem:[%s10052_s2 + $0x20] sm:$0xf] }
 0x449   : > { %v6259_v12 = vsel %vm3777_vm3, %v7085_v9, 0 }
 0x44f   : > { %7937 = vmatmul.mubr.msk.bf16.gmra.mrb[28].mxu1 %vm3279_vm2, %v4244_v51  ;;  %v5171_v51 = vld [vmem:[#allocation2 + $0x1c] sm:$0xff] }
 0x450   : > { %7940 = vmatprep.mubr.msk.bf16.mxu1 %vm3279_vm2, %v4245_v53  ;;  %v5206_v53 = vpack.c.bf16 %v5171_v51, %v5170_v50  ;;  %v5822_v50 = vld [vmem:[#allocation2 + $0x25] sm:$0xff] }
 0x451   : > { %v5858_v51 = vpack.c.bf16 %v5823_v6, %v5822_v50  ;;  %v6154_v6 = vld [vmem:[#allocation2 + $0x56] sm:$0xff]  ;;  %v6155_v50 = vld [vmem:[#allocation2 + $0x5e] sm:$0xff] }
 0x457   : > { %7941 = vmatmul.mubr.msk.bf16.gmra.mrb[32].mxu1 %vm3279_vm2, %v4571_v11  ;;  %v5607_v11 = vsel %vm3777_vm3, %v9770_v15, 0 }
 0x458   : > { %7946 = vmatprep.mubr.msk.bf16.mxu1 %vm3279_vm2, %v4880_v58  ;;  %v9801_v58 = vld [vmem:[%s10052_s2 + $0x1c] sm:$0xf] }
 0x459   : > { %v5933_v44 = vsel %vm3777_vm3, %v9801_v58, 0 }
 0x45f   : > { %7947 = vmatmul.mubr.msk.bf16.vlgmr.msra.gmra.mrb[0].mxu1 %vm3279_vm2, %v4881_v47  ;;  %v5176_v47 = vld [vmem:[#allocation2 + $0x44] sm:$0xff] }
 0x460   : > { %7983 = vmatpush3.bf16.msra.mxu1 %v5281_v63  ;;  %7950 = vmatprep.mubr.msk.bf16.mxu1 %vm3279_vm2, %v4882_v10  ;;  %v5209_v63 = vpack.c.bf16 %v5177_v39, %v5176_v47  ;;  %v5181_v10 = vld [vmem:[#allocation2 + $0x6c] sm:$0xff]  ;;  %v5833_v47 = vld [vmem:[#allocation2 + $0x7d] sm:$0xff] }
 0x461   : > { %8725 = vmatprep.subr.msk.bf16.mxu1 %vm3777_vm3, %v9770_v15  ;;  %v5182_v15 = vld [vmem:[#allocation2 + $0x74] sm:$0xff]  ;;  %v5211_v4 = vpack.c.bf16 %v5181_v10, %v5180_v14  ;;  %v5830_v39 = vld [vmem:[#allocation2 + $0x65] sm:$0xff]  ;;  %v5837_v14 = vld [vmem:[#allocation2 + $0x9d] sm:$0xff] }
 0x462   : > { %v5834_v10 = vld [vmem:[#allocation2 + $0x85] sm:$0xff] }
 0x467   : > { %7951 = vmatmul.mubr.msk.bf16.gmra.mrb[4].mxu1 %vm3279_vm2, %v4883_v16  ;;  %v5212_v16 = vpack.c.bf16 %v5183_v13, %v5182_v15  ;;  %v5836_v13 = vld [vmem:[#allocation2 + $0x95] sm:$0xff] }
 0x468   : > { %7954 = vmatprep.mubr.msk.bf16.mxu1 %vm3279_vm2, %v4884_v2  ;;  %v5186_v2 = vld [vmem:[#allocation2 + $0x94] sm:$0xff] }
 0x46f   : > { %7955 = vmatmul.mubr.msk.bf16.gmra.mrb[8].mxu1 %vm3279_vm2, %v4885_v5  ;;  %v5214_v5 = vpack.c.bf16 %v5187_v17, %v5186_v2  ;;  %v5840_v17 = vld [vmem:[#allocation2 + $0xb5] sm:$0xff] }
 0x470   : > { %7958 = vmatprep.mubr.msk.bf16.mxu1 %vm3279_vm2, %v4886_v21  ;;  %v5190_v21 = vld [vmem:[#allocation2 + $0xb4] sm:$0xff] }
 0x477   : > { %7959 = vmatmul.mubr.msk.bf16.gmra.mrb[12].mxu1 %vm3279_vm2, %v4887_v22  ;;  %v5216_v22 = vpack.c.bf16 %v5191_v23, %v5190_v21  ;;  %v5844_v23 = vld [vmem:[#allocation2 + $0xd5] sm:$0xff] }
 0x478   : > { %7962 = vmatprep.mubr.msk.bf16.mxu1 %vm3279_vm2, %v4888_v3  ;;  %v5194_v3 = vld [vmem:[#allocation2 + $0xd4] sm:$0xff] }
 0x47f   : > { %7963 = vmatmul.mubr.msk.bf16.gmra.mrb[16].mxu1 %vm3279_vm2, %v4889_v49  ;;  %v5218_v49 = vpack.c.bf16 %v5195_v26, %v5194_v3  ;;  %v5848_v26 = vld [vmem:[#allocation2 + $0xf5] sm:$0xff] }
 0x480   : > { %7966 = vmatprep.mubr.msk.bf16.mxu1 %vm3279_vm2, %v4890_v30  ;;  %v5198_v30 = vld [vmem:[#allocation2 + $0xf4] sm:$0xff] }
 0x487   : > { %7967 = vmatmul.mubr.msk.bf16.gmra.mrb[20].mxu1 %vm3279_vm2, %v4891_v27  ;;  %v5220_v27 = vpack.c.bf16 %v5199_v57, %v5198_v30  ;;  %v5852_v57 = vld [vmem:[#allocation2 + $0x115] sm:$0xff] }
 0x488   : > { %7970 = vmatprep.mubr.msk.bf16.mxu1 %vm3279_vm2, %v4892_v35  ;;  %v5202_v35 = vld [vmem:[#allocation2 + $0x114] sm:$0xff]  ;;  %v5873_v34 = vpack.c.bf16 %v5853_v31, %v5852_v57  ;;  %v9895_v31 = vld [vmem:[%s10053_s3 + $0x3] ss:$0 sm:$0xff] }
 0x48f   : > { %7971 = vmatmul.mubr.msk.bf16.gmra.mrb[24].mxu1 %vm3279_vm2, %v4893_v1  ;;  %v5222_v1 = vpack.c.bf16 %v5203_v36, %v5202_v35  ;;  %v5856_v36 = vld [vmem:[#allocation2 + $0x135] sm:$0xff] }
 0x490   : > { %7974 = vmatprep.mubr.msk.bf16.mxu1 %vm3279_vm2, %v4894_v41  ;;  %v5205_v41 = vld [vmem:[#allocation2 + $0x12c] sm:$0xff] }
 0x491   : > { %v5223_v43 = vpack.c.bf16 %v5205_v41, %v5204_v40  ;;  %v6148_v40 = vld [vmem:[#allocation2 + $0x26] sm:$0xff] }
 0x497   : > { %7975 = vmatmul.mubr.msk.bf16.gmra.mrb[28].mxu1 %vm3279_vm2, %v4895_v45  ;;  %v5530_v45 = vld [vmem:[#allocation2 + $0x134] sm:$0xff] }
 0x498   : > { %7978 = vmatprep.mubr.msk.bf16.mxu1 %vm3279_vm2, %v4896_v48  ;;  %v5549_v48 = vpack.c.bf16 %v5531_v46, %v5530_v45  ;;  %v6152_v46 = vld [vmem:[#allocation2 + $0x46] sm:$0xff] }
 0x49f   : > { %7979 = vmatmul.mubr.msk.bf16.gmra.mrb[32].mxu1 %vm3279_vm2, %v4897_v8  ;;  %v5825_v8 = vld [vmem:[#allocation2 + $0x3d] sm:$0xff] }
 0x4a0   : > { %7984 = vmatprep.mubr.msk.bf16.mxu1 %vm3279_vm2, %v5206_v53  ;;  %v5827_v53 = vld [vmem:[#allocation2 + $0x4d] sm:$0xff]  ;;  %v5859_v33 = vpack.c.bf16 %v5825_v8, %v5824_v52  ;;  %v6187_v52 = vpack.c.bf16 %v6155_v50, %v6154_v6 }
 0x4a1   : > { %v5860_v60 = vpack.c.bf16 %v5827_v53, %v5826_v55  ;;  %v6156_v8 = vld [vmem:[#allocation2 + $0x66] sm:$0xff]  ;;  %v6161_v55 = vld [vmem:[#allocation2 + $0x8e] sm:$0xff] }
 0x4a7   : > { %7985 = vmatmul.mubr.msk.bf16.vlgmr.msra.gmra.mrb[0].mxu1 %vm3279_vm2, %v9792_v56 }
 0x4a8   : > { %8021 = vmatpush3.bf16.msra.mxu1 %v5607_v11  ;;  %7988 = vmatprep.mubr.msk.bf16.mxu1 %vm3279_vm2, %v9796_v7  ;;  %v5829_v11 = vld [vmem:[#allocation2 + $0x5d] sm:$0xff] }
 0x4a9   : > { %8726 = vmatprep.subr.msk.bf16.mxu1 %vm3777_vm3, %v9801_v58 }
 0x4af   : > { %7989 = vmatmul.mubr.msk.bf16.gmra.mrb[4].mxu1 %vm3279_vm2, %v5209_v63 }
 0x4b0   : > { %7992 = vmatprep.mubr.msk.bf16.mxu1 %vm3279_vm2, %v5210_v0 }
 0x4b7   : > { %7993 = vmatmul.mubr.msk.bf16.gmra.mrb[8].mxu1 %vm3279_vm2, %v5211_v4 }
 0x4b8   : > { %7996 = vmatprep.mubr.msk.bf16.mxu1 %vm3279_vm2, %v5212_v16 }
 0x4bf   : > { %7997 = vmatmul.mubr.msk.bf16.gmra.mrb[12].mxu1 %vm3279_vm2, %v5213_v19 }
 0x4c0   : > { %8000 = vmatprep.mubr.msk.bf16.mxu1 %vm3279_vm2, %v5214_v5 }
 0x4c7   : > { %8001 = vmatmul.mubr.msk.bf16.gmra.mrb[16].mxu1 %vm3279_vm2, %v5215_v25 }
 0x4c8   : > { %8004 = vmatprep.mubr.msk.bf16.mxu1 %vm3279_vm2, %v5216_v22 }
 0x4cf   : > { %8005 = vmatmul.mubr.msk.bf16.gmra.mrb[20].mxu1 %vm3279_vm2, %v5217_v24 }
 0x4d0   : > { %8008 = vmatprep.mubr.msk.bf16.mxu1 %vm3279_vm2, %v5218_v49 }
 0x4d7   : > { %8009 = vmatmul.mubr.msk.bf16.gmra.mrb[24].mxu1 %vm3279_vm2, %v5219_v61 }
 0x4d8   : > { %8012 = vmatprep.mubr.msk.bf16.mxu1 %vm3279_vm2, %v5220_v27 }
 0x4df   : > { %8013 = vmatmul.mubr.msk.bf16.gmra.mrb[28].mxu1 %vm3279_vm2, %v5221_v38 }
 0x4e0   : > { %8016 = vmatprep.mubr.msk.bf16.mxu1 %vm3279_vm2, %v5222_v1 }
 0x4e7   : > { %8017 = vmatmul.mubr.msk.bf16.gmra.mrb[32].mxu1 %vm3279_vm2, %v5223_v43 }
 0x4e8   : > { %8022 = vmatprep.mubr.msk.bf16.mxu1 %vm3279_vm2, %v9792_v56  ;;  %v5828_v56 = vld [vmem:[#allocation2 + $0x55] sm:$0xff] }
 0x4e9   : > { %v5861_v58 = vpack.c.bf16 %v5829_v11, %v5828_v56  ;;  %v6160_v56 = vld [vmem:[#allocation2 + $0x86] sm:$0xff] }
 0x4ea   : > { %v6190_v11 = vpack.c.bf16 %v6161_v55, %v6160_v56 }
 0x4ef   : > { %8023 = vmatmul.mubr.msk.bf16.vlgmr.msra.gmra.mrb[0].mxu1 %vm3279_vm2, %v9796_v7  ;;  %v5831_v7 = vld [vmem:[#allocation2 + $0x6d] sm:$0xff] }
 0x4f0   : > { %8059 = vmatpush3.bf16.msra.mxu1 %v5933_v44  ;;  %8026 = vmatprep.mubr.msk.bf16.mxu1 %vm3279_vm2, %v5209_v63  ;;  %v5862_v59 = vpack.c.bf16 %v5831_v7, %v5830_v39  ;;  %v5835_v63 = vld [vmem:[#allocation2 + $0x8d] sm:$0xff]  ;;  %v6151_v44 = vld [vmem:[#allocation2 + $0x3e] sm:$0xff]  ;;  %v6162_v7 = vld [vmem:[#allocation2 + $0x96] sm:$0xff] }
 0x4f1   : > { %8727 = vmatprep.subr.msk.bf16.mxu1 %vm3777_vm3, %v7085_v9  ;;  %v5864_v15 = vpack.c.bf16 %v5835_v63, %v5834_v10  ;;  %v6153_v9 = vld [vmem:[#allocation2 + $0x4e] sm:$0xff]  ;;  %v6166_v63 = vld [vmem:[#allocation2 + $0xb6] sm:$0xff] }
 0x4f2   : > { %v6165_v39 = vld [vmem:[#allocation2 + $0xae] sm:$0xff] }
 0x4f3   : > { %v6169_v10 = vld [vmem:[#allocation2 + $0xce] sm:$0xff] }
 0x4f7   : > { %8027 = vmatmul.mubr.msk.bf16.gmra.mrb[4].mxu1 %vm3279_vm2, %v5210_v0  ;;  %v5863_v0 = vpack.c.bf16 %v5833_v47, %v5832_v62  ;;  %v6164_v62 = vld [vmem:[#allocation2 + $0xa6] sm:$0xff] }
 0x4f8   : > { %8030 = vmatprep.mubr.msk.bf16.mxu1 %vm3279_vm2, %v5211_v4  ;;  %v5839_v4 = vld [vmem:[#allocation2 + $0xad] sm:$0xff]  ;;  %v6192_v47 = vpack.c.bf16 %v6165_v39, %v6164_v62 }
 0x4f9   : > { %v5866_v2 = vpack.c.bf16 %v5839_v4, %v5838_v54  ;;  %v6170_v4 = vld [vmem:[#allocation2 + $0xd6] sm:$0xff]  ;;  %v6173_v54 = vld [vmem:[#allocation2 + $0xee] sm:$0xff] }
 0x4ff   : > { %8031 = vmatmul.mubr.msk.bf16.gmra.mrb[8].mxu1 %vm3279_vm2, %v5212_v16  ;;  %v5865_v16 = vpack.c.bf16 %v5837_v14, %v5836_v13  ;;  %v6168_v13 = vld [vmem:[#allocation2 + $0xc6] sm:$0xff] }
 0x500   : > { %8034 = vmatprep.mubr.msk.bf16.mxu1 %vm3279_vm2, %v5213_v19  ;;  %v5843_v19 = vld [vmem:[#allocation2 + $0xcd] sm:$0xff]  ;;  %v6194_v14 = vpack.c.bf16 %v6169_v10, %v6168_v13 }
 0x501   : > { %v5868_v21 = vpack.c.bf16 %v5843_v19, %v5842_v20  ;;  %v6174_v19 = vld [vmem:[#allocation2 + $0xf6] sm:$0xff]  ;;  %v6177_v20 = vld [vmem:[#allocation2 + $0x10e] sm:$0xff] }
 0x507   : > { %8035 = vmatmul.mubr.msk.bf16.gmra.mrb[12].mxu1 %vm3279_vm2, %v5214_v5  ;;  %v5867_v5 = vpack.c.bf16 %v5841_v18, %v5840_v17  ;;  %v6172_v17 = vld [vmem:[#allocation2 + $0xe6] sm:$0xff] }
 0x508   : > { %8038 = vmatprep.mubr.msk.bf16.mxu1 %vm3279_vm2, %v5215_v25  ;;  %v5847_v25 = vld [vmem:[#allocation2 + $0xed] sm:$0xff]  ;;  %v6196_v18 = vpack.c.bf16 %v6173_v54, %v6172_v17 }
 0x509   : > { %v5870_v3 = vpack.c.bf16 %v5847_v25, %v5846_v32  ;;  %v6178_v25 = vld [vmem:[#allocation2 + $0x116] sm:$0xff]  ;;  %v6180_v32 = vld [vmem:[#allocation2 + $0x126] sm:$0xff] }
 0x50f   : > { %8039 = vmatmul.mubr.msk.bf16.gmra.mrb[16].mxu1 %vm3279_vm2, %v5216_v22  ;;  %v5869_v22 = vpack.c.bf16 %v5845_v42, %v5844_v23  ;;  %v6176_v23 = vld [vmem:[#allocation2 + $0x106] sm:$0xff] }
 0x510   : > { %8042 = vmatprep.mubr.msk.bf16.mxu1 %vm3279_vm2, %v5217_v24  ;;  %v5851_v24 = vld [vmem:[#allocation2 + $0x10d] sm:$0xff]  ;;  %v6198_v42 = vpack.c.bf16 %v6177_v20, %v6176_v23 }
 0x511   : > { %v5872_v30 = vpack.c.bf16 %v5851_v24, %v5850_v29  ;;  %v6182_v24 = vld [vmem:[#allocation2 + $0x136] sm:$0xff] }
 0x517   : > { %8043 = vmatmul.mubr.msk.bf16.gmra.mrb[20].mxu1 %vm3279_vm2, %v5218_v49  ;;  %v5871_v49 = vpack.c.bf16 %v5849_v28, %v5848_v26 }
 0x518   : > { %8046 = vmatprep.mubr.msk.bf16.mxu1 %vm3279_vm2, %v5219_v61  ;;  %v5854_v61 = vld [vmem:[#allocation2 + $0x125] sm:$0xff] }
 0x51f   : > { %8047 = vmatmul.mubr.msk.bf16.gmra.mrb[24].mxu1 %vm3279_vm2, %v5220_v27  ;;  %v5855_v27 = vld [vmem:[#allocation2 + $0x12d] sm:$0xff] }
 0x520   : > { %8050 = vmatprep.mubr.msk.bf16.mxu1 %vm3279_vm2, %v5221_v38  ;;  %v5874_v35 = vpack.c.bf16 %v5855_v27, %v5854_v61  ;;  %v5875_v38 = vpack.c.bf16 %v5857_v37, %v5856_v36 }
 0x527   : > { %8051 = vmatmul.mubr.msk.bf16.gmra.mrb[28].mxu1 %vm3279_vm2, %v5222_v1  ;;  %v6149_v1 = vld [vmem:[#allocation2 + $0x2e] sm:$0xff] }
 0x528   : > { %8054 = vmatprep.mubr.msk.bf16.mxu1 %vm3279_vm2, %v5223_v43  ;;  %v6184_v41 = vpack.c.bf16 %v6149_v1, %v6148_v40  ;;  %v6150_v43 = vld [vmem:[#allocation2 + $0x36] sm:$0xff] }
 0x529   : > { %v6185_v45 = vpack.c.bf16 %v6151_v44, %v6150_v43 }
 0x52f   : > { %8055 = vmatmul.mubr.msk.bf16.gmra.mrb[32].mxu1 %vm3279_vm2, %v5549_v48  ;;  %v6186_v48 = vpack.c.bf16 %v6153_v9, %v6152_v46 }
 0x530   : > { %8060 = vmatprep.mubr.msk.bf16.mxu1 %vm3279_vm2, %v5858_v51  ;;  %v6157_v51 = vld [vmem:[#allocation2 + $0x6e] sm:$0xff] }
 0x531   : > { %v6188_v53 = vpack.c.bf16 %v6157_v51, %v6156_v8 }
 0x537   : > { %8061 = vmatmul.mubr.msk.bf16.vlgmr.msra.gmra.mrb[0].mxu1 %vm3279_vm2, %v5859_v33  ;;  %v6158_v33 = vld [vmem:[#allocation2 + $0x76] sm:$0xff] }
 0x538   : > { %8097 = vmatpush3.bf16.msra.mxu1 %v6259_v12  ;;  %8064 = vmatprep.mubr.msk.bf16.mxu1 %vm3279_vm2, %v5860_v60  ;;  %v6159_v12 = vld [vmem:[#allocation2 + $0x7e] sm:$0xff] }
 0x539   : > { %v6189_v60 = vpack.c.bf16 %v6159_v12, %v6158_v33 }
 0x53f   : > { %8065 = vmatmul.mubr.msk.bf16.gmra.mrb[4].mxu1 %vm3279_vm2, %v5861_v58  ;;  %v6163_v58 = vld [vmem:[#allocation2 + $0x9e] sm:$0xff] }
 0x540   : > { %8068 = vmatprep.mubr.msk.bf16.mxu1 %vm3279_vm2, %v5862_v59  ;;  %v6191_v59 = vpack.c.bf16 %v6163_v58, %v6162_v7 }
 0x547   : > { %8069 = vmatmul.mubr.msk.bf16.gmra.mrb[8].mxu1 %vm3279_vm2, %v5863_v0  ;;  %v6167_v0 = vld [vmem:[#allocation2 + $0xbe] sm:$0xff] }
 0x548   : > { %8072 = vmatprep.mubr.msk.bf16.mxu1 %vm3279_vm2, %v5864_v15  ;;  %v6193_v15 = vpack.c.bf16 %v6167_v0, %v6166_v63 }
 0x54f   : > { %8073 = vmatmul.mubr.msk.bf16.gmra.mrb[12].mxu1 %vm3279_vm2, %v5865_v16  ;;  %v6171_v16 = vld [vmem:[#allocation2 + $0xde] sm:$0xff] }
 0x550   : > { %8076 = vmatprep.mubr.msk.bf16.mxu1 %vm3279_vm2, %v5866_v2  ;;  %v6195_v2 = vpack.c.bf16 %v6171_v16, %v6170_v4 }
 0x557   : > { %8077 = vmatmul.mubr.msk.bf16.gmra.mrb[16].mxu1 %vm3279_vm2, %v5867_v5  ;;  %v6175_v5 = vld [vmem:[#allocation2 + $0xfe] sm:$0xff] }
 0x558   : > { %8080 = vmatprep.mubr.msk.bf16.mxu1 %vm3279_vm2, %v5868_v21  ;;  %v6197_v21 = vpack.c.bf16 %v6175_v5, %v6174_v19 }
 0x55f   : > { %8081 = vmatmul.mubr.msk.bf16.gmra.mrb[20].mxu1 %vm3279_vm2, %v5869_v22  ;;  %v6179_v22 = vld [vmem:[#allocation2 + $0x11e] sm:$0xff] }
 0x560   : > { %8084 = vmatprep.mubr.msk.bf16.mxu1 %vm3279_vm2, %v5870_v3  ;;  %v6181_v3 = vld [vmem:[#allocation2 + $0x12e] sm:$0xff]  ;;  %v6199_v26 = vpack.c.bf16 %v6179_v22, %v6178_v25 }
 0x561   : > { %v6200_v28 = vpack.c.bf16 %v6181_v3, %v6180_v32 }
 0x567   : > { %8085 = vmatmul.mubr.msk.bf16.gmra.mrb[24].mxu1 %vm3279_vm2, %v5871_v49  ;;  %v6183_v49 = vld [vmem:[#allocation2 + $0x13e] sm:$0xff] }
 0x568   : > { %8088 = vmatprep.mubr.msk.bf16.mxu1 %vm3279_vm2, %v5872_v30  ;;  %v6201_v29 = vpack.c.bf16 %v6183_v49, %v6182_v24  ;;  %v9890_v30 = vld [vmem:[%s10053_s3 + $0x2] ss:$0 sm:$0xff] }
 0x56f   : > { %8089 = vmatmul.mubr.msk.bf16.gmra.mrb[28].mxu1 %vm3279_vm2, %v5873_v34 }
 0x570   : > { %8092 = vmatprep.mubr.msk.bf16.mxu1 %vm3279_vm2, %v5874_v35 }
 0x577   : > { %8093 = vmatmul.mubr.msk.bf16.gmra.mrb[32].mxu1 %vm3279_vm2, %v5875_v38 }
 0x578   : > { %8098 = vmatprep.mubr.msk.bf16.mxu1 %vm3279_vm2, %v6184_v41 }
 0x57f   : > { %8099 = vmatmul.mubr.msk.bf16.vlgmr.msra.gmra.mrb[0].mxu1 %vm3279_vm2, %v6185_v45 }
 0x580   : > { %8102 = vmatprep.mubr.msk.bf16.mxu1 %vm3279_vm2, %v6186_v48 }
 0x587   : > { %8103 = vmatmul.mubr.msk.bf16.gmra.mrb[4].mxu1 %vm3279_vm2, %v6187_v52 }
 0x588   : > { %8106 = vmatprep.mubr.msk.bf16.mxu1 %vm3279_vm2, %v6188_v53 }
 0x58f   : > { %8107 = vmatmul.mubr.msk.bf16.gmra.mrb[8].mxu1 %vm3279_vm2, %v6189_v60 }
 0x590   : > { %8110 = vmatprep.mubr.msk.bf16.mxu1 %vm3279_vm2, %v6190_v11 }
 0x597   : > { %8111 = vmatmul.mubr.msk.bf16.gmra.mrb[12].mxu1 %vm3279_vm2, %v6191_v59 }
 0x598   : > { %8114 = vmatprep.mubr.msk.bf16.mxu1 %vm3279_vm2, %v6192_v47 }
 0x59f   : > { %8115 = vmatmul.mubr.msk.bf16.gmra.mrb[16].mxu1 %vm3279_vm2, %v6193_v15 }
 0x5a0   : > { %8118 = vmatprep.mubr.msk.bf16.mxu1 %vm3279_vm2, %v6194_v14 }
 0x5a7   : > { %8119 = vmatmul.mubr.msk.bf16.gmra.mrb[20].mxu1 %vm3279_vm2, %v6195_v2 }
 0x5a8   : > { %8122 = vmatprep.mubr.msk.bf16.mxu1 %vm3279_vm2, %v6196_v18 }
 0x5af   : > { %8123 = vmatmul.mubr.msk.bf16.gmra.mrb[24].mxu1 %vm3279_vm2, %v6197_v21 }
 0x5b0   : > { %8126 = vmatprep.mubr.msk.bf16.mxu1 %vm3279_vm2, %v6198_v42 }
 0x5b7   : > { %8127 = vmatmul.mubr.msk.bf16.gmra.mrb[28].mxu1 %vm3279_vm2, %v6199_v26 }
 0x5b8   : > { %8130 = vmatprep.mubr.msk.bf16.mxu1 %vm3279_vm2, %v6200_v28 }
 0x5bf   : > { %8131 = vmatmul.mubr.msk.bf16.gmra.mrb[32].mxu1 %vm3279_vm2, %v6201_v29 }
 0x652   : > { %v8100_v57 = vpop.f32.mrb[0].mxu1 }
 0x653   : > { %v6482_v61 = vmul.f32 %v8100_v57, %v9890_v30  ;;  %v6295_v27 = vpop.f32.mrb[1].mxu1 }
 0x654   : > { %v6480_v34 = vmul.f32 %v9890_v30, %v6295_v27  ;;  %v8101_v35 = vpop.f32.mrb[2].mxu1 }
 0x655   : > { %v6522_v36 = vadd.f32 %v9895_v31, %v6482_v61  ;;  %v6483_v37 = vmul.f32 %v8101_v35, %v9890_v30  ;;  %v6298_v38 = vpop.f32.mrb[3].mxu1 }
 0x656   : > { %v6520_v1 = vadd.f32 %v9895_v31, %v6480_v34  ;;  %v6481_v40 = vmul.f32 %v9890_v30, %v6298_v38 }
 0x657   : > { %vm6558_vm3 = vcmp.ge.f32.partialorder %v6522_v36, 0.0  ;;  %v6594_v41 = vmul.f32 0.01, %v6522_v36  ;;  %v6523_v43 = vadd.f32 %v9895_v31, %v6483_v37 }
 0x658   : > { %vm6556_vm12 = vcmp.ge.f32.partialorder %v6520_v1, 0.0  ;;  %v6592_v44 = vmul.f32 0.01, %v6520_v1  ;;  %v6521_v9 = vadd.f32 %v9895_v31, %v6481_v40 }
 0x659   : > { %v6630_v45 = vsel %vm6558_vm3, %v6522_v36, %v6594_v41  ;;  %vm6559_vm13 = vcmp.ge.f32.partialorder %v6523_v43, 0.0  ;;  %v6595_v46 = vmul.f32 0.01, %v6523_v43 }
 0x65a   : > { %6666 = vst.msk [vmem:[%s9907_s6 + $0x10] sm:$0xff] %vm3279_vm2, %v6630_v45  ;;  %v6628_v48 = vsel %vm6556_vm12, %v6520_v1, %v6592_v44  ;;  %vm6557_vm14 = vcmp.ge.f32.partialorder %v6521_v9, 0.0  ;;  %v6593_v6 = vmul.f32 0.01, %v6521_v9  ;;  %v8104_v50 = vpop.f32.mrb[4].mxu1 }
 0x65b   : > { %6664 = vst.msk [vmem:[%s9907_s6] sm:$0xff] %vm3279_vm2, %v6628_v48  ;;  %v6631_v51 = vsel %vm6559_vm13, %v6523_v43, %v6595_v46  ;;  %v6486_v52 = vmul.f32 %v8104_v50, %v9890_v30  ;;  %v6311_v8 = vpop.f32.mrb[5].mxu1 }
 0x65c   : > { %6667 = vst.msk [vmem:[%s9907_s6 + $0x18] sm:$0xff] %vm3279_vm2, %v6631_v51  ;;  %v6629_v53 = vsel %vm6557_vm14, %v6521_v9, %v6593_v6  ;;  %v6484_v33 = vmul.f32 %v9890_v30, %v6311_v8  ;;  %v8105_v12 = vpop.f32.mrb[6].mxu1 }
 0x65d   : > { %6665 = vst.msk [vmem:[%s9907_s6 + $0x8] sm:$0xff] %vm3279_vm2, %v6629_v53  ;;  %v6526_v55 = vadd.f32 %v9895_v31, %v6486_v52  ;;  %v6487_v60 = vmul.f32 %v8105_v12, %v9890_v30  ;;  %v6314_v56 = vpop.f32.mrb[7].mxu1 }
 0x65e   : > { %v6524_v11 = vadd.f32 %v9895_v31, %v6484_v33  ;;  %v6485_v7 = vmul.f32 %v9890_v30, %v6314_v56 }
 0x65f   : > { %vm6562_vm15 = vcmp.ge.f32.partialorder %v6526_v55, 0.0  ;;  %v6598_v58 = vmul.f32 0.01, %v6526_v55  ;;  %v6527_v39 = vadd.f32 %v9895_v31, %v6487_v60 }
 0x660   : > { %vm6560_vm0 = vcmp.ge.f32.partialorder %v6524_v11, 0.0  ;;  %v6596_v59 = vmul.f32 0.01, %v6524_v11  ;;  %v6525_v62 = vadd.f32 %v9895_v31, %v6485_v7 }
 0x661   : > { %v6634_v47 = vsel %vm6562_vm15, %v6526_v55, %v6598_v58  ;;  %vm6563_vm1 = vcmp.ge.f32.partialorder %v6527_v39, 0.0  ;;  %v6599_v63 = vmul.f32 0.01, %v6527_v39 }
 0x662   : > { %6670 = vst.msk [vmem:[%s9907_s6 + $0x30] sm:$0xff] %vm3279_vm2, %v6634_v47  ;;  %v6632_v0 = vsel %vm6560_vm0, %v6524_v11, %v6596_v59  ;;  %vm6561_vm4 = vcmp.ge.f32.partialorder %v6525_v62, 0.0  ;;  %v6597_v10 = vmul.f32 0.01, %v6525_v62  ;;  %v8108_v15 = vpop.f32.mrb[8].mxu1 }
 0x663   : > { %6668 = vst.msk [vmem:[%s9907_s6 + $0x20] sm:$0xff] %vm3279_vm2, %v6632_v0  ;;  %v6635_v13 = vsel %vm6563_vm1, %v6527_v39, %v6599_v63  ;;  %v6490_v14 = vmul.f32 %v8108_v15, %v9890_v30  ;;  %v6327_v4 = vpop.f32.mrb[9].mxu1 }
 0x664   : > { %6671 = vst.msk [vmem:[%s9907_s6 + $0x38] sm:$0xff] %vm3279_vm2, %v6635_v13  ;;  %v6633_v16 = vsel %vm6561_vm4, %v6525_v62, %v6597_v10  ;;  %v6488_v54 = vmul.f32 %v9890_v30, %v6327_v4  ;;  %v8109_v2 = vpop.f32.mrb[10].mxu1 }
 0x665   : > { %6669 = vst.msk [vmem:[%s9907_s6 + $0x28] sm:$0xff] %vm3279_vm2, %v6633_v16  ;;  %v6530_v17 = vadd.f32 %v9895_v31, %v6490_v14  ;;  %v6491_v18 = vmul.f32 %v8109_v2, %v9890_v30  ;;  %v6330_v19 = vpop.f32.mrb[11].mxu1 }
 0x666   : > { %v6528_v5 = vadd.f32 %v9895_v31, %v6488_v54  ;;  %v6489_v20 = vmul.f32 %v9890_v30, %v6330_v19 }
 0x667   : > { %vm6566_vm5 = vcmp.ge.f32.partialorder %v6530_v17, 0.0  ;;  %v6602_v21 = vmul.f32 0.01, %v6530_v17  ;;  %v6531_v23 = vadd.f32 %v9895_v31, %v6491_v18 }
 0x668   : > { %vm6564_vm6 = vcmp.ge.f32.partialorder %v6528_v5, 0.0  ;;  %v6600_v42 = vmul.f32 0.01, %v6528_v5  ;;  %v6529_v25 = vadd.f32 %v9895_v31, %v6489_v20 }
 0x669   : > { %v6638_v22 = vsel %vm6566_vm5, %v6530_v17, %v6602_v21  ;;  %vm6567_vm7 = vcmp.ge.f32.partialorder %v6531_v23, 0.0  ;;  %v6603_v32 = vmul.f32 0.01, %v6531_v23 }
 0x66a   : > { %6674 = vst.msk [vmem:[%s9907_s6 + $0x50] sm:$0xff] %vm3279_vm2, %v6638_v22  ;;  %v6636_v3 = vsel %vm6564_vm6, %v6528_v5, %v6600_v42  ;;  %vm6565_vm8 = vcmp.ge.f32.partialorder %v6529_v25, 0.0  ;;  %v6601_v26 = vmul.f32 0.01, %v6529_v25  ;;  %v8112_v28 = vpop.f32.mrb[12].mxu1 }
 0x66b   : > { %6672 = vst.msk [vmem:[%s9907_s6 + $0x40] sm:$0xff] %vm3279_vm2, %v6636_v3  ;;  %v6639_v24 = vsel %vm6567_vm7, %v6531_v23, %v6603_v32  ;;  %v6494_v49 = vmul.f32 %v8112_v28, %v9890_v30  ;;  %v6343_v29 = vpop.f32.mrb[13].mxu1 }
 0x66c   : > { %6675 = vst.msk [vmem:[%s9907_s6 + $0x58] sm:$0xff] %vm3279_vm2, %v6639_v24  ;;  %v6637_v57 = vsel %vm6565_vm8, %v6529_v25, %v6601_v26  ;;  %v6492_v61 = vmul.f32 %v9890_v30, %v6343_v29  ;;  %v8113_v27 = vpop.f32.mrb[14].mxu1 }
 0x66d   : > { %6673 = vst.msk [vmem:[%s9907_s6 + $0x48] sm:$0xff] %vm3279_vm2, %v6637_v57  ;;  %v6534_v34 = vadd.f32 %v9895_v31, %v6494_v49  ;;  %v6495_v35 = vmul.f32 %v8113_v27, %v9890_v30  ;;  %v6346_v36 = vpop.f32.mrb[15].mxu1 }
 0x66e   : > { %v6532_v37 = vadd.f32 %v9895_v31, %v6492_v61  ;;  %v6493_v38 = vmul.f32 %v9890_v30, %v6346_v36 }
 0x66f   : > { %vm6570_vm9 = vcmp.ge.f32.partialorder %v6534_v34, 0.0  ;;  %v6606_v1 = vmul.f32 0.01, %v6534_v34  ;;  %v6535_v40 = vadd.f32 %v9895_v31, %v6495_v35 }
 0x670   : > { %vm6568_vm10 = vcmp.ge.f32.partialorder %v6532_v37, 0.0  ;;  %v6604_v41 = vmul.f32 0.01, %v6532_v37  ;;  %v6533_v43 = vadd.f32 %v9895_v31, %v6493_v38 }
 0x671   : > { %v6642_v44 = vsel %vm6570_vm9, %v6534_v34, %v6606_v1  ;;  %vm6571_vm11 = vcmp.ge.f32.partialorder %v6535_v40, 0.0  ;;  %v6607_v9 = vmul.f32 0.01, %v6535_v40 }
 0x672   : > { %6678 = vst.msk [vmem:[%s9907_s6 + $0x70] sm:$0xff] %vm3279_vm2, %v6642_v44  ;;  %v6640_v45 = vsel %vm6568_vm10, %v6532_v37, %v6604_v41  ;;  %vm6569_vm3 = vcmp.ge.f32.partialorder %v6533_v43, 0.0  ;;  %v6605_v46 = vmul.f32 0.01, %v6533_v43  ;;  %v8116_v48 = vpop.f32.mrb[16].mxu1 }
 0x673   : > { %6676 = vst.msk [vmem:[%s9907_s6 + $0x60] sm:$0xff] %vm3279_vm2, %v6640_v45  ;;  %v6643_v6 = vsel %vm6571_vm11, %v6535_v40, %v6607_v9  ;;  %v6498_v50 = vmul.f32 %v8116_v48, %v9890_v30  ;;  %v6359_v51 = vpop.f32.mrb[17].mxu1 }
 0x674   : > { %6679 = vst.msk [vmem:[%s9907_s6 + $0x78] sm:$0xff] %vm3279_vm2, %v6643_v6  ;;  %v6641_v52 = vsel %vm6569_vm3, %v6533_v43, %v6605_v46  ;;  %v6496_v8 = vmul.f32 %v9890_v30, %v6359_v51  ;;  %v8117_v53 = vpop.f32.mrb[18].mxu1 }
 0x675   : > { %6677 = vst.msk [vmem:[%s9907_s6 + $0x68] sm:$0xff] %vm3279_vm2, %v6641_v52  ;;  %v6538_v33 = vadd.f32 %v9895_v31, %v6498_v50  ;;  %v6499_v12 = vmul.f32 %v8117_v53, %v9890_v30  ;;  %v6362_v55 = vpop.f32.mrb[19].mxu1 }
 0x676   : > { %v6536_v60 = vadd.f32 %v9895_v31, %v6496_v8  ;;  %v6497_v56 = vmul.f32 %v9890_v30, %v6362_v55 }
 0x677   : > { %vm6574_vm12 = vcmp.ge.f32.partialorder %v6538_v33, 0.0  ;;  %v6610_v11 = vmul.f32 0.01, %v6538_v33  ;;  %v6539_v7 = vadd.f32 %v9895_v31, %v6499_v12 }
 0x678   : > { %vm6572_vm13 = vcmp.ge.f32.partialorder %v6536_v60, 0.0  ;;  %v6608_v58 = vmul.f32 0.01, %v6536_v60  ;;  %v6537_v39 = vadd.f32 %v9895_v31, %v6497_v56 }
 0x679   : > { %v6646_v59 = vsel %vm6574_vm12, %v6538_v33, %v6610_v11  ;;  %vm6575_vm14 = vcmp.ge.f32.partialorder %v6539_v7, 0.0  ;;  %v6611_v62 = vmul.f32 0.01, %v6539_v7 }
 0x67a   : > { %6682 = vst.msk [vmem:[%s9907_s6 + $0x90] sm:$0xff] %vm3279_vm2, %v6646_v59  ;;  %v6644_v47 = vsel %vm6572_vm13, %v6536_v60, %v6608_v58  ;;  %vm6573_vm15 = vcmp.ge.f32.partialorder %v6537_v39, 0.0  ;;  %v6609_v63 = vmul.f32 0.01, %v6537_v39  ;;  %v8120_v0 = vpop.f32.mrb[20].mxu1 }
 0x67b   : > { %6680 = vst.msk [vmem:[%s9907_s6 + $0x80] sm:$0xff] %vm3279_vm2, %v6644_v47  ;;  %v6647_v10 = vsel %vm6575_vm14, %v6539_v7, %v6611_v62  ;;  %v6502_v15 = vmul.f32 %v8120_v0, %v9890_v30  ;;  %v6375_v13 = vpop.f32.mrb[21].mxu1 }
 0x67c   : > { %6683 = vst.msk [vmem:[%s9907_s6 + $0x98] sm:$0xff] %vm3279_vm2, %v6647_v10  ;;  %v6645_v14 = vsel %vm6573_vm15, %v6537_v39, %v6609_v63  ;;  %v6500_v4 = vmul.f32 %v9890_v30, %v6375_v13  ;;  %v8121_v16 = vpop.f32.mrb[22].mxu1 }
 0x67d   : > { %6681 = vst.msk [vmem:[%s9907_s6 + $0x88] sm:$0xff] %vm3279_vm2, %v6645_v14  ;;  %v6542_v54 = vadd.f32 %v9895_v31, %v6502_v15  ;;  %v6503_v2 = vmul.f32 %v8121_v16, %v9890_v30  ;;  %v6378_v17 = vpop.f32.mrb[23].mxu1 }
 0x67e   : > { %v6540_v18 = vadd.f32 %v9895_v31, %v6500_v4  ;;  %v6501_v19 = vmul.f32 %v9890_v30, %v6378_v17 }
 0x67f   : > { %vm6578_vm0 = vcmp.ge.f32.partialorder %v6542_v54, 0.0  ;;  %v6614_v5 = vmul.f32 0.01, %v6542_v54  ;;  %v6543_v20 = vadd.f32 %v9895_v31, %v6503_v2 }
 0x680   : > { %vm6576_vm1 = vcmp.ge.f32.partialorder %v6540_v18, 0.0  ;;  %v6612_v21 = vmul.f32 0.01, %v6540_v18  ;;  %v6541_v23 = vadd.f32 %v9895_v31, %v6501_v19 }
 0x681   : > { %v6650_v42 = vsel %vm6578_vm0, %v6542_v54, %v6614_v5  ;;  %vm6579_vm4 = vcmp.ge.f32.partialorder %v6543_v20, 0.0  ;;  %v6615_v25 = vmul.f32 0.01, %v6543_v20 }
 0x682   : > { %6686 = vst.msk [vmem:[%s9907_s6 + $0xb0] sm:$0xff] %vm3279_vm2, %v6650_v42  ;;  %v6648_v22 = vsel %vm6576_vm1, %v6540_v18, %v6612_v21  ;;  %vm6577_vm5 = vcmp.ge.f32.partialorder %v6541_v23, 0.0  ;;  %v6613_v32 = vmul.f32 0.01, %v6541_v23  ;;  %v8124_v3 = vpop.f32.mrb[24].mxu1 }
 0x683   : > { %6684 = vst.msk [vmem:[%s9907_s6 + $0xa0] sm:$0xff] %vm3279_vm2, %v6648_v22  ;;  %v6651_v26 = vsel %vm6579_vm4, %v6543_v20, %v6615_v25  ;;  %v6506_v28 = vmul.f32 %v8124_v3, %v9890_v30  ;;  %v6391_v24 = vpop.f32.mrb[25].mxu1 }
 0x684   : > { %6687 = vst.msk [vmem:[%s9907_s6 + $0xb8] sm:$0xff] %vm3279_vm2, %v6651_v26  ;;  %v6649_v49 = vsel %vm6577_vm5, %v6541_v23, %v6613_v32  ;;  %v6504_v29 = vmul.f32 %v9890_v30, %v6391_v24  ;;  %v8125_v57 = vpop.f32.mrb[26].mxu1 }
 0x685   : > { %6685 = vst.msk [vmem:[%s9907_s6 + $0xa8] sm:$0xff] %vm3279_vm2, %v6649_v49  ;;  %v6546_v61 = vadd.f32 %v9895_v31, %v6506_v28  ;;  %v6507_v27 = vmul.f32 %v8125_v57, %v9890_v30  ;;  %v6394_v34 = vpop.f32.mrb[27].mxu1 }
 0x686   : > { %v6544_v35 = vadd.f32 %v9895_v31, %v6504_v29  ;;  %v6505_v36 = vmul.f32 %v9890_v30, %v6394_v34 }
 0x687   : > { %vm6582_vm6 = vcmp.ge.f32.partialorder %v6546_v61, 0.0  ;;  %v6618_v37 = vmul.f32 0.01, %v6546_v61  ;;  %v6547_v38 = vadd.f32 %v9895_v31, %v6507_v27 }
 0x688   : > { %vm6580_vm7 = vcmp.ge.f32.partialorder %v6544_v35, 0.0  ;;  %v6616_v1 = vmul.f32 0.01, %v6544_v35  ;;  %v6545_v40 = vadd.f32 %v9895_v31, %v6505_v36 }
 0x689   : > { %v6654_v41 = vsel %vm6582_vm6, %v6546_v61, %v6618_v37  ;;  %vm6583_vm8 = vcmp.ge.f32.partialorder %v6547_v38, 0.0  ;;  %v6619_v43 = vmul.f32 0.01, %v6547_v38 }
 0x68a   : > { %6690 = vst.msk [vmem:[%s9907_s6 + $0xd0] sm:$0xff] %vm3279_vm2, %v6654_v41  ;;  %v6652_v44 = vsel %vm6580_vm7, %v6544_v35, %v6616_v1  ;;  %vm6581_vm9 = vcmp.ge.f32.partialorder %v6545_v40, 0.0  ;;  %v6617_v9 = vmul.f32 0.01, %v6545_v40  ;;  %v8128_v45 = vpop.f32.mrb[28].mxu1 }
 0x68b   : > { %6688 = vst.msk [vmem:[%s9907_s6 + $0xc0] sm:$0xff] %vm3279_vm2, %v6652_v44  ;;  %v6655_v46 = vsel %vm6583_vm8, %v6547_v38, %v6619_v43  ;;  %v6510_v48 = vmul.f32 %v8128_v45, %v9890_v30  ;;  %v6407_v6 = vpop.f32.mrb[29].mxu1 }
 0x68c   : > { %6691 = vst.msk [vmem:[%s9907_s6 + $0xd8] sm:$0xff] %vm3279_vm2, %v6655_v46  ;;  %v6653_v50 = vsel %vm6581_vm9, %v6545_v40, %v6617_v9  ;;  %v6508_v51 = vmul.f32 %v9890_v30, %v6407_v6  ;;  %v8129_v52 = vpop.f32.mrb[30].mxu1 }
 0x68d   : > { %6689 = vst.msk [vmem:[%s9907_s6 + $0xc8] sm:$0xff] %vm3279_vm2, %v6653_v50  ;;  %v6550_v8 = vadd.f32 %v9895_v31, %v6510_v48  ;;  %v6511_v53 = vmul.f32 %v8129_v52, %v9890_v30  ;;  %v6410_v33 = vpop.f32.mrb[31].mxu1 }
 0x68e   : > { %v6548_v12 = vadd.f32 %v9895_v31, %v6508_v51  ;;  %v6509_v55 = vmul.f32 %v9890_v30, %v6410_v33 }
 0x68f   : > { %vm6586_vm10 = vcmp.ge.f32.partialorder %v6550_v8, 0.0  ;;  %v6622_v60 = vmul.f32 0.01, %v6550_v8  ;;  %v6551_v56 = vadd.f32 %v9895_v31, %v6511_v53 }
 0x690   : > { %vm6584_vm11 = vcmp.ge.f32.partialorder %v6548_v12, 0.0  ;;  %v6620_v11 = vmul.f32 0.01, %v6548_v12  ;;  %v6549_v7 = vadd.f32 %v9895_v31, %v6509_v55 }
 0x691   : > { %v6658_v58 = vsel %vm6586_vm10, %v6550_v8, %v6622_v60  ;;  %vm6587_vm3 = vcmp.ge.f32.partialorder %v6551_v56, 0.0  ;;  %v6623_v39 = vmul.f32 0.01, %v6551_v56 }
 0x692   : > { %6694 = vst.msk [vmem:[%s9907_s6 + $0xf0] sm:$0xff] %vm3279_vm2, %v6658_v58  ;;  %v6656_v59 = vsel %vm6584_vm11, %v6548_v12, %v6620_v11  ;;  %vm6585_vm12 = vcmp.ge.f32.partialorder %v6549_v7, 0.0  ;;  %v6621_v62 = vmul.f32 0.01, %v6549_v7  ;;  %v8132_v47 = vpop.f32.mrb[32].mxu1 }
 0x693   : > { %6692 = vst.msk [vmem:[%s9907_s6 + $0xe0] sm:$0xff] %vm3279_vm2, %v6656_v59  ;;  %v6659_v63 = vsel %vm6587_vm3, %v6551_v56, %v6623_v39  ;;  %v6514_v0 = vmul.f32 %v8132_v47, %v9890_v30  ;;  %v6423_v10 = vpop.f32.mrb[33].mxu1 }
 0x694   : > { %6695 = vst.msk [vmem:[%s9907_s6 + $0xf8] sm:$0xff] %vm3279_vm2, %v6659_v63  ;;  %v6657_v15 = vsel %vm6585_vm12, %v6549_v7, %v6621_v62  ;;  %v6512_v13 = vmul.f32 %v9890_v30, %v6423_v10  ;;  %v8133_v14 = vpop.f32.mrb[34].mxu1 }
 0x695   : > { %6693 = vst.msk [vmem:[%s9907_s6 + $0xe8] sm:$0xff] %vm3279_vm2, %v6657_v15  ;;  %v6554_v4 = vadd.f32 %v9895_v31, %v6514_v0  ;;  %v6515_v16 = vmul.f32 %v8133_v14, %v9890_v30  ;;  %v6426_v54 = vpop.f32.mrb[35].mxu1 }
 0x696   : > { %v6552_v2 = vadd.f32 %v9895_v31, %v6512_v13  ;;  %v6513_v17 = vmul.f32 %v9890_v30, %v6426_v54 }
 0x697   : > { %vm6590_vm13 = vcmp.ge.f32.partialorder %v6554_v4, 0.0  ;;  %v6626_v18 = vmul.f32 0.01, %v6554_v4  ;;  %v6555_v19 = vadd.f32 %v9895_v31, %v6515_v16 }
 0x698   : > { %vm6588_vm14 = vcmp.ge.f32.partialorder %v6552_v2, 0.0  ;;  %v6624_v5 = vmul.f32 0.01, %v6552_v2  ;;  %v6553_v20 = vadd.f32 %v9895_v31, %v6513_v17 }
 0x699   : > { %v6662_v21 = vsel %vm6590_vm13, %v6554_v4, %v6626_v18  ;;  %vm6591_vm15 = vcmp.ge.f32.partialorder %v6555_v19, 0.0  ;;  %v6627_v23 = vmul.f32 0.01, %v6555_v19 }
 0x69a   : > { %6698 = vst.msk [vmem:[%s9907_s6 + $0x110] sm:$0xff] %vm3279_vm2, %v6662_v21  ;;  %v6660_v42 = vsel %vm6588_vm14, %v6552_v2, %v6624_v5  ;;  %vm6589_vm0 = vcmp.ge.f32.partialorder %v6553_v20, 0.0  ;;  %v6625_v25 = vmul.f32 0.01, %v6553_v20 }
 0x69b   : > { %6696 = vst.msk [vmem:[%s9907_s6 + $0x100] sm:$0xff] %vm3279_vm2, %v6660_v42  ;;  %v6663_v30 = vsel %vm6591_vm15, %v6555_v19, %v6627_v23 }
 0x69c   : > { %6699 = vst.msk [vmem:[%s9907_s6 + $0x118] sm:$0xff] %vm3279_vm2, %v6663_v30  ;;  %v6661_v22 = vsel %vm6589_vm0, %v6553_v20, %v6625_v25 }
 0x69d   : > { %6697 = vst.msk [vmem:[%s9907_s6 + $0x108] sm:$0xff] %vm3279_vm2, %v6661_v22 }
 0x69e PF: > { %s15_s18 = sadd.s32 1, %s8748_s18  }
 0x69f   : > { %p12_p4 = scmp.ge.s32.totalorder %s15_s18, 4  }
 0x6a1   :  { %14 = sbr.rel (!%p12_p4) target bundleno = 1 (0x1), region = 86 }

// kernel: encoder_forward.15
= control target key start
LH: loop header
LB: loop body
LE: loop exit
PB: predicated region body
PF: predicated region fallthrough
CT: control target
= control target key end

     0   :  { %s2196_s18 = smov 0   ;;  %s2520_s0 = inlined_call_operand.vmem [shape: f32[2,20,32], index: 0, kind: input, shape index: {}]   ;;  %s2521_s1 = inlined_call_operand.vmem [shape: bf16[9,32,64], index: 1, kind: input, shape index: {}]   ;;  %s2522_s2 = inlined_call_operand.vmem [shape: bf16[9,64,64], index: 2, kind: input, shape index: {}]   ;;  %s2523_s3 = inlined_call_operand.vmem [shape: f32[4,64], index: 3, kind: input, shape index: {}]   ;;  %s2524_s4 = inlined_call_operand.vmem [shape: f32[8,1], index: 4, kind: input, shape index: {}]   ;;  %s2525_s5 = inlined_call_operand.vmem [shape: f32[2,8,64], index: 5, kind: output, shape index: {}]  }
   0x1 LB: > { %s1594_s19 = sadd.s32 4294967295, %s2161_s18   ;;  %p1598_p0 = scmp.ge.s32.totalorder %s2161_s18, 1  ;;  %s2161_s18 = sphi %s2196_s18, %s15_s18  }
   0x2   : > { %p187_p1 = scmp.lt.s32.totalorder %s2161_s18, 3 }
   0x4   : > { %p188_p2 = pnand %p1598_p0, %p187_p1 }
   0x5   : > { %v2101_v0 = vld [vmem:[%s2521_s1 + $0x10] sm:$0xff] (!%p188_p2)   ;;  %v2163_v1 = vmov (!%p188_p2), 0.0   ;;  %v2102_v2 = vld [vmem:[%s2521_s1 + $0x18] sm:$0xff] (!%p188_p2)   ;;  %vm2164_vm0 = vmmov (!%p188_p2), 0   ;;  %p214_p3 = scmp.lt.s32.totalorder (!%p188_p2), %s1594_s19, 1  ;;  %v2165_v3 = vmov (!%p188_p2), 0  }
   0x6   : > { %191 = sbr.rel (%p188_p2) target bundleno = 666 (0x29a), region = 40  ;;  %1847 = vmatprep.subr.bf16.mxu0 (!%p188_p2), %v2163_v1  ;;  %1943 = vmatprep.subr.bf16.mxu1 (!%p188_p2), %v2163_v1  ;;  %vm249_vm1 = vcmask (!%p188_p2), 261120   ;;  %v2103_v5 = vld [vmem:[%s2521_s1] sm:$0xff] (!%p188_p2)   ;;  %v2104_v7 = vld [vmem:[%s2521_s1 + $0x8] sm:$0xff] (!%p188_p2)   ;;  %v2107_v14 = vld [vmem:[%s2521_s1 + $0x30] sm:$0xff] (!%p188_p2)   ;;  %vm804_vm2 = vcmask (!%p188_p2), 523264  }
   0x7   : > { %1848 = vmatpush3.bf16.msra.mxu0 (!%p188_p2), %v2101_v0  ;;  %1851 = vmatprep.mubr.msk.bf16.mxu0 (!%p188_p2), %vm2164_vm0, %v2163_v1  ;;  %v2105_v10 = vld [vmem:[%s2521_s1 + $0x20] sm:$0xff] (!%p188_p2)   ;;  %v2106_v12 = vld [vmem:[%s2521_s1 + $0x28] sm:$0xff] (!%p188_p2)   ;;  %v2108_v16 = vld [vmem:[%s2521_s1 + $0x38] sm:$0xff] (!%p188_p2)   ;;  %805 = vst.msk [vmem:[#allocation2] sm:$0xff] (!%p188_p2), %vm804_vm2, %v2163_v1  ;;  %vm807_vm3 = vcmask (!%p188_p2), 519168  }
   0x8   : > { %1849 = vmatprep.subr.bf16.mxu0 (!%p188_p2), %v2163_v1  ;;  %1951 = vmatprep.mubr.msk.bf16.mxu1 (!%p188_p2), %vm2164_vm0, %v2163_v1  ;;  %v809_v11 = vld [vmem:[%s2524_s4] sm:$0xff] (!%p188_p2)  ;;  %v2110_v20 = vld [vmem:[%s2521_s1 + $0x48] sm:$0xff] (!%p188_p2)   ;;  %v2111_v23 = vld [vmem:[%s2521_s1 + $0x50] sm:$0xff] (!%p188_p2)   ;;  %806 = vst.msk [vmem:[#allocation2 + $0x8] sm:$0xff] (!%p188_p2), %vm804_vm2, %v2163_v1 }
   0x9   : > { %2100 = vset.pattern.permute.xlu0 (!%p188_p2), %v2165_v3  ;;  %v2109_v19 = vld [vmem:[%s2521_s1 + $0x40] sm:$0xff] (!%p188_p2)   ;;  %v2112_v24 = vld [vmem:[%s2521_s1 + $0x58] sm:$0xff] (!%p188_p2)   ;;  %v2114_v28 = vld [vmem:[%s2521_s1 + $0x68] sm:$0xff] (!%p188_p2)   ;;  %808 = vst.msk [vmem:[#allocation2 + $0x10] sm:$0xf] (!%p188_p2), %vm807_vm3, %v2163_v1 }
   0xa   : > { %812 = vperm.xlu0 (!%p188_p2), %2100, %v809_v11   ;;  %v2113_v27 = vld [vmem:[%s2521_s1 + $0x60] sm:$0xff] (!%p188_p2)   ;;  %v2115_v31 = vld [vmem:[%s2521_s1 + $0x70] sm:$0xff] (!%p188_p2)   ;;  %v2116_v32 = vld [vmem:[%s2521_s1 + $0x78] sm:$0xff] (!%p188_p2)  }
   0xb   : > { %1850 = vmatpush3.bf16.msra.mxu0 (!%p188_p2), %v2102_v2  ;;  %v2117_v35 = vld [vmem:[%s2521_s1 + $0x80] sm:$0xff] (!%p188_p2)   ;;  %v2118_v36 = vld [vmem:[%s2521_s1 + $0x88] sm:$0xff] (!%p188_p2)   ;;  %v2123_v43 = vld [vmem:[%s2522_s2 + $0x30] sm:$0xff] (!%p188_p2)  }
   0xc   : > { %1855 = vmatprep.subr.bf16.mxu0 (!%p188_p2), %v2163_v1  ;;  %v2119_v39 = vld [vmem:[%s2522_s2 + $0x20] sm:$0xff] (!%p188_p2)   ;;  %v2121_v41 = vld [vmem:[%s2522_s2 + $0x28] sm:$0xff] (!%p188_p2)   ;;  %v2124_v44 = vld [vmem:[%s2522_s2 + $0x50] sm:$0xff] (!%p188_p2)  }
   0xd   : > { %s2527_s19 = smov (!%p214_p3, %s1594_s19), 1  ;;  %v2120_v40 = vld [vmem:[%s2522_s2 + $0x40] sm:$0xff]   ;;  %v2122_v42 = vld [vmem:[%s2522_s2 + $0x48] sm:$0xff]   ;;  %v2125_v45 = vld [vmem:[%s2522_s2 + $0x38] sm:$0xff]  }
   0xe   : > { %s2088_s24 = smul.u32 24, %s2527_s19  ;;  %1944 = vmatpush3.bf16.msra.mxu1 %v2120_v40  ;;  %v2126_v46 = vld [vmem:[%s2522_s2 + $0x58] sm:$0xff]   ;;  %v1660_v47 = vld [vmem:[%s2523_s3] ss:$0 sm:$0xff]  ;;  %v1661_v49 = vld [vmem:[%s2523_s3 + $0x1] ss:$0 sm:$0xff] }
   0xf   : > { %1945 = vmatprep.subr.bf16.mxu1 %v2163_v1  ;;  %v2127_v59 = vld [vmem:[%s2522_s2] sm:$0xff]   ;;  %v2129_v2 = vld [vmem:[%s2522_s2 + $0x8] sm:$0xff]   ;;  %s1600_s28 = sshll.u32 %s2527_s19, 3 }
  0x10   : > { %s2224_s27 = scalar_lea.vmem %s2520_s0, %s2088_s24  ;;  %v2128_v62 = vld [vmem:[%s2522_s2 + $0x60] sm:$0xff]   ;;  %v2130_v3 = vld [vmem:[%s2522_s2 + $0x68] sm:$0xff]   ;;  %s222_s6 = scalar_lea.vmem %s2525_s5, %s1600_s28 }
  0x11   : > { %v230_v4 = vld [vmem:[%s2224_s27 + $0x1] sm:$0xff]  ;;  %v663_v33 = vld [vmem:[%s2224_s27 + $0x9] sm:$0xff] }
  0x12   : > { %v231_v6 = vpack.c.bf16 %v230_v4, %v230_v4  ;;  %v224_v8 = vld [vmem:[%s2224_s27] sm:$0xff]  ;;  %v600_v29 = vld [vmem:[%s2224_s27 + $0x8] sm:$0xff]  ;;  %v664_v34 = vpack.c.bf16 %v663_v33, %v663_v33  ;;  %1946 = vmatpush3.bf16.msra.mxu1 %v2122_v42  ;;  %v2131_v4 = vld [vmem:[%s2522_s2 + $0x10] sm:$0xff]  }
  0x13   : > { %v225_v9 = vpack.c.bf16 %v224_v8, %v224_v8  ;;  %v348_v13 = vld [vmem:[%s2224_s27 + $0x2] sm:$0xff]  ;;  %v601_v30 = vpack.c.bf16 %v600_v29, %v600_v29  ;;  %v726_v37 = vld [vmem:[%s2224_s27 + $0xa] sm:$0xff]  ;;  %1947 = vmatprep.subr.bf16.mxu1 %v2163_v1  ;;  %v2150_v33 = vld [vmem:[%s2522_s2 + $0xf8] sm:$0xff]  }
  0x14   : > { %1852 = vmatmul.mubr.msk.bf16.vlgmr.msra.gmra.mrb[0].mxu0 %vm249_vm1, %v231_v6  ;;  %v349_v15 = vpack.c.bf16 %v348_v13, %v348_v13  ;;  %v411_v17 = vld [vmem:[%s2224_s27 + $0x4] sm:$0xff]  ;;  %v727_v38 = vpack.c.bf16 %v726_v37, %v726_v37  ;;  %v2133_v6 = vld [vmem:[%s2522_s2 + $0x18] sm:$0xff]  }
  0x15   : > { %1856 = vmatpush3.bf16.msra.mxu0 %v2103_v5  ;;  %1859 = vmatprep.mubr.msk.bf16.mxu0 %vm2164_vm0, %v2163_v1  ;;  %v412_v18 = vpack.c.bf16 %v411_v17, %v411_v17  ;;  %v474_v21 = vld [vmem:[%s2224_s27 + $0x5] sm:$0xff]  ;;  %v2132_v5 = vld [vmem:[%s2522_s2 + $0x70] sm:$0xff]  }
  0x16   : > { %1857 = vmatprep.subr.bf16.mxu0 %v2163_v1  ;;  %v475_v22 = vpack.c.bf16 %v474_v21, %v474_v21  ;;  %v537_v25 = vld [vmem:[%s2224_s27 + $0x6] sm:$0xff]  ;;  %1948 = vmatpush3.bf16.msra.mxu1 %v2124_v44  ;;  %v2142_v21 = vld [vmem:[%s2522_s2 + $0xb8] sm:$0xff]  }
  0x17   : > { %v538_v26 = vpack.c.bf16 %v537_v25, %v537_v25  ;;  %1949 = vmatprep.subr.bf16.mxu1 %v2163_v1  ;;  %v2136_v13 = vld [vmem:[%s2522_s2 + $0x88] sm:$0xff]   ;;  %v2139_v17 = vld [vmem:[%s2522_s2 + $0xa0] sm:$0xff]  }
  0x18   : > { %v2144_v25 = vld [vmem:[%s2522_s2 + $0xc8] sm:$0xff]   ;;  %v2147_v29 = vld [vmem:[%s2522_s2 + $0xe0] sm:$0xff]  }
  0x19   : > { %1858 = vmatpush3.bf16.msra.mxu0 %v2104_v7  ;;  %v2134_v7 = vld [vmem:[%s2522_s2 + $0x78] sm:$0xff]   ;;  %v2152_v37 = vld [vmem:[%s2522_s2 + $0x108] sm:$0xff]  }
  0x1a   : > { %1863 = vmatprep.subr.bf16.mxu0 %v2163_v1  ;;  %1950 = vmatpush3.bf16.msra.mxu1 %v2126_v46 }
  0x1b   : > { %1955 = vmatprep.subr.bf16.mxu1 %v2163_v1 }
  0x20   : > { %1860 = vmatmul.mubr.msk.bf16.vlgmr.msra.gmra.mrb[0].mxu0 %vm249_vm1, %v225_v9 }
  0x21   : > { %1864 = vmatpush3.bf16.msra.mxu0 %v2105_v10  ;;  %1867 = vmatprep.mubr.msk.bf16.mxu0 %vm2164_vm0, %v2163_v1  ;;  %v2135_v10 = vld [vmem:[%s2522_s2 + $0x80] sm:$0xff]  }
  0x22   : > { %1865 = vmatprep.subr.bf16.mxu0 %v2163_v1 }
  0x25   : > { %1866 = vmatpush3.bf16.msra.mxu0 %v2106_v12 }
  0x26   : > { %1871 = vmatprep.subr.bf16.mxu0 %v2163_v1 }
  0x2c   : > { %1868 = vmatmul.mubr.msk.bf16.vlgmr.msra.gmra.mrb[0].mxu0 %vm249_vm1, %v349_v15  ;;  %v2138_v15 = vld [vmem:[%s2522_s2 + $0x98] sm:$0xff]  }
  0x2d   : > { %1872 = vmatpush3.bf16.msra.mxu0 %v2107_v14  ;;  %1875 = vmatprep.mubr.msk.bf16.mxu0 %vm2164_vm0, %v2163_v1  ;;  %v2137_v14 = vld [vmem:[%s2522_s2 + $0x90] sm:$0xff]  }
  0x2e   : > { %1873 = vmatprep.subr.bf16.mxu0 %v2163_v1 }
  0x31   : > { %1874 = vmatpush3.bf16.msra.mxu0 %v2108_v16 }
  0x32   : > { %1879 = vmatprep.subr.bf16.mxu0 %v2163_v1 }
  0x38   : > { %1876 = vmatmul.mubr.msk.bf16.vlgmr.msra.gmra.mrb[0].mxu0 %vm249_vm1, %v412_v18 }
  0x39   : > { %1880 = vmatpush3.bf16.msra.mxu0 %v2109_v19  ;;  %1883 = vmatprep.mubr.msk.bf16.mxu0 %vm2164_vm0, %v2163_v1  ;;  %v2140_v19 = vld [vmem:[%s2522_s2 + $0xa8] sm:$0xff]  }
  0x3a   : > { %1881 = vmatprep.subr.bf16.mxu0 %v2163_v1 }
  0x3d   : > { %1882 = vmatpush3.bf16.msra.mxu0 %v2110_v20  ;;  %v2141_v20 = vld [vmem:[%s2522_s2 + $0xb0] sm:$0xff]  }
  0x3e   : > { %1887 = vmatprep.subr.bf16.mxu0 %v2163_v1 }
  0x44   : > { %1884 = vmatmul.mubr.msk.bf16.vlgmr.msra.gmra.mrb[0].mxu0 %vm249_vm1, %v475_v22 }
  0x45   : > { %1888 = vmatpush3.bf16.msra.mxu0 %v2111_v23  ;;  %1891 = vmatprep.mubr.msk.bf16.mxu0 %vm2164_vm0, %v2163_v1  ;;  %v2143_v23 = vld [vmem:[%s2522_s2 + $0xc0] sm:$0xff]  }
  0x46   : > { %1889 = vmatprep.subr.bf16.mxu0 %v2163_v1 }
  0x49   : > { %1890 = vmatpush3.bf16.msra.mxu0 %v2112_v24 }
  0x4a   : > { %1895 = vmatprep.subr.bf16.mxu0 %v2163_v1 }
  0x50   : > { %1892 = vmatmul.mubr.msk.bf16.vlgmr.msra.gmra.mrb[0].mxu0 %vm249_vm1, %v538_v26  ;;  %v2145_v26 = vld [vmem:[%s2522_s2 + $0xd0] sm:$0xff]  }
  0x51   : > { %1896 = vmatpush3.bf16.msra.mxu0 %v2113_v27  ;;  %1899 = vmatprep.mubr.msk.bf16.mxu0 %vm2164_vm0, %v2163_v1  ;;  %v2146_v27 = vld [vmem:[%s2522_s2 + $0xd8] sm:$0xff]  }
  0x52   : > { %1897 = vmatprep.subr.bf16.mxu0 %v2163_v1 }
  0x55   : > { %1898 = vmatpush3.bf16.msra.mxu0 %v2114_v28 }
  0x56   : > { %1903 = vmatprep.subr.bf16.mxu0 %v2163_v1 }
  0x5c   : > { %1900 = vmatmul.mubr.msk.bf16.vlgmr.msra.gmra.mrb[0].mxu0 %vm249_vm1, %v601_v30 }
  0x5d   : > { %1904 = vmatpush3.bf16.msra.mxu0 %v2115_v31  ;;  %1907 = vmatprep.mubr.msk.bf16.mxu0 %vm2164_vm0, %v2163_v1  ;;  %v2148_v31 = vld [vmem:[%s2522_s2 + $0xe8] sm:$0xff]  }
  0x5e   : > { %1905 = vmatprep.subr.bf16.mxu0 %v2163_v1 }
  0x61   : > { %1906 = vmatpush3.bf16.msra.mxu0 %v2116_v32  ;;  %v2149_v32 = vld [vmem:[%s2522_s2 + $0xf0] sm:$0xff]  }
  0x62   : > { %1911 = vmatprep.subr.bf16.mxu0 %v2163_v1 }
  0x68   : > { %1908 = vmatmul.mubr.msk.bf16.vlgmr.msra.gmra.mrb[0].mxu0 %vm249_vm1, %v664_v34 }
  0x69   : > { %1912 = vmatpush3.bf16.msra.mxu0 %v2117_v35  ;;  %1915 = vmatprep.mubr.msk.bf16.mxu0 %vm2164_vm0, %v2163_v1  ;;  %v2151_v35 = vld [vmem:[%s2522_s2 + $0x100] sm:$0xff]  }
  0x6a   : > { %1913 = vmatprep.subr.bf16.mxu0 %v2163_v1 }
  0x6d   : > { %1914 = vmatpush3.bf16.msra.mxu0 %v2118_v36 }
  0x6e   : > { %1919 = vmatprep.subr.bf16.mxu0 %v2163_v1 }
  0x74   : > { %1916 = vmatmul.mubr.msk.bf16.vlgmr.msra.gmra.mrb[0].mxu0 %vm249_vm1, %v727_v38  ;;  %v2153_v38 = vld [vmem:[%s2522_s2 + $0x110] sm:$0xff]  }
  0x75   : > { %1927 = vmatprep.mubr.msk.bf16.mxu0 %vm2164_vm0, %v2163_v1  ;;  %1920 = vmatpush3.bf16.msra.mxu0 %v2119_v39  ;;  %v2154_v39 = vld [vmem:[%s2522_s2 + $0x118] sm:$0xff]  }
  0x76   : > { %1921 = vmatprep.subr.bf16.mxu0 %v2163_v1 }
  0x79   : > { %1922 = vmatpush3.bf16.msra.mxu0 %v2121_v41 }
  0x7a   : > { %1923 = vmatprep.subr.bf16.mxu0 %v2163_v1 }
  0x7d   : > { %1924 = vmatpush3.bf16.msra.mxu0 %v2123_v43 }
  0x7e   : > { %1925 = vmatprep.subr.bf16.mxu0 %v2163_v1 }
  0x81   : > { %1926 = vmatpush3.bf16.msra.mxu0 %v2125_v45 }
  0x82   : > { %1931 = vmatprep.subr.bf16.mxu0 %v2163_v1 }
  0x89   : > { %v813_v55 = vpop.permute.xlu0 %812 }
 0x147   : > { %v782_v48 = vpop.f32.mrb[0].mxu0 }
 0x148   : > { %v795_v50 = vmul.f32 %v1660_v47, %v782_v48  ;;  %v1917_v51 = vpop.f32.mrb[1].mxu0  ;;  %v1771_v47 = vld [vmem:[%s2523_s3 + $0x2] ss:$0 sm:$0xff] }
 0x149   : > { %v785_v52 = vpop.f32.mrb[2].mxu0 }
 0x14a   : > { %v800_v53 = vadd.f32 %v1661_v49, %v795_v50  ;;  %v1918_v54 = vpop.f32.mrb[3].mxu0 }
 0x14c   : > { %vm801_vm4 = vcmp.ge.f32.partialorder %v800_v53, 0.0  ;;  %v802_v56 = vmul.f32 0.01, %v800_v53 }
 0x14e   : > { %v803_v57 = vsel %vm801_vm4, %v800_v53, %v802_v56 }
 0x14f   : > { %v815_v58 = vmul.f32 %v813_v55, %v803_v57 }
 0x151   : > { %816 = vst.msk [vmem:[#allocation2 + $0x5] sm:$0xff] %vm804_vm2, %v815_v58 }
 0x158   : > { %v827_v60 = vld [vmem:[#allocation2 + $0x1] sm:$0xff]  ;;  %v1367_v34 = vld [vmem:[#allocation2 + $0x9] sm:$0xff] }
 0x159   : > { %v972_v61 = vld [vmem:[#allocation2 + $0x2] sm:$0xff]  ;;  %v828_v63 = vpack.c.bf16 %v827_v60, %v827_v60  ;;  %v1368_v36 = vpack.c.bf16 %v1367_v34, %v1367_v34  ;;  %v1446_v40 = vld [vmem:[#allocation2 + $0xa] sm:$0xff] }
 0x15a   : > { %v973_v0 = vpack.c.bf16 %v972_v61, %v972_v61  ;;  %v817_v8 = vld [vmem:[#allocation2] sm:$0xff]  ;;  %v1288_v28 = vld [vmem:[#allocation2 + $0x8] sm:$0xff]  ;;  %v1447_v41 = vpack.c.bf16 %v1446_v40, %v1446_v40 }
 0x15b   : > { %1928 = vmatmul.mubr.msk.bf16.vlgmr.msra.gmra.mrb[4].mxu0 %vm804_vm2, %v828_v63  ;;  %v1051_v9 = vld [vmem:[#allocation2 + $0x4] sm:$0xff]  ;;  %v818_v11 = vpack.c.bf16 %v817_v8, %v817_v8  ;;  %v1289_v30 = vpack.c.bf16 %v1288_v28, %v1288_v28 }
 0x15c   : > { %1952 = vmatmul.mubr.msk.bf16.vlgmr.msra.gmra.mrb[0].mxu1 %vm804_vm2, %v973_v0  ;;  %1932 = vmatpush3.bf16.msra.mxu0 %v2127_v59  ;;  %v1052_v12 = vpack.c.bf16 %v1051_v9, %v1051_v9  ;;  %v1130_v16 = vld [vmem:[#allocation2 + $0x5] sm:$0xff] }
 0x15d   : > { %1956 = vmatpush3.bf16.msra.mxu1 %v2128_v62  ;;  %1933 = vmatprep.subr.bf16.mxu0 %v2163_v1  ;;  %v1131_v18 = vpack.c.bf16 %v1130_v16, %v1130_v16  ;;  %v1209_v22 = vld [vmem:[#allocation2 + $0x6] sm:$0xff] }
 0x15e   : > { %1957 = vmatprep.subr.bf16.mxu1 %v2163_v1  ;;  %1939 = vmatprep.mubr.msk.bf16.mxu0 %vm2164_vm0, %v2163_v1  ;;  %v1210_v24 = vpack.c.bf16 %v1209_v22, %v1209_v22 }
 0x15f   : > { %1963 = vmatprep.mubr.msk.bf16.mxu1 %vm2164_vm0, %v2163_v1 }
 0x160   : > { %1934 = vmatpush3.bf16.msra.mxu0 %v2129_v2 }
 0x161   : > { %1958 = vmatpush3.bf16.msra.mxu1 %v2130_v3  ;;  %1935 = vmatprep.subr.bf16.mxu0 %v2163_v1 }
 0x162   : > { %1959 = vmatprep.subr.bf16.mxu1 %v2163_v1 }
 0x164   : > { %1936 = vmatpush3.bf16.msra.mxu0 %v2131_v4 }
 0x165   : > { %1960 = vmatpush3.bf16.msra.mxu1 %v2132_v5  ;;  %1937 = vmatprep.subr.bf16.mxu0 %v2163_v1 }
 0x166   : > { %1961 = vmatprep.subr.bf16.mxu1 %v2163_v1 }
 0x168   : > { %1938 = vmatpush3.bf16.msra.mxu0 %v2133_v6 }
 0x169   : > { %1962 = vmatpush3.bf16.msra.mxu1 %v2134_v7 }
 0x16a   : > { %1967 = vmatprep.subr.bf16.mxu1 %v2163_v1 }
 0x16b   : > { %1940 = vmatmul.mubr.msk.bf16.vlgmr.msra.gmra.mrb[4].mxu0 %vm804_vm2, %v818_v11 }
 0x16c   : > { %1964 = vmatmul.mubr.msk.bf16.vlgmr.msra.gmra.mrb[0].mxu1 %vm804_vm2, %v1052_v12 }
 0x16d   : > { %1968 = vmatpush3.bf16.msra.mxu1 %v2135_v10  ;;  %1975 = vmatprep.mubr.msk.bf16.mxu1 %vm2164_vm0, %v2163_v1 }
 0x16e   : > { %1969 = vmatprep.subr.bf16.mxu1 %v2163_v1 }
 0x171   : > { %1970 = vmatpush3.bf16.msra.mxu1 %v2136_v13 }
 0x172   : > { %1971 = vmatprep.subr.bf16.mxu1 %v2163_v1 }
 0x175   : > { %1972 = vmatpush3.bf16.msra.mxu1 %v2137_v14 }
 0x176   : > { %1973 = vmatprep.subr.bf16.mxu1 %v2163_v1 }
 0x179   : > { %1974 = vmatpush3.bf16.msra.mxu1 %v2138_v15 }
 0x17a   : > { %1979 = vmatprep.subr.bf16.mxu1 %v2163_v1 }
 0x17c   : > { %1976 = vmatmul.mubr.msk.bf16.vlgmr.msra.gmra.mrb[0].mxu1 %vm804_vm2, %v1131_v18 }
 0x17d   : > { %1980 = vmatpush3.bf16.msra.mxu1 %v2139_v17  ;;  %1987 = vmatprep.mubr.msk.bf16.mxu1 %vm2164_vm0, %v2163_v1 }
 0x17e   : > { %1981 = vmatprep.subr.bf16.mxu1 %v2163_v1 }
 0x181   : > { %1982 = vmatpush3.bf16.msra.mxu1 %v2140_v19 }
 0x182   : > { %1983 = vmatprep.subr.bf16.mxu1 %v2163_v1 }
 0x185   : > { %1984 = vmatpush3.bf16.msra.mxu1 %v2141_v20 }
 0x186   : > { %1985 = vmatprep.subr.bf16.mxu1 %v2163_v1 }
 0x189   : > { %1986 = vmatpush3.bf16.msra.mxu1 %v2142_v21 }
 0x18a   : > { %1991 = vmatprep.subr.bf16.mxu1 %v2163_v1 }
 0x18c   : > { %1988 = vmatmul.mubr.msk.bf16.vlgmr.msra.gmra.mrb[0].mxu1 %vm804_vm2, %v1210_v24 }
 0x18d   : > { %1992 = vmatpush3.bf16.msra.mxu1 %v2143_v23  ;;  %1999 = vmatprep.mubr.msk.bf16.mxu1 %vm2164_vm0, %v2163_v1 }
 0x18e   : > { %1993 = vmatprep.subr.bf16.mxu1 %v2163_v1 }
 0x191   : > { %1994 = vmatpush3.bf16.msra.mxu1 %v2144_v25 }
 0x192   : > { %1995 = vmatprep.subr.bf16.mxu1 %v2163_v1 }
 0x195   : > { %1996 = vmatpush3.bf16.msra.mxu1 %v2145_v26 }
 0x196   : > { %1997 = vmatprep.subr.bf16.mxu1 %v2163_v1 }
 0x199   : > { %1998 = vmatpush3.bf16.msra.mxu1 %v2146_v27 }
 0x19a   : > { %2003 = vmatprep.subr.bf16.mxu1 %v2163_v1 }
 0x19c   : > { %2000 = vmatmul.mubr.msk.bf16.vlgmr.msra.gmra.mrb[0].mxu1 %vm804_vm2, %v1289_v30 }
 0x19d   : > { %2004 = vmatpush3.bf16.msra.mxu1 %v2147_v29  ;;  %2011 = vmatprep.mubr.msk.bf16.mxu1 %vm2164_vm0, %v2163_v1 }
 0x19e   : > { %2005 = vmatprep.subr.bf16.mxu1 %v2163_v1 }
 0x1a1   : > { %2006 = vmatpush3.bf16.msra.mxu1 %v2148_v31 }
 0x1a2   : > { %2007 = vmatprep.subr.bf16.mxu1 %v2163_v1 }
 0x1a5   : > { %2008 = vmatpush3.bf16.msra.mxu1 %v2149_v32 }
 0x1a6   : > { %2009 = vmatprep.subr.bf16.mxu1 %v2163_v1 }
 0x1a9   : > { %2010 = vmatpush3.bf16.msra.mxu1 %v2150_v33 }
 0x1aa   : > { %2015 = vmatprep.subr.bf16.mxu1 %v2163_v1 }
 0x1ac   : > { %2012 = vmatmul.mubr.msk.bf16.vlgmr.msra.gmra.mrb[0].mxu1 %vm804_vm2, %v1368_v36 }
 0x1ad   : > { %2016 = vmatpush3.bf16.msra.mxu1 %v2151_v35  ;;  %2023 = vmatprep.mubr.msk.bf16.mxu1 %vm2164_vm0, %v2163_v1 }
 0x1ae   : > { %2017 = vmatprep.subr.bf16.mxu1 %v2163_v1 }
 0x1b1   : > { %2018 = vmatpush3.bf16.msra.mxu1 %v2152_v37 }
 0x1b2   : > { %2019 = vmatprep.subr.bf16.mxu1 %v2163_v1 }
 0x1b5   : > { %2020 = vmatpush3.bf16.msra.mxu1 %v2153_v38 }
 0x1b6   : > { %2021 = vmatprep.subr.bf16.mxu1 %v2163_v1  ;;  %v1772_v1 = vld [vmem:[%s2523_s3 + $0x3] ss:$0 sm:$0xff] }
 0x1b9   : > { %2022 = vmatpush3.bf16.msra.mxu1 %v2154_v39 }
 0x1bc   : > { %2024 = vmatmul.mubr.msk.bf16.vlgmr.msra.gmra.mrb[0].mxu1 %vm804_vm2, %v1447_v41 }
 0x23e   : > { %v966_v42 = vpop.f32.mrb[4].mxu0 }
 0x23f   : > { %v1941_v43 = vpop.f32.mrb[5].mxu0 }
 0x240   : > { %v969_v44 = vpop.f32.mrb[6].mxu0 }
 0x241   : > { %v1942_v45 = vpop.f32.mrb[7].mxu0 }
 0x28f   : > { %v1518_v46 = vpop.f32.mrb[0].mxu1 }
 0x290   : > { %v2027_v48 = vadd.f32 %v1518_v46, %v966_v42  ;;  %v2025_v49 = vpop.f32.mrb[1].mxu1 }
 0x291   : > { %v1521_v50 = vpop.f32.mrb[2].mxu1 }
 0x292   : > { %v1531_v51 = vmul.f32 %v2027_v48, %v1771_v47  ;;  %v2026_v52 = vpop.f32.mrb[3].mxu1 }
 0x294   : > { %v1536_v53 = vadd.f32 %v1772_v1, %v1531_v51 }
 0x296   : > { %vm1537_vm5 = vcmp.ge.f32.partialorder %v1536_v53, 0.0  ;;  %v1538_v54 = vmul.f32 0.01, %v1536_v53 }
 0x298   : > { %v1539_v55 = vsel %vm1537_vm5, %v1536_v53, %v1538_v54 }
 0x299   : > { %1540 = vst.msk [vmem:[%s222_s6] sm:$0xff] %vm804_vm2, %v1539_v55 }
 0x29a PF: > { %s15_s18 = sadd.s32 1, %s2161_s18  }
 0x29b   : > { %p12_p4 = scmp.ge.s32.totalorder %s15_s18, 4  }
 0x29d   :  { %14 = sbr.rel (!%p12_p4) target bundleno = 1 (0x1), region = 86 }

// kernel: encoder_forward.17
= control target key start
LH: loop header
LB: loop body
LE: loop exit
PB: predicated region body
PF: predicated region fallthrough
CT: control target
= control target key end

     0   :  { %s2956_s18 = smov 0   ;;  %s3482_s0 = inlined_call_operand.vmem [shape: f32[2,12,64], index: 0, kind: input, shape index: {}]   ;;  %s3483_s1 = inlined_call_operand.vmem [shape: bf16[9,64,128], index: 1, kind: input, shape index: {}]   ;;  %s3484_s2 = inlined_call_operand.vmem [shape: bf16[9,128,128], index: 2, kind: input, shape index: {}]   ;;  %s3485_s3 = inlined_call_operand.vmem [shape: f32[4,128], index: 3, kind: input, shape index: {}]   ;;  %s3486_s4 = inlined_call_operand.vmem [shape: f32[3,1], index: 4, kind: input, shape index: {}]   ;;  %s3487_s5 = inlined_call_operand.vmem [shape: f32[2,3,128], index: 5, kind: output, shape index: {}]  }
   0x1 LB: > { %s1996_s19 = sadd.s32 4294967295, %s2921_s18   ;;  %p2000_p0 = scmp.ge.s32.totalorder %s2921_s18, 1  ;;  %s2921_s18 = sphi %s2956_s18, %s15_s18  }
   0x2   : > { %p187_p1 = scmp.lt.s32.totalorder %s2921_s18, 3 }
   0x4   : > { %p188_p2 = pnand %p2000_p0, %p187_p1 }
   0x5   : > { %v2807_v0 = vld [vmem:[%s3483_s1 + $0x20] sm:$0xff] (!%p188_p2)   ;;  %v2923_v1 = vmov (!%p188_p2), 0.0   ;;  %v2808_v2 = vld [vmem:[%s3483_s1 + $0x28] sm:$0xff] (!%p188_p2)   ;;  %vm2924_vm0 = vmmov (!%p188_p2), 0   ;;  %p214_p3 = scmp.lt.s32.totalorder (!%p188_p2), %s1996_s19, 1  ;;  %v2809_v3 = vld [vmem:[%s3483_s1 + $0x30] sm:$0xff] (!%p188_p2)  }
   0x6   : > { %191 = sbr.rel (%p188_p2) target bundleno = 795 (0x31b), region = 40  ;;  %2446 = vmatprep.subr.bf16.mxu0 (!%p188_p2), %v2923_v1  ;;  %948 = vst [vmem:[#allocation2] sm:$0xff] (!%p188_p2), %v2923_v1  ;;  %949 = vst [vmem:[#allocation2 + $0x8] sm:$0xf] (!%p188_p2), %v2923_v1  ;;  %2594 = vmatprep.subr.bf16.mxu1 (!%p188_p2), %v2923_v1  ;;  %v2810_v4 = vld [vmem:[%s3483_s1 + $0x38] sm:$0xff] (!%p188_p2)   ;;  %vm269_vm1 = vcmask (!%p188_p2), 523264  }
   0x7   : > { %2447 = vmatpush3.bf16.msra.mxu0 (!%p188_p2), %v2807_v0  ;;  %2454 = vmatprep.mubr.msk.bf16.mxu0 (!%p188_p2), %vm2924_vm0, %v2923_v1  ;;  %v2811_v7 = vld [vmem:[%s3483_s1] sm:$0xff] (!%p188_p2)   ;;  %v2812_v8 = vld [vmem:[%s3483_s1 + $0x8] sm:$0xff] (!%p188_p2)   ;;  %v2925_v9 = vmov (!%p188_p2), 0   ;;  %v2813_v10 = vld [vmem:[%s3483_s1 + $0x10] sm:$0xff] (!%p188_p2)  }
   0x8   : > { %2448 = vmatprep.subr.bf16.mxu0 (!%p188_p2), %v2923_v1  ;;  %2610 = vmatprep.mubr.msk.bf16.mxu1 (!%p188_p2), %vm2924_vm0, %v2923_v1  ;;  %v2814_v11 = vld [vmem:[%s3483_s1 + $0x18] sm:$0xff] (!%p188_p2)   ;;  %v2815_v14 = vld [vmem:[%s3483_s1 + $0x40] sm:$0xff] (!%p188_p2)   ;;  %v2816_v15 = vld [vmem:[%s3483_s1 + $0x48] sm:$0xff] (!%p188_p2)  }
   0x9   : > { %2806 = vset.pattern.permute.xlu0 (!%p188_p2), %v2925_v9  ;;  %v2817_v16 = vld [vmem:[%s3483_s1 + $0x50] sm:$0xff] (!%p188_p2)   ;;  %v950_v17 = vld [vmem:[%s3486_s4] sm:$0x7] (!%p188_p2)  ;;  %v2818_v18 = vld [vmem:[%s3483_s1 + $0x58] sm:$0xff] (!%p188_p2)  }
   0xa   : > { %953 = vperm.xlu0 (!%p188_p2), %2806, %v950_v17   ;;  %v2843_v19 = vld [vmem:[%s3484_s2 + $0x80] sm:$0xff] (!%p188_p2)   ;;  %v2844_v21 = vld [vmem:[%s3484_s2 + $0x88] sm:$0xff] (!%p188_p2)   ;;  %v2845_v24 = vld [vmem:[%s3484_s2 + $0x90] sm:$0xff] (!%p188_p2)  }
   0xb   : > { %2449 = vmatpush3.bf16.msra.mxu0 (!%p188_p2), %v2808_v2  ;;  %2595 = vmatpush3.bf16.msra.mxu1 (!%p188_p2), %v2843_v19  ;;  %v2819_v22 = vld [vmem:[%s3483_s1 + $0x60] sm:$0xff] (!%p188_p2)   ;;  %v2820_v25 = vld [vmem:[%s3483_s1 + $0x68] sm:$0xff] (!%p188_p2)   ;;  %v2821_v26 = vld [vmem:[%s3483_s1 + $0x70] sm:$0xff] (!%p188_p2)  }
   0xc   : > { %2450 = vmatprep.subr.bf16.mxu0 (!%p188_p2), %v2923_v1  ;;  %2596 = vmatprep.subr.bf16.mxu1 (!%p188_p2), %v2923_v1  ;;  %v2822_v27 = vld [vmem:[%s3483_s1 + $0x78] sm:$0xff] (!%p188_p2)   ;;  %v2823_v29 = vld [vmem:[%s3483_s1 + $0x80] sm:$0xff] (!%p188_p2)   ;;  %v2824_v31 = vld [vmem:[%s3483_s1 + $0x88] sm:$0xff] (!%p188_p2)  }
   0xd   : > { %s3489_s19 = smov (!%p214_p3, %s1996_s19), 1  ;;  %v2825_v32 = vld [vmem:[%s3483_s1 + $0x90] sm:$0xff]   ;;  %v2826_v33 = vld [vmem:[%s3483_s1 + $0x98] sm:$0xff]   ;;  %v2827_v35 = vld [vmem:[%s3483_s1 + $0xa0] sm:$0xff]  }
   0xe   : > { %s2319_s26 = sshll.u32 %s3489_s19, 4  ;;  %v2828_v37 = vld [vmem:[%s3483_s1 + $0xa8] sm:$0xff]   ;;  %v2829_v38 = vld [vmem:[%s3483_s1 + $0xb0] sm:$0xff]   ;;  %v2830_v39 = vld [vmem:[%s3483_s1 + $0xb8] sm:$0xff]   ;;  %s2003_s22 = sshll.u32 %s3489_s19, 2 }
   0xf   : > { %s2989_s29 = scalar_lea.vmem %s3482_s0, %s2319_s26  ;;  %2451 = vmatpush3.bf16.msra.mxu0 %v2809_v3  ;;  %2597 = vmatpush3.bf16.msra.mxu1 %v2844_v21  ;;  %v2831_v42 = vld [vmem:[%s3483_s1 + $0xc0] sm:$0xff]   ;;  %v2832_v43 = vld [vmem:[%s3483_s1 + $0xc8] sm:$0xff]   ;;  %v2833_v44 = vld [vmem:[%s3483_s1 + $0xd0] sm:$0xff]   ;;  %s222_s25 = scalar_lea.vmem %s3487_s5, %s2003_s22 }
  0x10   : > { %v234_v5 = vld [vmem:[%s2989_s29 + $0x1] sm:$0x7]  ;;  %2452 = vmatprep.subr.bf16.mxu0 %v2923_v1  ;;  %2598 = vmatprep.subr.bf16.mxu1 %v2923_v1  ;;  %v538_v34 = vld [vmem:[%s2989_s29 + $0x4] sm:$0x7]  ;;  %v2834_v45 = vld [vmem:[%s3483_s1 + $0xd8] sm:$0xff]  }
  0x11   : > { %v235_v6 = vpack.c.bf16 %v234_v5, %v234_v5  ;;  %v224_v12 = vld [vmem:[%s2989_s29] sm:$0x7]  ;;  %v459_v28 = vld [vmem:[%s2989_s29 + $0x3] sm:$0x7]  ;;  %v539_v36 = vpack.c.bf16 %v538_v34, %v538_v34  ;;  %v696_v46 = vld [vmem:[%s2989_s29 + $0x6] sm:$0x7] }
  0x12   : > { %v225_v13 = vpack.c.bf16 %v224_v12, %v224_v12  ;;  %v380_v20 = vld [vmem:[%s2989_s29 + $0x2] sm:$0x7]  ;;  %v460_v30 = vpack.c.bf16 %v459_v28, %v459_v28  ;;  %v617_v40 = vld [vmem:[%s2989_s29 + $0x5] sm:$0x7]  ;;  %v697_v47 = vpack.c.bf16 %v696_v46, %v696_v46  ;;  %v2836_v49 = vld [vmem:[%s3483_s1 + $0xe8] sm:$0xff]  }
  0x13   : > { %2453 = vmatpush3.bf16.msra.mxu0 %v2810_v4  ;;  %v381_v23 = vpack.c.bf16 %v380_v20, %v380_v20  ;;  %2599 = vmatpush3.bf16.msra.mxu1 %v2845_v24  ;;  %v618_v41 = vpack.c.bf16 %v617_v40, %v617_v40  ;;  %v2835_v48 = vld [vmem:[%s3483_s1 + $0xe0] sm:$0xff]   ;;  %v2837_v50 = vld [vmem:[%s3483_s1 + $0xf0] sm:$0xff]   ;;  %v2838_v51 = vld [vmem:[%s3483_s1 + $0xf8] sm:$0xff]  }
  0x14   : > { %2458 = vmatprep.subr.bf16.mxu0 %v2923_v1  ;;  %2600 = vmatprep.subr.bf16.mxu1 %v2923_v1  ;;  %v775_v52 = vld [vmem:[%s2989_s29 + $0x7] sm:$0x7]  ;;  %v2841_v56 = vld [vmem:[%s3483_s1 + $0x110] sm:$0xff]   ;;  %v2842_v57 = vld [vmem:[%s3483_s1 + $0x118] sm:$0xff]  }
  0x15   : > { %v776_v53 = vpack.c.bf16 %v775_v52, %v775_v52  ;;  %v2839_v54 = vld [vmem:[%s3483_s1 + $0x100] sm:$0xff]   ;;  %v2840_v55 = vld [vmem:[%s3483_s1 + $0x108] sm:$0xff]   ;;  %v2846_v60 = vld [vmem:[%s3484_s2 + $0x98] sm:$0xff]  }
  0x16   : > { %2455 = vmatmul.mubr.msk.bf16.vlgmr.msra.gmra.mrb[0].mxu0 %vm269_vm1, %v235_v6  ;;  %v854_v58 = vld [vmem:[%s2989_s29 + $0x8] sm:$0x7]  ;;  %v2847_v61 = vld [vmem:[%s3484_s2 + $0xa0] sm:$0xff]   ;;  %v2849_v63 = vld [vmem:[%s3484_s2 + $0xb0] sm:$0xff]  }
  0x17   : > { %2459 = vmatpush3.bf16.msra.mxu0 %v2811_v7  ;;  %2466 = vmatprep.mubr.msk.bf16.mxu0 %vm2924_vm0, %v2923_v1  ;;  %v855_v59 = vpack.c.bf16 %v854_v58, %v854_v58  ;;  %v2848_v62 = vld [vmem:[%s3484_s2 + $0xa8] sm:$0xff]   ;;  %v2850_v0 = vld [vmem:[%s3484_s2 + $0xb8] sm:$0xff]   ;;  %v2875_v2 = vld [vmem:[%s3484_s2 + $0x40] sm:$0xff]  }
  0x18   : > { %2460 = vmatprep.subr.bf16.mxu0 %v2923_v1  ;;  %2601 = vmatpush3.bf16.msra.mxu1 %v2846_v60  ;;  %v2877_v3 = vld [vmem:[%s3484_s2 + $0x48] sm:$0xff]   ;;  %v2879_v4 = vld [vmem:[%s3484_s2 + $0x50] sm:$0xff]   ;;  %v2881_v5 = vld [vmem:[%s3484_s2 + $0x58] sm:$0xff]  }
  0x19   : > { %2602 = vmatprep.subr.bf16.mxu1 %v2923_v1  ;;  %v2113_v6 = vld [vmem:[%s3485_s3] ss:$0 sm:$0xff]  ;;  %v2885_v17 = vld [vmem:[%s3484_s2 + $0x68] sm:$0xff]   ;;  %v2887_v20 = vld [vmem:[%s3484_s2 + $0x70] sm:$0xff]  }
  0x1a   : > { %v2889_v21 = vld [vmem:[%s3484_s2 + $0x78] sm:$0xff]   ;;  %v2851_v24 = vld [vmem:[%s3484_s2 + $0xc0] sm:$0xff]   ;;  %v2852_v28 = vld [vmem:[%s3484_s2 + $0xc8] sm:$0xff]  }
  0x1b   : > { %2461 = vmatpush3.bf16.msra.mxu0 %v2812_v8  ;;  %v2114_v8 = vld [vmem:[%s3485_s3 + $0x1] ss:$0 sm:$0xff]  ;;  %v2858_v40 = vld [vmem:[%s3484_s2 + $0xf8] sm:$0xff]   ;;  %v2865_v52 = vld [vmem:[%s3484_s2 + $0x130] sm:$0xff]  }
  0x1c   : > { %2462 = vmatprep.subr.bf16.mxu0 %v2923_v1  ;;  %2603 = vmatpush3.bf16.msra.mxu1 %v2847_v61  ;;  %v2855_v34 = vld [vmem:[%s3484_s2 + $0xe0] sm:$0xff]   ;;  %v2869_v58 = vld [vmem:[%s3484_s2 + $0x150] sm:$0xff]   ;;  %v2872_v61 = vld [vmem:[%s3484_s2 + $0x168] sm:$0xff]  }
  0x1d   : > { %2604 = vmatprep.subr.bf16.mxu1 %v2923_v1  ;;  %v2871_v60 = vld [vmem:[%s3484_s2 + $0x160] sm:$0xff]  }
  0x1f   : > { %2463 = vmatpush3.bf16.msra.mxu0 %v2813_v10 }
  0x20   : > { %2464 = vmatprep.subr.bf16.mxu0 %v2923_v1  ;;  %2605 = vmatpush3.bf16.msra.mxu1 %v2848_v62  ;;  %v2873_v62 = vld [vmem:[%s3484_s2 + $0x170] sm:$0xff]  }
  0x21   : > { %2606 = vmatprep.subr.bf16.mxu1 %v2923_v1 }
  0x23   : > { %2465 = vmatpush3.bf16.msra.mxu0 %v2814_v11  ;;  %v2883_v11 = vld [vmem:[%s3484_s2 + $0x60] sm:$0xff]  }
  0x24   : > { %2470 = vmatprep.subr.bf16.mxu0 %v2923_v1  ;;  %2607 = vmatpush3.bf16.msra.mxu1 %v2849_v63  ;;  %v2874_v63 = vld [vmem:[%s3484_s2 + $0x178] sm:$0xff]  }
  0x25   : > { %2608 = vmatprep.subr.bf16.mxu1 %v2923_v1 }
  0x26   : > { %2467 = vmatmul.mubr.msk.bf16.vlgmr.msra.gmra.mrb[0].mxu0 %vm269_vm1, %v225_v13 }
  0x27   : > { %2471 = vmatpush3.bf16.msra.mxu0 %v2815_v14  ;;  %2478 = vmatprep.mubr.msk.bf16.mxu0 %vm2924_vm0, %v2923_v1 }
  0x28   : > { %2472 = vmatprep.subr.bf16.mxu0 %v2923_v1  ;;  %2609 = vmatpush3.bf16.msra.mxu1 %v2850_v0 }
  0x29   : > { %2614 = vmatprep.subr.bf16.mxu1 %v2923_v1 }
  0x2b   : > { %2473 = vmatpush3.bf16.msra.mxu0 %v2816_v15 }
  0x2c   : > { %2474 = vmatprep.subr.bf16.mxu0 %v2923_v1 }
  0x2f   : > { %2475 = vmatpush3.bf16.msra.mxu0 %v2817_v16 }
  0x30   : > { %2476 = vmatprep.subr.bf16.mxu0 %v2923_v1 }
  0x33   : > { %2477 = vmatpush3.bf16.msra.mxu0 %v2818_v18 }
  0x34   : > { %2482 = vmatprep.subr.bf16.mxu0 %v2923_v1 }
  0x36   : > { %2479 = vmatmul.mubr.msk.bf16.vlgmr.msra.gmra.mrb[0].mxu0 %vm269_vm1, %v381_v23 }
  0x37   : > { %2483 = vmatpush3.bf16.msra.mxu0 %v2819_v22  ;;  %2490 = vmatprep.mubr.msk.bf16.mxu0 %vm2924_vm0, %v2923_v1  ;;  %v976_v22 = vld [vmem:[#allocation2 + $0x1] sm:$0x7] }
  0x38   : > { %2484 = vmatprep.subr.bf16.mxu0 %v2923_v1 }
  0x3b   : > { %2485 = vmatpush3.bf16.msra.mxu0 %v2820_v25  ;;  %v977_v25 = vpack.c.bf16 %v976_v22, %v976_v22 }
  0x3c   : > { %2486 = vmatprep.subr.bf16.mxu0 %v2923_v1 }
  0x3f   : > { %2487 = vmatpush3.bf16.msra.mxu0 %v2821_v26 }
  0x40   : > { %2488 = vmatprep.subr.bf16.mxu0 %v2923_v1 }
  0x43   : > { %2489 = vmatpush3.bf16.msra.mxu0 %v2822_v27  ;;  %v2891_v27 = vld [vmem:[%s3484_s2] sm:$0xff]  }
  0x44   : > { %2494 = vmatprep.subr.bf16.mxu0 %v2923_v1 }
  0x46   : > { %2491 = vmatmul.mubr.msk.bf16.vlgmr.msra.gmra.mrb[0].mxu0 %vm269_vm1, %v460_v30  ;;  %v2853_v30 = vld [vmem:[%s3484_s2 + $0xd0] sm:$0xff]  }
  0x47   : > { %2495 = vmatpush3.bf16.msra.mxu0 %v2823_v29  ;;  %2502 = vmatprep.mubr.msk.bf16.mxu0 %vm2924_vm0, %v2923_v1  ;;  %v2893_v29 = vld [vmem:[%s3484_s2 + $0x8] sm:$0xff]  }
  0x48   : > { %2496 = vmatprep.subr.bf16.mxu0 %v2923_v1 }
  0x4b   : > { %2497 = vmatpush3.bf16.msra.mxu0 %v2824_v31  ;;  %v2895_v31 = vld [vmem:[%s3484_s2 + $0x10] sm:$0xff]  }
  0x4c   : > { %2498 = vmatprep.subr.bf16.mxu0 %v2923_v1 }
  0x4f   : > { %2499 = vmatpush3.bf16.msra.mxu0 %v2825_v32  ;;  %v2854_v32 = vld [vmem:[%s3484_s2 + $0xd8] sm:$0xff]  }
  0x50   : > { %2500 = vmatprep.subr.bf16.mxu0 %v2923_v1 }
  0x53   : > { %2501 = vmatpush3.bf16.msra.mxu0 %v2826_v33  ;;  %v2897_v33 = vld [vmem:[%s3484_s2 + $0x18] sm:$0xff]  }
  0x54   : > { %2506 = vmatprep.subr.bf16.mxu0 %v2923_v1 }
  0x56   : > { %2503 = vmatmul.mubr.msk.bf16.vlgmr.msra.gmra.mrb[0].mxu0 %vm269_vm1, %v539_v36  ;;  %v2856_v36 = vld [vmem:[%s3484_s2 + $0xe8] sm:$0xff]  }
  0x57   : > { %2507 = vmatpush3.bf16.msra.mxu0 %v2827_v35  ;;  %2514 = vmatprep.mubr.msk.bf16.mxu0 %vm2924_vm0, %v2923_v1  ;;  %v2899_v35 = vld [vmem:[%s3484_s2 + $0x20] sm:$0xff]  }
  0x58   : > { %2508 = vmatprep.subr.bf16.mxu0 %v2923_v1 }
  0x5b   : > { %2509 = vmatpush3.bf16.msra.mxu0 %v2828_v37  ;;  %v2901_v37 = vld [vmem:[%s3484_s2 + $0x28] sm:$0xff]  }
  0x5c   : > { %2510 = vmatprep.subr.bf16.mxu0 %v2923_v1 }
  0x5f   : > { %2511 = vmatpush3.bf16.msra.mxu0 %v2829_v38  ;;  %v2857_v38 = vld [vmem:[%s3484_s2 + $0xf0] sm:$0xff]  }
  0x60   : > { %2512 = vmatprep.subr.bf16.mxu0 %v2923_v1 }
  0x63   : > { %2513 = vmatpush3.bf16.msra.mxu0 %v2830_v39  ;;  %v2903_v39 = vld [vmem:[%s3484_s2 + $0x30] sm:$0xff]  }
  0x64   : > { %2518 = vmatprep.subr.bf16.mxu0 %v2923_v1 }
  0x66   : > { %2515 = vmatmul.mubr.msk.bf16.vlgmr.msra.gmra.mrb[0].mxu0 %vm269_vm1, %v618_v41  ;;  %v2905_v41 = vld [vmem:[%s3484_s2 + $0x38] sm:$0xff]  }
  0x67   : > { %2519 = vmatpush3.bf16.msra.mxu0 %v2831_v42  ;;  %2526 = vmatprep.mubr.msk.bf16.mxu0 %vm2924_vm0, %v2923_v1 }
  0x68   : > { %2520 = vmatprep.subr.bf16.mxu0 %v2923_v1 }
  0x6b   : > { %2521 = vmatpush3.bf16.msra.mxu0 %v2832_v43  ;;  %v958_v43 = vld [vmem:[#allocation2] sm:$0x7] }
  0x6c   : > { %2522 = vmatprep.subr.bf16.mxu0 %v2923_v1 }
  0x6f   : > { %2523 = vmatpush3.bf16.msra.mxu0 %v2833_v44  ;;  %v959_v44 = vpack.c.bf16 %v958_v43, %v958_v43 }
  0x70   : > { %2524 = vmatprep.subr.bf16.mxu0 %v2923_v1 }
  0x73   : > { %2525 = vmatpush3.bf16.msra.mxu0 %v2834_v45  ;;  %v2859_v45 = vld [vmem:[%s3484_s2 + $0x100] sm:$0xff]  }
  0x74   : > { %2530 = vmatprep.subr.bf16.mxu0 %v2923_v1 }
  0x76   : > { %2527 = vmatmul.mubr.msk.bf16.vlgmr.msra.gmra.mrb[0].mxu0 %vm269_vm1, %v697_v47  ;;  %v2860_v47 = vld [vmem:[%s3484_s2 + $0x108] sm:$0xff]  }
  0x77   : > { %2531 = vmatpush3.bf16.msra.mxu0 %v2835_v48  ;;  %2538 = vmatprep.mubr.msk.bf16.mxu0 %vm2924_vm0, %v2923_v1  ;;  %v2861_v48 = vld [vmem:[%s3484_s2 + $0x110] sm:$0xff]  }
  0x78   : > { %2532 = vmatprep.subr.bf16.mxu0 %v2923_v1 }
  0x7b   : > { %2533 = vmatpush3.bf16.msra.mxu0 %v2836_v49  ;;  %v2862_v49 = vld [vmem:[%s3484_s2 + $0x118] sm:$0xff]  }
  0x7c   : > { %2534 = vmatprep.subr.bf16.mxu0 %v2923_v1 }
  0x7f   : > { %2535 = vmatpush3.bf16.msra.mxu0 %v2837_v50  ;;  %v2863_v50 = vld [vmem:[%s3484_s2 + $0x120] sm:$0xff]  }
  0x80   : > { %2536 = vmatprep.subr.bf16.mxu0 %v2923_v1 }
  0x83   : > { %2537 = vmatpush3.bf16.msra.mxu0 %v2838_v51  ;;  %v2864_v51 = vld [vmem:[%s3484_s2 + $0x128] sm:$0xff]  }
  0x84   : > { %2542 = vmatprep.subr.bf16.mxu0 %v2923_v1 }
  0x86   : > { %2539 = vmatmul.mubr.msk.bf16.vlgmr.msra.gmra.mrb[0].mxu0 %vm269_vm1, %v776_v53  ;;  %v2866_v53 = vld [vmem:[%s3484_s2 + $0x138] sm:$0xff]  }
  0x87   : > { %2543 = vmatpush3.bf16.msra.mxu0 %v2839_v54  ;;  %2550 = vmatprep.mubr.msk.bf16.mxu0 %vm2924_vm0, %v2923_v1 }
  0x88   : > { %2544 = vmatprep.subr.bf16.mxu0 %v2923_v1 }
  0x89   : > { %v954_v15 = vpop.permute.xlu0 %953 }
  0x8b   : > { %2545 = vmatpush3.bf16.msra.mxu0 %v2840_v55  ;;  %v2867_v55 = vld [vmem:[%s3484_s2 + $0x140] sm:$0xff]  }
  0x8c   : > { %2546 = vmatprep.subr.bf16.mxu0 %v2923_v1 }
  0x8f   : > { %2547 = vmatpush3.bf16.msra.mxu0 %v2841_v56 }
  0x90   : > { %2548 = vmatprep.subr.bf16.mxu0 %v2923_v1 }
  0x93   : > { %2549 = vmatpush3.bf16.msra.mxu0 %v2842_v57  ;;  %v2868_v57 = vld [vmem:[%s3484_s2 + $0x148] sm:$0xff]  }
  0x94   : > { %2554 = vmatprep.subr.bf16.mxu0 %v2923_v1 }
  0x96   : > { %2551 = vmatmul.mubr.msk.bf16.vlgmr.msra.gmra.mrb[0].mxu0 %vm269_vm1, %v855_v59  ;;  %v2870_v59 = vld [vmem:[%s3484_s2 + $0x158] sm:$0xff]  }
  0x97   : > { %2570 = vmatprep.mubr.msk.bf16.mxu0 %vm2924_vm0, %v2923_v1  ;;  %2555 = vmatpush3.bf16.msra.mxu0 %v2875_v2  ;;  %v2876_v2 = vld [vmem:[%s3484_s2 + $0x180] sm:$0xff]  }
  0x98   : > { %2556 = vmatprep.subr.bf16.mxu0 %v2923_v1 }
  0x9b   : > { %2557 = vmatpush3.bf16.msra.mxu0 %v2877_v3 }
  0x9c   : > { %2558 = vmatprep.subr.bf16.mxu0 %v2923_v1 }
  0x9f   : > { %2559 = vmatpush3.bf16.msra.mxu0 %v2879_v4  ;;  %v2878_v4 = vld [vmem:[%s3484_s2 + $0x188] sm:$0xff]  }
  0xa0   : > { %2560 = vmatprep.subr.bf16.mxu0 %v2923_v1 }
  0xa3   : > { %2561 = vmatpush3.bf16.msra.mxu0 %v2881_v5  ;;  %v2880_v5 = vld [vmem:[%s3484_s2 + $0x190] sm:$0xff]  }
  0xa4   : > { %2562 = vmatprep.subr.bf16.mxu0 %v2923_v1 }
  0xa7   : > { %2563 = vmatpush3.bf16.msra.mxu0 %v2883_v11 }
  0xa8   : > { %2564 = vmatprep.subr.bf16.mxu0 %v2923_v1 }
  0xab   : > { %2565 = vmatpush3.bf16.msra.mxu0 %v2885_v17  ;;  %v2900_v17 = vld [vmem:[%s3484_s2 + $0x1e0] sm:$0xff]  }
  0xac   : > { %2566 = vmatprep.subr.bf16.mxu0 %v2923_v1 }
  0xaf   : > { %2567 = vmatpush3.bf16.msra.mxu0 %v2887_v20  ;;  %v2906_v20 = vld [vmem:[%s3484_s2 + $0x1f8] sm:$0xff]  }
  0xb0   : > { %2568 = vmatprep.subr.bf16.mxu0 %v2923_v1 }
  0xb3   : > { %2569 = vmatpush3.bf16.msra.mxu0 %v2889_v21  ;;  %v1711_v21 = vld [vmem:[#allocation2 + $0x7] sm:$0x7] }
  0xb4   : > { %2574 = vmatprep.subr.bf16.mxu0 %v2923_v1  ;;  %v1712_v22 = vpack.c.bf16 %v1711_v21, %v1711_v21 }
  0xb6   : > { %2571 = vmatmul.mubr.bf16.vlgmr.msra.gmra.mrb[4].mxu0 %v977_v25  ;;  %v2909_v25 = vld [vmem:[%s3484_s2 + $0x210] sm:$0xff]  }
  0xb7   : > { %2575 = vmatpush3.bf16.msra.mxu0 %v2891_v27  ;;  %2590 = vmatprep.mubr.msk.bf16.mxu0 %vm2924_vm0, %v2923_v1  ;;  %v2911_v27 = vld [vmem:[%s3484_s2 + $0x220] sm:$0xff]  }
  0xb8   : > { %2576 = vmatprep.subr.bf16.mxu0 %v2923_v1 }
  0xbb   : > { %2577 = vmatpush3.bf16.msra.mxu0 %v2893_v29  ;;  %v2913_v29 = vld [vmem:[%s3484_s2 + $0x230] sm:$0xff]  }
  0xbc   : > { %2578 = vmatprep.subr.bf16.mxu0 %v2923_v1 }
  0xbf   : > { %2579 = vmatpush3.bf16.msra.mxu0 %v2895_v31  ;;  %v1819_v31 = vld [vmem:[#allocation2 + $0x8] sm:$0x7] }
  0xc0   : > { %2580 = vmatprep.subr.bf16.mxu0 %v2923_v1 }
  0xc3   : > { %2581 = vmatpush3.bf16.msra.mxu0 %v2897_v33 }
  0xc4   : > { %2582 = vmatprep.subr.bf16.mxu0 %v2923_v1 }
  0xc7   : > { %2583 = vmatpush3.bf16.msra.mxu0 %v2899_v35 }
  0xc8   : > { %2584 = vmatprep.subr.bf16.mxu0 %v2923_v1 }
  0xcb   : > { %2585 = vmatpush3.bf16.msra.mxu0 %v2901_v37 }
  0xcc   : > { %2586 = vmatprep.subr.bf16.mxu0 %v2923_v1 }
  0xcf   : > { %2587 = vmatpush3.bf16.msra.mxu0 %v2903_v39 }
  0xd0   : > { %2588 = vmatprep.subr.bf16.mxu0 %v2923_v1 }
  0xd3   : > { %2589 = vmatpush3.bf16.msra.mxu0 %v2905_v41  ;;  %v2316_v41 = vld [vmem:[%s3485_s3 + $0x3] ss:$0 sm:$0xff] }
  0xd6   : > { %2591 = vmatmul.mubr.bf16.vlgmr.msra.gmra.mrb[4].mxu0 %v959_v44 }
 0x169   : > { %v926_v7 = vpop.f32.mrb[0].mxu0 }
 0x16a   : > { %v939_v9 = vmul.f32 %v2113_v6, %v926_v7  ;;  %v2552_v10 = vpop.f32.mrb[1].mxu0  ;;  %v2882_v6 = vld [vmem:[%s3484_s2 + $0x198] sm:$0xff]   ;;  %v2884_v7 = vld [vmem:[%s3484_s2 + $0x1a0] sm:$0xff]  }
 0x16b   : > { %v929_v12 = vpop.f32.mrb[2].mxu0  ;;  %v2890_v10 = vld [vmem:[%s3484_s2 + $0x1b8] sm:$0xff]  }
 0x16c   : > { %v944_v13 = vadd.f32 %v2114_v8, %v939_v9  ;;  %v2553_v14 = vpop.f32.mrb[3].mxu0  ;;  %v2886_v8 = vld [vmem:[%s3484_s2 + $0x1a8] sm:$0xff]   ;;  %v2888_v9 = vld [vmem:[%s3484_s2 + $0x1b0] sm:$0xff]   ;;  %v2892_v12 = vld [vmem:[%s3484_s2 + $0x1c0] sm:$0xff]  }
 0x16d   : > { %v2894_v14 = vld [vmem:[%s3484_s2 + $0x1c8] sm:$0xff]  }
 0x16e   : > { %vm945_vm2 = vcmp.ge.f32.partialorder %v944_v13, 0.0  ;;  %v946_v16 = vmul.f32 0.0, %v944_v13 }
 0x170   : > { %v947_v18 = vsel %vm945_vm2, %v944_v13, %v946_v16  ;;  %v2898_v16 = vld [vmem:[%s3484_s2 + $0x1d8] sm:$0xff]  }
 0x171   : > { %v956_v19 = vmul.f32 %v954_v15, %v947_v18  ;;  %v2896_v15 = vld [vmem:[%s3484_s2 + $0x1d0] sm:$0xff]   ;;  %v2902_v18 = vld [vmem:[%s3484_s2 + $0x1e8] sm:$0xff]  }
 0x173   : > { %957 = vst [vmem:[#allocation2 + $0x4] sm:$0x7] %v956_v19  ;;  %v2904_v19 = vld [vmem:[%s3484_s2 + $0x1f0] sm:$0xff]  }
 0x17a   : > { %v1171_v23 = vld [vmem:[#allocation2 + $0x2] sm:$0x7]  ;;  %v1495_v0 = vld [vmem:[#allocation2 + $0x5] sm:$0x7] }
 0x17b   : > { %v1172_v26 = vpack.c.bf16 %v1171_v23, %v1171_v23  ;;  %v1279_v42 = vld [vmem:[#allocation2 + $0x3] sm:$0x7]  ;;  %v1496_v3 = vpack.c.bf16 %v1495_v0, %v1495_v0  ;;  %v1603_v11 = vld [vmem:[#allocation2 + $0x6] sm:$0x7] }
 0x17c   : > { %v1280_v46 = vpack.c.bf16 %v1279_v42, %v1279_v42  ;;  %v1387_v54 = vld [vmem:[#allocation2 + $0x4] sm:$0x7]  ;;  %v1604_v13 = vpack.c.bf16 %v1603_v11, %v1603_v11 }
 0x17d   : > { %2611 = vmatmul.mubr.bf16.vlgmr.msra.gmra.mrb[0].mxu1 %v1172_v26  ;;  %v1388_v56 = vpack.c.bf16 %v1387_v54, %v1387_v54  ;;  %v2907_v23 = vld [vmem:[%s3484_s2 + $0x200] sm:$0xff]   ;;  %v2910_v26 = vld [vmem:[%s3484_s2 + $0x218] sm:$0xff]  }
 0x17e   : > { %2615 = vmatpush3.bf16.msra.mxu1 %v2851_v24  ;;  %2630 = vmatprep.mubr.msk.bf16.mxu1 %vm2924_vm0, %v2923_v1  ;;  %v2908_v24 = vld [vmem:[%s3484_s2 + $0x208] sm:$0xff]  }
 0x17f   : > { %2616 = vmatprep.subr.bf16.mxu1 %v2923_v1 }
 0x182   : > { %2617 = vmatpush3.bf16.msra.mxu1 %v2852_v28  ;;  %v2912_v28 = vld [vmem:[%s3484_s2 + $0x228] sm:$0xff]  }
 0x183   : > { %2618 = vmatprep.subr.bf16.mxu1 %v2923_v1 }
 0x186   : > { %2619 = vmatpush3.bf16.msra.mxu1 %v2853_v30  ;;  %v2914_v30 = vld [vmem:[%s3484_s2 + $0x238] sm:$0xff]  }
 0x187   : > { %2620 = vmatprep.subr.bf16.mxu1 %v2923_v1 }
 0x18a   : > { %2621 = vmatpush3.bf16.msra.mxu1 %v2854_v32  ;;  %v1820_v32 = vpack.c.bf16 %v1819_v31, %v1819_v31 }
 0x18b   : > { %2622 = vmatprep.subr.bf16.mxu1 %v2923_v1 }
 0x18e   : > { %2623 = vmatpush3.bf16.msra.mxu1 %v2855_v34 }
 0x18f   : > { %2624 = vmatprep.subr.bf16.mxu1 %v2923_v1 }
 0x192   : > { %2625 = vmatpush3.bf16.msra.mxu1 %v2856_v36 }
 0x193   : > { %2626 = vmatprep.subr.bf16.mxu1 %v2923_v1 }
 0x196   : > { %2627 = vmatpush3.bf16.msra.mxu1 %v2857_v38  ;;  %v2315_v38 = vld [vmem:[%s3485_s3 + $0x2] ss:$0 sm:$0xff] }
 0x197   : > { %2628 = vmatprep.subr.bf16.mxu1 %v2923_v1 }
 0x19a   : > { %2629 = vmatpush3.bf16.msra.mxu1 %v2858_v40 }
 0x19b   : > { %2634 = vmatprep.subr.bf16.mxu1 %v2923_v1 }
 0x19d   : > { %2631 = vmatmul.mubr.bf16.vlgmr.msra.gmra.mrb[0].mxu1 %v1280_v46 }
 0x19e   : > { %2635 = vmatpush3.bf16.msra.mxu1 %v2859_v45  ;;  %2650 = vmatprep.mubr.msk.bf16.mxu1 %vm2924_vm0, %v2923_v1 }
 0x19f   : > { %2636 = vmatprep.subr.bf16.mxu1 %v2923_v1 }
 0x1a2   : > { %2637 = vmatpush3.bf16.msra.mxu1 %v2860_v47 }
 0x1a3   : > { %2638 = vmatprep.subr.bf16.mxu1 %v2923_v1 }
 0x1a6   : > { %2639 = vmatpush3.bf16.msra.mxu1 %v2861_v48 }
 0x1a7   : > { %2640 = vmatprep.subr.bf16.mxu1 %v2923_v1 }
 0x1a9   : > { %v1165_v33 = vpop.f32.mrb[4].mxu0 }
 0x1aa   : > { %2641 = vmatpush3.bf16.msra.mxu1 %v2862_v49  ;;  %v2592_v34 = vpop.f32.mrb[5].mxu0 }
 0x1ab   : > { %2642 = vmatprep.subr.bf16.mxu1 %v2923_v1  ;;  %v1168_v35 = vpop.f32.mrb[6].mxu0 }
 0x1ac   : > { %v2593_v36 = vpop.f32.mrb[7].mxu0 }
 0x1ae   : > { %2643 = vmatpush3.bf16.msra.mxu1 %v2863_v50 }
 0x1af   : > { %2644 = vmatprep.subr.bf16.mxu1 %v2923_v1 }
 0x1b2   : > { %2645 = vmatpush3.bf16.msra.mxu1 %v2864_v51 }
 0x1b3   : > { %2646 = vmatprep.subr.bf16.mxu1 %v2923_v1 }
 0x1b6   : > { %2647 = vmatpush3.bf16.msra.mxu1 %v2865_v52 }
 0x1b7   : > { %2648 = vmatprep.subr.bf16.mxu1 %v2923_v1 }
 0x1ba   : > { %2649 = vmatpush3.bf16.msra.mxu1 %v2866_v53 }
 0x1bb   : > { %2654 = vmatprep.subr.bf16.mxu1 %v2923_v1 }
 0x1bd   : > { %2651 = vmatmul.mubr.bf16.vlgmr.msra.gmra.mrb[0].mxu1 %v1388_v56 }
 0x1be   : > { %2655 = vmatpush3.bf16.msra.mxu1 %v2867_v55  ;;  %2670 = vmatprep.mubr.msk.bf16.mxu1 %vm2924_vm0, %v2923_v1 }
 0x1bf   : > { %2656 = vmatprep.subr.bf16.mxu1 %v2923_v1 }
 0x1c2   : > { %2657 = vmatpush3.bf16.msra.mxu1 %v2868_v57 }
 0x1c3   : > { %2658 = vmatprep.subr.bf16.mxu1 %v2923_v1 }
 0x1c6   : > { %2659 = vmatpush3.bf16.msra.mxu1 %v2869_v58 }
 0x1c7   : > { %2660 = vmatprep.subr.bf16.mxu1 %v2923_v1 }
 0x1ca   : > { %2661 = vmatpush3.bf16.msra.mxu1 %v2870_v59 }
 0x1cb   : > { %2662 = vmatprep.subr.bf16.mxu1 %v2923_v1 }
 0x1ce   : > { %2663 = vmatpush3.bf16.msra.mxu1 %v2871_v60 }
 0x1cf   : > { %2664 = vmatprep.subr.bf16.mxu1 %v2923_v1 }
 0x1d2   : > { %2665 = vmatpush3.bf16.msra.mxu1 %v2872_v61 }
 0x1d3   : > { %2666 = vmatprep.subr.bf16.mxu1 %v2923_v1 }
 0x1d6   : > { %2667 = vmatpush3.bf16.msra.mxu1 %v2873_v62 }
 0x1d7   : > { %2668 = vmatprep.subr.bf16.mxu1 %v2923_v1 }
 0x1da   : > { %2669 = vmatpush3.bf16.msra.mxu1 %v2874_v63 }
 0x1db   : > { %2674 = vmatprep.subr.bf16.mxu1 %v2923_v1 }
 0x1dd   : > { %2671 = vmatmul.mubr.bf16.vlgmr.msra.gmra.mrb[0].mxu1 %v1496_v3 }
 0x1de   : > { %2675 = vmatpush3.bf16.msra.mxu1 %v2876_v2  ;;  %2690 = vmatprep.mubr.msk.bf16.mxu1 %vm2924_vm0, %v2923_v1 }
 0x1df   : > { %2676 = vmatprep.subr.bf16.mxu1 %v2923_v1 }
 0x1e2   : > { %2677 = vmatpush3.bf16.msra.mxu1 %v2878_v4 }
 0x1e3   : > { %2678 = vmatprep.subr.bf16.mxu1 %v2923_v1 }
 0x1e6   : > { %2679 = vmatpush3.bf16.msra.mxu1 %v2880_v5 }
 0x1e7   : > { %2680 = vmatprep.subr.bf16.mxu1 %v2923_v1 }
 0x1ea   : > { %2681 = vmatpush3.bf16.msra.mxu1 %v2882_v6 }
 0x1eb   : > { %2682 = vmatprep.subr.bf16.mxu1 %v2923_v1 }
 0x1ee   : > { %2683 = vmatpush3.bf16.msra.mxu1 %v2884_v7 }
 0x1ef   : > { %2684 = vmatprep.subr.bf16.mxu1 %v2923_v1 }
 0x1f2   : > { %2685 = vmatpush3.bf16.msra.mxu1 %v2886_v8 }
 0x1f3   : > { %2686 = vmatprep.subr.bf16.mxu1 %v2923_v1 }
 0x1f6   : > { %2687 = vmatpush3.bf16.msra.mxu1 %v2888_v9 }
 0x1f7   : > { %2688 = vmatprep.subr.bf16.mxu1 %v2923_v1 }
 0x1fa   : > { %2689 = vmatpush3.bf16.msra.mxu1 %v2890_v10 }
 0x1fb   : > { %2694 = vmatprep.subr.bf16.mxu1 %v2923_v1 }
 0x1fd   : > { %2691 = vmatmul.mubr.bf16.vlgmr.msra.gmra.mrb[0].mxu1 %v1604_v13 }
 0x1fe   : > { %2695 = vmatpush3.bf16.msra.mxu1 %v2892_v12  ;;  %2710 = vmatprep.mubr.msk.bf16.mxu1 %vm2924_vm0, %v2923_v1 }
 0x1ff   : > { %2696 = vmatprep.subr.bf16.mxu1 %v2923_v1 }
 0x202   : > { %2697 = vmatpush3.bf16.msra.mxu1 %v2894_v14 }
 0x203   : > { %2698 = vmatprep.subr.bf16.mxu1 %v2923_v1 }
 0x206   : > { %2699 = vmatpush3.bf16.msra.mxu1 %v2896_v15 }
 0x207   : > { %2700 = vmatprep.subr.bf16.mxu1 %v2923_v1 }
 0x20a   : > { %2701 = vmatpush3.bf16.msra.mxu1 %v2898_v16 }
 0x20b   : > { %2702 = vmatprep.subr.bf16.mxu1 %v2923_v1 }
 0x20e   : > { %2703 = vmatpush3.bf16.msra.mxu1 %v2900_v17 }
 0x20f   : > { %2704 = vmatprep.subr.bf16.mxu1 %v2923_v1 }
 0x212   : > { %2705 = vmatpush3.bf16.msra.mxu1 %v2902_v18 }
 0x213   : > { %2706 = vmatprep.subr.bf16.mxu1 %v2923_v1 }
 0x216   : > { %2707 = vmatpush3.bf16.msra.mxu1 %v2904_v19 }
 0x217   : > { %2708 = vmatprep.subr.bf16.mxu1 %v2923_v1 }
 0x21a   : > { %2709 = vmatpush3.bf16.msra.mxu1 %v2906_v20 }
 0x21b   : > { %2714 = vmatprep.subr.bf16.mxu1 %v2923_v1 }
 0x21d   : > { %2711 = vmatmul.mubr.bf16.vlgmr.msra.gmra.mrb[0].mxu1 %v1712_v22 }
 0x21e   : > { %2715 = vmatpush3.bf16.msra.mxu1 %v2907_v23  ;;  %2730 = vmatprep.mubr.msk.bf16.mxu1 %vm2924_vm0, %v2923_v1 }
 0x21f   : > { %2716 = vmatprep.subr.bf16.mxu1 %v2923_v1 }
 0x222   : > { %2717 = vmatpush3.bf16.msra.mxu1 %v2908_v24 }
 0x223   : > { %2718 = vmatprep.subr.bf16.mxu1 %v2923_v1 }
 0x226   : > { %2719 = vmatpush3.bf16.msra.mxu1 %v2909_v25 }
 0x227   : > { %2720 = vmatprep.subr.bf16.mxu1 %v2923_v1 }
 0x22a   : > { %2721 = vmatpush3.bf16.msra.mxu1 %v2910_v26 }
 0x22b   : > { %2722 = vmatprep.subr.bf16.mxu1 %v2923_v1 }
 0x22e   : > { %2723 = vmatpush3.bf16.msra.mxu1 %v2911_v27 }
 0x22f   : > { %2724 = vmatprep.subr.bf16.mxu1 %v2923_v1 }
 0x232   : > { %2725 = vmatpush3.bf16.msra.mxu1 %v2912_v28 }
 0x233   : > { %2726 = vmatprep.subr.bf16.mxu1 %v2923_v1 }
 0x236   : > { %2727 = vmatpush3.bf16.msra.mxu1 %v2913_v29 }
 0x237   : > { %2728 = vmatprep.subr.bf16.mxu1 %v2923_v1 }
 0x23a   : > { %2729 = vmatpush3.bf16.msra.mxu1 %v2914_v30 }
 0x23d   : > { %2731 = vmatmul.mubr.bf16.vlgmr.msra.gmra.mrb[0].mxu1 %v1820_v32 }
 0x310   : > { %v1920_v37 = vpop.f32.mrb[0].mxu1 }
 0x311   : > { %v2734_v39 = vadd.f32 %v1920_v37, %v1165_v33  ;;  %v2732_v40 = vpop.f32.mrb[1].mxu1 }
 0x312   : > { %v1923_v1 = vpop.f32.mrb[2].mxu1 }
 0x313   : > { %v1933_v42 = vmul.f32 %v2734_v39, %v2315_v38  ;;  %v2733_v43 = vpop.f32.mrb[3].mxu1 }
 0x315   : > { %v1938_v44 = vadd.f32 %v2316_v41, %v1933_v42 }
 0x317   : > { %vm1939_vm3 = vcmp.ge.f32.partialorder %v1938_v44, 0.0  ;;  %v1940_v45 = vmul.f32 0.0, %v1938_v44 }
 0x319   : > { %v1941_v46 = vsel %vm1939_vm3, %v1938_v44, %v1940_v45 }
 0x31a   : > { %1942 = vst [vmem:[%s222_s25] sm:$0x7] %v1941_v46 }
 0x31b PF: > { %s15_s18 = sadd.s32 1, %s2921_s18  }
 0x31c   : > { %p12_p4 = scmp.ge.s32.totalorder %s15_s18, 4  }
 0x31e   :  { %14 = sbr.rel (!%p12_p4) target bundleno = 1 (0x1), region = 86 }

</bundles_post_ra>
